<compile_context>
chip_gen: v6e
topology: v6e:2x2x1
jax: 0.10.0
libtpu: 0.0.40
codegen_flags: <defaults>
</compile_context>

<pallas_src>
import numpy as np
import jax
import jax.numpy as jnp
from jax.experimental import pallas as pl
from jax.experimental.pallas import tpu as pltpu

BN_EPS = 1e-5
C = 128            # lane-dense padded channel width used throughout the kernel

# Flattened "padded grid + margin" layouts
#   stage A (conv1 out / conv2 in): 14x14 valid, 16x16 padded, margin 17 -> 290 rows
#   stage B (conv2 out):            16x16 padded grid                    -> 256 rows
#   stage C (pool1 / conv3 / conv4): 6x6 valid, 8x8 padded, margin 9     ->  88 rows
ROWS_A, WP_A, MARG_A = 290, 16, 17
ROWS_B = 256
ROWS_C, WP_C, MARG_C = 88, 8, 9


# ------------------------------ fused kernel --------------------------------

def fused_forward_kernel(p1_ref, mask1_ref, w1_ref, sh1_ref,
                         w2_ref, sh2_ref, sel2_ref,
                         w3_ref, sh3_ref, mask3_ref,
                         w4_ref, sh4_ref, mask4_ref,
                         o_ref,
                         b1_ref, a2_ref, b3_ref, b4_ref):
    f32 = jnp.float32

    # conv1 (6x6, s=2, p=2) + BN + ReLU.  Patches arrive already laid out on the
    # 16x16-padded / margin-17 flat grid; mask zeroes pad & margin rows so conv2
    # sees true zero padding.
    a1 = jnp.dot(p1_ref[0], w1_ref[...], preferred_element_type=f32)
    b1_ref[...] = mask1_ref[...] * jnp.maximum(a1 + sh1_ref[...], 0.0)

    # conv2 (3x3, s=1, p=1) + BN + ReLU as 9 shifted matmuls over the flat grid.
    acc = jnp.zeros((ROWS_B, C), f32)
    for t in range(9):
        s = (t // 3 - 1) * WP_A + (t % 3 - 1)
        acc = acc + jnp.dot(b1_ref[MARG_A + s:MARG_A + s + ROWS_B, :], w2_ref[t],
                            preferred_element_type=f32)
    a2_ref[...] = jnp.maximum(acc + sh2_ref[...], 0.0)

    # MaxPool 3x3/s2 (14x14 -> 6x6): stride-1 window max, then one constant 0/1
    # select+scatter matmul that lands the result directly in conv3's padded
    # 8x8 / margin-9 layout (zeros everywhere else).
    m = a2_ref[0:222, :]
    for t in range(1, 9):
        s = (t // 3) * WP_A + (t % 3)
        m = jnp.maximum(m, a2_ref[s:s + 222, :])
    b3_ref[...] = jnp.dot(sel2_ref[...], m, preferred_element_type=f32)

    # conv3 (3x3, s=1, p=1) + BN + ReLU.
    acc = jnp.zeros((64, C), f32)
    for t in range(9):
        s = (t // 3 - 1) * WP_C + (t % 3 - 1)
        acc = acc + jnp.dot(b3_ref[MARG_C + s:MARG_C + s + 64, :], w3_ref[t],
                            preferred_element_type=f32)
    a3 = jnp.maximum(acc + sh3_ref[...], 0.0)
    # Place conv3's valid 6x6 interior (masked) into conv4's padded buffer.
    b4_ref[...] = jnp.zeros((ROWS_C, C), f32)
    b4_ref[MARG_C:MARG_C + 64, :] = mask3_ref[...] * a3

    # conv4 (3x3, s=1, p=1) + BN + ReLU.
    acc = jnp.zeros((64, C), f32)
    for t in range(9):
        s = (t // 3 - 1) * WP_C + (t % 3 - 1)
        acc = acc + jnp.dot(b4_ref[MARG_C + s:MARG_C + s + 64, :], w4_ref[t],
                            preferred_element_type=f32)
    a4 = jnp.maximum(acc + sh4_ref[...], 0.0)

    # MaxPool(3,2) 6x6 -> 2x2 followed by view(B,128,4).max(-1) == max over the
    # 5x5 region covered by the pool windows; then F.normalize(p=2, dim=1).
    feat = jnp.max(jnp.where(mask4_ref[...] > 0.0, a4, -3.0e38),
                   axis=0, keepdims=True)                        # (1, 128)
    n2 = jnp.sum(feat * feat, axis=1, keepdims=True)
    o_ref[0] = feat * jax.lax.rsqrt(jnp.maximum(n2, 1e-24))      # eps == 1e-12 on the norm


# ------------------------ constants & parameters -----------------------------

def _layout_constants():
    # mask over the 290-row conv2-input buffer: 1 at the 14x14 valid conv1 outputs
    mask1 = np.zeros((ROWS_A, 1), np.float32)
    for hp in range(1, 15):
        for wp in range(1, 15):
            mask1[MARG_A + hp * WP_A + wp, 0] = 1.0
    # 0/1 matrix: select the 6x6 pooled positions of the stride-1 window max AND
    # scatter them into conv3's 8x8-padded / margin-9 flat layout
    sel2 = np.zeros((ROWS_C, 222), np.float32)
    for ph in range(6):
        for pw in range(6):
            sel2[MARG_C + (ph + 1) * WP_C + (pw + 1),
                 (2 * ph + 1) * WP_A + (2 * pw + 1)] = 1.0
    # interior (6x6) mask over the 8x8 padded grid (conv3 -> conv4 handoff)
    mask3 = np.zeros((64, 1), np.float32)
    for hp in range(1, 7):
        for wp in range(1, 7):
            mask3[hp * WP_C + wp, 0] = 1.0
    # rows reachable by MaxPool(3,2) on the 6x6 map == its 5x5 region (head max)
    mask4 = np.zeros((64, 1), np.float32)
    for hp in range(1, 6):
        for wp in range(1, 6):
            mask4[hp * WP_C + wp, 0] = 1.0
    return (jnp.asarray(mask1), jnp.asarray(sel2),
            jnp.asarray(mask3), jnp.asarray(mask4))


def init_params(key):
    conv_cfg = [(6, 1, 32), (3, 32, 64), (3, 64, 128), (3, 128, 128)]  # (k, cin, cout)
    raw = []
    for k, cin, cout in conv_cfg:
        key, kw, kb = jax.random.split(key, 3)
        fan_out = cout * k * k                          # kaiming_normal_(fan_out, relu)
        w = jax.random.normal(kw, (k, k, cin, cout), jnp.float32) * (2.0 / fan_out) ** 0.5
        bound = 1.0 / (cin * k * k) ** 0.5              # default Conv2d bias init
        b = jax.random.uniform(kb, (cout,), jnp.float32, -bound, bound)
        raw.append((w, b))

    # eval-mode BatchNorm (gamma=1, beta=0, mean=0, var=1): fold the scale into
    # the weights, keep only a per-channel shift (= bias * scale).
    scale = 1.0 / (1.0 + BN_EPS) ** 0.5
    (w1, b1), (w2, b2), (w3, b3), (w4, b4) = raw

    W1 = jnp.pad((w1 * scale).reshape(36, 32), ((0, 0), (0, C - 32)))
    SH1 = jnp.pad((b1 * scale).reshape(1, 32), ((0, 0), (0, C - 32)))
    W2 = jnp.pad((w2 * scale).reshape(9, 32, 64), ((0, 0), (0, C - 32), (0, C - 64)))
    SH2 = jnp.pad((b2 * scale).reshape(1, 64), ((0, 0), (0, C - 64)))
    W3 = jnp.pad((w3 * scale).reshape(9, 64, 128), ((0, 0), (0, C - 64), (0, 0)))
    SH3 = (b3 * scale).reshape(1, 128)
    W4 = (w4 * scale).reshape(9, 128, 128)
    SH4 = (b4 * scale).reshape(1, 128)

    mask1, sel2, mask3, mask4 = _layout_constants()
    pallas_params = (mask1, W1, SH1, W2, SH2, sel2, W3, SH3, mask3, W4, SH4, mask4)
    return pallas_params, raw


# -------------------------------- wrapper ------------------------------------

def _conv1_patches(x_nhwc):
    # im2col for the 6x6 / stride-2 / pad-2 first conv, laid out directly on the
    # 16x16-padded / margin-17 flat grid expected by the kernel.
    bsz = x_nhwc.shape[0]
    xp = jnp.pad(x_nhwc, ((0, 0), (2, 2), (2, 2), (0, 0)))           # (B, 32, 32, 1)
    taps = []
    for i in range(6):
        for j in range(6):
            taps.append(xp[:, i:i + 27:2, j:j + 27:2, :])            # (B, 14, 14, 1)
    p = jnp.concatenate(taps, axis=-1)                               # (B, 14, 14, 36)
    p = jnp.pad(p, ((0, 0), (1, 1), (1, 1), (0, 0))).reshape(bsz, ROWS_B, 36)
    return jnp.pad(p, ((0, 0), (MARG_A, MARG_A), (0, 0)))            # (B, 290, 36)


@jax.jit
def forward(x_nchw, params):
    (mask1, W1, SH1, W2, SH2, sel2, W3, SH3, mask3, W4, SH4, mask4) = params
    bsz = x_nchw.shape[0]
    x = jnp.transpose(x_nchw, (0, 2, 3, 1)).astype(jnp.float32)      # NCHW -> NHWC
    p1 = _conv1_patches(x)

    bcast2 = lambda b: (0, 0)
    bcast3 = lambda b: (0, 0, 0)
    out = pl.pallas_call(
        fused_forward_kernel,
        out_shape=jax.ShapeDtypeStruct((bsz, 1, C), jnp.float32),
        grid=(bsz,),
        in_specs=[
            pl.BlockSpec((1, ROWS_A, 36), lambda b: (b, 0, 0)),  # conv1 patches (per image)
            pl.BlockSpec((ROWS_A, 1), bcast2),                   # mask1
            pl.BlockSpec((36, C), bcast2),                       # W1
            pl.BlockSpec((1, C), bcast2),                        # SH1
            pl.BlockSpec((9, C, C), bcast3),                     # W2
            pl.BlockSpec((1, C), bcast2),                        # SH2
            pl.BlockSpec((ROWS_C, 222), bcast2),                 # sel2 (pool1 select+scatter)
            pl.BlockSpec((9, C, C), bcast3),                     # W3
            pl.BlockSpec((1, C), bcast2),                        # SH3
            pl.BlockSpec((64, 1), bcast2),                       # mask3
            pl.BlockSpec((9, C, C), bcast3),                     # W4
            pl.BlockSpec((1, C), bcast2),                        # SH4
            pl.BlockSpec((64, 1), bcast2),                       # mask4
        ],
        out_specs=pl.BlockSpec((1, 1, C), lambda b: (b, 0, 0)),
        scratch_shapes=[
            pltpu.VMEM((ROWS_A, C), jnp.float32),   # conv1 out in conv2's padded layout
            pltpu.VMEM((ROWS_B, C), jnp.float32),   # conv2 out (16x16 padded grid)
            pltpu.VMEM((ROWS_C, C), jnp.float32),   # pool1 out in conv3's padded layout
            pltpu.VMEM((ROWS_C, C), jnp.float32),   # conv3 out in conv4's padded layout
        ],
        compiler_params=pltpu.CompilerParams(dimension_semantics=("parallel",)),
    )(p1, mask1, W1, SH1, W2, SH2, sel2, W3, SH3, mask3, W4, SH4, mask4)
    return out.reshape(bsz, C)


# ---------------------- pure-JAX reference (for checking) --------------------

def reference_forward(x_nchw, raw):
    scale = 1.0 / (1.0 + BN_EPS) ** 0.5
    x = jnp.transpose(x_nchw, (0, 2, 3, 1)).astype(jnp.float32)

    def conv_bn_relu(x, w, b, stride, pad):
        y = jax.lax.conv_general_dilated(
            x, w, (stride, stride), [(pad, pad), (pad, pad)],
            dimension_numbers=("NHWC", "HWIO", "NHWC"))
        return jnp.maximum(y * scale + b * scale, 0.0)

    def pool(x):
        return jax.lax.reduce_window(x, -jnp.inf, jax.lax.max,
                                     (1, 3, 3, 1), (1, 2, 2, 1), "VALID")

    (w1, b1), (w2, b2), (w3, b3), (w4, b4) = raw
    x = conv_bn_relu(x, w1, b1, 2, 2)
    x = conv_bn_relu(x, w2, b2, 1, 1)
    x = pool(x)
    x = conv_bn_relu(x, w3, b3, 1, 1)
    x = conv_bn_relu(x, w4, b4, 1, 1)
    x = pool(x)                                                # (B, 2, 2, 128)
    f = jnp.max(x.reshape(x.shape[0], 4, 128), axis=1)         # view(B,128,4).max(-1)
    n = jnp.sqrt(jnp.sum(f * f, axis=1, keepdims=True))
    return f / jnp.maximum(n, 1e-12)


if __name__ == "__main__":
    key = jax.random.PRNGKey(0)
    kx, kp = jax.random.split(key)
    x = jax.random.normal(kx, (2, 1, 28, 28), jnp.float32)     # MNIST-shaped input, B=2
    params, raw = init_params(kp)

    out = jax.block_until_ready(forward(x, params))
    assert out.shape == (2, 128), out.shape

    ref = jax.block_until_ready(reference_forward(x, raw))
    np.testing.assert_allclose(np.asarray(out), np.asarray(ref), rtol=0.1, atol=0.03)
    print("KERNEL_OK")
</pallas_src>

<mosaic_0001>
module attributes {stable_mosaic.version = 11 : i64} {
  func.func @fused_forward_kernel(%arg0: i32, %arg1: memref<1x290x36xf32, #tpu.memory_space<vmem>>, %arg2: memref<290x1xf32, #tpu.memory_space<vmem>>, %arg3: memref<36x128xf32, #tpu.memory_space<vmem>>, %arg4: memref<1x128xf32, #tpu.memory_space<vmem>>, %arg5: memref<9x128x128xf32, #tpu.memory_space<vmem>>, %arg6: memref<1x128xf32, #tpu.memory_space<vmem>>, %arg7: memref<88x222xf32, #tpu.memory_space<vmem>>, %arg8: memref<9x128x128xf32, #tpu.memory_space<vmem>>, %arg9: memref<1x128xf32, #tpu.memory_space<vmem>>, %arg10: memref<64x1xf32, #tpu.memory_space<vmem>>, %arg11: memref<9x128x128xf32, #tpu.memory_space<vmem>>, %arg12: memref<1x128xf32, #tpu.memory_space<vmem>>, %arg13: memref<64x1xf32, #tpu.memory_space<vmem>>, %arg14: memref<1x1x128xf32, #tpu.memory_space<vmem>>, %arg15: memref<290x128xf32, #tpu.memory_space<vmem>>, %arg16: memref<256x128xf32, #tpu.memory_space<vmem>>, %arg17: memref<88x128xf32, #tpu.memory_space<vmem>>, %arg18: memref<88x128xf32, #tpu.memory_space<vmem>>) attributes {dimension_semantics = [#tpu.dimension_semantics<parallel>], iteration_bounds = array<i64: 2>, scalar_prefetch = 0 : i64, scratch_operands = 4 : i64, tpu.core_type = #tpu.core_type<tc>, window_params = [{transform_indices = @transform_0, window_bounds = array<i64: 1, 290, 36>}, {pipeline_mode = #tpu.pipeline_mode<synchronous>, transform_indices = @transform_1, window_bounds = array<i64: 290, 1>}, {pipeline_mode = #tpu.pipeline_mode<synchronous>, transform_indices = @transform_2, window_bounds = array<i64: 36, 128>}, {pipeline_mode = #tpu.pipeline_mode<synchronous>, transform_indices = @transform_3, window_bounds = array<i64: 1, 128>}, {pipeline_mode = #tpu.pipeline_mode<synchronous>, transform_indices = @transform_4, window_bounds = array<i64: 9, 128, 128>}, {pipeline_mode = #tpu.pipeline_mode<synchronous>, transform_indices = @transform_5, window_bounds = array<i64: 1, 128>}, {pipeline_mode = #tpu.pipeline_mode<synchronous>, transform_indices = @transform_6, window_bounds = array<i64: 88, 222>}, {pipeline_mode = #tpu.pipeline_mode<synchronous>, transform_indices = @transform_7, window_bounds = array<i64: 9, 128, 128>}, {pipeline_mode = #tpu.pipeline_mode<synchronous>, transform_indices = @transform_8, window_bounds = array<i64: 1, 128>}, {pipeline_mode = #tpu.pipeline_mode<synchronous>, transform_indices = @transform_9, window_bounds = array<i64: 64, 1>}, {pipeline_mode = #tpu.pipeline_mode<synchronous>, transform_indices = @transform_10, window_bounds = array<i64: 9, 128, 128>}, {pipeline_mode = #tpu.pipeline_mode<synchronous>, transform_indices = @transform_11, window_bounds = array<i64: 1, 128>}, {pipeline_mode = #tpu.pipeline_mode<synchronous>, transform_indices = @transform_12, window_bounds = array<i64: 64, 1>}, {transform_indices = @transform_13, window_bounds = array<i64: 1, 1, 128>}]} {
    %c0 = arith.constant 0 : index
    %c0_0 = arith.constant 0 : index
    %c0_1 = arith.constant 0 : index
    %0 = vector.load %arg1[%c0, %c0_0, %c0_1] : memref<1x290x36xf32, #tpu.memory_space<vmem>>, vector<1x290x36xf32>
    %1 = vector.shape_cast %0 : vector<1x290x36xf32> to vector<290x36xf32>
    %c0_2 = arith.constant 0 : index
    %c0_3 = arith.constant 0 : index
    %2 = vector.load %arg3[%c0_2, %c0_3] : memref<36x128xf32, #tpu.memory_space<vmem>>, vector<36x128xf32>
    %cst = arith.constant dense<0.000000e+00> : vector<290x128xf32>
    %3 = tpu.matmul %1, %2, %cst {dimension_numbers = #tpu.dot_dimension_numbers<[1], [0], [0], [1], [0, 0, 1, 1], [], []>} : vector<290x36xf32>, vector<36x128xf32>, vector<290x128xf32> -> vector<290x128xf32>
    %c0_4 = arith.constant 0 : index
    %c0_5 = arith.constant 0 : index
    %4 = vector.load %arg2[%c0_4, %c0_5] : memref<290x1xf32, #tpu.memory_space<vmem>>, vector<290x1xf32>
    %c0_6 = arith.constant 0 : index
    %c0_7 = arith.constant 0 : index
    %5 = vector.load %arg4[%c0_6, %c0_7] : memref<1x128xf32, #tpu.memory_space<vmem>>, vector<1x128xf32>
    %6 = vector.broadcast %5 : vector<1x128xf32> to vector<290x128xf32>
    %7 = arith.addf %3, %6 : vector<290x128xf32>
    %cst_8 = arith.constant 0.000000e+00 : f32
    %8 = vector.broadcast %cst_8 : f32 to vector<290x128xf32>
    %9 = arith.maximumf %7, %8 : vector<290x128xf32>
    %10 = vector.broadcast %4 : vector<290x1xf32> to vector<290x128xf32>
    %11 = arith.mulf %10, %9 : vector<290x128xf32>
    %c0_9 = arith.constant 0 : index
    %c0_10 = arith.constant 0 : index
    %12 = vector.load %arg15[%c0_9, %c0_10] : memref<290x128xf32, #tpu.memory_space<vmem>>, vector<290x128xf32>
    tpu.vector_store %arg15[%c0_9, %c0_10], %11 {strides = array<i32>} : memref<290x128xf32, #tpu.memory_space<vmem>>, vector<290x128xf32>,
    %cst_11 = arith.constant 0.000000e+00 : f32
    %13 = vector.broadcast %cst_11 : f32 to vector<256x128xf32>
    %c0_12 = arith.constant 0 : index
    %c0_13 = arith.constant 0 : index
    %14 = vector.load %arg15[%c0_12, %c0_13] : memref<290x128xf32, #tpu.memory_space<vmem>>, vector<256x128xf32>
    %c0_14 = arith.constant 0 : index
    %c0_15 = arith.constant 0 : index
    %c0_16 = arith.constant 0 : index
    %15 = vector.load %arg5[%c0_14, %c0_15, %c0_16] : memref<9x128x128xf32, #tpu.memory_space<vmem>>, vector<1x128x128xf32>
    %16 = vector.shape_cast %15 : vector<1x128x128xf32> to vector<128x128xf32>
    %cst_17 = arith.constant dense<0.000000e+00> : vector<256x128xf32>
    %17 = tpu.matmul %14, %16, %cst_17 {dimension_numbers = #tpu.dot_dimension_numbers<[1], [0], [0], [1], [0, 0, 1, 1], [], []>} : vector<256x128xf32>, vector<128x128xf32>, vector<256x128xf32> -> vector<256x128xf32>
    %18 = arith.addf %13, %17 : vector<256x128xf32>
    %c1 = arith.constant 1 : index
    %c0_18 = arith.constant 0 : index
    %19 = vector.load %arg15[%c1, %c0_18] : memref<290x128xf32, #tpu.memory_space<vmem>>, vector<256x128xf32>
    %c1_19 = arith.constant 1 : index
    %c0_20 = arith.constant 0 : index
    %c0_21 = arith.constant 0 : index
    %20 = vector.load %arg5[%c1_19, %c0_20, %c0_21] : memref<9x128x128xf32, #tpu.memory_space<vmem>>, vector<1x128x128xf32>
    %21 = vector.shape_cast %20 : vector<1x128x128xf32> to vector<128x128xf32>
    %cst_22 = arith.constant dense<0.000000e+00> : vector<256x128xf32>
    %22 = tpu.matmul %19, %21, %cst_22 {dimension_numbers = #tpu.dot_dimension_numbers<[1], [0], [0], [1], [0, 0, 1, 1], [], []>} : vector<256x128xf32>, vector<128x128xf32>, vector<256x128xf32> -> vector<256x128xf32>
    %23 = arith.addf %18, %22 : vector<256x128xf32>
    %c2 = arith.constant 2 : index
    %c0_23 = arith.constant 0 : index
    %24 = vector.load %arg15[%c2, %c0_23] : memref<290x128xf32, #tpu.memory_space<vmem>>, vector<256x128xf32>
    %c2_24 = arith.constant 2 : index
    %c0_25 = arith.constant 0 : index
    %c0_26 = arith.constant 0 : index
    %25 = vector.load %arg5[%c2_24, %c0_25, %c0_26] : memref<9x128x128xf32, #tpu.memory_space<vmem>>, vector<1x128x128xf32>
    %26 = vector.shape_cast %25 : vector<1x128x128xf32> to vector<128x128xf32>
    %cst_27 = arith.constant dense<0.000000e+00> : vector<256x128xf32>
    %27 = tpu.matmul %24, %26, %cst_27 {dimension_numbers = #tpu.dot_dimension_numbers<[1], [0], [0], [1], [0, 0, 1, 1], [], []>} : vector<256x128xf32>, vector<128x128xf32>, vector<256x128xf32> -> vector<256x128xf32>
    %28 = arith.addf %23, %27 : vector<256x128xf32>
    %c16 = arith.constant 16 : index
    %c0_28 = arith.constant 0 : index
    %29 = vector.load %arg15[%c16, %c0_28] : memref<290x128xf32, #tpu.memory_space<vmem>>, vector<256x128xf32>
    %c3 = arith.constant 3 : index
    %c0_29 = arith.constant 0 : index
    %c0_30 = arith.constant 0 : index
    %30 = vector.load %arg5[%c3, %c0_29, %c0_30] : memref<9x128x128xf32, #tpu.memory_space<vmem>>, vector<1x128x128xf32>
    %31 = vector.shape_cast %30 : vector<1x128x128xf32> to vector<128x128xf32>
    %cst_31 = arith.constant dense<0.000000e+00> : vector<256x128xf32>
    %32 = tpu.matmul %29, %31, %cst_31 {dimension_numbers = #tpu.dot_dimension_numbers<[1], [0], [0], [1], [0, 0, 1, 1], [], []>} : vector<256x128xf32>, vector<128x128xf32>, vector<256x128xf32> -> vector<256x128xf32>
    %33 = arith.addf %28, %32 : vector<256x128xf32>
    %c17 = arith.constant 17 : index
    %c0_32 = arith.constant 0 : index
    %34 = vector.load %arg15[%c17, %c0_32] : memref<290x128xf32, #tpu.memory_space<vmem>>, vector<256x128xf32>
    %c4 = arith.constant 4 : index
    %c0_33 = arith.constant 0 : index
    %c0_34 = arith.constant 0 : index
    %35 = vector.load %arg5[%c4, %c0_33, %c0_34] : memref<9x128x128xf32, #tpu.memory_space<vmem>>, vector<1x128x128xf32>
    %36 = vector.shape_cast %35 : vector<1x128x128xf32> to vector<128x128xf32>
    %cst_35 = arith.constant dense<0.000000e+00> : vector<256x128xf32>
    %37 = tpu.matmul %34, %36, %cst_35 {dimension_numbers = #tpu.dot_dimension_numbers<[1], [0], [0], [1], [0, 0, 1, 1], [], []>} : vector<256x128xf32>, vector<128x128xf32>, vector<256x128xf32> -> vector<256x128xf32>
    %38 = arith.addf %33, %37 : vector<256x128xf32>
    %c18 = arith.constant 18 : index
    %c0_36 = arith.constant 0 : index
    %39 = vector.load %arg15[%c18, %c0_36] : memref<290x128xf32, #tpu.memory_space<vmem>>, vector<256x128xf32>
    %c5 = arith.constant 5 : index
    %c0_37 = arith.constant 0 : index
    %c0_38 = arith.constant 0 : index
    %40 = vector.load %arg5[%c5, %c0_37, %c0_38] : memref<9x128x128xf32, #tpu.memory_space<vmem>>, vector<1x128x128xf32>
    %41 = vector.shape_cast %40 : vector<1x128x128xf32> to vector<128x128xf32>
    %cst_39 = arith.constant dense<0.000000e+00> : vector<256x128xf32>
    %42 = tpu.matmul %39, %41, %cst_39 {dimension_numbers = #tpu.dot_dimension_numbers<[1], [0], [0], [1], [0, 0, 1, 1], [], []>} : vector<256x128xf32>, vector<128x128xf32>, vector<256x128xf32> -> vector<256x128xf32>
    %43 = arith.addf %38, %42 : vector<256x128xf32>
    %c32 = arith.constant 32 : index
    %c0_40 = arith.constant 0 : index
    %44 = vector.load %arg15[%c32, %c0_40] : memref<290x128xf32, #tpu.memory_space<vmem>>, vector<256x128xf32>
    %c6 = arith.constant 6 : index
    %c0_41 = arith.constant 0 : index
    %c0_42 = arith.constant 0 : index
    %45 = vector.load %arg5[%c6, %c0_41, %c0_42] : memref<9x128x128xf32, #tpu.memory_space<vmem>>, vector<1x128x128xf32>
    %46 = vector.shape_cast %45 : vector<1x128x128xf32> to vector<128x128xf32>
    %cst_43 = arith.constant dense<0.000000e+00> : vector<256x128xf32>
    %47 = tpu.matmul %44, %46, %cst_43 {dimension_numbers = #tpu.dot_dimension_numbers<[1], [0], [0], [1], [0, 0, 1, 1], [], []>} : vector<256x128xf32>, vector<128x128xf32>, vector<256x128xf32> -> vector<256x128xf32>
    %48 = arith.addf %43, %47 : vector<256x128xf32>
    %c33 = arith.constant 33 : index
    %c0_44 = arith.constant 0 : index
    %49 = vector.load %arg15[%c33, %c0_44] : memref<290x128xf32, #tpu.memory_space<vmem>>, vector<256x128xf32>
    %c7 = arith.constant 7 : index
    %c0_45 = arith.constant 0 : index
    %c0_46 = arith.constant 0 : index
    %50 = vector.load %arg5[%c7, %c0_45, %c0_46] : memref<9x128x128xf32, #tpu.memory_space<vmem>>, vector<1x128x128xf32>
    %51 = vector.shape_cast %50 : vector<1x128x128xf32> to vector<128x128xf32>
    %cst_47 = arith.constant dense<0.000000e+00> : vector<256x128xf32>
    %52 = tpu.matmul %49, %51, %cst_47 {dimension_numbers = #tpu.dot_dimension_numbers<[1], [0], [0], [1], [0, 0, 1, 1], [], []>} : vector<256x128xf32>, vector<128x128xf32>, vector<256x128xf32> -> vector<256x128xf32>
    %53 = arith.addf %48, %52 : vector<256x128xf32>
    %c34 = arith.constant 34 : index
    %c0_48 = arith.constant 0 : index
    %54 = vector.load %arg15[%c34, %c0_48] : memref<290x128xf32, #tpu.memory_space<vmem>>, vector<256x128xf32>
    %c8 = arith.constant 8 : index
    %c0_49 = arith.constant 0 : index
    %c0_50 = arith.constant 0 : index
    %55 = vector.load %arg5[%c8, %c0_49, %c0_50] : memref<9x128x128xf32, #tpu.memory_space<vmem>>, vector<1x128x128xf32>
    %56 = vector.shape_cast %55 : vector<1x128x128xf32> to vector<128x128xf32>
    %cst_51 = arith.constant dense<0.000000e+00> : vector<256x128xf32>
    %57 = tpu.matmul %54, %56, %cst_51 {dimension_numbers = #tpu.dot_dimension_numbers<[1], [0], [0], [1], [0, 0, 1, 1], [], []>} : vector<256x128xf32>, vector<128x128xf32>, vector<256x128xf32> -> vector<256x128xf32>
    %58 = arith.addf %53, %57 : vector<256x128xf32>
    %c0_52 = arith.constant 0 : index
    %c0_53 = arith.constant 0 : index
    %59 = vector.load %arg6[%c0_52, %c0_53] : memref<1x128xf32, #tpu.memory_space<vmem>>, vector<1x128xf32>
    %60 = vector.broadcast %59 : vector<1x128xf32> to vector<256x128xf32>
    %61 = arith.addf %58, %60 : vector<256x128xf32>
    %cst_54 = arith.constant 0.000000e+00 : f32
    %62 = vector.broadcast %cst_54 : f32 to vector<256x128xf32>
    %63 = arith.maximumf %61, %62 : vector<256x128xf32>
    %c0_55 = arith.constant 0 : index
    %c0_56 = arith.constant 0 : index
    %64 = vector.load %arg16[%c0_55, %c0_56] : memref<256x128xf32, #tpu.memory_space<vmem>>, vector<256x128xf32>
    tpu.vector_store %arg16[%c0_55, %c0_56], %63 {strides = array<i32>} : memref<256x128xf32, #tpu.memory_space<vmem>>, vector<256x128xf32>,
    %c0_57 = arith.constant 0 : index
    %c0_58 = arith.constant 0 : index
    %65 = vector.load %arg16[%c0_57, %c0_58] : memref<256x128xf32, #tpu.memory_space<vmem>>, vector<222x128xf32>
    %c1_59 = arith.constant 1 : index
    %c0_60 = arith.constant 0 : index
    %66 = vector.load %arg16[%c1_59, %c0_60] : memref<256x128xf32, #tpu.memory_space<vmem>>, vector<222x128xf32>
    %67 = arith.maximumf %65, %66 : vector<222x128xf32>
    %c2_61 = arith.constant 2 : index
    %c0_62 = arith.constant 0 : index
    %68 = vector.load %arg16[%c2_61, %c0_62] : memref<256x128xf32, #tpu.memory_space<vmem>>, vector<222x128xf32>
    %69 = arith.maximumf %67, %68 : vector<222x128xf32>
    %c16_63 = arith.constant 16 : index
    %c0_64 = arith.constant 0 : index
    %70 = vector.load %arg16[%c16_63, %c0_64] : memref<256x128xf32, #tpu.memory_space<vmem>>, vector<222x128xf32>
    %71 = arith.maximumf %69, %70 : vector<222x128xf32>
    %c17_65 = arith.constant 17 : index
    %c0_66 = arith.constant 0 : index
    %72 = vector.load %arg16[%c17_65, %c0_66] : memref<256x128xf32, #tpu.memory_space<vmem>>, vector<222x128xf32>
    %73 = arith.maximumf %71, %72 : vector<222x128xf32>
    %c18_67 = arith.constant 18 : index
    %c0_68 = arith.constant 0 : index
    %74 = vector.load %arg16[%c18_67, %c0_68] : memref<256x128xf32, #tpu.memory_space<vmem>>, vector<222x128xf32>
    %75 = arith.maximumf %73, %74 : vector<222x128xf32>
    %c32_69 = arith.constant 32 : index
    %c0_70 = arith.constant 0 : index
    %76 = vector.load %arg16[%c32_69, %c0_70] : memref<256x128xf32, #tpu.memory_space<vmem>>, vector<222x128xf32>
    %77 = arith.maximumf %75, %76 : vector<222x128xf32>
    %c33_71 = arith.constant 33 : index
    %c0_72 = arith.constant 0 : index
    %78 = vector.load %arg16[%c33_71, %c0_72] : memref<256x128xf32, #tpu.memory_space<vmem>>, vector<222x128xf32>
    %79 = arith.maximumf %77, %78 : vector<222x128xf32>
    %c34_73 = arith.constant 34 : index
    %c0_74 = arith.constant 0 : index
    %80 = vector.load %arg16[%c34_73, %c0_74] : memref<256x128xf32, #tpu.memory_space<vmem>>, vector<222x128xf32>
    %81 = arith.maximumf %79, %80 : vector<222x128xf32>
    %c0_75 = arith.constant 0 : index
    %c0_76 = arith.constant 0 : index
    %82 = vector.load %arg7[%c0_75, %c0_76] : memref<88x222xf32, #tpu.memory_space<vmem>>, vector<88x222xf32>
    %cst_77 = arith.constant dense<0.000000e+00> : vector<88x128xf32>
    %83 = tpu.matmul %82, %81, %cst_77 {dimension_numbers = #tpu.dot_dimension_numbers<[1], [0], [0], [1], [0, 0, 1, 1], [], []>} : vector<88x222xf32>, vector<222x128xf32>, vector<88x128xf32> -> vector<88x128xf32>
    %c0_78 = arith.constant 0 : index
    %c0_79 = arith.constant 0 : index
    %84 = vector.load %arg17[%c0_78, %c0_79] : memref<88x128xf32, #tpu.memory_space<vmem>>, vector<88x128xf32>
    tpu.vector_store %arg17[%c0_78, %c0_79], %83 {strides = array<i32>} : memref<88x128xf32, #tpu.memory_space<vmem>>, vector<88x128xf32>,
    %cst_80 = arith.constant 0.000000e+00 : f32
    %85 = vector.broadcast %cst_80 : f32 to vector<64x128xf32>
    %c0_81 = arith.constant 0 : index
    %c0_82 = arith.constant 0 : index
    %86 = vector.load %arg17[%c0_81, %c0_82] : memref<88x128xf32, #tpu.memory_space<vmem>>, vector<64x128xf32>
    %c0_83 = arith.constant 0 : index
    %c0_84 = arith.constant 0 : index
    %c0_85 = arith.constant 0 : index
    %87 = vector.load %arg8[%c0_83, %c0_84, %c0_85] : memref<9x128x128xf32, #tpu.memory_space<vmem>>, vector<1x128x128xf32>
    %88 = vector.shape_cast %87 : vector<1x128x128xf32> to vector<128x128xf32>
    %cst_86 = arith.constant dense<0.000000e+00> : vector<64x128xf32>
    %89 = tpu.matmul %86, %88, %cst_86 {dimension_numbers = #tpu.dot_dimension_numbers<[1], [0], [0], [1], [0, 0, 1, 1], [], []>} : vector<64x128xf32>, vector<128x128xf32>, vector<64x128xf32> -> vector<64x128xf32>
    %90 = arith.addf %85, %89 : vector<64x128xf32>
    %c1_87 = arith.constant 1 : index
    %c0_88 = arith.constant 0 : index
    %91 = vector.load %arg17[%c1_87, %c0_88] : memref<88x128xf32, #tpu.memory_space<vmem>>, vector<64x128xf32>
    %c1_89 = arith.constant 1 : index
    %c0_90 = arith.constant 0 : index
    %c0_91 = arith.constant 0 : index
    %92 = vector.load %arg8[%c1_89, %c0_90, %c0_91] : memref<9x128x128xf32, #tpu.memory_space<vmem>>, vector<1x128x128xf32>
    %93 = vector.shape_cast %92 : vector<1x128x128xf32> to vector<128x128xf32>
    %cst_92 = arith.constant dense<0.000000e+00> : vector<64x128xf32>
    %94 = tpu.matmul %91, %93, %cst_92 {dimension_numbers = #tpu.dot_dimension_numbers<[1], [0], [0], [1], [0, 0, 1, 1], [], []>} : vector<64x128xf32>, vector<128x128xf32>, vector<64x128xf32> -> vector<64x128xf32>
    %95 = arith.addf %90, %94 : vector<64x128xf32>
    %c2_93 = arith.constant 2 : index
    %c0_94 = arith.constant 0 : index
    %96 = vector.load %arg17[%c2_93, %c0_94] : memref<88x128xf32, #tpu.memory_space<vmem>>, vector<64x128xf32>
    %c2_95 = arith.constant 2 : index
    %c0_96 = arith.constant 0 : index
    %c0_97 = arith.constant 0 : index
    %97 = vector.load %arg8[%c2_95, %c0_96, %c0_97] : memref<9x128x128xf32, #tpu.memory_space<vmem>>, vector<1x128x128xf32>
    %98 = vector.shape_cast %97 : vector<1x128x128xf32> to vector<128x128xf32>
    %cst_98 = arith.constant dense<0.000000e+00> : vector<64x128xf32>
    %99 = tpu.matmul %96, %98, %cst_98 {dimension_numbers = #tpu.dot_dimension_numbers<[1], [0], [0], [1], [0, 0, 1, 1], [], []>} : vector<64x128xf32>, vector<128x128xf32>, vector<64x128xf32> -> vector<64x128xf32>
    %100 = arith.addf %95, %99 : vector<64x128xf32>
    %c8_99 = arith.constant 8 : index
    %c0_100 = arith.constant 0 : index
    %101 = vector.load %arg17[%c8_99, %c0_100] : memref<88x128xf32, #tpu.memory_space<vmem>>, vector<64x128xf32>
    %c3_101 = arith.constant 3 : index
    %c0_102 = arith.constant 0 : index
    %c0_103 = arith.constant 0 : index
    %102 = vector.load %arg8[%c3_101, %c0_102, %c0_103] : memref<9x128x128xf32, #tpu.memory_space<vmem>>, vector<1x128x128xf32>
    %103 = vector.shape_cast %102 : vector<1x128x128xf32> to vector<128x128xf32>
    %cst_104 = arith.constant dense<0.000000e+00> : vector<64x128xf32>
    %104 = tpu.matmul %101, %103, %cst_104 {dimension_numbers = #tpu.dot_dimension_numbers<[1], [0], [0], [1], [0, 0, 1, 1], [], []>} : vector<64x128xf32>, vector<128x128xf32>, vector<64x128xf32> -> vector<64x128xf32>
    %105 = arith.addf %100, %104 : vector<64x128xf32>
    %c9 = arith.constant 9 : index
    %c0_105 = arith.constant 0 : index
    %106 = vector.load %arg17[%c9, %c0_105] : memref<88x128xf32, #tpu.memory_space<vmem>>, vector<64x128xf32>
    %c4_106 = arith.constant 4 : index
    %c0_107 = arith.constant 0 : index
    %c0_108 = arith.constant 0 : index
    %107 = vector.load %arg8[%c4_106, %c0_107, %c0_108] : memref<9x128x128xf32, #tpu.memory_space<vmem>>, vector<1x128x128xf32>
    %108 = vector.shape_cast %107 : vector<1x128x128xf32> to vector<128x128xf32>
    %cst_109 = arith.constant dense<0.000000e+00> : vector<64x128xf32>
    %109 = tpu.matmul %106, %108, %cst_109 {dimension_numbers = #tpu.dot_dimension_numbers<[1], [0], [0], [1], [0, 0, 1, 1], [], []>} : vector<64x128xf32>, vector<128x128xf32>, vector<64x128xf32> -> vector<64x128xf32>
    %110 = arith.addf %105, %109 : vector<64x128xf32>
    %c10 = arith.constant 10 : index
    %c0_110 = arith.constant 0 : index
    %111 = vector.load %arg17[%c10, %c0_110] : memref<88x128xf32, #tpu.memory_space<vmem>>, vector<64x128xf32>
    %c5_111 = arith.constant 5 : index
    %c0_112 = arith.constant 0 : index
    %c0_113 = arith.constant 0 : index
    %112 = vector.load %arg8[%c5_111, %c0_112, %c0_113] : memref<9x128x128xf32, #tpu.memory_space<vmem>>, vector<1x128x128xf32>
    %113 = vector.shape_cast %112 : vector<1x128x128xf32> to vector<128x128xf32>
    %cst_114 = arith.constant dense<0.000000e+00> : vector<64x128xf32>
    %114 = tpu.matmul %111, %113, %cst_114 {dimension_numbers = #tpu.dot_dimension_numbers<[1], [0], [0], [1], [0, 0, 1, 1], [], []>} : vector<64x128xf32>, vector<128x128xf32>, vector<64x128xf32> -> vector<64x128xf32>
    %115 = arith.addf %110, %114 : vector<64x128xf32>
    %c16_115 = arith.constant 16 : index
    %c0_116 = arith.constant 0 : index
    %116 = vector.load %arg17[%c16_115, %c0_116] : memref<88x128xf32, #tpu.memory_space<vmem>>, vector<64x128xf32>
    %c6_117 = arith.constant 6 : index
    %c0_118 = arith.constant 0 : index
    %c0_119 = arith.constant 0 : index
    %117 = vector.load %arg8[%c6_117, %c0_118, %c0_119] : memref<9x128x128xf32, #tpu.memory_space<vmem>>, vector<1x128x128xf32>
    %118 = vector.shape_cast %117 : vector<1x128x128xf32> to vector<128x128xf32>
    %cst_120 = arith.constant dense<0.000000e+00> : vector<64x128xf32>
    %119 = tpu.matmul %116, %118, %cst_120 {dimension_numbers = #tpu.dot_dimension_numbers<[1], [0], [0], [1], [0, 0, 1, 1], [], []>} : vector<64x128xf32>, vector<128x128xf32>, vector<64x128xf32> -> vector<64x128xf32>
    %120 = arith.addf %115, %119 : vector<64x128xf32>
    %c17_121 = arith.constant 17 : index
    %c0_122 = arith.constant 0 : index
    %121 = vector.load %arg17[%c17_121, %c0_122] : memref<88x128xf32, #tpu.memory_space<vmem>>, vector<64x128xf32>
    %c7_123 = arith.constant 7 : index
    %c0_124 = arith.constant 0 : index
    %c0_125 = arith.constant 0 : index
    %122 = vector.load %arg8[%c7_123, %c0_124, %c0_125] : memref<9x128x128xf32, #tpu.memory_space<vmem>>, vector<1x128x128xf32>
    %123 = vector.shape_cast %122 : vector<1x128x128xf32> to vector<128x128xf32>
    %cst_126 = arith.constant dense<0.000000e+00> : vector<64x128xf32>
    %124 = tpu.matmul %121, %123, %cst_126 {dimension_numbers = #tpu.dot_dimension_numbers<[1], [0], [0], [1], [0, 0, 1, 1], [], []>} : vector<64x128xf32>, vector<128x128xf32>, vector<64x128xf32> -> vector<64x128xf32>
    %125 = arith.addf %120, %124 : vector<64x128xf32>
    %c18_127 = arith.constant 18 : index
    %c0_128 = arith.constant 0 : index
    %126 = vector.load %arg17[%c18_127, %c0_128] : memref<88x128xf32, #tpu.memory_space<vmem>>, vector<64x128xf32>
    %c8_129 = arith.constant 8 : index
    %c0_130 = arith.constant 0 : index
    %c0_131 = arith.constant 0 : index
    %127 = vector.load %arg8[%c8_129, %c0_130, %c0_131] : memref<9x128x128xf32, #tpu.memory_space<vmem>>, vector<1x128x128xf32>
    %128 = vector.shape_cast %127 : vector<1x128x128xf32> to vector<128x128xf32>
    %cst_132 = arith.constant dense<0.000000e+00> : vector<64x128xf32>
    %129 = tpu.matmul %126, %128, %cst_132 {dimension_numbers = #tpu.dot_dimension_numbers<[1], [0], [0], [1], [0, 0, 1, 1], [], []>} : vector<64x128xf32>, vector<128x128xf32>, vector<64x128xf32> -> vector<64x128xf32>
    %130 = arith.addf %125, %129 : vector<64x128xf32>
    %c0_133 = arith.constant 0 : index
    %c0_134 = arith.constant 0 : index
    %131 = vector.load %arg9[%c0_133, %c0_134] : memref<1x128xf32, #tpu.memory_space<vmem>>, vector<1x128xf32>
    %132 = vector.broadcast %131 : vector<1x128xf32> to vector<64x128xf32>
    %133 = arith.addf %130, %132 : vector<64x128xf32>
    %cst_135 = arith.constant 0.000000e+00 : f32
    %134 = vector.broadcast %cst_135 : f32 to vector<64x128xf32>
    %135 = arith.maximumf %133, %134 : vector<64x128xf32>
    %cst_136 = arith.constant 0.000000e+00 : f32
    %136 = vector.broadcast %cst_136 : f32 to vector<88x128xf32>
    %c0_137 = arith.constant 0 : index
    %c0_138 = arith.constant 0 : index
    %137 = vector.load %arg18[%c0_137, %c0_138] : memref<88x128xf32, #tpu.memory_space<vmem>>, vector<88x128xf32>
    tpu.vector_store %arg18[%c0_137, %c0_138], %136 {strides = array<i32>} : memref<88x128xf32, #tpu.memory_space<vmem>>, vector<88x128xf32>,
    %c0_139 = arith.constant 0 : index
    %c0_140 = arith.constant 0 : index
    %138 = vector.load %arg10[%c0_139, %c0_140] : memref<64x1xf32, #tpu.memory_space<vmem>>, vector<64x1xf32>
    %139 = vector.broadcast %138 : vector<64x1xf32> to vector<64x128xf32>
    %140 = arith.mulf %139, %135 : vector<64x128xf32>
    %c9_141 = arith.constant 9 : index
    %c0_142 = arith.constant 0 : index
    %141 = vector.load %arg18[%c9_141, %c0_142] : memref<88x128xf32, #tpu.memory_space<vmem>>, vector<64x128xf32>
    tpu.vector_store %arg18[%c9_141, %c0_142], %140 {strides = array<i32>} : memref<88x128xf32, #tpu.memory_space<vmem>>, vector<64x128xf32>,
    %cst_143 = arith.constant 0.000000e+00 : f32
    %142 = vector.broadcast %cst_143 : f32 to vector<64x128xf32>
    %c0_144 = arith.constant 0 : index
    %c0_145 = arith.constant 0 : index
    %143 = vector.load %arg18[%c0_144, %c0_145] : memref<88x128xf32, #tpu.memory_space<vmem>>, vector<64x128xf32>
    %c0_146 = arith.constant 0 : index
    %c0_147 = arith.constant 0 : index
    %c0_148 = arith.constant 0 : index
    %144 = vector.load %arg11[%c0_146, %c0_147, %c0_148] : memref<9x128x128xf32, #tpu.memory_space<vmem>>, vector<1x128x128xf32>
    %145 = vector.shape_cast %144 : vector<1x128x128xf32> to vector<128x128xf32>
    %cst_149 = arith.constant dense<0.000000e+00> : vector<64x128xf32>
    %146 = tpu.matmul %143, %145, %cst_149 {dimension_numbers = #tpu.dot_dimension_numbers<[1], [0], [0], [1], [0, 0, 1, 1], [], []>} : vector<64x128xf32>, vector<128x128xf32>, vector<64x128xf32> -> vector<64x128xf32>
    %147 = arith.addf %142, %146 : vector<64x128xf32>
    %c1_150 = arith.constant 1 : index
    %c0_151 = arith.constant 0 : index
    %148 = vector.load %arg18[%c1_150, %c0_151] : memref<88x128xf32, #tpu.memory_space<vmem>>, vector<64x128xf32>
    %c1_152 = arith.constant 1 : index
    %c0_153 = arith.constant 0 : index
    %c0_154 = arith.constant 0 : index
    %149 = vector.load %arg11[%c1_152, %c0_153, %c0_154] : memref<9x128x128xf32, #tpu.memory_space<vmem>>, vector<1x128x128xf32>
    %150 = vector.shape_cast %149 : vector<1x128x128xf32> to vector<128x128xf32>
    %cst_155 = arith.constant dense<0.000000e+00> : vector<64x128xf32>
    %151 = tpu.matmul %148, %150, %cst_155 {dimension_numbers = #tpu.dot_dimension_numbers<[1], [0], [0], [1], [0, 0, 1, 1], [], []>} : vector<64x128xf32>, vector<128x128xf32>, vector<64x128xf32> -> vector<64x128xf32>
    %152 = arith.addf %147, %151 : vector<64x128xf32>
    %c2_156 = arith.constant 2 : index
    %c0_157 = arith.constant 0 : index
    %153 = vector.load %arg18[%c2_156, %c0_157] : memref<88x128xf32, #tpu.memory_space<vmem>>, vector<64x128xf32>
    %c2_158 = arith.constant 2 : index
    %c0_159 = arith.constant 0 : index
    %c0_160 = arith.constant 0 : index
    %154 = vector.load %arg11[%c2_158, %c0_159, %c0_160] : memref<9x128x128xf32, #tpu.memory_space<vmem>>, vector<1x128x128xf32>
    %155 = vector.shape_cast %154 : vector<1x128x128xf32> to vector<128x128xf32>
    %cst_161 = arith.constant dense<0.000000e+00> : vector<64x128xf32>
    %156 = tpu.matmul %153, %155, %cst_161 {dimension_numbers = #tpu.dot_dimension_numbers<[1], [0], [0], [1], [0, 0, 1, 1], [], []>} : vector<64x128xf32>, vector<128x128xf32>, vector<64x128xf32> -> vector<64x128xf32>
    %157 = arith.addf %152, %156 : vector<64x128xf32>
    %c8_162 = arith.constant 8 : index
    %c0_163 = arith.constant 0 : index
    %158 = vector.load %arg18[%c8_162, %c0_163] : memref<88x128xf32, #tpu.memory_space<vmem>>, vector<64x128xf32>
    %c3_164 = arith.constant 3 : index
    %c0_165 = arith.constant 0 : index
    %c0_166 = arith.constant 0 : index
    %159 = vector.load %arg11[%c3_164, %c0_165, %c0_166] : memref<9x128x128xf32, #tpu.memory_space<vmem>>, vector<1x128x128xf32>
    %160 = vector.shape_cast %159 : vector<1x128x128xf32> to vector<128x128xf32>
    %cst_167 = arith.constant dense<0.000000e+00> : vector<64x128xf32>
    %161 = tpu.matmul %158, %160, %cst_167 {dimension_numbers = #tpu.dot_dimension_numbers<[1], [0], [0], [1], [0, 0, 1, 1], [], []>} : vector<64x128xf32>, vector<128x128xf32>, vector<64x128xf32> -> vector<64x128xf32>
    %162 = arith.addf %157, %161 : vector<64x128xf32>
    %c9_168 = arith.constant 9 : index
    %c0_169 = arith.constant 0 : index
    %163 = vector.load %arg18[%c9_168, %c0_169] : memref<88x128xf32, #tpu.memory_space<vmem>>, vector<64x128xf32>
    %c4_170 = arith.constant 4 : index
    %c0_171 = arith.constant 0 : index
    %c0_172 = arith.constant 0 : index
    %164 = vector.load %arg11[%c4_170, %c0_171, %c0_172] : memref<9x128x128xf32, #tpu.memory_space<vmem>>, vector<1x128x128xf32>
    %165 = vector.shape_cast %164 : vector<1x128x128xf32> to vector<128x128xf32>
    %cst_173 = arith.constant dense<0.000000e+00> : vector<64x128xf32>
    %166 = tpu.matmul %163, %165, %cst_173 {dimension_numbers = #tpu.dot_dimension_numbers<[1], [0], [0], [1], [0, 0, 1, 1], [], []>} : vector<64x128xf32>, vector<128x128xf32>, vector<64x128xf32> -> vector<64x128xf32>
    %167 = arith.addf %162, %166 : vector<64x128xf32>
    %c10_174 = arith.constant 10 : index
    %c0_175 = arith.constant 0 : index
    %168 = vector.load %arg18[%c10_174, %c0_175] : memref<88x128xf32, #tpu.memory_space<vmem>>, vector<64x128xf32>
    %c5_176 = arith.constant 5 : index
    %c0_177 = arith.constant 0 : index
    %c0_178 = arith.constant 0 : index
    %169 = vector.load %arg11[%c5_176, %c0_177, %c0_178] : memref<9x128x128xf32, #tpu.memory_space<vmem>>, vector<1x128x128xf32>
    %170 = vector.shape_cast %169 : vector<1x128x128xf32> to vector<128x128xf32>
    %cst_179 = arith.constant dense<0.000000e+00> : vector<64x128xf32>
    %171 = tpu.matmul %168, %170, %cst_179 {dimension_numbers = #tpu.dot_dimension_numbers<[1], [0], [0], [1], [0, 0, 1, 1], [], []>} : vector<64x128xf32>, vector<128x128xf32>, vector<64x128xf32> -> vector<64x128xf32>
    %172 = arith.addf %167, %171 : vector<64x128xf32>
    %c16_180 = arith.constant 16 : index
    %c0_181 = arith.constant 0 : index
    %173 = vector.load %arg18[%c16_180, %c0_181] : memref<88x128xf32, #tpu.memory_space<vmem>>, vector<64x128xf32>
    %c6_182 = arith.constant 6 : index
    %c0_183 = arith.constant 0 : index
    %c0_184 = arith.constant 0 : index
    %174 = vector.load %arg11[%c6_182, %c0_183, %c0_184] : memref<9x128x128xf32, #tpu.memory_space<vmem>>, vector<1x128x128xf32>
    %175 = vector.shape_cast %174 : vector<1x128x128xf32> to vector<128x128xf32>
    %cst_185 = arith.constant dense<0.000000e+00> : vector<64x128xf32>
    %176 = tpu.matmul %173, %175, %cst_185 {dimension_numbers = #tpu.dot_dimension_numbers<[1], [0], [0], [1], [0, 0, 1, 1], [], []>} : vector<64x128xf32>, vector<128x128xf32>, vector<64x128xf32> -> vector<64x128xf32>
    %177 = arith.addf %172, %176 : vector<64x128xf32>
    %c17_186 = arith.constant 17 : index
    %c0_187 = arith.constant 0 : index
    %178 = vector.load %arg18[%c17_186, %c0_187] : memref<88x128xf32, #tpu.memory_space<vmem>>, vector<64x128xf32>
    %c7_188 = arith.constant 7 : index
    %c0_189 = arith.constant 0 : index
    %c0_190 = arith.constant 0 : index
    %179 = vector.load %arg11[%c7_188, %c0_189, %c0_190] : memref<9x128x128xf32, #tpu.memory_space<vmem>>, vector<1x128x128xf32>
    %180 = vector.shape_cast %179 : vector<1x128x128xf32> to vector<128x128xf32>
    %cst_191 = arith.constant dense<0.000000e+00> : vector<64x128xf32>
    %181 = tpu.matmul %178, %180, %cst_191 {dimension_numbers = #tpu.dot_dimension_numbers<[1], [0], [0], [1], [0, 0, 1, 1], [], []>} : vector<64x128xf32>, vector<128x128xf32>, vector<64x128xf32> -> vector<64x128xf32>
    %182 = arith.addf %177, %181 : vector<64x128xf32>
    %c18_192 = arith.constant 18 : index
    %c0_193 = arith.constant 0 : index
    %183 = vector.load %arg18[%c18_192, %c0_193] : memref<88x128xf32, #tpu.memory_space<vmem>>, vector<64x128xf32>
    %c8_194 = arith.constant 8 : index
    %c0_195 = arith.constant 0 : index
    %c0_196 = arith.constant 0 : index
    %184 = vector.load %arg11[%c8_194, %c0_195, %c0_196] : memref<9x128x128xf32, #tpu.memory_space<vmem>>, vector<1x128x128xf32>
    %185 = vector.shape_cast %184 : vector<1x128x128xf32> to vector<128x128xf32>
    %cst_197 = arith.constant dense<0.000000e+00> : vector<64x128xf32>
    %186 = tpu.matmul %183, %185, %cst_197 {dimension_numbers = #tpu.dot_dimension_numbers<[1], [0], [0], [1], [0, 0, 1, 1], [], []>} : vector<64x128xf32>, vector<128x128xf32>, vector<64x128xf32> -> vector<64x128xf32>
    %187 = arith.addf %182, %186 : vector<64x128xf32>
    %c0_198 = arith.constant 0 : index
    %c0_199 = arith.constant 0 : index
    %188 = vector.load %arg12[%c0_198, %c0_199] : memref<1x128xf32, #tpu.memory_space<vmem>>, vector<1x128xf32>
    %189 = vector.broadcast %188 : vector<1x128xf32> to vector<64x128xf32>
    %190 = arith.addf %187, %189 : vector<64x128xf32>
    %cst_200 = arith.constant 0.000000e+00 : f32
    %191 = vector.broadcast %cst_200 : f32 to vector<64x128xf32>
    %192 = arith.maximumf %190, %191 : vector<64x128xf32>
    %c0_201 = arith.constant 0 : index
    %c0_202 = arith.constant 0 : index
    %193 = vector.load %arg13[%c0_201, %c0_202] : memref<64x1xf32, #tpu.memory_space<vmem>>, vector<64x1xf32>
    %cst_203 = arith.constant 0.000000e+00 : f32
    %194 = vector.broadcast %cst_203 : f32 to vector<64x1xf32>
    %195 = arith.cmpf ogt, %193, %194 : vector<64x1xf32>
    %cst_204 = arith.constant -3.000000e+38 : f32
    %196 = vector.shape_cast %195 : vector<64x1xi1> to vector<64x1xi1>
    %197 = vector.broadcast %196 : vector<64x1xi1> to vector<64x128xi1>
    %198 = vector.broadcast %cst_204 : f32 to vector<64x128xf32>
    %199 = arith.select %197, %192, %198 : vector<64x128xi1>, vector<64x128xf32>
    %cst_205 = arith.constant dense<0xFF800000> : vector<128xf32>
    %200 = vector.multi_reduction <maximumf>, %199, %cst_205 [0] : vector<64x128xf32> to vector<128xf32>
    %201 = vector.shape_cast %200 : vector<128xf32> to vector<1x128xf32>
    %202 = arith.mulf %201, %201 : vector<1x128xf32>
    %cst_206 = arith.constant dense<0.000000e+00> : vector<1xf32>
    %203 = vector.multi_reduction <add>, %202, %cst_206 [1] : vector<1x128xf32> to vector<1xf32>
    %204 = vector.shape_cast %203 : vector<1xf32> to vector<1x1xf32>
    %cst_207 = arith.constant 1.000000e-24 : f32
    %205 = vector.broadcast %cst_207 : f32 to vector<1x1xf32>
    %206 = arith.maximumf %204, %205 : vector<1x1xf32>
    %207 = math.rsqrt %206 : vector<1x1xf32>
    %208 = vector.broadcast %207 : vector<1x1xf32> to vector<1x128xf32>
    %209 = arith.mulf %201, %208 : vector<1x128xf32>
    %c0_208 = arith.constant 0 : index
    %c0_209 = arith.constant 0 : index
    %c0_210 = arith.constant 0 : index
    %210 = vector.load %arg14[%c0_208, %c0_209, %c0_210] : memref<1x1x128xf32, #tpu.memory_space<vmem>>, vector<1x1x128xf32>
    %211 = vector.shape_cast %210 : vector<1x1x128xf32> to vector<1x128xf32>
    %212 = vector.shape_cast %209 : vector<1x128xf32> to vector<1x1x128xf32>
    tpu.vector_store %arg14[%c0_208, %c0_209, %c0_210], %212 {strides = array<i32>} : memref<1x1x128xf32, #tpu.memory_space<vmem>>, vector<1x1x128xf32>,
    return
  }
  func.func @transform_0(%arg0: i32) -> (i32, i32, i32) {
    %c0_i32 = arith.constant 0 : i32
    %c0_i32_0 = arith.constant 0 : i32
    %c0_i32_1 = arith.constant 0 : i32
    return %arg0, %c0_i32, %c0_i32_0 : i32, i32, i32
  }
  func.func @transform_1(%arg0: i32) -> (i32, i32) {
    %c0_i32 = arith.constant 0 : i32
    %c0_i32_0 = arith.constant 0 : i32
    %c0_i32_1 = arith.constant 0 : i32
    return %c0_i32, %c0_i32_0 : i32, i32
  }
  func.func @transform_2(%arg0: i32) -> (i32, i32) {
    %c0_i32 = arith.constant 0 : i32
    %c0_i32_0 = arith.constant 0 : i32
    %c0_i32_1 = arith.constant 0 : i32
    return %c0_i32, %c0_i32_0 : i32, i32
  }
  func.func @transform_3(%arg0: i32) -> (i32, i32) {
    %c0_i32 = arith.constant 0 : i32
    %c0_i32_0 = arith.constant 0 : i32
    %c0_i32_1 = arith.constant 0 : i32
    return %c0_i32, %c0_i32_0 : i32, i32
  }
  func.func @transform_4(%arg0: i32) -> (i32, i32, i32) {
    %c0_i32 = arith.constant 0 : i32
    %c0_i32_0 = arith.constant 0 : i32
    %c0_i32_1 = arith.constant 0 : i32
    %c0_i32_2 = arith.constant 0 : i32
    return %c0_i32, %c0_i32_0, %c0_i32_1 : i32, i32, i32
  }
  func.func @transform_5(%arg0: i32) -> (i32, i32) {
    %c0_i32 = arith.constant 0 : i32
    %c0_i32_0 = arith.constant 0 : i32
    %c0_i32_1 = arith.constant 0 : i32
    return %c0_i32, %c0_i32_0 : i32, i32
  }
  func.func @transform_6(%arg0: i32) -> (i32, i32) {
    %c0_i32 = arith.constant 0 : i32
    %c0_i32_0 = arith.constant 0 : i32
    %c0_i32_1 = arith.constant 0 : i32
    return %c0_i32, %c0_i32_0 : i32, i32
  }
  func.func @transform_7(%arg0: i32) -> (i32, i32, i32) {
    %c0_i32 = arith.constant 0 : i32
    %c0_i32_0 = arith.constant 0 : i32
    %c0_i32_1 = arith.constant 0 : i32
    %c0_i32_2 = arith.constant 0 : i32
    return %c0_i32, %c0_i32_0, %c0_i32_1 : i32, i32, i32
  }
  func.func @transform_8(%arg0: i32) -> (i32, i32) {
    %c0_i32 = arith.constant 0 : i32
    %c0_i32_0 = arith.constant 0 : i32
    %c0_i32_1 = arith.constant 0 : i32
    return %c0_i32, %c0_i32_0 : i32, i32
  }
  func.func @transform_9(%arg0: i32) -> (i32, i32) {
    %c0_i32 = arith.constant 0 : i32
    %c0_i32_0 = arith.constant 0 : i32
    %c0_i32_1 = arith.constant 0 : i32
    return %c0_i32, %c0_i32_0 : i32, i32
  }
  func.func @transform_10(%arg0: i32) -> (i32, i32, i32) {
    %c0_i32 = arith.constant 0 : i32
    %c0_i32_0 = arith.constant 0 : i32
    %c0_i32_1 = arith.constant 0 : i32
    %c0_i32_2 = arith.constant 0 : i32
    return %c0_i32, %c0_i32_0, %c0_i32_1 : i32, i32, i32
  }
  func.func @transform_11(%arg0: i32) -> (i32, i32) {
    %c0_i32 = arith.constant 0 : i32
    %c0_i32_0 = arith.constant 0 : i32
    %c0_i32_1 = arith.constant 0 : i32
    return %c0_i32, %c0_i32_0 : i32, i32
  }
  func.func @transform_12(%arg0: i32) -> (i32, i32) {
    %c0_i32 = arith.constant 0 : i32
    %c0_i32_0 = arith.constant 0 : i32
    %c0_i32_1 = arith.constant 0 : i32
    return %c0_i32, %c0_i32_0 : i32, i32
  }
  func.func @transform_13(%arg0: i32) -> (i32, i32, i32) {
    %c0_i32 = arith.constant 0 : i32
    %c0_i32_0 = arith.constant 0 : i32
    %c0_i32_1 = arith.constant 0 : i32
    return %arg0, %c0_i32, %c0_i32_0 : i32, i32, i32
  }
}

</mosaic_0001>

<bundles_post_ra>
// kernel: forward.1
= control target key start
LH: loop header
LB: loop body
LE: loop exit
PB: predicated region body
PF: predicated region fallthrough
CT: control target
= control target key end

     0   :  { %s14404_s0 = inlined_call_operand.vmem [shape: f32[2,290,36], index: 0, kind: input, shape index: {}]   ;;  %s14405_s1 = inlined_call_operand.vmem [shape: f32[290,1], index: 1, kind: input, shape index: {}]   ;;  %s14406_s2 = inlined_call_operand.vmem [shape: f32[36,128], index: 2, kind: input, shape index: {}]   ;;  %s14407_s3 = inlined_call_operand.vmem [shape: f32[1,128], index: 3, kind: input, shape index: {}]   ;;  %s14408_s4 = inlined_call_operand.vmem [shape: f32[9,128,128], index: 4, kind: input, shape index: {}]   ;;  %s14409_s5 = inlined_call_operand.vmem [shape: f32[1,128], index: 5, kind: input, shape index: {}]   ;;  %s14410_s6 = inlined_call_operand.vmem [shape: f32[88,222], index: 6, kind: input, shape index: {}]   ;;  %s14411_s7 = inlined_call_operand.vmem [shape: f32[9,128,128], index: 7, kind: input, shape index: {}]   ;;  %s14412_s8 = inlined_call_operand.vmem [shape: f32[1,128], index: 8, kind: input, shape index: {}]   ;;  %s14413_s9 = inlined_call_operand.vmem [shape: f32[64,1], index: 9, kind: input, shape index: {}]   ;;  %s14414_s10 = inlined_call_operand.vmem [shape: f32[9,128,128], index: 10, kind: input, shape index: {}]   ;;  %s14415_s11 = inlined_call_operand.vmem [shape: f32[1,128], index: 11, kind: input, shape index: {}]   ;;  %s14416_s12 = inlined_call_operand.vmem [shape: f32[64,1], index: 12, kind: input, shape index: {}]   ;;  %s14417_s13 = inlined_call_operand.hbm [shape: f32[2,1,128], index: 13, kind: output, shape index: {}]  }
   0x1   :  { %14482 = sst [smem:[#allocation149_spill]] %s14404_s0 }
   0x2   :  { %14483 = sst [smem:[#allocation150_spill]] %s14405_s1 }
   0x3   :  { %18 = vsyncpa [#allocation7], 0 }
   0x4   :  { %20 = vsyncpa [#allocation7 + $0x1], 0  ;;  %s10414_s25 = smov 0   ;;  %s10416_s26 = smov 0  }
   0x5   :  { %s10418_s27 = smov 0   ;;  %s10420_s28 = smov 0  }
   0x6 LB: > { %14484 = sst [smem:[#allocation9_spill]] %s10334_s27  ;;  %s10435_s29 = sadd.s32 4294967295, %s10338_s28   ;;  %s10338_s28 = sphi %s10420_s28, %s14923_s28   ;;  %s10334_s27 = sphi %s10418_s27, %s14920_s27   ;;  %s10330_s26 = sphi %s10416_s26, %s14922_s26   ;;  %s10326_s25 = sphi %s10414_s25, %s14921_s25  }
   0x7   : > { %s7243_s30 = sadd.s32 4294967294, %s10338_s28   ;;  %s10439_s14 = sadd.s32 1, %s10338_s28  }
   0x8   : > { %s311_s15 = sadd.s32 1, %s10334_s27  ;;  %s308_s16 = ssub.s32 %s10338_s28, %s10439_s14 }
   0x9   : > { %p321_p0 = scmp.ne.s32.totalorder %s10334_s27, %s10330_s26  ;;  %p309_p1 = scmp.eq.s32.totalorder %s308_s16, 0 }
   0xa   : > { %p322_p2 = scmp.eq.s32.totalorder %s10435_s29, 1  ;;  %p327_p3 = scmp.ne.s32.totalorder %s10330_s26, %s10326_s25 }
   0xb   : > { %p328_p4 = scmp.eq.s32.totalorder %s7243_s30, 1  ;;  %p7246_p7 = scmp.ge.s32.totalorder %s10338_s28, 1 }
   0xc   : > { %s10450_s17 = scalar_select %p309_p1, %s10334_s27, %s311_s15  }
   0xd   : > { %p10452_p5 = por %p322_p2, %p321_p0  ;;  %p10456_p6 = por %p328_p4, %p327_p3 }
   0xe   : > { %14485 = sst [smem:[#allocation10_spill]] %s10450_s17  ;;  %p390_p8 = scmp.lt.s32.totalorder %s10338_s28, 3 }
  0x10   : > { %p391_p9 = pnand %p7246_p7, %p390_p8 }
  0x12   : > { %394 = sbr.rel (%p391_p9) target bundleno = 2005 (0x7d5), region = 72 }
  0x17   : > { %v479_v0 = vld [vmem:[%s14406_s2 + $0x20] sm:$0xf]  ;;  %vm636_vm0 = vcmask 1043456   ;;  %v10340_v1 = vmov 0.0   ;;  %v478_v2 = vld [vmem:[%s14406_s2 + $0x18] sm:$0xff]  ;;  %p433_p10 = scmp.lt.s32.totalorder %s10435_s29, 1 }
  0x18   : > { %8595 = vmatprep.subr.mxu0 %v10340_v1  ;;  %5768 = vst [vmem:[#allocation5] sm:$0xff] %v10340_v1  ;;  %5769 = vst [vmem:[#allocation5 + $0x8] sm:$0xff] %v10340_v1  ;;  %vm10341_vm1 = vmmov 0   ;;  %s14488_s1 = sld [smem:[#allocation150_spill]]  ;;  %v477_v4 = vld [vmem:[%s14406_s2 + $0x10] sm:$0xff]  ;;  %v10342_v5 = vmov 0  }
  0x19   : > { %5770 = vst [vmem:[#allocation5 + $0x10] sm:$0xff] %v10340_v1  ;;  %5771 = vst [vmem:[#allocation5 + $0x18] sm:$0xff] %v10340_v1  ;;  %8596 = vmatpush3.msk.msra.mxu0 %vm636_vm0, %v479_v0  ;;  %8605 = vmatprep.mubr.msk.f32.mxu0 %vm10341_vm1, %v10340_v1  ;;  %s434_s20 = scalar_select %p433_p10, %s10435_s29, 1  ;;  %v476_v7 = vld [vmem:[%s14406_s2 + $0x8] sm:$0xff]  ;;  %v475_v9 = vld [vmem:[%s14406_s2] sm:$0xff]  ;;  %vm524_vm2 = vcmask 293888  }
  0x1a   : > { %5772 = vst [vmem:[#allocation5 + $0x20] sm:$0xff] %v10340_v1  ;;  %5773 = vst [vmem:[#allocation5 + $0x28] sm:$0xff] %v10340_v1  ;;  %8597 = vmatprep.subr.mxu0 %v10340_v1  ;;  %10271 = vset.pattern.permute.xlu0 %v10342_v5  ;;  %s14489_s0 = sld [smem:[#allocation149_spill]]  ;;  %v7302_v31 = vld [vmem:[%s14408_s4 + $0xf8] sm:$0xff]  ;;  %v7301_v34 = vld [vmem:[%s14408_s4 + $0xf0] sm:$0xff]  ;;  %vm4351_vm11 = vcmask 769024  }
  0x1b   : > { %5774 = vst [vmem:[#allocation5 + $0x30] sm:$0xff] %v10340_v1  ;;  %5775 = vst [vmem:[#allocation5 + $0x38] sm:$0xff] %v10340_v1  ;;  %8598 = vmatpush3.msra.mxu0 %v478_v2  ;;  %s10228_s30 = smul.u32 296, %s434_s20  ;;  %10272 = vset.pattern.permute.xlu1 %v10342_v5  ;;  %v7318_v32 = vld [vmem:[%s14408_s4 + $0x178] sm:$0xff]  ;;  %v7317_v36 = vld [vmem:[%s14408_s4 + $0x170] sm:$0xff]  ;;  %vm4385_vm12 = vcmask 1045504  }
  0x1c   : > { %5776 = vst [vmem:[#allocation5 + $0x40] sm:$0xff] %v10340_v1  ;;  %5777 = vst [vmem:[#allocation5 + $0x48] sm:$0xff] %v10340_v1  ;;  %8599 = vmatprep.subr.mxu0 %v10340_v1  ;;  %8716 = vmatprep.subr.mxu1 %v7302_v31  ;;  %v7300_v39 = vld [vmem:[%s14408_s4 + $0xe8] sm:$0xff]  ;;  %v7299_v44 = vld [vmem:[%s14408_s4 + $0xe0] sm:$0xff]  ;;  %s431_s27 = sand.u32 1, %s10330_s26   ;;  %s10343_s15 = smov [#allocation6]  }
  0x1d   : > { %5778 = vst [vmem:[#allocation5 + $0x50] sm:$0xff] %v10340_v1  ;;  %8600 = vmatpush3.msra.mxu0 %v477_v4  ;;  %8717 = vmatpush3.msra.mxu1 %v7302_v31  ;;  %v7316_v41 = vld [vmem:[%s14408_s4 + $0x168] sm:$0xff]  ;;  %v7315_v46 = vld [vmem:[%s14408_s4 + $0x160] sm:$0xff]  ;;  %v7298_v49 = vld [vmem:[%s14408_s4 + $0xd8] sm:$0xff]  ;;  %s432_s16 = scalar_lea.vmem [#allocation6], %s431_s27  ;;  %s7176_s24 = scalar_lea.sflag [#allocation7], %s431_s27 }
  0x1e   : > { %v480_v3 = vld [vmem:[%s14488_s1] sm:$0xff]  ;;  %v482_v6 = vld [vmem:[%s14488_s1 + $0x10] sm:$0xff]  ;;  %v481_v8 = vld [vmem:[%s14488_s1 + $0x8] sm:$0xff]  ;;  %8601 = vmatprep.subr.mxu0 %v10340_v1  ;;  %8718 = vmatprep.subr.mxu1 %v7301_v34  ;;  %s7188_s21 = sshll.u32 %s432_s16, 4  ;;  %s7189_s21 = int_to_ptr.vmem [resolvable:$true] %s7188_s21 }
  0x1f   : > { %929 = vperm.xlu0 %10271, %v480_v3   ;;  %939 = vperm.xlu1 %10272, %v482_v6   ;;  %v483_v10 = vld [vmem:[%s14488_s1 + $0x18] sm:$0xff]  ;;  %v484_v12 = vld [vmem:[%s14488_s1 + $0x20] sm:$0xff]  ;;  %v485_v13 = vld [vmem:[%s14488_s1 + $0x28] sm:$0xff]  ;;  %s10278_s17 = scalar_lea.vmem %s7189_s21, 16 }
  0x20   : > { %s10511_s23 = scalar_lea.vmem %s14489_s0, %s10228_s30  ;;  %8602 = vmatpush3.msra.mxu0 %v476_v7  ;;  %v486_v15 = vld [vmem:[%s14488_s1 + $0x30] sm:$0xff]  ;;  %v487_v16 = vld [vmem:[%s14488_s1 + $0x38] sm:$0xff]  ;;  %v488_v18 = vld [vmem:[%s14488_s1 + $0x40] sm:$0xff]  ;;  %8719 = vmatpush3.msra.mxu1 %v7301_v34  ;;  %s7686_s30 = sshll.u32 %s10435_s29, 4 }
  0x21   : > { %v438_v11 = vld [vmem:[%s10511_s23] sm:$0xff]  ;;  %8603 = vmatprep.subr.mxu0 %v10340_v1  ;;  %v439_v14 = vld [vmem:[%s10511_s23 + $0x8] sm:$0xff]  ;;  %v440_v17 = vld [vmem:[%s10511_s23 + $0x10] sm:$0xff]  ;;  %8720 = vmatprep.subr.mxu1 %v7300_v39  ;;  %s7186_s20 = scalar_lea.hbm %s14417_s13, %s7686_s30  ;;  %p10279_p11 = scmp.ne.s32.totalorder %s7189_s21, %s10278_s17 }
  0x22   : > { %8604 = vmatpush3.msra.mxu0 %v475_v9  ;;  %v489_v19 = vld [vmem:[%s14488_s1 + $0x48] sm:$0xff]  ;;  %v441_v20 = vld [vmem:[%s10511_s23 + $0x18] sm:$0xff]  ;;  %v490_v21 = vld [vmem:[%s14488_s1 + $0x50] sm:$0xff]  ;;  %8721 = vmatpush3.msra.mxu1 %v7300_v39  ;;  %s10282_s0 = sshll.u32 %s10343_s15, 4  ;;  %s10283_s0 = int_to_ptr.vmem [resolvable:$false] %s10282_s0 }
  0x23   : > { %934 = vperm.xlu0 %10271, %v481_v8   ;;  %944 = vperm.xlu1 %10272, %v483_v10   ;;  %v491_v22 = vld [vmem:[%s14488_s1 + $0x58] sm:$0xff]  ;;  %v442_v23 = vld [vmem:[%s10511_s23 + $0x20] sm:$0xff]  ;;  %v493_v25 = vld [vmem:[%s14488_s1 + $0x68] sm:$0xff]  ;;  %p10280_p12 = pnand %p10279_p11, %p10452_p5  ;;  %s10284_s29 = scalar_lea.vmem %s10283_s0, 32 }
  0x24   : > { %8606 = vmatmul.mubr.msk.f32.vlgmr.msra.gmra.mxu0 %vm524_vm2, %v438_v11  ;;  %v492_v24 = vld [vmem:[%s14488_s1 + $0x60] sm:$0xff]  ;;  %v443_v26 = vld [vmem:[%s10511_s23 + $0x28] sm:$0xff]  ;;  %v494_v27 = vld [vmem:[%s14488_s1 + $0x70] sm:$0xff]  ;;  %8876 = vmatprep.subr.mxu0 %v7318_v32  ;;  %p10285_p0 = scmp.lt.s32.totalorder %s7189_s21, %s10283_s0  ;;  %p10286_p1 = scmp.lt.s32.totalorder %s10284_s29, %s10278_s17 }
  0x25   : > { %8608 = vmatprep.mubr.msk.f32.mxu0 %vm10341_vm1, %v10340_v1  ;;  %v495_v28 = vld [vmem:[%s14488_s1 + $0x78] sm:$0xff]  ;;  %v444_v29 = vld [vmem:[%s10511_s23 + $0x30] sm:$0xff]  ;;  %v496_v30 = vld [vmem:[%s14488_s1 + $0x80] sm:$0xff]  ;;  %8877 = vmatpush3.msra.mxu0 %v7318_v32  ;;  %p10281_p13 = pneg %p10280_p12 }
  0x26   : > { %v497_v33 = vld [vmem:[%s14488_s1 + $0x88] sm:$0xff]  ;;  %v445_v35 = vld [vmem:[%s10511_s23 + $0x38] sm:$0xff]  ;;  %v498_v37 = vld [vmem:[%s14488_s1 + $0x90] sm:$0xff]  ;;  %8878 = vmatprep.subr.mxu0 %v7317_v36  ;;  %8722 = vmatprep.subr.mxu1 %v7299_v44  ;;  %p10287_p2 = por %p10286_p1, %p10285_p0 }
  0x27   : > { %949 = vperm.xlu0 %10271, %v484_v12   ;;  %954 = vperm.xlu1 %10272, %v485_v13   ;;  %v499_v38 = vld [vmem:[%s14488_s1 + $0x98] sm:$0xff]  ;;  %v446_v40 = vld [vmem:[%s10511_s23 + $0x40] sm:$0xff]  ;;  %v501_v43 = vld [vmem:[%s14488_s1 + $0xa8] sm:$0xff] }
  0x28   : > { %8609 = vmatmul.mubr.msk.f32.gmra.mxu0 %vm524_vm2, %v439_v14  ;;  %v500_v42 = vld [vmem:[%s14488_s1 + $0xa0] sm:$0xff]  ;;  %v447_v45 = vld [vmem:[%s10511_s23 + $0x48] sm:$0xff]  ;;  %v502_v47 = vld [vmem:[%s14488_s1 + $0xb0] sm:$0xff]  ;;  %8723 = vmatpush3.msra.mxu1 %v7299_v44  ;;  %p10288_p3 = pnand %p10287_p2, %p10281_p13 }
  0x29   : > { %8611 = vmatprep.mubr.msk.f32.mxu0 %vm10341_vm1, %v10340_v1  ;;  %8879 = vmatpush3.msra.mxu0 %v7317_v36  ;;  %v503_v48 = vld [vmem:[%s14488_s1 + $0xb8] sm:$0xff]  ;;  %v448_v50 = vld [vmem:[%s10511_s23 + $0x50] sm:$0xff]  ;;  %v504_v52 = vld [vmem:[%s14488_s1 + $0xc0] sm:$0xff] }
  0x2a   : > { %8880 = vmatprep.subr.mxu0 %v7316_v41  ;;  %v7314_v51 = vld [vmem:[%s14408_s4 + $0x158] sm:$0xff]  ;;  %8724 = vmatprep.subr.mxu1 %v7298_v49  ;;  %v505_v53 = vld [vmem:[%s14488_s1 + $0xc8] sm:$0xff]  ;;  %v506_v55 = vld [vmem:[%s14488_s1 + $0xd0] sm:$0xff] }
  0x2b   : > { %959 = vperm.xlu0 %10271, %v486_v15   ;;  %964 = vperm.xlu1 %10272, %v487_v16   ;;  %v449_v54 = vld [vmem:[%s10511_s23 + $0x58] sm:$0xff]  ;;  %v450_v57 = vld [vmem:[%s10511_s23 + $0x60] sm:$0xff]  ;;  %v509_v59 = vld [vmem:[%s14488_s1 + $0xe8] sm:$0xff] }
  0x2c   : > { %8612 = vmatmul.mubr.msk.f32.gmra.mxu0 %vm524_vm2, %v440_v17  ;;  %8725 = vmatpush3.msra.mxu1 %v7298_v49  ;;  %v507_v56 = vld [vmem:[%s14488_s1 + $0xd8] sm:$0xff]  ;;  %v508_v58 = vld [vmem:[%s14488_s1 + $0xe0] sm:$0xff]  ;;  %v451_v60 = vld [vmem:[%s10511_s23 + $0x68] sm:$0xff] }
  0x2d   : > { %8614 = vmatprep.mubr.msk.f32.mxu0 %vm10341_vm1, %v10340_v1  ;;  %8881 = vmatpush3.msra.mxu0 %v7316_v41  ;;  %v510_v61 = vld [vmem:[%s14488_s1 + $0xf0] sm:$0xff]  ;;  %v511_v62 = vld [vmem:[%s14488_s1 + $0xf8] sm:$0xff]  ;;  %v512_v0 = vld [vmem:[%s14488_s1 + $0x100] sm:$0xff] }
  0x2e   : > { %8882 = vmatprep.subr.mxu0 %v7315_v46  ;;  %v452_v63 = vld [vmem:[%s10511_s23 + $0x70] sm:$0xff]  ;;  %v513_v2 = vld [vmem:[%s14488_s1 + $0x108] sm:$0xff]  ;;  %v453_v3 = vld [vmem:[%s10511_s23 + $0x78] sm:$0xff] }
  0x2f   : > { %969 = vperm.xlu0 %10271, %v488_v18   ;;  %974 = vperm.xlu1 %10272, %v489_v19   ;;  %v514_v4 = vld [vmem:[%s14488_s1 + $0x110] sm:$0xff]  ;;  %v515_v6 = vld [vmem:[%s14488_s1 + $0x118] sm:$0xff]  ;;  %v454_v7 = vld [vmem:[%s10511_s23 + $0x80] sm:$0xff] }
  0x30   : > { %8615 = vmatmul.mubr.msk.f32.gmra.mxu0 %vm524_vm2, %v441_v20  ;;  %v516_v8 = vld [vmem:[%s14488_s1 + $0x120] sm:$0x3]  ;;  %v7297_v10 = vld [vmem:[%s14408_s4 + $0xd0] sm:$0xff]  ;;  %v455_v12 = vld [vmem:[%s10511_s23 + $0x88] sm:$0xff] }
  0x31   : > { %8617 = vmatprep.mubr.msk.f32.mxu0 %vm10341_vm1, %v10340_v1  ;;  %8883 = vmatpush3.msra.mxu0 %v7315_v46  ;;  %v5779_v9 = vld [vmem:[%s14413_s9] sm:$0xff]  ;;  %v7313_v11 = vld [vmem:[%s14408_s4 + $0x150] sm:$0xff]  ;;  %v5780_v13 = vld [vmem:[%s14413_s9 + $0x8] sm:$0xff] }
  0x32   : > { %8884 = vmatprep.subr.mxu0 %v7314_v51  ;;  %8726 = vmatprep.subr.mxu1 %v7297_v10  ;;  %v7296_v14 = vld [vmem:[%s14408_s4 + $0xc8] sm:$0xff]  ;;  %v5781_v15 = vld [vmem:[%s14413_s9 + $0x10] sm:$0xff]  ;;  %v7295_v18 = vld [vmem:[%s14408_s4 + $0xc0] sm:$0xff] }
  0x33   : > { %979 = vperm.xlu0 %10271, %v490_v21   ;;  %984 = vperm.xlu1 %10272, %v491_v22   ;;  %v7312_v16 = vld [vmem:[%s14408_s4 + $0x148] sm:$0xff]  ;;  %v456_v17 = vld [vmem:[%s10511_s23 + $0x90] sm:$0xff]  ;;  %v5782_v19 = vld [vmem:[%s14413_s9 + $0x18] sm:$0xff] }
  0x34   : > { %8618 = vmatmul.mubr.msk.f32.gmra.mxu0 %vm524_vm2, %v442_v23  ;;  %8727 = vmatpush3.msra.mxu1 %v7297_v10  ;;  %v5783_v20 = vld [vmem:[%s14413_s9 + $0x20] sm:$0xff]  ;;  %v457_v22 = vld [vmem:[%s10511_s23 + $0x98] sm:$0xff]  ;;  %v7093_v32 = vld [vmem:[%s14416_s12 + $0x10] sm:$0xff] }
  0x35   : > { %8620 = vmatprep.mubr.msk.f32.mxu0 %vm10341_vm1, %v10340_v1  ;;  %8885 = vmatpush3.msra.mxu0 %v7314_v51  ;;  %v7311_v21 = vld [vmem:[%s14408_s4 + $0x140] sm:$0xff]  ;;  %v7294_v23 = vld [vmem:[%s14408_s4 + $0xb8] sm:$0xff]  ;;  %v459_v36 = vld [vmem:[%s10511_s23 + $0xa8] sm:$0xff]  ;;  %vm7101_vm5 = vcmp.gt.f32.partialorder %v7093_v32, 0.0 }
  0x36   : > { %8886 = vmatprep.subr.mxu0 %v7313_v11  ;;  %8728 = vmatprep.subr.mxu1 %v7296_v14  ;;  %v5786_v31 = vld [vmem:[%s14413_s9 + $0x38] sm:$0xff]  ;;  %v7095_v39 = vld [vmem:[%s14416_s12 + $0x20] sm:$0xff]  ;;  %v7096_v41 = vld [vmem:[%s14416_s12 + $0x28] sm:$0xff] }
  0x37   : > { %989 = vperm.xlu0 %10271, %v492_v24   ;;  %994 = vperm.xlu1 %10272, %v493_v25   ;;  %v5784_v24 = vld [vmem:[%s14413_s9 + $0x28] sm:$0xff]  ;;  %v7091_v25 = vld [vmem:[%s14416_s12] sm:$0xff]  ;;  %v7094_v34 = vld [vmem:[%s14416_s12 + $0x18] sm:$0xff]  ;;  %vm7103_vm7 = vcmp.gt.f32.partialorder %v7095_v39, 0.0  ;;  %vm7104_vm8 = vcmp.gt.f32.partialorder %v7096_v41, 0.0 }
  0x38   : > { %8621 = vmatmul.mubr.msk.f32.gmra.mxu0 %vm524_vm2, %v443_v26  ;;  %8729 = vmatpush3.msra.mxu1 %v7296_v14  ;;  %v5785_v26 = vld [vmem:[%s14413_s9 + $0x30] sm:$0xff]  ;;  %vm7099_vm3 = vcmp.gt.f32.partialorder %v7091_v25, 0.0  ;;  %vm7102_vm6 = vcmp.gt.f32.partialorder %v7094_v34, 0.0  ;;  %v7291_v44 = vld [vmem:[%s14408_s4 + $0xa0] sm:$0xff]  ;;  %v7290_v51 = vld [vmem:[%s14408_s4 + $0x98] sm:$0xff] }
  0x39   : > { %8623 = vmatprep.mubr.msk.f32.mxu0 %vm10341_vm1, %v10340_v1  ;;  %8887 = vmatpush3.msra.mxu0 %v7313_v11  ;;  %v7097_v46 = vld [vmem:[%s14416_s12 + $0x30] sm:$0xff]  ;;  %v7307_v49 = vld [vmem:[%s14408_s4 + $0x120] sm:$0xff]  ;;  %v473_v10 = vld [vmem:[%s10511_s23 + $0x118] sm:$0xff] }
  0x3a   : > { %8888 = vmatprep.subr.mxu0 %v7312_v16  ;;  %8730 = vmatprep.subr.mxu1 %v7295_v18  ;;  %vm7105_vm9 = vcmp.gt.f32.partialorder %v7097_v46, 0.0  ;;  %v474_v11 = vld [vmem:[%s10511_s23 + $0x120] sm:$0x3] }
  0x3b   : > { %999 = vperm.xlu0 %10271, %v494_v27   ;;  %1004 = vperm.xlu1 %10272, %v495_v28   ;;  %v7092_v27 = vld [vmem:[%s14416_s12 + $0x8] sm:$0xff]  ;;  %v7310_v28 = vld [vmem:[%s14408_s4 + $0x138] sm:$0xff]  ;;  %v10923_v14 = vld [vmem:[%s14407_s3] ss:$0 sm:$0xff] }
  0x3c   : > { %8624 = vmatmul.mubr.msk.f32.gmra.mxu0 %vm524_vm2, %v444_v29  ;;  %8731 = vmatpush3.msra.mxu1 %v7295_v18  ;;  %v458_v29 = vld [vmem:[%s10511_s23 + $0xa0] sm:$0xff]  ;;  %vm7100_vm4 = vcmp.gt.f32.partialorder %v7092_v27, 0.0 }
  0x3d   : > { %8626 = vmatprep.mubr.msk.f32.mxu0 %vm10341_vm1, %v10340_v1  ;;  %8889 = vmatpush3.msra.mxu0 %v7312_v16 }
  0x3e   : > { %8890 = vmatprep.subr.mxu0 %v7311_v21  ;;  %8732 = vmatprep.subr.mxu1 %v7294_v23 }
  0x3f   : > { %1009 = vperm.xlu0 %10271, %v496_v30   ;;  %1014 = vperm.xlu1 %10272, %v497_v33   ;;  %v7293_v30 = vld [vmem:[%s14408_s4 + $0xb0] sm:$0xff]  ;;  %v7107_v33 = vsel %vm7099_vm3, 1, %v10342_v5 }
  0x40   : > { %8627 = vmatmul.mubr.msk.f32.gmra.mxu0 %vm524_vm2, %v445_v35  ;;  %8733 = vmatpush3.msra.mxu1 %v7294_v23  ;;  %v7309_v35 = vld [vmem:[%s14408_s4 + $0x130] sm:$0xff] }
  0x41   : > { %8629 = vmatprep.mubr.msk.f32.mxu0 %vm10341_vm1, %v10340_v1  ;;  %8891 = vmatpush3.msra.mxu0 %v7311_v21 }
  0x42   : > { %8892 = vmatprep.subr.mxu0 %v7310_v28  ;;  %8734 = vmatprep.subr.mxu1 %v7293_v30 }
  0x43   : > { %1019 = vperm.xlu0 %10271, %v498_v37   ;;  %1024 = vperm.xlu1 %10272, %v499_v38   ;;  %v7292_v37 = vld [vmem:[%s14408_s4 + $0xa8] sm:$0xff]  ;;  %v7108_v38 = vsel %vm7100_vm4, 1, %v10342_v5 }
  0x44   : > { %8630 = vmatmul.mubr.msk.f32.gmra.mxu0 %vm524_vm2, %v446_v40  ;;  %8735 = vmatpush3.msra.mxu1 %v7293_v30  ;;  %v7109_v40 = vsel %vm7101_vm5, 1, %v10342_v5 }
  0x45   : > { %8632 = vmatprep.mubr.msk.f32.mxu0 %vm10341_vm1, %v10340_v1  ;;  %8893 = vmatpush3.msra.mxu0 %v7310_v28 }
  0x46   : > { %8894 = vmatprep.subr.mxu0 %v7309_v35  ;;  %8736 = vmatprep.subr.mxu1 %v7292_v37 }
  0x47   : > { %1029 = vperm.xlu0 %10271, %v500_v42   ;;  %1034 = vperm.xlu1 %10272, %v501_v43   ;;  %v7308_v42 = vld [vmem:[%s14408_s4 + $0x128] sm:$0xff]  ;;  %v460_v43 = vld [vmem:[%s10511_s23 + $0xb0] sm:$0xff] }
  0x48   : > { %8633 = vmatmul.mubr.msk.f32.gmra.mxu0 %vm524_vm2, %v447_v45  ;;  %v7110_v45 = vsel %vm7102_vm6, 1, %v10342_v5  ;;  %8737 = vmatpush3.msra.mxu1 %v7292_v37 }
  0x49   : > { %8635 = vmatprep.mubr.msk.f32.mxu0 %vm10341_vm1, %v10340_v1  ;;  %8895 = vmatpush3.msra.mxu0 %v7309_v35 }
  0x4a   : > { %8896 = vmatprep.subr.mxu0 %v7308_v42  ;;  %8738 = vmatprep.subr.mxu1 %v7291_v44 }
  0x4b   : > { %1039 = vperm.xlu0 %10271, %v502_v47   ;;  %1044 = vperm.xlu1 %10272, %v503_v48   ;;  %v7111_v47 = vsel %vm7103_vm7, 1, %v10342_v5  ;;  %v7098_v48 = vld [vmem:[%s14416_s12 + $0x38] sm:$0xff] }
  0x4c   : > { %8636 = vmatmul.mubr.msk.f32.gmra.mxu0 %vm524_vm2, %v448_v50  ;;  %v461_v50 = vld [vmem:[%s10511_s23 + $0xb8] sm:$0xff]  ;;  %8739 = vmatpush3.msra.mxu1 %v7291_v44  ;;  %vm7106_vm10 = vcmp.gt.f32.partialorder %v7098_v48, 0.0  ;;  %v1232_v48 = vld [vmem:[%s14408_s4 + $0x70] sm:$0xff] }
  0x4d   : > { %8638 = vmatprep.mubr.msk.f32.mxu0 %vm10341_vm1, %v10340_v1  ;;  %8897 = vmatpush3.msra.mxu0 %v7308_v42 }
  0x4e   : > { %8898 = vmatprep.subr.mxu0 %v7307_v49  ;;  %8740 = vmatprep.subr.mxu1 %v7290_v51 }
  0x4f   : > { %1049 = vperm.xlu0 %10271, %v504_v52   ;;  %1054 = vperm.xlu1 %10272, %v505_v53   ;;  %v7112_v52 = vsel %vm7104_vm8, 1, %v10342_v5  ;;  %v7113_v53 = vsel %vm7105_vm9, 1, %v10342_v5 }
  0x50   : > { %8639 = vmatmul.mubr.msk.f32.gmra.mxu0 %vm524_vm2, %v449_v54  ;;  %v7306_v54 = vld [vmem:[%s14408_s4 + $0x118] sm:$0xff]  ;;  %8741 = vmatpush3.msra.mxu1 %v7290_v51 }
  0x51   : > { %8641 = vmatprep.mubr.msk.f32.mxu0 %vm10341_vm1, %v10340_v1  ;;  %8899 = vmatpush3.msra.mxu0 %v7307_v49 }
  0x52   : > { %8900 = vmatprep.subr.mxu0 %v7306_v54 }
  0x53   : > { %1059 = vperm.xlu0 %10271, %v506_v55   ;;  %1064 = vperm.xlu1 %10272, %v507_v56   ;;  %v462_v55 = vld [vmem:[%s10511_s23 + $0xc0] sm:$0xff]  ;;  %v7289_v56 = vld [vmem:[%s14408_s4 + $0x90] sm:$0xff] }
  0x54   : > { %8642 = vmatmul.mubr.msk.f32.gmra.mxu0 %vm524_vm2, %v450_v57  ;;  %v7114_v57 = vsel %vm7106_vm10, 1, %v10342_v5  ;;  %8742 = vmatprep.subr.mxu1 %v7289_v56  ;;  %v463_v5 = vld [vmem:[%s10511_s23 + $0xc8] sm:$0xff] }
  0x55   : > { %8644 = vmatprep.mubr.msk.f32.mxu0 %vm10341_vm1, %v10340_v1  ;;  %8901 = vmatpush3.msra.mxu0 %v7306_v54 }
  0x56   : > { %8743 = vmatpush3.msra.mxu1 %v7289_v56 }
  0x57   : > { %1069 = vperm.xlu0 %10271, %v508_v58   ;;  %1074 = vperm.xlu1 %10272, %v509_v59   ;;  %v7305_v58 = vld [vmem:[%s14408_s4 + $0x110] sm:$0xff]  ;;  %v7288_v59 = vld [vmem:[%s14408_s4 + $0x88] sm:$0xff] }
  0x58   : > { %8645 = vmatmul.mubr.msk.f32.gmra.mxu0 %vm524_vm2, %v451_v60  ;;  %8902 = vmatprep.subr.mxu0 %v7305_v58  ;;  %v7304_v60 = vld [vmem:[%s14408_s4 + $0x108] sm:$0xff] }
  0x59   : > { %8647 = vmatprep.mubr.msk.f32.mxu0 %vm10341_vm1, %v10340_v1  ;;  %8744 = vmatprep.subr.mxu1 %v7288_v59 }
  0x5a   : > { %8745 = vmatpush3.msra.mxu1 %v7288_v59  ;;  %8903 = vmatpush3.msra.mxu0 %v7305_v58  ;;  %v1231_v58 = vld [vmem:[%s14408_s4 + $0x68] sm:$0xff] }
  0x5b   : > { %1079 = vperm.xlu0 %10271, %v510_v61   ;;  %1084 = vperm.xlu1 %10272, %v511_v62   ;;  %v7287_v61 = vld [vmem:[%s14408_s4 + $0x80] sm:$0xff]  ;;  %v464_v62 = vld [vmem:[%s10511_s23 + $0xd0] sm:$0xff]  ;;  %v7348_v59 = vld [vmem:[%s14408_s4 + $0x268] sm:$0xff] }
  0x5c   : > { %8648 = vmatmul.mubr.msk.f32.gmra.mxu0 %vm524_vm2, %v452_v63  ;;  %v7303_v63 = vld [vmem:[%s14408_s4 + $0x100] sm:$0xff]  ;;  %8904 = vmatprep.subr.mxu0 %v7304_v60 }
  0x5d   : > { %8650 = vmatprep.mubr.msk.f32.mxu0 %vm10341_vm1, %v10340_v1  ;;  %8746 = vmatprep.subr.mxu1 %v7287_v61 }
  0x5e   : > { %8905 = vmatpush3.msra.mxu0 %v7304_v60  ;;  %8747 = vmatpush3.msra.mxu1 %v7287_v61 }
  0x5f   : > { %1089 = vperm.xlu0 %10271, %v512_v0   ;;  %1094 = vperm.xlu1 %10272, %v513_v2   ;;  %v465_v0 = vld [vmem:[%s10511_s23 + $0xd8] sm:$0xff]  ;;  %v466_v2 = vld [vmem:[%s10511_s23 + $0xe0] sm:$0xff] }
  0x60   : > { %8651 = vmatmul.mubr.msk.f32.gmra.mxu0 %vm524_vm2, %v453_v3  ;;  %8906 = vmatprep.subr.mxu0 %v7303_v63  ;;  %v467_v3 = vld [vmem:[%s10511_s23 + $0xe8] sm:$0xff] }
  0x61   : > { %8653 = vmatprep.mubr.msk.f32.mxu0 %vm10341_vm1, %v10340_v1  ;;  %8907 = vmatpush3.msra.mxu0 %v7303_v63  ;;  %v1230_v63 = vld [vmem:[%s14408_s4 + $0x60] sm:$0xff] }
  0x63   : > { %1099 = vperm.xlu0 %10271, %v514_v4   ;;  %1104 = vperm.xlu1 %10272, %v515_v6   ;;  %v468_v4 = vld [vmem:[%s10511_s23 + $0xf0] sm:$0xff]  ;;  %v469_v6 = vld [vmem:[%s10511_s23 + $0xf8] sm:$0xff] }
  0x64   : > { %8654 = vmatmul.mubr.msk.f32.gmra.mxu0 %vm524_vm2, %v454_v7  ;;  %v470_v7 = vld [vmem:[%s10511_s23 + $0x100] sm:$0xff] }
  0x65   : > { %8656 = vmatprep.mubr.msk.f32.mxu0 %vm10341_vm1, %v10340_v1 }
  0x67   : > { %1109 = vperm.xlu0 %10271, %v516_v8   ;;  %5789 = vperm.xlu1 %10272, %v5779_v9   ;;  %v471_v8 = vld [vmem:[%s10511_s23 + $0x108] sm:$0xff]  ;;  %v472_v9 = vld [vmem:[%s10511_s23 + $0x110] sm:$0xff] }
  0x68   : > { %8657 = vmatmul.mubr.msk.f32.gmra.mxu0 %vm524_vm2, %v455_v12  ;;  %v1233_v12 = vld [vmem:[%s14408_s4 + $0x78] sm:$0xff] }
  0x69   : > { %8659 = vmatprep.mubr.msk.f32.mxu0 %vm10341_vm1, %v10340_v1  ;;  %8796 = vmatprep.subr.mxu1 %v1233_v12 }
  0x6b   : > { %5794 = vperm.xlu0 %10271, %v5780_v13   ;;  %5799 = vperm.xlu1 %10272, %v5781_v15   ;;  %v7350_v13 = vld [vmem:[%s14408_s4 + $0x278] sm:$0xff] }
  0x6c   : > { %8660 = vmatmul.mubr.msk.f32.gmra.mxu0 %vm524_vm2, %v456_v17  ;;  %9036 = vmatprep.subr.mxu0 %v7350_v13 }
  0x6d   : > { %8662 = vmatprep.mubr.msk.f32.mxu0 %vm10341_vm1, %v10340_v1 }
  0x6f   : > { %5804 = vperm.xlu0 %10271, %v5782_v19   ;;  %5809 = vperm.xlu1 %10272, %v5783_v20  }
  0x70   : > { %8663 = vmatmul.mubr.msk.f32.gmra.mxu0 %vm524_vm2, %v457_v22 }
  0x71   : > { %8665 = vmatprep.mubr.msk.f32.mxu0 %vm10341_vm1, %v10340_v1 }
  0x73   : > { %5814 = vperm.xlu0 %10271, %v5784_v24   ;;  %5819 = vperm.xlu1 %10272, %v5785_v26  }
  0x74   : > { %8666 = vmatmul.mubr.msk.f32.gmra.mxu0 %vm524_vm2, %v458_v29 }
  0x75   : > { %8668 = vmatprep.mubr.msk.f32.mxu0 %vm10341_vm1, %v10340_v1 }
  0x77   : > { %5824 = vperm.xlu0 %10271, %v5786_v31   ;;  %7116 = vperm.xlu1 %10272, %v7107_v33  }
  0x78   : > { %8669 = vmatmul.mubr.msk.f32.gmra.mxu0 %vm524_vm2, %v459_v36 }
  0x79   : > { %8671 = vmatprep.mubr.msk.f32.mxu0 %vm10341_vm1, %v10340_v1 }
  0x7b   : > { %7119 = vperm.xlu0 %10271, %v7108_v38   ;;  %7122 = vperm.xlu1 %10272, %v7109_v40  }
  0x7c   : > { %8672 = vmatmul.mubr.msk.f32.gmra.mxu0 %vm524_vm2, %v460_v43 }
  0x7d   : > { %8674 = vmatprep.mubr.msk.f32.mxu0 %vm10341_vm1, %v10340_v1 }
  0x7f   : > { %7125 = vperm.xlu0 %10271, %v7110_v45   ;;  %7128 = vperm.xlu1 %10272, %v7111_v47  }
  0x80   : > { %8675 = vmatmul.mubr.msk.f32.gmra.mxu0 %vm524_vm2, %v461_v50 }
  0x81   : > { %8677 = vmatprep.mubr.msk.f32.mxu0 %vm10341_vm1, %v10340_v1 }
  0x83   : > { %7131 = vperm.xlu0 %10271, %v7112_v52   ;;  %7134 = vperm.xlu1 %10272, %v7113_v53   ;;  %v7349_v52 = vld [vmem:[%s14408_s4 + $0x270] sm:$0xff] }
  0x84   : > { %8678 = vmatmul.mubr.msk.f32.gmra.mxu0 %vm524_vm2, %v462_v55 }
  0x85   : > { %8680 = vmatprep.mubr.msk.f32.mxu0 %vm10341_vm1, %v10340_v1 }
  0x87   : > { %7137 = vperm.xlu0 %10271, %v7114_v57  }
  0x88   : > { %8681 = vmatmul.mubr.msk.f32.gmra.mxu0 %vm524_vm2, %v463_v5 }
  0x89   : > { %8683 = vmatprep.mubr.msk.f32.mxu0 %vm10341_vm1, %v10340_v1 }
  0x8c   : > { %8684 = vmatmul.mubr.msk.f32.gmra.mxu0 %vm524_vm2, %v464_v62 }
  0x8d   : > { %8686 = vmatprep.mubr.msk.f32.mxu0 %vm10341_vm1, %v10340_v1 }
  0x90   : > { %8687 = vmatmul.mubr.msk.f32.gmra.mxu0 %vm524_vm2, %v465_v0  ;;  %v7347_v0 = vld [vmem:[%s14408_s4 + $0x260] sm:$0xff] }
  0x91   : > { %8689 = vmatprep.mubr.msk.f32.mxu0 %vm10341_vm1, %v10340_v1 }
  0x94   : > { %8690 = vmatmul.mubr.msk.f32.gmra.mxu0 %vm524_vm2, %v466_v2 }
  0x95   : > { %8692 = vmatprep.mubr.msk.f32.mxu0 %vm10341_vm1, %v10340_v1 }
  0x98   : > { %8693 = vmatmul.mubr.msk.f32.gmra.mxu0 %vm524_vm2, %v467_v3 }
  0x99   : > { %8695 = vmatprep.mubr.msk.f32.mxu0 %vm10341_vm1, %v10340_v1 }
  0x9a   : > { %v930_v16 = vpop.permute.xlu0 %929  ;;  %v940_v28 = vpop.permute.xlu1 %939 }
  0x9c   : > { %8696 = vmatmul.mubr.msk.f32.gmra.mxu0 %vm524_vm2, %v468_v4 }
  0x9d   : > { %8698 = vmatprep.mubr.msk.f32.mxu0 %vm10341_vm1, %v10340_v1 }
  0x9e   : > { %v935_v24 = vpop.permute.xlu0 %934  ;;  %v945_v36 = vpop.permute.xlu1 %944 }
  0xa0   : > { %8699 = vmatmul.mubr.msk.f32.gmra.mxu0 %vm524_vm2, %v469_v6 }
  0xa1   : > { %8701 = vmatprep.mubr.msk.f32.mxu0 %vm10341_vm1, %v10340_v1 }
  0xa2   : > { %v950_v44 = vpop.permute.xlu0 %949  ;;  %v955_v54 = vpop.permute.xlu1 %954 }
  0xa4   : > { %8702 = vmatmul.mubr.msk.f32.gmra.mxu0 %vm524_vm2, %v470_v7  ;;  %v1229_v7 = vld [vmem:[%s14408_s4 + $0x58] sm:$0xff] }
  0xa5   : > { %8704 = vmatprep.mubr.msk.f32.mxu0 %vm10341_vm1, %v10340_v1 }
  0xa6   : > { %v960_v2 = vpop.permute.xlu0 %959 }
  0xa8   : > { %8705 = vmatmul.mubr.msk.f32.gmra.mxu0 %vm524_vm2, %v471_v8 }
  0xa9   : > { %8707 = vmatprep.mubr.msk.f32.mxu0 %vm10341_vm1, %v10340_v1 }
  0xac   : > { %8708 = vmatmul.mubr.msk.f32.gmra.mxu0 %vm524_vm2, %v472_v9 }
  0xad   : > { %8710 = vmatprep.mubr.msk.f32.mxu0 %vm10341_vm1, %v10340_v1 }
  0xb0   : > { %8711 = vmatmul.mubr.msk.f32.gmra.mxu0 %vm524_vm2, %v473_v10 }
  0xb1   : > { %8713 = vmatprep.mubr.msk.f32.mxu0 %vm10341_vm1, %v10340_v1 }
  0xb4   : > { %8714 = vmatmul.mubr.msk.f32.gmra.mxu0 %vm524_vm2, %v474_v11  ;;  %v7346_v11 = vld [vmem:[%s14408_s4 + $0x258] sm:$0xff] }
  0xe4   : > { %v706_v15 = vpop.f32.mrf.mxu0 }
  0xe5   : > { %v707_v1 = vadd.f32 %v10923_v14, %v706_v15 }
  0xe6   : > { %v8607_v17 = vpop.f32.mrf.mxu0 }
  0xe7   : > { %v890_v18 = vmax.f32 %v707_v1, 0.0  ;;  %v1228_v17 = vld [vmem:[%s14408_s4 + $0x50] sm:$0xff] }
  0xe8   : > { %v711_v19 = vpop.f32.mrf.mxu0 }
  0xe9   : > { %v1112_v20 = vmul.f32 %v930_v16, %v890_v18  ;;  %v712_v21 = vadd.f32 %v10923_v14, %v711_v19  ;;  %v7345_v18 = vld [vmem:[%s14408_s4 + $0x250] sm:$0xff] }
  0xea   : > { %v8610_v22 = vpop.f32.mrf.mxu0 }
  0xeb   : > { %1149 = vst [vmem:[#allocation2] sm:$0xff] %v1112_v20  ;;  %v891_v23 = vmax.f32 %v712_v21, 0.0 }
  0xec   : > { %v716_v25 = vpop.f32.mrf.mxu0 }
  0xed   : > { %v1113_v26 = vmul.f32 %v935_v24, %v891_v23  ;;  %v717_v27 = vadd.f32 %v10923_v14, %v716_v25  ;;  %v1227_v23 = vld [vmem:[%s14408_s4 + $0x48] sm:$0xff]  ;;  %v970_v25 = vpop.permute.xlu0 %969 }
  0xee   : > { %v8613_v29 = vpop.f32.mrf.mxu0  ;;  %v7344_v24 = vld [vmem:[%s14408_s4 + $0x248] sm:$0xff] }
  0xef   : > { %1150 = vst [vmem:[#allocation2 + $0x8] sm:$0xff] %v1113_v26  ;;  %v892_v30 = vmax.f32 %v717_v27, 0.0  ;;  %v1226_v29 = vld [vmem:[%s14408_s4 + $0x40] sm:$0xff] }
  0xf0   : > { %v721_v31 = vpop.f32.mrf.mxu0 }
  0xf1   : > { %v1114_v32 = vmul.f32 %v940_v28, %v892_v30  ;;  %v722_v33 = vadd.f32 %v10923_v14, %v721_v31 }
  0xf2   : > { %v8616_v34 = vpop.f32.mrf.mxu0 }
  0xf3   : > { %1151 = vst [vmem:[#allocation2 + $0x10] sm:$0xff] %v1114_v32  ;;  %v893_v35 = vmax.f32 %v722_v33, 0.0  ;;  %v7343_v33 = vld [vmem:[%s14408_s4 + $0x240] sm:$0xff] }
  0xf4   : > { %v726_v37 = vpop.f32.mrf.mxu0 }
  0xf5   : > { %v10929_v38 = vmul.f32 %v945_v36, %v893_v35  ;;  %v727_v39 = vadd.f32 %v10923_v14, %v726_v37 }
  0xf6   : > { %v8619_v40 = vpop.f32.mrf.mxu0  ;;  %v1234_v41 = vld [vmem:[#allocation2 + $0x1] sm:$0xff] }
  0xf7   : > { %v1733_v42 = vld [vmem:[#allocation2 + $0x2] sm:$0xff]  ;;  %1152 = vst [vmem:[#allocation2 + $0x18] sm:$0xff] %v10929_v38  ;;  %v894_v43 = vmax.f32 %v727_v39, 0.0  ;;  %8748 = vmatprep.mubr.f32.mxu1 %v1234_v41  ;;  %v1225_v40 = vld [vmem:[%s14408_s4 + $0x38] sm:$0xff] }
  0xf8   : > { %8908 = vmatprep.mubr.f32.mxu0 %v1733_v42  ;;  %v731_v45 = vpop.f32.mrf.mxu0  ;;  %v7342_v41 = vld [vmem:[%s14408_s4 + $0x238] sm:$0xff] }
  0xf9   : > { %v10933_v46 = vmul.f32 %v950_v44, %v894_v43  ;;  %v732_v47 = vadd.f32 %v10923_v14, %v731_v45 }
  0xfa   : > { %v8622_v49 = vpop.f32.mrf.mxu0  ;;  %v1235_v50 = vld [vmem:[#allocation2 + $0x9] sm:$0xff] }
  0xfb   : > { %v1734_v51 = vld [vmem:[#allocation2 + $0xa] sm:$0xff]  ;;  %1153 = vst [vmem:[#allocation2 + $0x20] sm:$0xff] %v10933_v46  ;;  %v895_v53 = vmax.f32 %v732_v47, 0.0  ;;  %8749 = vmatmul.mubr.f32.vlgmr.msra.gmra.mxu1 %v1235_v50  ;;  %v980_v49 = vpop.permute.xlu0 %979 }
  0xfc   : > { %8909 = vmatmul.mubr.f32.vlgmr.msra.gmra.mxu0 %v1734_v51  ;;  %v736_v55 = vpop.f32.mrf.mxu0  ;;  %8797 = vmatpush3.msra.mxu1 %v1233_v12  ;;  %v1224_v47 = vld [vmem:[%s14408_s4 + $0x30] sm:$0xff] }
  0xfd   : > { %9037 = vmatpush3.msra.mxu0 %v7350_v13  ;;  %v10943_v56 = vmul.f32 %v955_v54, %v895_v53  ;;  %v737_v57 = vadd.f32 %v10923_v14, %v736_v55  ;;  %8798 = vmatprep.subr.mxu1 %v1232_v48  ;;  %v965_v13 = vpop.permute.xlu1 %964  ;;  %v1223_v53 = vld [vmem:[%s14408_s4 + $0x28] sm:$0xff] }
  0xfe   : > { %9038 = vmatprep.subr.mxu0 %v7349_v52  ;;  %v8625_v5 = vpop.f32.mrf.mxu0  ;;  %v10952_v60 = vld [vmem:[#allocation2 + $0x11] sm:$0xff]  ;;  %8799 = vmatpush3.msra.mxu1 %v1232_v48 }
  0xff   : > { %v1735_v61 = vld [vmem:[#allocation2 + $0x12] sm:$0xff]  ;;  %9039 = vmatpush3.msra.mxu0 %v7349_v52  ;;  %1154 = vst [vmem:[#allocation2 + $0x28] sm:$0xff] %v10943_v56  ;;  %v896_v62 = vmax.f32 %v737_v57, 0.0  ;;  %8751 = vmatprep.mubr.f32.mxu1 %v10952_v60 }
 0x100   : > { %8911 = vmatprep.mubr.f32.mxu0 %v1735_v61  ;;  %v741_v3 = vpop.f32.mrf.mxu0  ;;  %8800 = vmatprep.subr.mxu1 %v1231_v58  ;;  %v7341_v48 = vld [vmem:[%s14408_s4 + $0x230] sm:$0xff] }
 0x101   : > { %9040 = vmatprep.subr.mxu0 %v7348_v59  ;;  %v10962_v4 = vmul.f32 %v960_v2, %v896_v62  ;;  %v742_v6 = vadd.f32 %v10923_v14, %v741_v3  ;;  %8801 = vmatpush3.msra.mxu1 %v1231_v58  ;;  %v975_v35 = vpop.permute.xlu1 %974  ;;  %v7340_v58 = vld [vmem:[%s14408_s4 + $0x228] sm:$0xff]  ;;  %v7339_v2 = vld [vmem:[%s14408_s4 + $0x220] sm:$0xff] }
 0x102   : > { %9041 = vmatpush3.msra.mxu0 %v7348_v59  ;;  %v8628_v8 = vpop.f32.mrf.mxu0  ;;  %v10968_v9 = vld [vmem:[#allocation2 + $0x19] sm:$0xff]  ;;  %8802 = vmatprep.subr.mxu1 %v1230_v63 }
 0x103   : > { %v1736_v10 = vld [vmem:[#allocation2 + $0x1a] sm:$0xff]  ;;  %9042 = vmatprep.subr.mxu0 %v7347_v0  ;;  %1155 = vst [vmem:[#allocation2 + $0x30] sm:$0xff] %v10962_v4  ;;  %v897_v12 = vmax.f32 %v742_v6, 0.0  ;;  %8752 = vmatmul.mubr.f32.gmra.mxu1 %v10968_v9 }
 0x104   : > { %8912 = vmatmul.mubr.f32.gmra.mxu0 %v1736_v10  ;;  %v746_v15 = vpop.f32.mrf.mxu0  ;;  %8803 = vmatpush3.msra.mxu1 %v1230_v63  ;;  %v1221_v10 = vld [vmem:[%s14408_s4 + $0x18] sm:$0xff] }
 0x105   : > { %9043 = vmatpush3.msra.mxu0 %v7347_v0  ;;  %v10975_v1 = vmul.f32 %v965_v13, %v897_v12  ;;  %v747_v16 = vadd.f32 %v10923_v14, %v746_v15  ;;  %8804 = vmatprep.subr.mxu1 %v1229_v7  ;;  %v985_v5 = vpop.permute.xlu1 %984  ;;  %v1222_v0 = vld [vmem:[%s14408_s4 + $0x20] sm:$0xff]  ;;  %v990_v12 = vpop.permute.xlu0 %989 }
 0x106   : > { %9044 = vmatprep.subr.mxu0 %v7346_v11  ;;  %v8631_v19 = vpop.f32.mrf.mxu0  ;;  %v10984_v20 = vld [vmem:[#allocation2 + $0x21] sm:$0xff]  ;;  %8805 = vmatpush3.msra.mxu1 %v1229_v7 }
 0x107   : > { %v1737_v21 = vld [vmem:[#allocation2 + $0x22] sm:$0xff]  ;;  %9045 = vmatpush3.msra.mxu0 %v7346_v11  ;;  %1156 = vst [vmem:[#allocation2 + $0x38] sm:$0xff] %v10975_v1  ;;  %v898_v22 = vmax.f32 %v747_v16, 0.0  ;;  %8754 = vmatprep.mubr.f32.mxu1 %v10984_v20  ;;  %v7338_v11 = vld [vmem:[%s14408_s4 + $0x218] sm:$0xff] }
 0x108   : > { %8914 = vmatprep.mubr.f32.mxu0 %v1737_v21  ;;  %v751_v26 = vpop.f32.mrf.mxu0  ;;  %8806 = vmatprep.subr.mxu1 %v1228_v17 }
 0x109   : > { %9046 = vmatprep.subr.mxu0 %v7345_v18  ;;  %v10994_v27 = vmul.f32 %v970_v25, %v898_v22  ;;  %v752_v28 = vadd.f32 %v10923_v14, %v751_v26  ;;  %8807 = vmatpush3.msra.mxu1 %v1228_v17  ;;  %v1220_v17 = vld [vmem:[%s14408_s4 + $0x10] sm:$0xff] }
 0x10a   : > { %9047 = vmatpush3.msra.mxu0 %v7345_v18  ;;  %v8634_v30 = vpop.f32.mrf.mxu0  ;;  %v11000_v31 = vld [vmem:[#allocation2 + $0x29] sm:$0xff]  ;;  %8808 = vmatprep.subr.mxu1 %v1227_v23 }
 0x10b   : > { %v1738_v32 = vld [vmem:[#allocation2 + $0x2a] sm:$0xff]  ;;  %9048 = vmatprep.subr.mxu0 %v7344_v24  ;;  %1157 = vst [vmem:[#allocation2 + $0x40] sm:$0xff] %v10994_v27  ;;  %v899_v34 = vmax.f32 %v752_v28, 0.0  ;;  %8755 = vmatmul.mubr.f32.gmra.mxu1 %v11000_v31 }
 0x10c   : > { %8915 = vmatmul.mubr.f32.gmra.mxu0 %v1738_v32  ;;  %v756_v36 = vpop.f32.mrf.mxu0  ;;  %8809 = vmatpush3.msra.mxu1 %v1227_v23  ;;  %v7337_v22 = vld [vmem:[%s14408_s4 + $0x210] sm:$0xff]  ;;  %v7336_v30 = vld [vmem:[%s14408_s4 + $0x208] sm:$0xff] }
 0x10d   : > { %9049 = vmatpush3.msra.mxu0 %v7344_v24  ;;  %v11007_v37 = vmul.f32 %v975_v35, %v899_v34  ;;  %v757_v39 = vadd.f32 %v10923_v14, %v756_v36  ;;  %8810 = vmatprep.subr.mxu1 %v1226_v29  ;;  %v995_v24 = vpop.permute.xlu1 %994  ;;  %v1218_v36 = vld [vmem:[%s14408_s4] sm:$0xff] }
 0x10e   : > { %9050 = vmatprep.subr.mxu0 %v7343_v33  ;;  %v8637_v42 = vpop.f32.mrf.mxu0  ;;  %v11016_v43 = vld [vmem:[#allocation2 + $0x31] sm:$0xff]  ;;  %8811 = vmatpush3.msra.mxu1 %v1226_v29  ;;  %v1219_v29 = vld [vmem:[%s14408_s4 + $0x8] sm:$0xff] }
 0x10f   : > { %v1739_v44 = vld [vmem:[#allocation2 + $0x32] sm:$0xff]  ;;  %9051 = vmatpush3.msra.mxu0 %v7343_v33  ;;  %1158 = vst [vmem:[#allocation2 + $0x48] sm:$0xff] %v11007_v37  ;;  %v900_v45 = vmax.f32 %v757_v39, 0.0  ;;  %8757 = vmatprep.mubr.f32.mxu1 %v11016_v43  ;;  %v7335_v39 = vld [vmem:[%s14408_s4 + $0x200] sm:$0xff] }
 0x110   : > { %8917 = vmatprep.mubr.f32.mxu0 %v1739_v44  ;;  %v761_v50 = vpop.f32.mrf.mxu0  ;;  %8812 = vmatprep.subr.mxu1 %v1225_v40 }
 0x111   : > { %9052 = vmatprep.subr.mxu0 %v7342_v41  ;;  %v11026_v51 = vmul.f32 %v980_v49, %v900_v45  ;;  %v762_v52 = vadd.f32 %v10923_v14, %v761_v50  ;;  %8813 = vmatpush3.msra.mxu1 %v1225_v40  ;;  %v1000_v40 = vpop.permute.xlu0 %999  ;;  %v11096_v45 = vld [vmem:[%s14408_s4 + $0x1f8] sm:$0xff] }
 0x112   : > { %9053 = vmatpush3.msra.mxu0 %v7342_v41  ;;  %v8640_v54 = vpop.f32.mrf.mxu0  ;;  %v11032_v55 = vld [vmem:[#allocation2 + $0x39] sm:$0xff]  ;;  %8814 = vmatprep.subr.mxu1 %v1224_v47 }
 0x113   : > { %v1740_v57 = vld [vmem:[#allocation2 + $0x3a] sm:$0xff]  ;;  %9054 = vmatprep.subr.mxu0 %v7341_v48  ;;  %1159 = vst [vmem:[#allocation2 + $0x50] sm:$0xff] %v11026_v51  ;;  %v901_v59 = vmax.f32 %v762_v52, 0.0  ;;  %8758 = vmatmul.mubr.f32.gmra.mxu1 %v11032_v55 }
 0x114   : > { %8918 = vmatmul.mubr.f32.gmra.mxu0 %v1740_v57  ;;  %v766_v61 = vpop.f32.mrf.mxu0  ;;  %8815 = vmatpush3.msra.mxu1 %v1224_v47  ;;  %v11103_v50 = vld [vmem:[%s14408_s4 + $0x378] sm:$0xff] }
 0x115   : > { %9055 = vmatpush3.msra.mxu0 %v7341_v48  ;;  %v11039_v62 = vmul.f32 %v985_v5, %v901_v59  ;;  %v767_v63 = vadd.f32 %v10923_v14, %v766_v61  ;;  %8816 = vmatprep.subr.mxu1 %v1223_v53 }
 0x116   : > { %9056 = vmatprep.subr.mxu0 %v7340_v58  ;;  %v8643_v3 = vpop.f32.mrf.mxu0  ;;  %v11048_v6 = vld [vmem:[#allocation2 + $0x41] sm:$0xff]  ;;  %8817 = vmatpush3.msra.mxu1 %v1223_v53  ;;  %v1005_v53 = vpop.permute.xlu1 %1004 }
 0x117   : > { %v1741_v7 = vld [vmem:[#allocation2 + $0x42] sm:$0xff]  ;;  %9057 = vmatpush3.msra.mxu0 %v7340_v58  ;;  %1160 = vst [vmem:[#allocation2 + $0x58] sm:$0xff] %v11039_v62  ;;  %v902_v8 = vmax.f32 %v767_v63, 0.0  ;;  %8760 = vmatprep.mubr.f32.mxu1 %v11048_v6 }
 0x118   : > { %8920 = vmatprep.mubr.f32.mxu0 %v1741_v7  ;;  %v771_v13 = vpop.f32.mrf.mxu0  ;;  %8818 = vmatprep.subr.mxu1 %v1222_v0 }
 0x119   : > { %9058 = vmatprep.subr.mxu0 %v7339_v2  ;;  %v11058_v15 = vmul.f32 %v990_v12, %v902_v8  ;;  %v772_v16 = vadd.f32 %v10923_v14, %v771_v13  ;;  %8819 = vmatpush3.msra.mxu1 %v1222_v0  ;;  %v1010_v0 = vpop.permute.xlu0 %1009 }
 0x11a   : > { %9059 = vmatpush3.msra.mxu0 %v7339_v2  ;;  %v8646_v18 = vpop.f32.mrf.mxu0  ;;  %v11064_v19 = vld [vmem:[#allocation2 + $0x49] sm:$0xff]  ;;  %8820 = vmatprep.subr.mxu1 %v1221_v10  ;;  %v1015_v13 = vpop.permute.xlu1 %1014 }
 0x11b   : > { %v1742_v21 = vld [vmem:[#allocation2 + $0x4a] sm:$0xff]  ;;  %9060 = vmatprep.subr.mxu0 %v7338_v11  ;;  %1161 = vst [vmem:[#allocation2 + $0x60] sm:$0xff] %v11058_v15  ;;  %v903_v23 = vmax.f32 %v772_v16, 0.0  ;;  %8761 = vmatmul.mubr.f32.gmra.mxu1 %v11064_v19 }
 0x11c   : > { %8921 = vmatmul.mubr.f32.gmra.mxu0 %v1742_v21  ;;  %v776_v25 = vpop.f32.mrf.mxu0  ;;  %8821 = vmatpush3.msra.mxu1 %v1221_v10 }
 0x11d   : > { %9061 = vmatpush3.msra.mxu0 %v7338_v11  ;;  %v11071_v26 = vmul.f32 %v995_v24, %v903_v23  ;;  %v777_v28 = vadd.f32 %v10923_v14, %v776_v25  ;;  %8822 = vmatprep.subr.mxu1 %v1220_v17  ;;  %v1020_v25 = vpop.permute.xlu0 %1019 }
 0x11e   : > { %9062 = vmatprep.subr.mxu0 %v7337_v22  ;;  %v8649_v32 = vpop.f32.mrf.mxu0  ;;  %v11080_v33 = vld [vmem:[#allocation2 + $0x51] sm:$0xff]  ;;  %8823 = vmatpush3.msra.mxu1 %v1220_v17 }
 0x11f   : > { %v1743_v34 = vld [vmem:[#allocation2 + $0x52] sm:$0xff]  ;;  %9063 = vmatpush3.msra.mxu0 %v7337_v22  ;;  %1162 = vst [vmem:[#allocation2 + $0x68] sm:$0xff] %v11071_v26  ;;  %v904_v35 = vmax.f32 %v777_v28, 0.0  ;;  %8763 = vmatprep.mubr.f32.mxu1 %v11080_v33 }
 0x120   : > { %8923 = vmatprep.mubr.f32.mxu0 %v1743_v34  ;;  %v781_v41 = vpop.f32.mrf.mxu0  ;;  %8824 = vmatprep.subr.mxu1 %v1219_v29 }
 0x121   : > { %9064 = vmatprep.subr.mxu0 %v7336_v30  ;;  %v11090_v42 = vmul.f32 %v1000_v40, %v904_v35  ;;  %v782_v44 = vadd.f32 %v10923_v14, %v781_v41  ;;  %8825 = vmatpush3.msra.mxu1 %v1219_v29 }
 0x122   : > { %9065 = vmatpush3.msra.mxu0 %v7336_v30  ;;  %v8652_v47 = vpop.f32.mrf.mxu0  ;;  %v11098_v48 = vld [vmem:[#allocation2 + $0x59] sm:$0xff]  ;;  %8826 = vmatprep.subr.mxu1 %v1218_v36 }
 0x123   : > { %v1744_v49 = vld [vmem:[#allocation2 + $0x5a] sm:$0xff]  ;;  %9066 = vmatprep.subr.mxu0 %v7335_v39  ;;  %1163 = vst [vmem:[#allocation2 + $0x70] sm:$0xff] %v11090_v42  ;;  %v905_v52 = vmax.f32 %v782_v44, 0.0  ;;  %8764 = vmatmul.mubr.f32.gmra.mxu1 %v11098_v48 }
 0x124   : > { %8924 = vmatmul.mubr.f32.gmra.mxu0 %v1744_v49  ;;  %v786_v54 = vpop.f32.mrf.mxu0  ;;  %8827 = vmatpush3.msra.mxu1 %v1218_v36 }
 0x125   : > { %9067 = vmatpush3.msra.mxu0 %v7335_v39  ;;  %v11107_v57 = vmul.f32 %v1005_v53, %v905_v52  ;;  %v787_v58 = vadd.f32 %v10923_v14, %v786_v54  ;;  %8956 = vmatprep.subr.mxu1 %v11096_v45  ;;  %v1025_v39 = vpop.permute.xlu1 %1024  ;;  %v1030_v54 = vpop.permute.xlu0 %1029 }
 0x126   : > { %9196 = vmatprep.subr.mxu0 %v11103_v50  ;;  %v8655_v59 = vpop.f32.mrf.mxu0  ;;  %v11112_v5 = vld [vmem:[#allocation2 + $0x61] sm:$0xff] }
 0x127   : > { %v1745_v61 = vld [vmem:[#allocation2 + $0x62] sm:$0xff]  ;;  %1164 = vst [vmem:[#allocation2 + $0x78] sm:$0xff] %v11107_v57  ;;  %v906_v63 = vmax.f32 %v787_v58, 0.0  ;;  %8766 = vmatprep.mubr.f32.mxu1 %v11112_v5 }
 0x128   : > { %8926 = vmatprep.mubr.f32.mxu0 %v1745_v61  ;;  %v791_v2 = vpop.f32.mrf.mxu0 }
 0x129   : > { %v11116_v3 = vmul.f32 %v1010_v0, %v906_v63  ;;  %v792_v7 = vadd.f32 %v10923_v14, %v791_v2 }
 0x12a   : > { %v8658_v8 = vpop.f32.mrf.mxu0  ;;  %v11119_v10 = vld [vmem:[#allocation2 + $0x69] sm:$0xff] }
 0x12b   : > { %v1746_v11 = vld [vmem:[#allocation2 + $0x6a] sm:$0xff]  ;;  %1165 = vst [vmem:[#allocation2 + $0x80] sm:$0xff] %v11116_v3  ;;  %v907_v12 = vmax.f32 %v792_v7, 0.0  ;;  %8767 = vmatmul.mubr.f32.gmra.mxu1 %v11119_v10  ;;  %v1035_v8 = vpop.permute.xlu1 %1034 }
 0x12c   : > { %8927 = vmatmul.mubr.f32.gmra.mxu0 %v1746_v11  ;;  %v796_v16 = vpop.f32.mrf.mxu0 }
 0x12d   : > { %v11123_v17 = vmul.f32 %v1015_v13, %v907_v12  ;;  %v797_v18 = vadd.f32 %v10923_v14, %v796_v16 }
 0x12e   : > { %v8661_v21 = vpop.f32.mrf.mxu0  ;;  %v11126_v22 = vld [vmem:[#allocation2 + $0x71] sm:$0xff] }
 0x12f   : > { %v1747_v23 = vld [vmem:[#allocation2 + $0x72] sm:$0xff]  ;;  %1166 = vst [vmem:[#allocation2 + $0x88] sm:$0xff] %v11123_v17  ;;  %v908_v24 = vmax.f32 %v797_v18, 0.0  ;;  %8769 = vmatprep.mubr.f32.mxu1 %v11126_v22 }
 0x130   : > { %8929 = vmatprep.mubr.f32.mxu0 %v1747_v23  ;;  %v801_v28 = vpop.f32.mrf.mxu0 }
 0x131   : > { %v11130_v29 = vmul.f32 %v1020_v25, %v908_v24  ;;  %v802_v30 = vadd.f32 %v10923_v14, %v801_v28  ;;  %v1040_v24 = vpop.permute.xlu0 %1039 }
 0x132   : > { %v8664_v32 = vpop.f32.mrf.mxu0  ;;  %v11133_v34 = vld [vmem:[#allocation2 + $0x79] sm:$0xff] }
 0x133   : > { %v1748_v35 = vld [vmem:[#allocation2 + $0x7a] sm:$0xff]  ;;  %1167 = vst [vmem:[#allocation2 + $0x90] sm:$0xff] %v11130_v29  ;;  %v909_v36 = vmax.f32 %v802_v30, 0.0  ;;  %8770 = vmatmul.mubr.f32.gmra.mxu1 %v11133_v34 }
 0x134   : > { %8930 = vmatmul.mubr.f32.gmra.mxu0 %v1748_v35  ;;  %v806_v40 = vpop.f32.mrf.mxu0 }
 0x135   : > { %v11137_v41 = vmul.f32 %v1025_v39, %v909_v36  ;;  %v807_v44 = vadd.f32 %v10923_v14, %v806_v40  ;;  %v1045_v40 = vpop.permute.xlu1 %1044 }
 0x136   : > { %v8667_v47 = vpop.f32.mrf.mxu0  ;;  %v11140_v49 = vld [vmem:[#allocation2 + $0x81] sm:$0xff] }
 0x137   : > { %v1749_v52 = vld [vmem:[#allocation2 + $0x82] sm:$0xff]  ;;  %1168 = vst [vmem:[#allocation2 + $0x98] sm:$0xff] %v11137_v41  ;;  %v910_v53 = vmax.f32 %v807_v44, 0.0  ;;  %8772 = vmatprep.mubr.f32.mxu1 %v11140_v49 }
 0x138   : > { %8932 = vmatprep.mubr.f32.mxu0 %v1749_v52  ;;  %v811_v58 = vpop.f32.mrf.mxu0 }
 0x139   : > { %v11144_v59 = vmul.f32 %v1030_v54, %v910_v53  ;;  %v812_v61 = vadd.f32 %v10923_v14, %v811_v58 }
 0x13a   : > { %v8670_v63 = vpop.f32.mrf.mxu0  ;;  %v11147_v0 = vld [vmem:[#allocation2 + $0x89] sm:$0xff] }
 0x13b   : > { %v1750_v2 = vld [vmem:[#allocation2 + $0x8a] sm:$0xff]  ;;  %1169 = vst [vmem:[#allocation2 + $0xa0] sm:$0xff] %v11144_v59  ;;  %v911_v7 = vmax.f32 %v812_v61, 0.0  ;;  %8773 = vmatmul.mubr.f32.gmra.mxu1 %v11147_v0  ;;  %v1050_v63 = vpop.permute.xlu0 %1049 }
 0x13c   : > { %8933 = vmatmul.mubr.f32.gmra.mxu0 %v1750_v2  ;;  %v816_v11 = vpop.f32.mrf.mxu0 }
 0x13d   : > { %v11151_v12 = vmul.f32 %v1035_v8, %v911_v7  ;;  %v817_v13 = vadd.f32 %v10923_v14, %v816_v11 }
 0x13e   : > { %v8673_v16 = vpop.f32.mrf.mxu0  ;;  %v11154_v18 = vld [vmem:[#allocation2 + $0x91] sm:$0xff] }
 0x13f   : > { %v1751_v21 = vld [vmem:[#allocation2 + $0x92] sm:$0xff]  ;;  %1170 = vst [vmem:[#allocation2 + $0xa8] sm:$0xff] %v11151_v12  ;;  %v912_v23 = vmax.f32 %v817_v13, 0.0  ;;  %8775 = vmatprep.mubr.f32.mxu1 %v11154_v18 }
 0x140   : > { %8935 = vmatprep.mubr.f32.mxu0 %v1751_v21  ;;  %v821_v25 = vpop.f32.mrf.mxu0 }
 0x141   : > { %v11158_v28 = vmul.f32 %v1040_v24, %v912_v23  ;;  %v822_v30 = vadd.f32 %v10923_v14, %v821_v25  ;;  %v1055_v23 = vpop.permute.xlu1 %1054 }
 0x142   : > { %v8676_v32 = vpop.f32.mrf.mxu0  ;;  %v11161_v35 = vld [vmem:[#allocation2 + $0x99] sm:$0xff] }
 0x143   : > { %v1752_v36 = vld [vmem:[#allocation2 + $0x9a] sm:$0xff]  ;;  %1171 = vst [vmem:[#allocation2 + $0xb0] sm:$0xff] %v11158_v28  ;;  %v913_v39 = vmax.f32 %v822_v30, 0.0  ;;  %8776 = vmatmul.mubr.f32.gmra.mxu1 %v11161_v35 }
 0x144   : > { %8936 = vmatmul.mubr.f32.gmra.mxu0 %v1752_v36  ;;  %v826_v44 = vpop.f32.mrf.mxu0 }
 0x145   : > { %v11165_v47 = vmul.f32 %v1045_v40, %v913_v39  ;;  %v827_v52 = vadd.f32 %v10923_v14, %v826_v44  ;;  %v1060_v44 = vpop.permute.xlu0 %1059 }
 0x146   : > { %v8679_v53 = vpop.f32.mrf.mxu0  ;;  %v11168_v54 = vld [vmem:[#allocation2 + $0xa1] sm:$0xff] }
 0x147   : > { %v1753_v58 = vld [vmem:[#allocation2 + $0xa2] sm:$0xff]  ;;  %1172 = vst [vmem:[#allocation2 + $0xb8] sm:$0xff] %v11165_v47  ;;  %v914_v61 = vmax.f32 %v827_v52, 0.0  ;;  %8778 = vmatprep.mubr.f32.mxu1 %v11168_v54 }
 0x148   : > { %8938 = vmatprep.mubr.f32.mxu0 %v1753_v58  ;;  %v831_v2 = vpop.f32.mrf.mxu0 }
 0x149   : > { %v11172_v7 = vmul.f32 %v1050_v63, %v914_v61  ;;  %v832_v8 = vadd.f32 %v10923_v14, %v831_v2 }
 0x14a   : > { %v8682_v11 = vpop.f32.mrf.mxu0  ;;  %v11175_v13 = vld [vmem:[#allocation2 + $0xa9] sm:$0xff] }
 0x14b   : > { %v1754_v16 = vld [vmem:[#allocation2 + $0xaa] sm:$0xff]  ;;  %1173 = vst [vmem:[#allocation2 + $0xc0] sm:$0xff] %v11172_v7  ;;  %v915_v21 = vmax.f32 %v832_v8, 0.0  ;;  %8779 = vmatmul.mubr.f32.gmra.mxu1 %v11175_v13  ;;  %v1065_v11 = vpop.permute.xlu1 %1064 }
 0x14c   : > { %8939 = vmatmul.mubr.f32.gmra.mxu0 %v1754_v16  ;;  %v836_v24 = vpop.f32.mrf.mxu0 }
 0x14d   : > { %v11179_v25 = vmul.f32 %v1055_v23, %v915_v21  ;;  %v837_v30 = vadd.f32 %v10923_v14, %v836_v24 }
 0x14e   : > { %v8685_v32 = vpop.f32.mrf.mxu0  ;;  %v11182_v36 = vld [vmem:[#allocation2 + $0xb1] sm:$0xff] }
 0x14f   : > { %14490 = vst [vmem:[#allocation11_spill] sm:$0xff] %v11179_v25  ;;  %v1755_v39 = vld [vmem:[#allocation2 + $0xb2] sm:$0xff]  ;;  %1174 = vst [vmem:[#allocation2 + $0xc8] sm:$0xff] %v11179_v25  ;;  %v916_v40 = vmax.f32 %v837_v30, 0.0  ;;  %8781 = vmatprep.mubr.f32.mxu1 %v11182_v36 }
 0x150   : > { %8941 = vmatprep.mubr.f32.mxu0 %v1755_v39  ;;  %v841_v52 = vpop.f32.mrf.mxu0 }
 0x151   : > { %v11186_v53 = vmul.f32 %v1060_v44, %v916_v40  ;;  %v842_v58 = vadd.f32 %v10923_v14, %v841_v52  ;;  %v1070_v40 = vpop.permute.xlu0 %1069 }
 0x152   : > { %v8688_v61 = vpop.f32.mrf.mxu0  ;;  %v11189_v63 = vld [vmem:[#allocation2 + $0xb9] sm:$0xff] }
 0x153   : > { %14491 = vst [vmem:[#allocation12_spill] sm:$0xff] %v11186_v53  ;;  %v1756_v2 = vld [vmem:[#allocation2 + $0xba] sm:$0xff]  ;;  %1175 = vst [vmem:[#allocation2 + $0xd0] sm:$0xff] %v11186_v53  ;;  %v917_v8 = vmax.f32 %v842_v58, 0.0  ;;  %8782 = vmatmul.mubr.f32.gmra.mxu1 %v11189_v63 }
 0x154   : > { %8942 = vmatmul.mubr.f32.gmra.mxu0 %v1756_v2  ;;  %v846_v16 = vpop.f32.mrf.mxu0 }
 0x155   : > { %v11193_v21 = vmul.f32 %v1065_v11, %v917_v8  ;;  %v847_v23 = vadd.f32 %v10923_v14, %v846_v16  ;;  %v1075_v16 = vpop.permute.xlu1 %1074 }
 0x156   : > { %v8691_v24 = vpop.f32.mrf.mxu0  ;;  %v11196_v30 = vld [vmem:[#allocation2 + $0xc1] sm:$0xff] }
 0x157   : > { %14492 = vst [vmem:[#allocation13_spill] sm:$0xff] %v11193_v21  ;;  %v1757_v32 = vld [vmem:[#allocation2 + $0xc2] sm:$0xff]  ;;  %1176 = vst [vmem:[#allocation2 + $0xd8] sm:$0xff] %v11193_v21  ;;  %v918_v39 = vmax.f32 %v847_v23, 0.0  ;;  %8784 = vmatprep.mubr.f32.mxu1 %v11196_v30 }
 0x158   : > { %8944 = vmatprep.mubr.f32.mxu0 %v1757_v32  ;;  %v851_v44 = vpop.f32.mrf.mxu0 }
 0x159   : > { %v11200_v52 = vmul.f32 %v1070_v40, %v918_v39  ;;  %v852_v58 = vadd.f32 %v10923_v14, %v851_v44 }
 0x15a   : > { %v8694_v61 = vpop.f32.mrf.mxu0  ;;  %v11203_v2 = vld [vmem:[#allocation2 + $0xc9] sm:$0xff] }
 0x15b   : > { %14493 = vst [vmem:[#allocation14_spill] sm:$0xff] %v11200_v52  ;;  %v1758_v8 = vld [vmem:[#allocation2 + $0xca] sm:$0xff]  ;;  %1177 = vst [vmem:[#allocation2 + $0xe0] sm:$0xff] %v11200_v52  ;;  %v919_v11 = vmax.f32 %v852_v58, 0.0  ;;  %8785 = vmatmul.mubr.f32.gmra.mxu1 %v11203_v2  ;;  %v1080_v58 = vpop.permute.xlu0 %1079 }
 0x15c   : > { %8945 = vmatmul.mubr.f32.gmra.mxu0 %v1758_v8  ;;  %v856_v23 = vpop.f32.mrf.mxu0 }
 0x15d   : > { %v11207_v24 = vmul.f32 %v1075_v16, %v919_v11  ;;  %v857_v32 = vadd.f32 %v10923_v14, %v856_v23 }
 0x15e   : > { %v8697_v39 = vpop.f32.mrf.mxu0  ;;  %v11210_v40 = vld [vmem:[#allocation2 + $0xd1] sm:$0xff] }
 0x15f   : > { %14494 = vst [vmem:[#allocation15_spill] sm:$0xff] %v11207_v24  ;;  %14495 = vst [vmem:[#allocation16_spill] sm:$0xff] %v11210_v40  ;;  %v1759_v44 = vld [vmem:[#allocation2 + $0xd2] sm:$0xff]  ;;  %v920_v61 = vmax.f32 %v857_v32, 0.0  ;;  %8787 = vmatprep.mubr.f32.mxu1 %v11210_v40  ;;  %v1085_v32 = vpop.permute.xlu1 %1084 }
 0x160   : > { %1178 = vst [vmem:[#allocation2 + $0xe8] sm:$0xff] %v11207_v24  ;;  %8947 = vmatprep.mubr.f32.mxu0 %v1759_v44  ;;  %v861_v52 = vpop.f32.mrf.mxu0 }
 0x161   : > { %v11214_v21 = vmul.f32 %v1080_v58, %v920_v61  ;;  %v862_v8 = vadd.f32 %v10923_v14, %v861_v52 }
 0x162   : > { %v8700_v11 = vpop.f32.mrf.mxu0  ;;  %v11217_v16 = vld [vmem:[#allocation2 + $0xd9] sm:$0xff] }
 0x163   : > { %14496 = vst [vmem:[#allocation17_spill] sm:$0xff] %v11214_v21  ;;  %14497 = vst [vmem:[#allocation18_spill] sm:$0xff] %v11217_v16  ;;  %v1760_v23 = vld [vmem:[#allocation2 + $0xda] sm:$0xff]  ;;  %v921_v39 = vmax.f32 %v862_v8, 0.0  ;;  %8788 = vmatmul.mubr.f32.gmra.mxu1 %v11217_v16  ;;  %v1090_v8 = vpop.permute.xlu0 %1089 }
 0x164   : > { %1179 = vst [vmem:[#allocation2 + $0xf0] sm:$0xff] %v11214_v21  ;;  %8948 = vmatmul.mubr.f32.gmra.mxu0 %v1760_v23  ;;  %v866_v24 = vpop.f32.mrf.mxu0 }
 0x165   : > { %v11221_v53 = vmul.f32 %v1085_v32, %v921_v39  ;;  %v867_v44 = vadd.f32 %v10923_v14, %v866_v24 }
 0x166   : > { %v8703_v61 = vpop.f32.mrf.mxu0 }
 0x167   : > { %14498 = vst [vmem:[#allocation19_spill] sm:$0xff] %v11221_v53  ;;  %v11224_v58 = vld [vmem:[#allocation2 + $0xe1] sm:$0xff]  ;;  %1180 = vst [vmem:[#allocation2 + $0xf8] sm:$0xff] %v11221_v53  ;;  %v922_v11 = vmax.f32 %v867_v44, 0.0  ;;  %v1095_v61 = vpop.permute.xlu1 %1094 }
 0x168   : > { %14499 = vst [vmem:[#allocation20_spill] sm:$0xff] %v11224_v58  ;;  %v1761_v52 = vld [vmem:[#allocation2 + $0xe2] sm:$0xff]  ;;  %8790 = vmatprep.mubr.f32.mxu1 %v11224_v58  ;;  %v871_v21 = vpop.f32.mrf.mxu0 }
 0x169   : > { %8950 = vmatprep.mubr.f32.mxu0 %v1761_v52  ;;  %v1144_v16 = vmul.f32 %v1090_v8, %v922_v11  ;;  %v872_v23 = vadd.f32 %v10923_v14, %v871_v21 }
 0x16a   : > { %v8706_v25 = vpop.f32.mrf.mxu0 }
 0x16b   : > { %v11229_v39 = vld [vmem:[#allocation2 + $0xe9] sm:$0xff]  ;;  %1181 = vst [vmem:[#allocation2 + $0x100] sm:$0xff] %v1144_v16  ;;  %v923_v24 = vmax.f32 %v872_v23, 0.0  ;;  %v1100_v25 = vpop.permute.xlu0 %1099 }
 0x16c   : > { %14500 = vst [vmem:[#allocation21_spill] sm:$0xff] %v11229_v39  ;;  %v1762_v32 = vld [vmem:[#allocation2 + $0xea] sm:$0xff]  ;;  %8791 = vmatmul.mubr.f32.gmra.mxu1 %v11229_v39  ;;  %v876_v53 = vpop.f32.mrf.mxu0 }
 0x16d   : > { %8951 = vmatmul.mubr.f32.gmra.mxu0 %v1762_v32  ;;  %v1145_v44 = vmul.f32 %v1095_v61, %v923_v24  ;;  %v877_v58 = vadd.f32 %v10923_v14, %v876_v53  ;;  %v1105_v61 = vpop.permute.xlu1 %1104 }
 0x16e   : > { %v8709_v52 = vpop.f32.mrf.mxu0  ;;  %v11233_v40 = vld [vmem:[#allocation2 + $0xf1] sm:$0xff] }
 0x16f   : > { %v1763_v11 = vld [vmem:[#allocation2 + $0xf2] sm:$0xff]  ;;  %1182 = vst [vmem:[#allocation2 + $0x108] sm:$0xff] %v1145_v44  ;;  %v924_v21 = vmax.f32 %v877_v58, 0.0  ;;  %8793 = vmatprep.mubr.f32.mxu1 %v11233_v40  ;;  %v1186_v58 = vld [vmem:[#allocation2] sm:$0xff] }
 0x170   : > { %8953 = vmatprep.mubr.f32.mxu0 %v1763_v11  ;;  %v881_v16 = vpop.f32.mrf.mxu0 }
 0x171   : > { %v11236_v8 = vmul.f32 %v1100_v25, %v924_v21  ;;  %v882_v23 = vadd.f32 %v10923_v14, %v881_v16  ;;  %v1187_v21 = vld [vmem:[#allocation2 + $0x8] sm:$0xff] }
 0x172   : > { %v8712_v32 = vpop.f32.mrf.mxu0  ;;  %v11239_v39 = vld [vmem:[#allocation2 + $0xf9] sm:$0xff] }
 0x173   : > { %v1764_v24 = vld [vmem:[#allocation2 + $0xfa] sm:$0xff]  ;;  %1183 = vst [vmem:[#allocation2 + $0x110] sm:$0xff] %v11236_v8  ;;  %v925_v53 = vmax.f32 %v882_v23, 0.0  ;;  %8794 = vmatmul.mubr.f32.gmra.mxu1 %v11239_v39  ;;  %v11249_v23 = vld [vmem:[#allocation2 + $0x10] sm:$0xff] }
 0x174   : > { %8954 = vmatmul.mubr.f32.gmra.mxu0 %v1764_v24  ;;  %v886_v44 = vpop.f32.mrf.mxu0  ;;  %8828 = vmatprep.mubr.f32.mxu1 %v1186_v58  ;;  %v7333_v32 = vld [vmem:[%s14408_s4 + $0x1f0] sm:$0xff]  ;;  %v1110_v24 = vpop.permute.xlu0 %1109  ;;  %v2961_v58 = vld [vmem:[#allocation2 + $0x40] sm:$0xff] }
 0x175   : > { %9068 = vmatprep.mubr.f32.mxu0 %v10952_v60  ;;  %v11244_v52 = vmul.f32 %v1105_v61, %v925_v53  ;;  %v887_v11 = vadd.f32 %v10923_v14, %v886_v44  ;;  %v7381_v60 = vld [vmem:[%s14408_s4 + $0x370] sm:$0xff]  ;;  %v2960_v53 = vld [vmem:[#allocation2 + $0x38] sm:$0xff]  ;;  %v7364_v61 = vld [vmem:[%s14408_s4 + $0x2e8] sm:$0xff] }
 0x176   : > { %v8715_v25 = vpop.f32.mrf.mxu0  ;;  %v7412_v44 = vld [vmem:[%s14408_s4 + $0x468] sm:$0xff] }
 0x177   : > { %1184 = vst [vmem:[#allocation2 + $0x118] sm:$0xff] %v11244_v52  ;;  %v926_v16 = vmax.f32 %v887_v11, 0.0  ;;  %8829 = vmatmul.mubr.f32.vlgmr.msra.gmra.mxu1 %v1187_v21  ;;  %v2962_v11 = vld [vmem:[#allocation2 + $0x48] sm:$0xff]  ;;  %v2963_v21 = vld [vmem:[#allocation2 + $0x50] sm:$0xff]  ;;  %v7363_v25 = vld [vmem:[%s14408_s4 + $0x2e0] sm:$0xff] }
 0x178   : > { %9069 = vmatmul.mubr.f32.vlgmr.msra.gmra.mxu0 %v10968_v9  ;;  %8831 = vmatprep.mubr.f32.mxu1 %v11249_v23  ;;  %v7332_v9 = vld [vmem:[%s14408_s4 + $0x1e8] sm:$0xff] }
 0x179   : > { %9071 = vmatprep.mubr.f32.mxu0 %v10984_v20  ;;  %v1148_v14 = vmul.f32 %v1110_v24, %v926_v16  ;;  %8957 = vmatpush3.msra.mxu1 %v11096_v45  ;;  %v7380_v20 = vld [vmem:[%s14408_s4 + $0x368] sm:$0xff]  ;;  %v7322_v45 = vld [vmem:[%s14408_s4 + $0x198] sm:$0xff]  ;;  %v7411_v16 = vld [vmem:[%s14408_s4 + $0x460] sm:$0xff] }
 0x17a   : > { %9197 = vmatpush3.msra.mxu0 %v11103_v50  ;;  %8958 = vmatprep.subr.mxu1 %v7333_v32  ;;  %v14501_v50 = vld [vmem:[#allocation16_spill] sm:$0xff]  ;;  %v7410_v24 = vld [vmem:[%s14408_s4 + $0x458] sm:$0xff] }
 0x17b   : > { %9198 = vmatprep.subr.mxu0 %v7381_v60  ;;  %1185 = vst [vmem:[#allocation2 + $0x120] sm:$0x3] %v1148_v14  ;;  %8832 = vmatmul.mubr.f32.gmra.mxu1 %v10929_v38  ;;  %v7331_v38 = vld [vmem:[%s14408_s4 + $0x1e0] sm:$0xff]  ;;  %v2966_v14 = vld [vmem:[#allocation2 + $0x68] sm:$0xff] }
 0x17c   : > { %9072 = vmatmul.mubr.f32.gmra.mxu0 %v11000_v31  ;;  %8834 = vmatprep.mubr.f32.mxu1 %v10933_v46  ;;  %v7379_v31 = vld [vmem:[%s14408_s4 + $0x360] sm:$0xff]  ;;  %v7330_v46 = vld [vmem:[%s14408_s4 + $0x1d8] sm:$0xff] }
 0x17d   : > { %9074 = vmatprep.mubr.f32.mxu0 %v11016_v43  ;;  %8959 = vmatpush3.msra.mxu1 %v7333_v32  ;;  %v7327_v43 = vld [vmem:[%s14408_s4 + $0x1c0] sm:$0xff] }
 0x17e   : > { %9199 = vmatpush3.msra.mxu0 %v7381_v60  ;;  %8960 = vmatprep.subr.mxu1 %v7332_v9  ;;  %v2965_v32 = vld [vmem:[#allocation2 + $0x60] sm:$0xff]  ;;  %v7362_v60 = vld [vmem:[%s14408_s4 + $0x2d8] sm:$0xff] }
 0x17f   : > { %9200 = vmatprep.subr.mxu0 %v7380_v20  ;;  %8835 = vmatmul.mubr.f32.gmra.mxu1 %v10943_v56  ;;  %v7378_v56 = vld [vmem:[%s14408_s4 + $0x358] sm:$0xff] }
 0x180   : > { %9075 = vmatmul.mubr.f32.gmra.mxu0 %v11032_v55  ;;  %8837 = vmatprep.mubr.f32.mxu1 %v10962_v4  ;;  %v7329_v4 = vld [vmem:[%s14408_s4 + $0x1d0] sm:$0xff]  ;;  %v7326_v55 = vld [vmem:[%s14408_s4 + $0x1b8] sm:$0xff] }
 0x181   : > { %9077 = vmatprep.mubr.f32.mxu0 %v11048_v6  ;;  %8961 = vmatpush3.msra.mxu1 %v7332_v9  ;;  %v7325_v6 = vld [vmem:[%s14408_s4 + $0x1b0] sm:$0xff] }
 0x182   : > { %9201 = vmatpush3.msra.mxu0 %v7380_v20  ;;  %8962 = vmatprep.subr.mxu1 %v7331_v38  ;;  %v2967_v9 = vld [vmem:[#allocation2 + $0x70] sm:$0xff] }
 0x183   : > { %9202 = vmatprep.subr.mxu0 %v7379_v31  ;;  %8838 = vmatmul.mubr.f32.gmra.mxu1 %v10975_v1  ;;  %v7377_v1 = vld [vmem:[%s14408_s4 + $0x350] sm:$0xff] }
 0x184   : > { %9078 = vmatmul.mubr.f32.gmra.mxu0 %v11064_v19  ;;  %8840 = vmatprep.mubr.f32.mxu1 %v10994_v27  ;;  %v7328_v27 = vld [vmem:[%s14408_s4 + $0x1c8] sm:$0xff]  ;;  %v7361_v20 = vld [vmem:[%s14408_s4 + $0x2d0] sm:$0xff] }
 0x185   : > { %9080 = vmatprep.mubr.f32.mxu0 %v11080_v33  ;;  %8963 = vmatpush3.msra.mxu1 %v7331_v38  ;;  %v7324_v19 = vld [vmem:[%s14408_s4 + $0x1a8] sm:$0xff]  ;;  %v7323_v33 = vld [vmem:[%s14408_s4 + $0x1a0] sm:$0xff]  ;;  %v7409_v38 = vld [vmem:[%s14408_s4 + $0x450] sm:$0xff] }
 0x186   : > { %9203 = vmatpush3.msra.mxu0 %v7379_v31  ;;  %8964 = vmatprep.subr.mxu1 %v7330_v46  ;;  %v2968_v31 = vld [vmem:[#allocation2 + $0x78] sm:$0xff] }
 0x187   : > { %9204 = vmatprep.subr.mxu0 %v7378_v56  ;;  %8841 = vmatmul.mubr.f32.gmra.mxu1 %v11007_v37  ;;  %v7376_v37 = vld [vmem:[%s14408_s4 + $0x348] sm:$0xff] }
 0x188   : > { %9081 = vmatmul.mubr.f32.gmra.mxu0 %v11098_v48  ;;  %8843 = vmatprep.mubr.f32.mxu1 %v11026_v51  ;;  %v7375_v51 = vld [vmem:[%s14408_s4 + $0x340] sm:$0xff]  ;;  %v7370_v48 = vld [vmem:[%s14408_s4 + $0x318] sm:$0xff] }
 0x189   : > { %9083 = vmatprep.mubr.f32.mxu0 %v11112_v5  ;;  %8965 = vmatpush3.msra.mxu1 %v7330_v46  ;;  %v14503_v5 = vld [vmem:[#allocation18_spill] sm:$0xff]  ;;  %v2969_v46 = vld [vmem:[#allocation2 + $0x80] sm:$0xff] }
 0x18a   : > { %9205 = vmatpush3.msra.mxu0 %v7378_v56  ;;  %8966 = vmatprep.subr.mxu1 %v7329_v4  ;;  %v7360_v56 = vld [vmem:[%s14408_s4 + $0x2c8] sm:$0xff] }
 0x18b   : > { %9206 = vmatprep.subr.mxu0 %v7377_v1  ;;  %8844 = vmatmul.mubr.f32.gmra.mxu1 %v11039_v62  ;;  %v7374_v62 = vld [vmem:[%s14408_s4 + $0x338] sm:$0xff] }
 0x18c   : > { %9084 = vmatmul.mubr.f32.gmra.mxu0 %v11119_v10  ;;  %8846 = vmatprep.mubr.f32.mxu1 %v11058_v15  ;;  %v7373_v15 = vld [vmem:[%s14408_s4 + $0x330] sm:$0xff] }
 0x18d   : > { %9086 = vmatprep.mubr.f32.mxu0 %v11126_v22  ;;  %8967 = vmatpush3.msra.mxu1 %v7329_v4  ;;  %v7369_v10 = vld [vmem:[%s14408_s4 + $0x310] sm:$0xff]  ;;  %v14505_v22 = vld [vmem:[#allocation20_spill] sm:$0xff] }
 0x18e   : > { %9207 = vmatpush3.msra.mxu0 %v7377_v1  ;;  %8968 = vmatprep.subr.mxu1 %v7328_v27  ;;  %v7408_v4 = vld [vmem:[%s14408_s4 + $0x448] sm:$0xff] }
 0x18f   : > { %9208 = vmatprep.subr.mxu0 %v7376_v37  ;;  %8847 = vmatmul.mubr.f32.gmra.mxu1 %v11071_v26  ;;  %v7372_v26 = vld [vmem:[%s14408_s4 + $0x328] sm:$0xff] }
 0x190   : > { %9087 = vmatmul.mubr.f32.gmra.mxu0 %v11133_v34  ;;  %8849 = vmatprep.mubr.f32.mxu1 %v11090_v42  ;;  %v7371_v42 = vld [vmem:[%s14408_s4 + $0x320] sm:$0xff]  ;;  %v14507_v34 = vld [vmem:[#allocation21_spill] sm:$0xff] }
 0x191   : > { %9089 = vmatprep.mubr.f32.mxu0 %v11140_v49  ;;  %8969 = vmatpush3.msra.mxu1 %v7328_v27  ;;  %v7368_v49 = vld [vmem:[%s14408_s4 + $0x308] sm:$0xff]  ;;  %v2971_v27 = vld [vmem:[#allocation2 + $0x90] sm:$0xff] }
 0x192   : > { %9209 = vmatpush3.msra.mxu0 %v7376_v37  ;;  %8970 = vmatprep.subr.mxu1 %v7327_v43  ;;  %v2970_v1 = vld [vmem:[#allocation2 + $0x88] sm:$0xff]  ;;  %v7359_v37 = vld [vmem:[%s14408_s4 + $0x2c0] sm:$0xff] }
 0x193   : > { %9210 = vmatprep.subr.mxu0 %v7375_v51  ;;  %8850 = vmatmul.mubr.f32.gmra.mxu1 %v11107_v57  ;;  %v14502_v57 = vld [vmem:[#allocation11_spill] sm:$0xff] }
 0x194   : > { %9090 = vmatmul.mubr.f32.gmra.mxu0 %v11147_v0  ;;  %8852 = vmatprep.mubr.f32.mxu1 %v11116_v3  ;;  %v7321_v3 = vld [vmem:[%s14408_s4 + $0x190] sm:$0xff]  ;;  %v14509_v0 = vld [vmem:[#allocation15_spill] sm:$0xff] }
 0x195   : > { %9092 = vmatprep.mubr.f32.mxu0 %v11154_v18  ;;  %8971 = vmatpush3.msra.mxu1 %v7327_v43  ;;  %v7319_v18 = vld [vmem:[%s14408_s4 + $0x180] sm:$0xff] }
 0x196   : > { %9211 = vmatpush3.msra.mxu0 %v7375_v51  ;;  %8972 = vmatprep.subr.mxu1 %v7326_v55  ;;  %v7407_v43 = vld [vmem:[%s14408_s4 + $0x440] sm:$0xff]  ;;  %v2972_v51 = vld [vmem:[#allocation2 + $0x98] sm:$0xff] }
 0x197   : > { %9212 = vmatprep.subr.mxu0 %v7374_v62  ;;  %8853 = vmatmul.mubr.f32.gmra.mxu1 %v11123_v17  ;;  %v14504_v17 = vld [vmem:[#allocation12_spill] sm:$0xff] }
 0x198   : > { %9093 = vmatmul.mubr.f32.gmra.mxu0 %v11161_v35  ;;  %8855 = vmatprep.mubr.f32.mxu1 %v11130_v29  ;;  %v14506_v29 = vld [vmem:[#allocation13_spill] sm:$0xff] }
 0x199   : > { %9095 = vmatprep.mubr.f32.mxu0 %v11168_v54  ;;  %8973 = vmatpush3.msra.mxu1 %v7326_v55  ;;  %v14510_v35 = vld [vmem:[#allocation17_spill] sm:$0xff]  ;;  %v14511_v54 = vld [vmem:[#allocation19_spill] sm:$0xff] }
 0x19a   : > { %9213 = vmatpush3.msra.mxu0 %v7374_v62  ;;  %8974 = vmatprep.subr.mxu1 %v7325_v6  ;;  %v2973_v55 = vld [vmem:[#allocation2 + $0xa0] sm:$0xff]  ;;  %v7358_v62 = vld [vmem:[%s14408_s4 + $0x2b8] sm:$0xff] }
 0x19b   : > { %9214 = vmatprep.subr.mxu0 %v7373_v15  ;;  %8856 = vmatmul.mubr.f32.gmra.mxu1 %v11137_v41  ;;  %v7320_v41 = vld [vmem:[%s14408_s4 + $0x188] sm:$0xff] }
 0x19c   : > { %9096 = vmatmul.mubr.f32.gmra.mxu0 %v11175_v13  ;;  %8858 = vmatprep.mubr.f32.mxu1 %v11144_v59  ;;  %v14508_v59 = vld [vmem:[#allocation14_spill] sm:$0xff] }
 0x19d   : > { %9098 = vmatprep.mubr.f32.mxu0 %v11182_v36  ;;  %8975 = vmatpush3.msra.mxu1 %v7325_v6  ;;  %v7366_v13 = vld [vmem:[%s14408_s4 + $0x2f8] sm:$0xff] }
 0x19e   : > { %9215 = vmatpush3.msra.mxu0 %v7373_v15  ;;  %8976 = vmatprep.subr.mxu1 %v7324_v19  ;;  %v7414_v36 = vld [vmem:[%s14408_s4 + $0x478] sm:$0xff]  ;;  %v2974_v15 = vld [vmem:[#allocation2 + $0xa8] sm:$0xff] }
 0x19f   : > { %9216 = vmatprep.subr.mxu0 %v7372_v26  ;;  %8859 = vmatmul.mubr.f32.gmra.mxu1 %v11151_v12  ;;  %v2375_v12 = vld [vmem:[#allocation2 + $0x101] sm:$0xff]  ;;  %v7406_v6 = vld [vmem:[%s14408_s4 + $0x438] sm:$0xff] }
 0x1a0   : > { %9099 = vmatmul.mubr.f32.gmra.mxu0 %v11189_v63  ;;  %8861 = vmatprep.mubr.f32.mxu1 %v11158_v28  ;;  %v7367_v28 = vld [vmem:[%s14408_s4 + $0x300] sm:$0xff]  ;;  %v2040_v63 = vld [vmem:[#allocation2 + $0x18] sm:$0xff] }
 0x1a1   : > { %9101 = vmatprep.mubr.f32.mxu0 %v11196_v30  ;;  %8977 = vmatpush3.msra.mxu1 %v7324_v19  ;;  %v2958_v30 = vld [vmem:[#allocation2 + $0x28] sm:$0xff]  ;;  %v2975_v19 = vld [vmem:[#allocation2 + $0xb0] sm:$0xff] }
 0x1a2   : > { %9217 = vmatpush3.msra.mxu0 %v7372_v26  ;;  %8978 = vmatprep.subr.mxu1 %v7323_v33  ;;  %v7357_v26 = vld [vmem:[%s14408_s4 + $0x2b0] sm:$0xff] }
 0x1a3   : > { %9218 = vmatprep.subr.mxu0 %v7371_v42  ;;  %8862 = vmatmul.mubr.f32.gmra.mxu1 %v11165_v47  ;;  %v2376_v47 = vld [vmem:[#allocation2 + $0x109] sm:$0xff] }
 0x1a4   : > { %9102 = vmatmul.mubr.f32.gmra.mxu0 %v11203_v2  ;;  %8864 = vmatprep.mubr.f32.mxu1 %v11172_v7  ;;  %v2957_v7 = vld [vmem:[#allocation2 + $0x20] sm:$0xff]  ;;  %v2959_v2 = vld [vmem:[#allocation2 + $0x30] sm:$0xff] }
 0x1a5   : > { %9104 = vmatprep.mubr.f32.mxu0 %v14501_v50  ;;  %8979 = vmatpush3.msra.mxu1 %v7323_v33  ;;  %v7405_v33 = vld [vmem:[%s14408_s4 + $0x430] sm:$0xff]  ;;  %v2977_v50 = vld [vmem:[#allocation2 + $0xc0] sm:$0xff] }
 0x1a6   : > { %9219 = vmatpush3.msra.mxu0 %v7371_v42  ;;  %8980 = vmatprep.subr.mxu1 %v7322_v45 }
 0x1a7   : > { %9220 = vmatprep.subr.mxu0 %v7370_v48  ;;  %8865 = vmatmul.mubr.f32.gmra.mxu1 %v14502_v57  ;;  %v7356_v57 = vld [vmem:[%s14408_s4 + $0x2a8] sm:$0xff] }
 0x1a8   : > { %9105 = vmatmul.mubr.f32.gmra.mxu0 %v14503_v5  ;;  %8867 = vmatprep.mubr.f32.mxu1 %v14504_v17  ;;  %v7404_v5 = vld [vmem:[%s14408_s4 + $0x428] sm:$0xff] }
 0x1a9   : > { %9107 = vmatprep.mubr.f32.mxu0 %v14505_v22  ;;  %8981 = vmatpush3.msra.mxu1 %v7322_v45  ;;  %v2978_v17 = vld [vmem:[#allocation2 + $0xc8] sm:$0xff] }
 0x1aa   : > { %9221 = vmatpush3.msra.mxu0 %v7370_v48  ;;  %8982 = vmatprep.subr.mxu1 %v7321_v3  ;;  %v2976_v48 = vld [vmem:[#allocation2 + $0xb8] sm:$0xff] }
 0x1ab   : > { %9222 = vmatprep.subr.mxu0 %v7369_v10  ;;  %8868 = vmatmul.mubr.f32.gmra.mxu1 %v14506_v29 }
 0x1ac   : > { %9108 = vmatmul.mubr.f32.gmra.mxu0 %v14507_v34  ;;  %8870 = vmatprep.mubr.f32.mxu1 %v14508_v59  ;;  %v2979_v34 = vld [vmem:[#allocation2 + $0xd0] sm:$0xff]  ;;  %v2980_v59 = vld [vmem:[#allocation2 + $0xd8] sm:$0xff] }
 0x1ad   : > { %9110 = vmatprep.mubr.f32.mxu0 %v11233_v40  ;;  %8983 = vmatpush3.msra.mxu1 %v7321_v3  ;;  %v7365_v40 = vld [vmem:[%s14408_s4 + $0x2f0] sm:$0xff] }
 0x1ae   : > { %9223 = vmatpush3.msra.mxu0 %v7369_v10  ;;  %8984 = vmatprep.subr.mxu1 %v7320_v41 }
 0x1af   : > { %9224 = vmatprep.subr.mxu0 %v7368_v49  ;;  %8871 = vmatmul.mubr.f32.gmra.mxu1 %v14509_v0 }
 0x1b0   : > { %9111 = vmatmul.mubr.f32.gmra.mxu0 %v11239_v39  ;;  %8873 = vmatprep.mubr.f32.mxu1 %v14510_v35  ;;  %v7413_v39 = vld [vmem:[%s14408_s4 + $0x470] sm:$0xff]  ;;  %v7402_v35 = vld [vmem:[%s14408_s4 + $0x418] sm:$0xff] }
 0x1b1   : > { %9113 = vmatprep.mubr.f32.mxu0 %v2375_v12  ;;  %8985 = vmatpush3.msra.mxu1 %v7320_v41  ;;  %v7355_v41 = vld [vmem:[%s14408_s4 + $0x2a0] sm:$0xff] }
 0x1b2   : > { %9225 = vmatpush3.msra.mxu0 %v7368_v49  ;;  %8986 = vmatprep.subr.mxu1 %v7319_v18  ;;  %v7403_v49 = vld [vmem:[%s14408_s4 + $0x420] sm:$0xff] }
 0x1b3   : > { %9226 = vmatprep.subr.mxu0 %v7367_v28  ;;  %8874 = vmatmul.mubr.f32.gmra.mxu1 %v14511_v54 }
 0x1b4   : > { %9114 = vmatmul.mubr.f32.gmra.mxu0 %v2376_v47  ;;  %8988 = vmatprep.mubr.f32.mxu1 %v11249_v23  ;;  %v2964_v23 = vld [vmem:[#allocation2 + $0x58] sm:$0xff] }
 0x1b5   : > { %9228 = vmatprep.mubr.f32.mxu0 %v2957_v7  ;;  %8987 = vmatpush3.msra.mxu1 %v7319_v18  ;;  %v2981_v18 = vld [vmem:[#allocation2 + $0xe0] sm:$0xff] }
 0x1b6   : > { %9227 = vmatpush3.msra.mxu0 %v7367_v28  ;;  %9116 = vmatprep.subr.mxu1 %v7366_v13  ;;  %v7354_v28 = vld [vmem:[%s14408_s4 + $0x298] sm:$0xff] }
 0x1b7   : > { %9356 = vmatprep.subr.mxu0 %v7414_v36  ;;  %8989 = vmatmul.mubr.f32.vlgmr.msra.gmra.mxu1 %v2040_v63  ;;  %v7401_v63 = vld [vmem:[%s14408_s4 + $0x410] sm:$0xff] }
 0x1b8   : > { %9229 = vmatmul.mubr.f32.vlgmr.msra.gmra.mxu0 %v2958_v30  ;;  %8991 = vmatprep.mubr.f32.mxu1 %v2957_v7  ;;  %v2982_v7 = vld [vmem:[#allocation2 + $0xe8] sm:$0xff] }
 0x1b9   : > { %9231 = vmatprep.mubr.f32.mxu0 %v2959_v2  ;;  %9117 = vmatpush3.msra.mxu1 %v7366_v13  ;;  %v2983_v13 = vld [vmem:[#allocation2 + $0xf0] sm:$0xff] }
 0x1ba   : > { %9357 = vmatpush3.msra.mxu0 %v7414_v36  ;;  %9118 = vmatprep.subr.mxu1 %v7365_v40  ;;  %v7353_v36 = vld [vmem:[%s14408_s4 + $0x290] sm:$0xff] }
 0x1bb   : > { %9358 = vmatprep.subr.mxu0 %v7413_v39  ;;  %8992 = vmatmul.mubr.f32.gmra.mxu1 %v2958_v30  ;;  %v11462_v42 = vpop.f32.mrf.mxu1 }
 0x1bc   : > { %9232 = vmatmul.mubr.f32.gmra.mxu0 %v2960_v53  ;;  %8994 = vmatprep.mubr.f32.mxu1 %v2959_v2  ;;  %v11464_v45 = vpop.f32.mrf.mxu0 }
 0x1bd   : > { %9234 = vmatprep.mubr.f32.mxu0 %v2961_v58  ;;  %9119 = vmatpush3.msra.mxu1 %v7365_v40  ;;  %v11472_v3 = vpop.f32.mrf.mxu1  ;;  %v2984_v40 = vld [vmem:[#allocation2 + $0xf8] sm:$0xff] }
 0x1be   : > { %9359 = vmatpush3.msra.mxu0 %v7413_v39  ;;  %9120 = vmatprep.subr.mxu1 %v7364_v61  ;;  %v11474_v10 = vpop.f32.mrf.mxu0 }
 0x1bf   : > { %9360 = vmatprep.subr.mxu0 %v7412_v44  ;;  %8995 = vmatmul.mubr.f32.gmra.mxu1 %v2960_v53  ;;  %14512 = vst [vmem:[#allocation16_spill] sm:$0xff] %v11474_v10  ;;  %v3279_v10 = vld [vmem:[#allocation2 + $0xa1] sm:$0xff] }
 0x1c0   : > { %9235 = vmatmul.mubr.f32.gmra.mxu0 %v2962_v11  ;;  %8997 = vmatprep.mubr.f32.mxu1 %v2961_v58  ;;  %v2985_v58 = vld [vmem:[#allocation2 + $0x100] sm:$0xff] }
 0x1c1   : > { %9237 = vmatprep.mubr.f32.mxu0 %v2963_v21  ;;  %9121 = vmatpush3.msra.mxu1 %v7364_v61  ;;  %v7352_v61 = vld [vmem:[%s14408_s4 + $0x288] sm:$0xff] }
 0x1c2   : > { %9361 = vmatpush3.msra.mxu0 %v7412_v44  ;;  %9122 = vmatprep.subr.mxu1 %v7363_v25  ;;  %v7400_v44 = vld [vmem:[%s14408_s4 + $0x408] sm:$0xff] }
 0x1c3   : > { %9362 = vmatprep.subr.mxu0 %v7411_v16  ;;  %8998 = vmatmul.mubr.f32.gmra.mxu1 %v2962_v11  ;;  %v11476_v22 = vpop.f32.mrf.mxu1  ;;  %v2986_v11 = vld [vmem:[#allocation2 + $0x108] sm:$0xff] }
 0x1c4   : > { %9238 = vmatmul.mubr.f32.gmra.mxu0 %v2964_v23  ;;  %9000 = vmatprep.mubr.f32.mxu1 %v2963_v21  ;;  %v11478_v29 = vpop.f32.mrf.mxu0 }
 0x1c5   : > { %9240 = vmatprep.mubr.f32.mxu0 %v2965_v32  ;;  %9123 = vmatpush3.msra.mxu1 %v7363_v25  ;;  %v11486_v0 = vpop.f32.mrf.mxu1 }
 0x1c6   : > { %9363 = vmatpush3.msra.mxu0 %v7411_v16  ;;  %9124 = vmatprep.subr.mxu1 %v7362_v60  ;;  %v11488_v12 = vpop.f32.mrf.mxu0  ;;  %v7351_v16 = vld [vmem:[%s14408_s4 + $0x280] sm:$0xff] }
 0x1c7   : > { %9364 = vmatprep.subr.mxu0 %v7410_v24  ;;  %9001 = vmatmul.mubr.f32.gmra.mxu1 %v2964_v23  ;;  %14513 = vst [vmem:[#allocation11_spill] sm:$0xff] %v11488_v12  ;;  %v7399_v23 = vld [vmem:[%s14408_s4 + $0x400] sm:$0xff] }
 0x1c8   : > { %9241 = vmatmul.mubr.f32.gmra.mxu0 %v2966_v14  ;;  %9003 = vmatprep.mubr.f32.mxu1 %v2965_v32 }
 0x1c9   : > { %9243 = vmatprep.mubr.f32.mxu0 %v2967_v9  ;;  %9125 = vmatpush3.msra.mxu1 %v7362_v60 }
 0x1ca   : > { %9365 = vmatpush3.msra.mxu0 %v7410_v24  ;;  %9126 = vmatprep.subr.mxu1 %v7361_v20  ;;  %v2651_v24 = vld [vmem:[#allocation2 + $0x12] sm:$0xff] }
 0x1cb   : > { %9366 = vmatprep.subr.mxu0 %v7409_v38  ;;  %9004 = vmatmul.mubr.f32.gmra.mxu1 %v2966_v14  ;;  %v11496_v47 = vpop.f32.mrf.mxu1  ;;  %v3569_v14 = vld [vmem:[#allocation2 + $0x22] sm:$0xff] }
 0x1cc   : > { %9244 = vmatmul.mubr.f32.gmra.mxu0 %v2968_v31  ;;  %9006 = vmatprep.mubr.f32.mxu1 %v2967_v9  ;;  %v11498_v54 = vpop.f32.mrf.mxu0  ;;  %v7398_v9 = vld [vmem:[%s14408_s4 + $0x3f8] sm:$0xff] }
 0x1cd   : > { %9246 = vmatprep.mubr.f32.mxu0 %v2969_v46  ;;  %9127 = vmatpush3.msra.mxu1 %v7361_v20  ;;  %v11506_v30 = vpop.f32.mrf.mxu1 }
 0x1ce   : > { %9367 = vmatpush3.msra.mxu0 %v7409_v38  ;;  %9128 = vmatprep.subr.mxu1 %v7360_v56  ;;  %v11508_v2 = vpop.f32.mrf.mxu0  ;;  %v2652_v38 = vld [vmem:[#allocation2 + $0x1a] sm:$0xff] }
 0x1cf   : > { %9368 = vmatprep.subr.mxu0 %v7408_v4  ;;  %9007 = vmatmul.mubr.f32.gmra.mxu1 %v2968_v31  ;;  %14514 = vst [vmem:[#allocation18_spill] sm:$0xff] %v11508_v2  ;;  %v3570_v31 = vld [vmem:[#allocation2 + $0x2a] sm:$0xff]  ;;  %v3275_v2 = vld [vmem:[#allocation2 + $0x81] sm:$0xff] }
 0x1d0   : > { %9247 = vmatmul.mubr.f32.gmra.mxu0 %v2970_v1  ;;  %9009 = vmatprep.mubr.f32.mxu1 %v2969_v46 }
 0x1d1   : > { %9249 = vmatprep.mubr.f32.mxu0 %v2971_v27  ;;  %9129 = vmatpush3.msra.mxu1 %v7360_v56  ;;  %v3571_v56 = vld [vmem:[#allocation2 + $0x32] sm:$0xff] }
 0x1d2   : > { %9369 = vmatpush3.msra.mxu0 %v7408_v4  ;;  %9130 = vmatprep.subr.mxu1 %v7359_v37  ;;  %v7397_v4 = vld [vmem:[%s14408_s4 + $0x3f0] sm:$0xff] }
 0x1d3   : > { %9370 = vmatprep.subr.mxu0 %v7407_v43  ;;  %9010 = vmatmul.mubr.f32.gmra.mxu1 %v2970_v1  ;;  %v11510_v39 = vpop.f32.mrf.mxu1  ;;  %v3572_v1 = vld [vmem:[#allocation2 + $0x3a] sm:$0xff] }
 0x1d4   : > { %9250 = vmatmul.mubr.f32.gmra.mxu0 %v2972_v51  ;;  %9012 = vmatprep.mubr.f32.mxu1 %v2971_v27  ;;  %v11512_v53 = vpop.f32.mrf.mxu0 }
 0x1d5   : > { %9252 = vmatprep.mubr.f32.mxu0 %v2973_v55  ;;  %9131 = vmatpush3.msra.mxu1 %v7359_v37  ;;  %v11520_v21 = vpop.f32.mrf.mxu1 }
 0x1d6   : > { %9371 = vmatpush3.msra.mxu0 %v7407_v43  ;;  %9132 = vmatprep.subr.mxu1 %v7358_v62  ;;  %14515 = vst [vmem:[#allocation12_spill] sm:$0xff] %v11520_v21  ;;  %v11522_v25 = vpop.f32.mrf.mxu0  ;;  %v3573_v43 = vld [vmem:[#allocation2 + $0x42] sm:$0xff] }
 0x1d7   : > { %9372 = vmatprep.subr.mxu0 %v7406_v6  ;;  %9013 = vmatmul.mubr.f32.gmra.mxu1 %v2972_v51  ;;  %14516 = vst [vmem:[#allocation20_spill] sm:$0xff] %v11522_v25  ;;  %v7396_v51 = vld [vmem:[%s14408_s4 + $0x3e8] sm:$0xff] }
 0x1d8   : > { %9253 = vmatmul.mubr.f32.gmra.mxu0 %v2974_v15  ;;  %9015 = vmatprep.mubr.f32.mxu1 %v2973_v55  ;;  %v3271_v25 = vld [vmem:[#allocation2 + $0x61] sm:$0xff] }
 0x1d9   : > { %9255 = vmatprep.mubr.f32.mxu0 %v2975_v19  ;;  %9133 = vmatpush3.msra.mxu1 %v7358_v62 }
 0x1da   : > { %9373 = vmatpush3.msra.mxu0 %v7406_v6  ;;  %9134 = vmatprep.subr.mxu1 %v7357_v26  ;;  %v3574_v6 = vld [vmem:[#allocation2 + $0x4a] sm:$0xff] }
 0x1db   : > { %9374 = vmatprep.subr.mxu0 %v7405_v33  ;;  %9016 = vmatmul.mubr.f32.gmra.mxu1 %v2974_v15  ;;  %v11531_v32 = vpop.f32.mrf.mxu1  ;;  %v3575_v15 = vld [vmem:[#allocation2 + $0x52] sm:$0xff] }
 0x1dc   : > { %9256 = vmatmul.mubr.f32.gmra.mxu0 %v2976_v48  ;;  %9018 = vmatprep.mubr.f32.mxu1 %v2975_v19  ;;  %v11533_v60 = vpop.f32.mrf.mxu0  ;;  %v7395_v19 = vld [vmem:[%s14408_s4 + $0x3e0] sm:$0xff] }
 0x1dd   : > { %9258 = vmatprep.mubr.f32.mxu0 %v2977_v50  ;;  %9135 = vmatpush3.msra.mxu1 %v7357_v26 }
 0x1de   : > { %9375 = vmatpush3.msra.mxu0 %v7405_v33  ;;  %9136 = vmatprep.subr.mxu1 %v7356_v57  ;;  %v11541_v20 = vpop.f32.mrf.mxu0 }
 0x1df   : > { %9376 = vmatprep.subr.mxu0 %v7404_v5  ;;  %9019 = vmatmul.mubr.f32.gmra.mxu1 %v2976_v48  ;;  %14518 = vst [vmem:[#allocation21_spill] sm:$0xff] %v11541_v20  ;;  %v3576_v48 = vld [vmem:[#allocation2 + $0x5a] sm:$0xff] }
 0x1e0   : > { %9259 = vmatmul.mubr.f32.gmra.mxu0 %v2978_v17  ;;  %9021 = vmatprep.mubr.f32.mxu1 %v2977_v50 }
 0x1e1   : > { %9261 = vmatprep.mubr.f32.mxu0 %v2979_v34  ;;  %9137 = vmatpush3.msra.mxu1 %v7356_v57 }
 0x1e2   : > { %9377 = vmatpush3.msra.mxu0 %v7404_v5  ;;  %9138 = vmatprep.subr.mxu1 %v7355_v41  ;;  %v3577_v5 = vld [vmem:[#allocation2 + $0x62] sm:$0xff] }
 0x1e3   : > { %9378 = vmatprep.subr.mxu0 %v7403_v49  ;;  %9022 = vmatmul.mubr.f32.gmra.mxu1 %v2978_v17  ;;  %v7394_v17 = vld [vmem:[%s14408_s4 + $0x3d8] sm:$0xff] }
 0x1e4   : > { %9262 = vmatmul.mubr.f32.gmra.mxu0 %v2980_v59  ;;  %9024 = vmatprep.mubr.f32.mxu1 %v2979_v34  ;;  %v3578_v34 = vld [vmem:[#allocation2 + $0x6a] sm:$0xff] }
 0x1e5   : > { %9264 = vmatprep.mubr.f32.mxu0 %v2981_v18  ;;  %9139 = vmatpush3.msra.mxu1 %v7355_v41 }
 0x1e6   : > { %9379 = vmatpush3.msra.mxu0 %v7403_v49  ;;  %9140 = vmatprep.subr.mxu1 %v7354_v28 }
 0x1e7   : > { %9380 = vmatprep.subr.mxu0 %v7402_v35  ;;  %9025 = vmatmul.mubr.f32.gmra.mxu1 %v2980_v59  ;;  %v3579_v59 = vld [vmem:[#allocation2 + $0x72] sm:$0xff] }
 0x1e8   : > { %9265 = vmatmul.mubr.f32.gmra.mxu0 %v2982_v7  ;;  %9027 = vmatprep.mubr.f32.mxu1 %v2981_v18  ;;  %v7393_v18 = vld [vmem:[%s14408_s4 + $0x3d0] sm:$0xff] }
 0x1e9   : > { %9267 = vmatprep.mubr.f32.mxu0 %v2983_v13  ;;  %9141 = vmatpush3.msra.mxu1 %v7354_v28 }
 0x1ea   : > { %9381 = vmatpush3.msra.mxu0 %v7402_v35  ;;  %9142 = vmatprep.subr.mxu1 %v7353_v36 }
 0x1eb   : > { %9382 = vmatprep.subr.mxu0 %v7401_v63  ;;  %9028 = vmatmul.mubr.f32.gmra.mxu1 %v2982_v7  ;;  %v3580_v7 = vld [vmem:[#allocation2 + $0x7a] sm:$0xff] }
 0x1ec   : > { %9268 = vmatmul.mubr.f32.gmra.mxu0 %v2984_v40  ;;  %9030 = vmatprep.mubr.f32.mxu1 %v2983_v13  ;;  %v3581_v13 = vld [vmem:[#allocation2 + $0x82] sm:$0xff] }
 0x1ed   : > { %9270 = vmatprep.mubr.f32.mxu0 %v2985_v58  ;;  %9143 = vmatpush3.msra.mxu1 %v7353_v36  ;;  %v7392_v36 = vld [vmem:[%s14408_s4 + $0x3c8] sm:$0xff] }
 0x1ee   : > { %9383 = vmatpush3.msra.mxu0 %v7401_v63  ;;  %9144 = vmatprep.subr.mxu1 %v7352_v61 }
 0x1ef   : > { %9384 = vmatprep.subr.mxu0 %v7400_v44  ;;  %9031 = vmatmul.mubr.f32.gmra.mxu1 %v2984_v40 }
 0x1f0   : > { %9271 = vmatmul.mubr.f32.gmra.mxu0 %v2986_v11  ;;  %9033 = vmatprep.mubr.f32.mxu1 %v2985_v58  ;;  %v3582_v58 = vld [vmem:[#allocation2 + $0x8a] sm:$0xff] }
 0x1f1   : > { %9273 = vmatprep.mubr.f32.mxu0 %v11236_v8  ;;  %9145 = vmatpush3.msra.mxu1 %v7352_v61  ;;  %v11539_v8 = vpop.f32.mrf.mxu1 }
 0x1f2   : > { %9385 = vmatpush3.msra.mxu0 %v7400_v44  ;;  %9146 = vmatprep.subr.mxu1 %v7351_v16  ;;  %14517 = vst [vmem:[#allocation13_spill] sm:$0xff] %v11539_v8 }
 0x1f3   : > { %9386 = vmatprep.subr.mxu0 %v7399_v23  ;;  %9034 = vmatmul.mubr.f32.gmra.mxu1 %v2986_v11  ;;  %v11543_v46 = vpop.f32.mrf.mxu1  ;;  %v3583_v11 = vld [vmem:[#allocation2 + $0x92] sm:$0xff] }
 0x1f4   : > { %9274 = vmatmul.mubr.f32.gmra.mxu0 %v11244_v52  ;;  %9148 = vmatprep.mubr.f32.mxu1 %v2651_v24  ;;  %v11545_v52 = vpop.f32.mrf.mxu0 }
 0x1f5   : > { %9388 = vmatprep.mubr.f32.mxu0 %v3569_v14  ;;  %9147 = vmatpush3.msra.mxu1 %v7351_v16  ;;  %v11550_v27 = vpop.f32.mrf.mxu1  ;;  %v7391_v16 = vld [vmem:[%s14408_s4 + $0x3c0] sm:$0xff] }
 0x1f6   : > { %9387 = vmatpush3.msra.mxu0 %v7399_v23  ;;  %9276 = vmatprep.subr.mxu1 %v7398_v9  ;;  %14519 = vst [vmem:[#allocation14_spill] sm:$0xff] %v11550_v27  ;;  %v11552_v37 = vpop.f32.mrf.mxu0  ;;  %v3584_v23 = vld [vmem:[#allocation2 + $0x9a] sm:$0xff] }
 0x1f7   : > { %9149 = vmatmul.mubr.f32.vlgmr.msra.gmra.mxu1 %v2652_v38  ;;  %14520 = vst [vmem:[#allocation15_spill] sm:$0xff] %v11552_v37  ;;  %v11557_v55 = vpop.f32.mrf.mxu1  ;;  %v7390_v38 = vld [vmem:[%s14408_s4 + $0x3b8] sm:$0xff] }
 0x1f8   : > { %9389 = vmatmul.mubr.f32.vlgmr.msra.gmra.mxu0 %v3570_v31  ;;  %9151 = vmatprep.mubr.f32.mxu1 %v3569_v14  ;;  %v11559_v62 = vpop.f32.mrf.mxu0 }
 0x1f9   : > { %9391 = vmatprep.mubr.f32.mxu0 %v3571_v56  ;;  %9277 = vmatpush3.msra.mxu1 %v7398_v9  ;;  %v11564_v26 = vpop.f32.mrf.mxu1  ;;  %v3585_v9 = vld [vmem:[#allocation2 + $0xa2] sm:$0xff] }
 0x1fa   : > { %9278 = vmatprep.subr.mxu1 %v7397_v4  ;;  %14521 = vst [vmem:[#allocation17_spill] sm:$0xff] %v11564_v26  ;;  %v11566_v33 = vpop.f32.mrf.mxu0 }
 0x1fb   : > { %9152 = vmatmul.mubr.f32.gmra.mxu1 %v3570_v31  ;;  %14522 = vst [vmem:[#allocation19_spill] sm:$0xff] %v11566_v33  ;;  %v11568_v50 = vpop.f32.mrf.mxu1  ;;  %v3265_v33 = vld [vmem:[#allocation2 + $0x31] sm:$0xff] }
 0x1fc   : > { %9392 = vmatmul.mubr.f32.gmra.mxu0 %v3572_v1  ;;  %9154 = vmatprep.mubr.f32.mxu1 %v3571_v56  ;;  %v11570_v57 = vpop.f32.mrf.mxu0 }
 0x1fd   : > { %9394 = vmatprep.mubr.f32.mxu0 %v3573_v43  ;;  %9279 = vmatpush3.msra.mxu1 %v7397_v4  ;;  %v11575_v41 = vpop.f32.mrf.mxu1  ;;  %v3586_v4 = vld [vmem:[#allocation2 + $0xaa] sm:$0xff] }
 0x1fe   : > { %9280 = vmatprep.subr.mxu1 %v7396_v51  ;;  %14523 = vst [vmem:[#allocation22_spill] sm:$0xff] %v11575_v41  ;;  %v11577_v49 = vpop.f32.mrf.mxu0  ;;  %v3281_v41 = vld [vmem:[#allocation2 + $0xb1] sm:$0xff] }
 0x1ff   : > { %9155 = vmatmul.mubr.f32.gmra.mxu1 %v3572_v1  ;;  %14524 = vst [vmem:[#allocation23_spill] sm:$0xff] %v11577_v49  ;;  %v11582_v28 = vpop.f32.mrf.mxu1  ;;  %v3587_v1 = vld [vmem:[#allocation2 + $0xb2] sm:$0xff]  ;;  %v3264_v49 = vld [vmem:[#allocation2 + $0x29] sm:$0xff] }
 0x200   : > { %9395 = vmatmul.mubr.f32.gmra.mxu0 %v3574_v6  ;;  %9157 = vmatprep.mubr.f32.mxu1 %v3573_v43  ;;  %v11584_v35 = vpop.f32.mrf.mxu0  ;;  %v7389_v43 = vld [vmem:[%s14408_s4 + $0x3b0] sm:$0xff] }
 0x201   : > { %9397 = vmatprep.mubr.f32.mxu0 %v3575_v15  ;;  %9281 = vmatpush3.msra.mxu1 %v7396_v51  ;;  %v11589_v63 = vpop.f32.mrf.mxu1 }
 0x202   : > { %9282 = vmatprep.subr.mxu1 %v7395_v19  ;;  %14525 = vst [vmem:[#allocation24_spill] sm:$0xff] %v11589_v63  ;;  %v11591_v40 = vpop.f32.mrf.mxu0 }
 0x203   : > { %9158 = vmatmul.mubr.f32.gmra.mxu1 %v3574_v6  ;;  %14526 = vst [vmem:[#allocation25_spill] sm:$0xff] %v11591_v40  ;;  %v11593_v61 = vpop.f32.mrf.mxu1 }
 0x204   : > { %9398 = vmatmul.mubr.f32.gmra.mxu0 %v3576_v48  ;;  %9160 = vmatprep.mubr.f32.mxu1 %v3575_v15  ;;  %v11595_v44 = vpop.f32.mrf.mxu0  ;;  %v3588_v15 = vld [vmem:[#allocation2 + $0xba] sm:$0xff] }
 0x205   : > { %9400 = vmatprep.mubr.f32.mxu0 %v3577_v5  ;;  %9283 = vmatpush3.msra.mxu1 %v7395_v19  ;;  %v11600_v24 = vpop.f32.mrf.mxu1 }
 0x206   : > { %9284 = vmatprep.subr.mxu1 %v7394_v17  ;;  %14527 = vst [vmem:[#allocation26_spill] sm:$0xff] %v11600_v24  ;;  %v11602_v14 = vpop.f32.mrf.mxu0 }
 0x207   : > { %9161 = vmatmul.mubr.f32.gmra.mxu1 %v3576_v48  ;;  %14528 = vst [vmem:[#allocation27_spill] sm:$0xff] %v11602_v14 }
 0x208   : > { %9401 = vmatmul.mubr.f32.gmra.mxu0 %v3578_v34  ;;  %9163 = vmatprep.mubr.f32.mxu1 %v3577_v5  ;;  %v3589_v5 = vld [vmem:[#allocation2 + $0xc2] sm:$0xff] }
 0x209   : > { %9403 = vmatprep.mubr.f32.mxu0 %v3579_v59  ;;  %9285 = vmatpush3.msra.mxu1 %v7394_v17  ;;  %v7388_v17 = vld [vmem:[%s14408_s4 + $0x3a8] sm:$0xff] }
 0x20a   : > { %9286 = vmatprep.subr.mxu1 %v7393_v18 }
 0x20b   : > { %9164 = vmatmul.mubr.f32.gmra.mxu1 %v3578_v34  ;;  %v11607_v31 = vpop.f32.mrf.mxu1  ;;  %v3590_v34 = vld [vmem:[#allocation2 + $0xca] sm:$0xff] }
 0x20c   : > { %9404 = vmatmul.mubr.f32.gmra.mxu0 %v3580_v7  ;;  %9166 = vmatprep.mubr.f32.mxu1 %v3579_v59  ;;  %v11609_v56 = vpop.f32.mrf.mxu0 }
 0x20d   : > { %9406 = vmatprep.mubr.f32.mxu0 %v3581_v13  ;;  %9287 = vmatpush3.msra.mxu1 %v7393_v18  ;;  %v11614_v51 = vpop.f32.mrf.mxu1 }
 0x20e   : > { %9288 = vmatprep.subr.mxu1 %v7392_v36  ;;  %14529 = vst [vmem:[#allocation28_spill] sm:$0xff] %v11614_v51  ;;  %v11616_v6 = vpop.f32.mrf.mxu0  ;;  %v3277_v51 = vld [vmem:[#allocation2 + $0x91] sm:$0xff] }
 0x20f   : > { %9167 = vmatmul.mubr.f32.gmra.mxu1 %v3580_v7  ;;  %14530 = vst [vmem:[#allocation29_spill] sm:$0xff] %v11616_v6  ;;  %v3591_v7 = vld [vmem:[#allocation2 + $0xd2] sm:$0xff]  ;;  %v3600_v6 = vld [vmem:[#allocation2 + $0x11a] sm:$0xff] }
 0x210   : > { %9407 = vmatmul.mubr.f32.gmra.mxu0 %v3582_v58  ;;  %9169 = vmatprep.mubr.f32.mxu1 %v3581_v13  ;;  %v7387_v13 = vld [vmem:[%s14408_s4 + $0x3a0] sm:$0xff] }
 0x211   : > { %9409 = vmatprep.mubr.f32.mxu0 %v3583_v11  ;;  %9289 = vmatpush3.msra.mxu1 %v7392_v36 }
 0x212   : > { %9290 = vmatprep.subr.mxu1 %v7391_v16 }
 0x213   : > { %9170 = vmatmul.mubr.f32.gmra.mxu1 %v3582_v58  ;;  %v11618_v19 = vpop.f32.mrf.mxu1 }
 0x214   : > { %9410 = vmatmul.mubr.f32.gmra.mxu0 %v3584_v23  ;;  %9172 = vmatprep.mubr.f32.mxu1 %v3583_v11  ;;  %v11620_v48 = vpop.f32.mrf.mxu0  ;;  %v3592_v11 = vld [vmem:[#allocation2 + $0xda] sm:$0xff] }
 0x215   : > { %9412 = vmatprep.mubr.f32.mxu0 %v3585_v9  ;;  %9291 = vmatpush3.msra.mxu1 %v7391_v16  ;;  %v11625_v59 = vpop.f32.mrf.mxu1  ;;  %v3593_v16 = vld [vmem:[#allocation2 + $0xe2] sm:$0xff] }
 0x216   : > { %9292 = vmatprep.subr.mxu1 %v7390_v38  ;;  %14531 = vst [vmem:[#allocation30_spill] sm:$0xff] %v11625_v59  ;;  %v11627_v18 = vpop.f32.mrf.mxu0 }
 0x217   : > { %9173 = vmatmul.mubr.f32.gmra.mxu1 %v3584_v23  ;;  %14532 = vst [vmem:[#allocation31_spill] sm:$0xff] %v11627_v18  ;;  %v7386_v23 = vld [vmem:[%s14408_s4 + $0x398] sm:$0xff] }
 0x218   : > { %9413 = vmatmul.mubr.f32.gmra.mxu0 %v3586_v4  ;;  %9175 = vmatprep.mubr.f32.mxu1 %v3585_v9  ;;  %v3599_v18 = vld [vmem:[#allocation2 + $0x112] sm:$0xff] }
 0x219   : > { %9415 = vmatprep.mubr.f32.mxu0 %v3587_v1  ;;  %9293 = vmatpush3.msra.mxu1 %v7390_v38 }
 0x21a   : > { %9294 = vmatprep.subr.mxu1 %v7389_v43 }
 0x21b   : > { %9176 = vmatmul.mubr.f32.gmra.mxu1 %v3586_v4  ;;  %v11632_v36 = vpop.f32.mrf.mxu1  ;;  %v3594_v4 = vld [vmem:[#allocation2 + $0xea] sm:$0xff] }
 0x21c   : > { %9416 = vmatmul.mubr.f32.gmra.mxu0 %v3588_v15  ;;  %9178 = vmatprep.mubr.f32.mxu1 %v3587_v1  ;;  %v11634_v58 = vpop.f32.mrf.mxu0 }
 0x21d   : > { %9418 = vmatprep.mubr.f32.mxu0 %v3589_v5  ;;  %9295 = vmatpush3.msra.mxu1 %v7389_v43  ;;  %v11639_v9 = vpop.f32.mrf.mxu1 }
 0x21e   : > { %9296 = vmatprep.subr.mxu1 %v7388_v17  ;;  %14533 = vst [vmem:[#allocation32_spill] sm:$0xff] %v11639_v9  ;;  %v11641_v38 = vpop.f32.mrf.mxu0  ;;  %v3273_v9 = vld [vmem:[#allocation2 + $0x71] sm:$0xff] }
 0x21f   : > { %9179 = vmatmul.mubr.f32.gmra.mxu1 %v3588_v15  ;;  %14534 = vst [vmem:[#allocation33_spill] sm:$0xff] %v11641_v38  ;;  %v3595_v15 = vld [vmem:[#allocation2 + $0xf2] sm:$0xff] }
 0x220   : > { %9419 = vmatmul.mubr.f32.gmra.mxu0 %v3590_v34  ;;  %9181 = vmatprep.mubr.f32.mxu1 %v3589_v5  ;;  %v7385_v5 = vld [vmem:[%s14408_s4 + $0x390] sm:$0xff] }
 0x221   : > { %9421 = vmatprep.mubr.f32.mxu0 %v3591_v7  ;;  %9297 = vmatpush3.msra.mxu1 %v7388_v17  ;;  %v3596_v17 = vld [vmem:[#allocation2 + $0xfa] sm:$0xff] }
 0x222   : > { %9298 = vmatprep.subr.mxu1 %v7387_v13 }
 0x223   : > { %9182 = vmatmul.mubr.f32.gmra.mxu1 %v3590_v34  ;;  %v11643_v1 = vpop.f32.mrf.mxu1 }
 0x224   : > { %9422 = vmatmul.mubr.f32.gmra.mxu0 %v3592_v11  ;;  %9184 = vmatprep.mubr.f32.mxu1 %v3591_v7  ;;  %v11645_v43 = vpop.f32.mrf.mxu0 }
 0x225   : > { %9424 = vmatprep.mubr.f32.mxu0 %v3593_v16  ;;  %9299 = vmatpush3.msra.mxu1 %v7387_v13  ;;  %v11650_v34 = vpop.f32.mrf.mxu1  ;;  %v3597_v13 = vld [vmem:[#allocation2 + $0x102] sm:$0xff] }
 0x226   : > { %9300 = vmatprep.subr.mxu1 %v7386_v23  ;;  %14535 = vst [vmem:[#allocation34_spill] sm:$0xff] %v11650_v34  ;;  %v11652_v7 = vpop.f32.mrf.mxu0 }
 0x227   : > { %9185 = vmatmul.mubr.f32.gmra.mxu1 %v3592_v11  ;;  %14536 = vst [vmem:[#allocation35_spill] sm:$0xff] %v11652_v7  ;;  %v7384_v11 = vld [vmem:[%s14408_s4 + $0x388] sm:$0xff] }
 0x228   : > { %9425 = vmatmul.mubr.f32.gmra.mxu0 %v3594_v4  ;;  %9187 = vmatprep.mubr.f32.mxu1 %v3593_v16 }
 0x229   : > { %9427 = vmatprep.mubr.f32.mxu0 %v3595_v15  ;;  %9301 = vmatpush3.msra.mxu1 %v7386_v23  ;;  %v3598_v23 = vld [vmem:[#allocation2 + $0x10a] sm:$0xff] }
 0x22a   : > { %9302 = vmatprep.subr.mxu1 %v7385_v5 }
 0x22b   : > { %9188 = vmatmul.mubr.f32.gmra.mxu1 %v3594_v4  ;;  %v7383_v4 = vld [vmem:[%s14408_s4 + $0x380] sm:$0xff] }
 0x22c   : > { %9428 = vmatmul.mubr.f32.gmra.mxu0 %v3596_v17  ;;  %9190 = vmatprep.mubr.f32.mxu1 %v3595_v15  ;;  %v11657_v38 = vpop.f32.mrf.mxu1 }
 0x22d   : > { %9430 = vmatprep.mubr.f32.mxu0 %v3597_v13  ;;  %v11659_v16 = vpop.f32.mrf.mxu0  ;;  %9303 = vmatpush3.msra.mxu1 %v7385_v5 }
 0x22e   : > { %9304 = vmatprep.subr.mxu1 %v7384_v11  ;;  %v11664_v7 = vpop.f32.mrf.mxu1 }
 0x22f   : > { %9191 = vmatmul.mubr.f32.gmra.mxu1 %v3596_v17  ;;  %14537 = vst [vmem:[#allocation36_spill] sm:$0xff] %v11664_v7  ;;  %v11666_v15 = vpop.f32.mrf.mxu0  ;;  %v3263_v17 = vld [vmem:[#allocation2 + $0x21] sm:$0xff] }
 0x230   : > { %9431 = vmatmul.mubr.f32.gmra.mxu0 %v3598_v23  ;;  %9193 = vmatprep.mubr.f32.mxu1 %v3597_v13  ;;  %14538 = vst [vmem:[#allocation37_spill] sm:$0xff] %v11666_v15 }
 0x231   : > { %9433 = vmatprep.mubr.f32.mxu0 %v3599_v18  ;;  %9305 = vmatpush3.msra.mxu1 %v7384_v11  ;;  %v10275_v18 = vld [vmem:[#allocation5] sm:$0xff] }
 0x232   : > { %9306 = vmatprep.subr.mxu1 %v7383_v4 }
 0x233   : > { %v11668_v14 = vpop.f32.mrf.mxu1  ;;  %9194 = vmatmul.mubr.f32.gmra.mxu1 %v3598_v23  ;;  %v3266_v23 = vld [vmem:[#allocation2 + $0x39] sm:$0xff] }
 0x234   : > { %v11670_v5 = vpop.f32.mrf.mxu0  ;;  %9434 = vmatmul.mubr.f32.gmra.mxu0 %v3600_v6  ;;  %9308 = vmatprep.mubr.f32.mxu1 %v3263_v17 }
 0x235   : > { %9307 = vmatpush3.msra.mxu1 %v7383_v4  ;;  %v11672_v40 = vpop.f32.mrf.mxu1 }
 0x236   : > { %14539 = vst [vmem:[#allocation38_spill] sm:$0xff] %v11672_v40  ;;  %v11674_v13 = vpop.f32.mrf.mxu0  ;;  %4389 = vmatprep.subr.mxu1 %v10275_v18  ;;  %v3269_v40 = vld [vmem:[#allocation2 + $0x51] sm:$0xff] }
 0x237   : > { %14540 = vst [vmem:[#allocation39_spill] sm:$0xff] %v11674_v13  ;;  %v11676_v15 = vpop.f32.mrf.mxu1  ;;  %9309 = vmatmul.mubr.f32.vlgmr.msra.gmra.mxu1 %v3264_v49  ;;  %v3267_v13 = vld [vmem:[#allocation2 + $0x41] sm:$0xff] }
 0x238   : > { %v11678_v11 = vpop.f32.mrf.mxu0  ;;  %9311 = vmatprep.mubr.f32.mxu1 %v3265_v33 }
 0x239   : > { %14541 = vst [vmem:[#allocation40_spill] sm:$0xff] %v11678_v11  ;;  %v11680_v37 = vpop.f32.mrf.mxu1  ;;  %v3268_v11 = vld [vmem:[#allocation2 + $0x49] sm:$0xff] }
 0x23a   : > { %v11682_v6 = vpop.f32.mrf.mxu0 }
 0x23b   : > { %14542 = vst [vmem:[#allocation41_spill] sm:$0xff] %v11682_v6  ;;  %v11684_v4 = vpop.f32.mrf.mxu1  ;;  %9312 = vmatmul.mubr.f32.gmra.mxu1 %v3266_v23 }
 0x23c   : > { %v11686_v17 = vpop.f32.mrf.mxu0  ;;  %9314 = vmatprep.mubr.f32.mxu1 %v3267_v13 }
 0x23d   : > { %14543 = vst [vmem:[#allocation42_spill] sm:$0xff] %v11686_v17  ;;  %v11688_v18 = vpop.f32.mrf.mxu1  ;;  %v3270_v17 = vld [vmem:[#allocation2 + $0x59] sm:$0xff] }
 0x23e   : > { %v11690_v20 = vpop.f32.mrf.mxu0 }
 0x23f   : > { %14544 = vst [vmem:[#allocation43_spill] sm:$0xff] %v11690_v20  ;;  %v11692_v49 = vpop.f32.mrf.mxu1  ;;  %9315 = vmatmul.mubr.f32.gmra.mxu1 %v3268_v11 }
 0x240   : > { %v11694_v33 = vpop.f32.mrf.mxu0  ;;  %9317 = vmatprep.mubr.f32.mxu1 %v3269_v40 }
 0x241   : > { %14545 = vst [vmem:[#allocation44_spill] sm:$0xff] %v11694_v33  ;;  %v11696_v6 = vpop.f32.mrf.mxu1  ;;  %v3272_v33 = vld [vmem:[#allocation2 + $0x69] sm:$0xff] }
 0x242   : > { %v11698_v7 = vpop.f32.mrf.mxu0 }
 0x243   : > { %14546 = vst [vmem:[#allocation45_spill] sm:$0xff] %v11698_v7  ;;  %v11700_v23 = vpop.f32.mrf.mxu1  ;;  %9318 = vmatmul.mubr.f32.gmra.mxu1 %v3270_v17 }
 0x244   : > { %v11702_v13 = vpop.f32.mrf.mxu0  ;;  %9320 = vmatprep.mubr.f32.mxu1 %v3271_v25 }
 0x245   : > { %14547 = vst [vmem:[#allocation46_spill] sm:$0xff] %v11702_v13  ;;  %v11704_v20 = vpop.f32.mrf.mxu1  ;;  %v3274_v13 = vld [vmem:[#allocation2 + $0x79] sm:$0xff] }
 0x246   : > { %14548 = vst [vmem:[#allocation47_spill] sm:$0xff] %v11704_v20  ;;  %v11706_v34 = vpop.f32.mrf.mxu0 }
 0x247   : > { %14549 = vst [vmem:[#allocation48_spill] sm:$0xff] %v11706_v34  ;;  %v11708_v11 = vpop.f32.mrf.mxu1  ;;  %9321 = vmatmul.mubr.f32.gmra.mxu1 %v3272_v33 }
 0x248   : > { %v11710_v40 = vpop.f32.mrf.mxu0  ;;  %9323 = vmatprep.mubr.f32.mxu1 %v3273_v9 }
 0x249   : > { %14550 = vst [vmem:[#allocation49_spill] sm:$0xff] %v11710_v40  ;;  %v11712_v7 = vpop.f32.mrf.mxu1  ;;  %v3276_v40 = vld [vmem:[#allocation2 + $0x89] sm:$0xff] }
 0x24a   : > { %14551 = vst [vmem:[#allocation50_spill] sm:$0xff] %v11712_v7  ;;  %v11714_v59 = vpop.f32.mrf.mxu0 }
 0x24b   : > { %14552 = vst [vmem:[#allocation51_spill] sm:$0xff] %v11714_v59  ;;  %v11716_v17 = vpop.f32.mrf.mxu1  ;;  %9324 = vmatmul.mubr.f32.gmra.mxu1 %v3274_v13 }
 0x24c   : > { %v11718_v25 = vpop.f32.mrf.mxu0  ;;  %9326 = vmatprep.mubr.f32.mxu1 %v3275_v2 }
 0x24d   : > { %14553 = vst [vmem:[#allocation52_spill] sm:$0xff] %v11718_v25  ;;  %v11720_v34 = vpop.f32.mrf.mxu1  ;;  %v3278_v25 = vld [vmem:[#allocation2 + $0x99] sm:$0xff] }
 0x24e   : > { %14554 = vst [vmem:[#allocation53_spill] sm:$0xff] %v11720_v34  ;;  %v11722_v12 = vpop.f32.mrf.mxu0 }
 0x24f   : > { %14555 = vst [vmem:[#allocation54_spill] sm:$0xff] %v11722_v12  ;;  %v11724_v33 = vpop.f32.mrf.mxu1  ;;  %9327 = vmatmul.mubr.f32.gmra.mxu1 %v3276_v40 }
 0x250   : > { %v11726_v9 = vpop.f32.mrf.mxu0  ;;  %9329 = vmatprep.mubr.f32.mxu1 %v3277_v51 }
 0x251   : > { %14556 = vst [vmem:[#allocation55_spill] sm:$0xff] %v11726_v9  ;;  %v11728_v59 = vpop.f32.mrf.mxu1  ;;  %v3280_v9 = vld [vmem:[#allocation2 + $0xa9] sm:$0xff] }
 0x252   : > { %14557 = vst [vmem:[#allocation56_spill] sm:$0xff] %v11728_v59  ;;  %v11730_v24 = vpop.f32.mrf.mxu0 }
 0x253   : > { %14558 = vst [vmem:[#allocation57_spill] sm:$0xff] %v11730_v24  ;;  %v11732_v13 = vpop.f32.mrf.mxu1  ;;  %9330 = vmatmul.mubr.f32.gmra.mxu1 %v3278_v25 }
 0x254   : > { %v11734_v2 = vpop.f32.mrf.mxu0  ;;  %9332 = vmatprep.mubr.f32.mxu1 %v3279_v10 }
 0x255   : > { %14559 = vst [vmem:[#allocation58_spill] sm:$0xff] %v11734_v2  ;;  %v11736_v12 = vpop.f32.mrf.mxu1  ;;  %v3282_v2 = vld [vmem:[#allocation2 + $0xb9] sm:$0xff] }
 0x256   : > { %14560 = vst [vmem:[#allocation59_spill] sm:$0xff] %v11736_v12  ;;  %v11738_v63 = vpop.f32.mrf.mxu0  ;;  %v3283_v12 = vld [vmem:[#allocation2 + $0xc1] sm:$0xff] }
 0x257   : > { %14561 = vst [vmem:[#allocation60_spill] sm:$0xff] %v11738_v63  ;;  %v11740_v40 = vpop.f32.mrf.mxu1  ;;  %9333 = vmatmul.mubr.f32.gmra.mxu1 %v3280_v9 }
 0x258   : > { %v11742_v51 = vpop.f32.mrf.mxu0  ;;  %9335 = vmatprep.mubr.f32.mxu1 %v3281_v41 }
 0x259   : > { %14562 = vst [vmem:[#allocation61_spill] sm:$0xff] %v11742_v51  ;;  %v11744_v24 = vpop.f32.mrf.mxu1  ;;  %v3284_v51 = vld [vmem:[#allocation2 + $0xc9] sm:$0xff] }
 0x25a   : > { %14563 = vst [vmem:[#allocation62_spill] sm:$0xff] %v11744_v24  ;;  %v11746_v59 = vpop.f32.mrf.mxu0  ;;  %v3285_v24 = vld [vmem:[#allocation2 + $0xd1] sm:$0xff] }
 0x25b   : > { %14564 = vst [vmem:[#allocation63_spill] sm:$0xff] %v11746_v59  ;;  %v11748_v25 = vpop.f32.mrf.mxu1  ;;  %9336 = vmatmul.mubr.f32.gmra.mxu1 %v3282_v2 }
 0x25c   : > { %v11750_v10 = vpop.f32.mrf.mxu0  ;;  %9338 = vmatprep.mubr.f32.mxu1 %v3283_v12 }
 0x25d   : > { %14565 = vst [vmem:[#allocation64_spill] sm:$0xff] %v11750_v10  ;;  %v11752_v63 = vpop.f32.mrf.mxu1  ;;  %v3286_v10 = vld [vmem:[#allocation2 + $0xd9] sm:$0xff] }
 0x25e   : > { %14566 = vst [vmem:[#allocation65_spill] sm:$0xff] %v11752_v63  ;;  %v11754_v26 = vpop.f32.mrf.mxu0  ;;  %v3287_v63 = vld [vmem:[#allocation2 + $0xe1] sm:$0xff] }
 0x25f   : > { %14567 = vst [vmem:[#allocation66_spill] sm:$0xff] %v11754_v26  ;;  %v11756_v9 = vpop.f32.mrf.mxu1  ;;  %9339 = vmatmul.mubr.f32.gmra.mxu1 %v3284_v51 }
 0x260   : > { %v11758_v41 = vpop.f32.mrf.mxu0  ;;  %9341 = vmatprep.mubr.f32.mxu1 %v3285_v24 }
 0x261   : > { %14568 = vst [vmem:[#allocation67_spill] sm:$0xff] %v11758_v41  ;;  %v11760_v59 = vpop.f32.mrf.mxu1  ;;  %v3288_v41 = vld [vmem:[#allocation2 + $0xe9] sm:$0xff] }
 0x262   : > { %14569 = vst [vmem:[#allocation68_spill] sm:$0xff] %v11760_v59  ;;  %v11762_v34 = vpop.f32.mrf.mxu0  ;;  %v3289_v59 = vld [vmem:[#allocation2 + $0xf1] sm:$0xff] }
 0x263   : > { %14570 = vst [vmem:[#allocation69_spill] sm:$0xff] %v11762_v34  ;;  %v11764_v2 = vpop.f32.mrf.mxu1  ;;  %9342 = vmatmul.mubr.f32.gmra.mxu1 %v3286_v10 }
 0x264   : > { %v11766_v12 = vpop.f32.mrf.mxu0  ;;  %9344 = vmatprep.mubr.f32.mxu1 %v3287_v63 }
 0x265   : > { %14571 = vst [vmem:[#allocation70_spill] sm:$0xff] %v11766_v12  ;;  %v11768_v26 = vpop.f32.mrf.mxu1  ;;  %v3290_v12 = vld [vmem:[#allocation2 + $0xf9] sm:$0xff] }
 0x266   : > { %14572 = vst [vmem:[#allocation71_spill] sm:$0xff] %v11768_v26  ;;  %v11770_v27 = vpop.f32.mrf.mxu0  ;;  %v3291_v26 = vld [vmem:[#allocation2 + $0x101] sm:$0xff] }
 0x267   : > { %14573 = vst [vmem:[#allocation72_spill] sm:$0xff] %v11770_v27  ;;  %v11772_v51 = vpop.f32.mrf.mxu1  ;;  %9345 = vmatmul.mubr.f32.gmra.mxu1 %v3288_v41 }
 0x268   : > { %v11774_v24 = vpop.f32.mrf.mxu0  ;;  %9347 = vmatprep.mubr.f32.mxu1 %v3289_v59 }
 0x269   : > { %14574 = vst [vmem:[#allocation73_spill] sm:$0xff] %v11774_v24  ;;  %v11776_v34 = vpop.f32.mrf.mxu1  ;;  %v3292_v24 = vld [vmem:[#allocation2 + $0x109] sm:$0xff] }
 0x26a   : > { %14575 = vst [vmem:[#allocation74_spill] sm:$0xff] %v11776_v34  ;;  %v11778_v7 = vpop.f32.mrf.mxu0  ;;  %v3293_v34 = vld [vmem:[#allocation2 + $0x111] sm:$0xff] }
 0x26b   : > { %14576 = vst [vmem:[#allocation75_spill] sm:$0xff] %v11778_v7  ;;  %v11780_v10 = vpop.f32.mrf.mxu1  ;;  %9348 = vmatmul.mubr.f32.gmra.mxu1 %v3290_v12  ;;  %v1580_v12 = vadd.f32 %v11676_v15, %v11462_v42 }
 0x26c   : > { %v11782_v63 = vpop.f32.mrf.mxu0  ;;  %9350 = vmatprep.mubr.f32.mxu1 %v3291_v26  ;;  %v3294_v26 = vld [vmem:[#allocation2 + $0x119] sm:$0xff] }
 0x26d   : > { %14577 = vst [vmem:[#allocation76_spill] sm:$0xff] %v11782_v63  ;;  %v11784_v27 = vpop.f32.mrf.mxu1 }
 0x26e   : > { %14578 = vst [vmem:[#allocation77_spill] sm:$0xff] %v11784_v27  ;;  %v11786_v8 = vpop.f32.mrf.mxu0 }
 0x26f   : > { %14579 = vst [vmem:[#allocation78_spill] sm:$0xff] %v11786_v8  ;;  %v11788_v41 = vpop.f32.mrf.mxu1  ;;  %9351 = vmatmul.mubr.f32.gmra.mxu1 %v3292_v24 }
 0x270   : > { %v11790_v59 = vpop.f32.mrf.mxu0  ;;  %9353 = vmatprep.mubr.f32.mxu1 %v3293_v34  ;;  %v1590_v34 = vadd.f32 %v11684_v4, %v11476_v22 }
 0x271   : > { %14580 = vst [vmem:[#allocation79_spill] sm:$0xff] %v11790_v59  ;;  %v11792_v7 = vpop.f32.mrf.mxu1 }
 0x272   : > { %14581 = vst [vmem:[#allocation80_spill] sm:$0xff] %v11792_v7  ;;  %v11794_v20 = vpop.f32.mrf.mxu0 }
 0x273   : > { %14582 = vst [vmem:[#allocation81_spill] sm:$0xff] %v11794_v20  ;;  %v8875_v63 = vpop.f32.mrf.mxu1  ;;  %9354 = vmatmul.mubr.f32.gmra.mxu1 %v3294_v26  ;;  %v2008_v20 = vadd.f32 %v11464_v45, %v1580_v12 }
 0x274   : > { %v11798_v27 = vpop.f32.mrf.mxu0  ;;  %v11801_v8 = vadd.f32 %v8875_v63, %v11668_v14  ;;  %v1600_v14 = vadd.f32 %v11692_v49, %v11496_v47  ;;  %v2010_v63 = vadd.f32 %v11478_v29, %v1590_v34 }
 0x275   : > { %14583 = vst [vmem:[#allocation82_spill] sm:$0xff] %v11798_v27  ;;  %v11803_v21 = vpop.f32.mrf.mxu1 }
 0x276   : > { %v11805_v24 = vpop.f32.mrf.mxu0 }
 0x277   : > { %14584 = vst [vmem:[#allocation83_spill] sm:$0xff] %v11805_v24  ;;  %v8990_v59 = vpop.f32.mrf.mxu1 }
 0x278   : > { %v11810_v7 = vpop.f32.mrf.mxu0  ;;  %v11812_v42 = vadd.f32 %v8990_v59, %v2008_v20  ;;  %v1610_v20 = vadd.f32 %v11700_v23, %v11510_v39  ;;  %v2012_v59 = vadd.f32 %v11498_v54, %v1600_v14  ;;  %v1630_v14 = vadd.f32 %v11716_v17, %v11543_v46 }
 0x279   : > { %14585 = vst [vmem:[#allocation84_spill] sm:$0xff] %v11810_v7  ;;  %v11814_v15 = vpop.f32.mrf.mxu1  ;;  %v14675_v7 = vld [vmem:[#allocation74_spill] sm:$0xff] }
 0x27a   : > { %v11816_v26 = vpop.f32.mrf.mxu0  ;;  %v2014_v34 = vadd.f32 %v11512_v53, %v1610_v20  ;;  %v1640_v20 = vadd.f32 %v11724_v33, %v11557_v55 }
 0x27b   : > { %14586 = vst [vmem:[#allocation85_spill] sm:$0xff] %v11816_v26  ;;  %v8993_v24 = vpop.f32.mrf.mxu1 }
 0x27c   : > { %v11821_v27 = vpop.f32.mrf.mxu0  ;;  %v11823_v22 = vadd.f32 %v8993_v24, %v2010_v63  ;;  %v1620_v24 = vadd.f32 %v11708_v11, %v11531_v32 }
 0x27d   : > { %14587 = vst [vmem:[#allocation86_spill] sm:$0xff] %v11821_v27  ;;  %v11825_v45 = vpop.f32.mrf.mxu1  ;;  %v14655_v27 = vld [vmem:[#allocation53_spill] sm:$0xff] }
 0x27e   : > { %v11827_v4 = vpop.f32.mrf.mxu0 }
 0x27f   : > { %14588 = vst [vmem:[#allocation87_spill] sm:$0xff] %v11827_v4  ;;  %v8996_v12 = vpop.f32.mrf.mxu1 }
 0x280   : > { %v11832_v26 = vpop.f32.mrf.mxu0  ;;  %v11834_v47 = vadd.f32 %v8996_v12, %v2012_v59  ;;  %v2016_v59 = vadd.f32 %v11533_v60, %v1620_v24  ;;  %v1650_v24 = vadd.f32 %v11732_v13, %v11568_v50 }
 0x281   : > { %14589 = vst [vmem:[#allocation88_spill] sm:$0xff] %v11832_v26  ;;  %v11836_v29 = vpop.f32.mrf.mxu1 }
 0x282   : > { %v11838_v49 = vpop.f32.mrf.mxu0 }
 0x283   : > { %14590 = vst [vmem:[#allocation89_spill] sm:$0xff] %v11838_v49  ;;  %v8999_v63 = vpop.f32.mrf.mxu1 }
 0x284   : > { %v11843_v4 = vpop.f32.mrf.mxu0  ;;  %v11845_v39 = vadd.f32 %v8999_v63, %v2014_v34  ;;  %v2018_v34 = vadd.f32 %v11545_v52, %v1630_v14  ;;  %v1660_v14 = vadd.f32 %v11740_v40, %v11582_v28 }
 0x285   : > { %14591 = vst [vmem:[#allocation90_spill] sm:$0xff] %v11843_v4  ;;  %v11847_v54 = vpop.f32.mrf.mxu1 }
 0x286   : > { %v11849_v23 = vpop.f32.mrf.mxu0 }
 0x287   : > { %14592 = vst [vmem:[#allocation91_spill] sm:$0xff] %v11849_v23  ;;  %v9002_v12 = vpop.f32.mrf.mxu1 }
 0x288   : > { %v11854_v49 = vpop.f32.mrf.mxu0  ;;  %v11856_v32 = vadd.f32 %v9002_v12, %v2016_v59  ;;  %v2020_v59 = vadd.f32 %v11559_v62, %v1640_v20  ;;  %v1670_v20 = vadd.f32 %v11748_v25, %v11593_v61 }
 0x289   : > { %14593 = vst [vmem:[#allocation92_spill] sm:$0xff] %v11854_v49  ;;  %v11858_v53 = vpop.f32.mrf.mxu1 }
 0x28a   : > { %v11860_v11 = vpop.f32.mrf.mxu0 }
 0x28b   : > { %14594 = vst [vmem:[#allocation93_spill] sm:$0xff] %v11860_v11  ;;  %v9005_v63 = vpop.f32.mrf.mxu1 }
 0x28c   : > { %v11865_v23 = vpop.f32.mrf.mxu0  ;;  %v11867_v46 = vadd.f32 %v9005_v63, %v2018_v34  ;;  %v2022_v34 = vadd.f32 %v11570_v57, %v1650_v24  ;;  %v1680_v24 = vadd.f32 %v11756_v9, %v11607_v31 }
 0x28d   : > { %14595 = vst [vmem:[#allocation94_spill] sm:$0xff] %v11865_v23  ;;  %v11869_v60 = vpop.f32.mrf.mxu1 }
 0x28e   : > { %v11871_v17 = vpop.f32.mrf.mxu0 }
 0x28f   : > { %14596 = vst [vmem:[#allocation95_spill] sm:$0xff] %v11871_v17  ;;  %v9008_v12 = vpop.f32.mrf.mxu1 }
 0x290   : > { %v11876_v11 = vpop.f32.mrf.mxu0  ;;  %v11878_v55 = vadd.f32 %v9008_v12, %v2020_v59  ;;  %v2024_v59 = vadd.f32 %v11584_v35, %v1660_v14  ;;  %v1690_v14 = vadd.f32 %v11764_v2, %v11618_v19 }
 0x291   : > { %14597 = vst [vmem:[#allocation96_spill] sm:$0xff] %v11876_v11  ;;  %v11880_v52 = vpop.f32.mrf.mxu1 }
 0x292   : > { %v11882_v33 = vpop.f32.mrf.mxu0 }
 0x293   : > { %14598 = vst [vmem:[#allocation97_spill] sm:$0xff] %v11882_v33  ;;  %v9011_v63 = vpop.f32.mrf.mxu1 }
 0x294   : > { %v11887_v17 = vpop.f32.mrf.mxu0  ;;  %v11889_v50 = vadd.f32 %v9011_v63, %v2022_v34  ;;  %v2026_v34 = vadd.f32 %v11595_v44, %v1670_v20  ;;  %v1700_v20 = vadd.f32 %v11772_v51, %v11632_v36 }
 0x295   : > { %14599 = vst [vmem:[#allocation98_spill] sm:$0xff] %v11887_v17  ;;  %v11891_v62 = vpop.f32.mrf.mxu1 }
 0x296   : > { %v11893_v13 = vpop.f32.mrf.mxu0 }
 0x297   : > { %14600 = vst [vmem:[#allocation99_spill] sm:$0xff] %v11893_v13  ;;  %v9014_v12 = vpop.f32.mrf.mxu1 }
 0x298   : > { %v11898_v33 = vpop.f32.mrf.mxu0  ;;  %v11900_v28 = vadd.f32 %v9014_v12, %v2024_v59  ;;  %v2028_v59 = vadd.f32 %v11609_v56, %v1680_v24  ;;  %v1710_v24 = vadd.f32 %v11780_v10, %v11643_v1 }
 0x299   : > { %14601 = vst [vmem:[#allocation100_spill] sm:$0xff] %v11898_v33  ;;  %v11902_v57 = vpop.f32.mrf.mxu1 }
 0x29a   : > { %v11904_v40 = vpop.f32.mrf.mxu0 }
 0x29b   : > { %14602 = vst [vmem:[#allocation101_spill] sm:$0xff] %v11904_v40  ;;  %v9017_v63 = vpop.f32.mrf.mxu1 }
 0x29c   : > { %v11909_v13 = vpop.f32.mrf.mxu0  ;;  %v11911_v61 = vadd.f32 %v9017_v63, %v2026_v34  ;;  %v2030_v34 = vadd.f32 %v11620_v48, %v1690_v14  ;;  %v1720_v14 = vadd.f32 %v11788_v41, %v11657_v38 }
 0x29d   : > { %14603 = vst [vmem:[#allocation102_spill] sm:$0xff] %v11909_v13  ;;  %v11913_v35 = vpop.f32.mrf.mxu1 }
 0x29e   : > { %v11915_v25 = vpop.f32.mrf.mxu0 }
 0x29f   : > { %14604 = vst [vmem:[#allocation103_spill] sm:$0xff] %v11915_v25  ;;  %v9020_v12 = vpop.f32.mrf.mxu1 }
 0x2a0   : > { %v11920_v40 = vpop.f32.mrf.mxu0  ;;  %v11922_v31 = vadd.f32 %v9020_v12, %v2028_v59  ;;  %v2032_v59 = vadd.f32 %v11634_v58, %v1700_v20  ;;  %v2036_v20 = vadd.f32 %v11659_v16, %v1720_v14 }
 0x2a1   : > { %14605 = vst [vmem:[#allocation104_spill] sm:$0xff] %v11920_v40  ;;  %v11924_v44 = vpop.f32.mrf.mxu1 }
 0x2a2   : > { %v11926_v9 = vpop.f32.mrf.mxu0 }
 0x2a3   : > { %14606 = vst [vmem:[#allocation105_spill] sm:$0xff] %v11926_v9  ;;  %v9023_v63 = vpop.f32.mrf.mxu1 }
 0x2a4   : > { %v11931_v25 = vpop.f32.mrf.mxu0  ;;  %v11933_v19 = vadd.f32 %v9023_v63, %v2030_v34  ;;  %v2034_v34 = vadd.f32 %v11645_v43, %v1710_v24  ;;  %v2038_v43 = vadd.f32 %v11670_v5, %v11801_v8 }
 0x2a5   : > { %14607 = vst [vmem:[#allocation106_spill] sm:$0xff] %v11931_v25  ;;  %v11935_v56 = vpop.f32.mrf.mxu1 }
 0x2a6   : > { %v11937_v2 = vpop.f32.mrf.mxu0 }
 0x2a7   : > { %14608 = vst [vmem:[#allocation107_spill] sm:$0xff] %v11937_v2  ;;  %v9026_v12 = vpop.f32.mrf.mxu1 }
 0x2a8   : > { %v11942_v9 = vpop.f32.mrf.mxu0  ;;  %v11944_v36 = vadd.f32 %v9026_v12, %v2032_v59 }
 0x2a9   : > { %14609 = vst [vmem:[#allocation108_spill] sm:$0xff] %v11942_v9  ;;  %v11946_v48 = vpop.f32.mrf.mxu1 }
 0x2aa   : > { %v11948_v51 = vpop.f32.mrf.mxu0 }
 0x2ab   : > { %14610 = vst [vmem:[#allocation109_spill] sm:$0xff] %v11948_v51  ;;  %v9029_v63 = vpop.f32.mrf.mxu1 }
 0x2ac   : > { %v11953_v2 = vpop.f32.mrf.mxu0  ;;  %v11955_v1 = vadd.f32 %v9029_v63, %v2034_v34 }
 0x2ad   : > { %14611 = vst [vmem:[#allocation110_spill] sm:$0xff] %v11953_v2  ;;  %v11957_v58 = vpop.f32.mrf.mxu1 }
 0x2ae   : > { %14612 = vst [vmem:[#allocation111_spill] sm:$0xff] %v11955_v1  ;;  %v11959_v10 = vpop.f32.mrf.mxu0 }
 0x2af   : > { %14613 = vst [vmem:[#allocation112_spill] sm:$0xff] %v11959_v10  ;;  %v9032_v59 = vpop.f32.mrf.mxu1 }
 0x2b0   : > { %v11962_v12 = vpop.f32.mrf.mxu0  ;;  %v11964_v51 = vadd.f32 %v9032_v59, %v2036_v20 }
 0x2b1   : > { %14614 = vst [vmem:[#allocation113_spill] sm:$0xff] %v11962_v12  ;;  %v11966_v9 = vpop.f32.mrf.mxu1 }
 0x2b2   : > { %14615 = vst [vmem:[#allocation114_spill] sm:$0xff] %v11964_v51  ;;  %v11968_v38 = vpop.f32.mrf.mxu0  ;;  %v14667_v51 = vld [vmem:[#allocation28_spill] sm:$0xff] }
 0x2b3   : > { %14616 = vst [vmem:[#allocation115_spill] sm:$0xff] %v11968_v38  ;;  %v9035_v41 = vpop.f32.mrf.mxu1 }
 0x2b4   : > { %v11972_v24 = vpop.f32.mrf.mxu0  ;;  %v11974_v34 = vadd.f32 %v9035_v41, %v2038_v43 }
 0x2b5   : > { %14617 = vst [vmem:[#allocation116_spill] sm:$0xff] %v11972_v24  ;;  %v11976_v63 = vpop.f32.mrf.mxu1 }
 0x2b6   : > { %14618 = vst [vmem:[#allocation117_spill] sm:$0xff] %v11974_v34  ;;  %v11978_v16 = vpop.f32.mrf.mxu0  ;;  %v14660_v34 = vld [vmem:[#allocation22_spill] sm:$0xff] }
 0x2b7   : > { %14619 = vst [vmem:[#allocation118_spill] sm:$0xff] %v11978_v16  ;;  %v11980_v14 = vpop.f32.mrf.mxu1 }
 0x2b8   : > { %v11984_v59 = vpop.f32.mrf.mxu0 }
 0x2b9   : > { %v11982_v20 = vpop.f32.mrf.mxu1  ;;  %14620 = vst [vmem:[#allocation119_spill] sm:$0xff] %v11984_v59 }
 0x2ba   : > { %v11990_v8 = vpop.f32.mrf.mxu0 }
 0x2bb   : > { %v11986_v12 = vpop.f32.mrf.mxu1  ;;  %14623 = vst [vmem:[#allocation122_spill] sm:$0xff] %v11990_v8 }
 0x2bc   : > { %14621 = vst [vmem:[#allocation120_spill] sm:$0xff] %v11986_v12  ;;  %v11996_v41 = vpop.f32.mrf.mxu0  ;;  %v14680_v12 = vld [vmem:[#allocation80_spill] sm:$0xff] }
 0x2bd   : > { %v11988_v38 = vpop.f32.mrf.mxu1  ;;  %14626 = vst [vmem:[#allocation125_spill] sm:$0xff] %v11996_v41 }
 0x2be   : > { %14622 = vst [vmem:[#allocation121_spill] sm:$0xff] %v11988_v38  ;;  %v12002_v10 = vpop.f32.mrf.mxu0  ;;  %v14678_v38 = vld [vmem:[#allocation20_spill] sm:$0xff] }
 0x2bf   : > { %v11992_v5 = vpop.f32.mrf.mxu1  ;;  %14629 = vst [vmem:[#allocation128_spill] sm:$0xff] %v12002_v10 }
 0x2c0   : > { %14624 = vst [vmem:[#allocation123_spill] sm:$0xff] %v11992_v5  ;;  %v12008_v40 = vpop.f32.mrf.mxu0 }
 0x2c1   : > { %v11994_v43 = vpop.f32.mrf.mxu1  ;;  %14632 = vst [vmem:[#allocation131_spill] sm:$0xff] %v12008_v40 }
 0x2c2   : > { %14625 = vst [vmem:[#allocation124_spill] sm:$0xff] %v11994_v43  ;;  %v12014_v17 = vpop.f32.mrf.mxu0 }
 0x2c3   : > { %v11998_v24 = vpop.f32.mrf.mxu1  ;;  %14635 = vst [vmem:[#allocation134_spill] sm:$0xff] %v12014_v17 }
 0x2c4   : > { %14627 = vst [vmem:[#allocation126_spill] sm:$0xff] %v11998_v24  ;;  %v12020_v41 = vpop.f32.mrf.mxu0 }
 0x2c5   : > { %v12000_v16 = vpop.f32.mrf.mxu1  ;;  %14638 = vst [vmem:[#allocation137_spill] sm:$0xff] %v12020_v41  ;;  %v1575_v41 = vadd.f32 %v11680_v37, %v11472_v3  ;;  %v14658_v37 = vld [vmem:[#allocation17_spill] sm:$0xff] }
 0x2c6   : > { %14628 = vst [vmem:[#allocation127_spill] sm:$0xff] %v12000_v16  ;;  %v12026_v8 = vpop.f32.mrf.mxu0  ;;  %v14665_v16 = vld [vmem:[#allocation26_spill] sm:$0xff] }
 0x2c7   : > { %v12004_v2 = vpop.f32.mrf.mxu1  ;;  %14641 = vst [vmem:[#allocation140_spill] sm:$0xff] %v12026_v8  ;;  %v1585_v8 = vadd.f32 %v11688_v18, %v11486_v0  ;;  %v14659_v0 = vld [vmem:[#allocation56_spill] sm:$0xff] }
 0x2c8   : > { %14630 = vst [vmem:[#allocation129_spill] sm:$0xff] %v12004_v2  ;;  %v12032_v26 = vpop.f32.mrf.mxu0  ;;  %v1635_v18 = vadd.f32 %v14659_v0, %v14658_v37  ;;  %v14672_v37 = vld [vmem:[#allocation30_spill] sm:$0xff]  ;;  %v14673_v0 = vld [vmem:[#allocation71_spill] sm:$0xff] }
 0x2c9   : > { %v12006_v25 = vpop.f32.mrf.mxu1  ;;  %14644 = vst [vmem:[#allocation143_spill] sm:$0xff] %v12032_v26  ;;  %v14650_v26 = vld [vmem:[#allocation12_spill] sm:$0xff] }
 0x2ca   : > { %14631 = vst [vmem:[#allocation130_spill] sm:$0xff] %v12006_v25  ;;  %v14663_v25 = vld [vmem:[#allocation62_spill] sm:$0xff] }
 0x2cb   : > { %v12010_v13 = vpop.f32.mrf.mxu1 }
 0x2cc   : > { %14633 = vst [vmem:[#allocation132_spill] sm:$0xff] %v12010_v13 }
 0x2cd   : > { %v12012_v33 = vpop.f32.mrf.mxu1 }
 0x2ce   : > { %14634 = vst [vmem:[#allocation133_spill] sm:$0xff] %v12012_v33 }
 0x2cf   : > { %v12016_v11 = vpop.f32.mrf.mxu1 }
 0x2d0   : > { %14636 = vst [vmem:[#allocation135_spill] sm:$0xff] %v12016_v11  ;;  %v12038_v11 = vpop.f32.mrf.mxu0 }
 0x2d1   : > { %v12018_v23 = vpop.f32.mrf.mxu1  ;;  %14647 = vst [vmem:[#allocation146_spill] sm:$0xff] %v12038_v11  ;;  %v14654_v11 = vld [vmem:[#allocation14_spill] sm:$0xff] }
 0x2d2   : > { %14637 = vst [vmem:[#allocation136_spill] sm:$0xff] %v12018_v23  ;;  %v12056_v59 = vpop.f32.mrf.mxu0 }
 0x2d3   : > { %v12022_v49 = vpop.f32.mrf.mxu1  ;;  %14656 = vst [vmem:[#allocation12_spill] sm:$0xff] %v12056_v59  ;;  %v14669_v59 = vld [vmem:[#allocation11_spill] sm:$0xff] }
 0x2d4   : > { %14639 = vst [vmem:[#allocation138_spill] sm:$0xff] %v12022_v49  ;;  %v14652_v49 = vld [vmem:[#allocation13_spill] sm:$0xff]  ;;  %v2009_v24 = vadd.f32 %v14669_v59, %v1585_v8  ;;  %v12088_v1 = vpop.f32.mrf.mxu0 }
 0x2d5   : > { %v12024_v10 = vpop.f32.mrf.mxu1 }
 0x2d6   : > { %14640 = vst [vmem:[#allocation139_spill] sm:$0xff] %v12024_v10  ;;  %v14651_v10 = vld [vmem:[#allocation47_spill] sm:$0xff] }
 0x2d7   : > { %v12028_v4 = vpop.f32.mrf.mxu1 }
 0x2d8   : > { %14642 = vst [vmem:[#allocation141_spill] sm:$0xff] %v12028_v4  ;;  %v1595_v4 = vadd.f32 %v11696_v6, %v11506_v30  ;;  %v14661_v30 = vld [vmem:[#allocation59_spill] sm:$0xff] }
 0x2d9   : > { %v12030_v40 = vpop.f32.mrf.mxu1  ;;  %v1645_v6 = vadd.f32 %v14661_v30, %v14660_v34  ;;  %v1685_v34 = vadd.f32 %v14673_v0, %v14672_v37  ;;  %v14674_v30 = vld [vmem:[#allocation32_spill] sm:$0xff]  ;;  %v14685_v0 = vld [vmem:[#allocation19_spill] sm:$0xff] }
 0x2da   : > { %14643 = vst [vmem:[#allocation142_spill] sm:$0xff] %v12030_v40 }
 0x2db   : > { %v12034_v33 = vpop.f32.mrf.mxu1 }
 0x2dc   : > { %14645 = vst [vmem:[#allocation144_spill] sm:$0xff] %v12034_v33  ;;  %v1605_v33 = vadd.f32 %v14651_v10, %v14650_v26  ;;  %v14664_v26 = vld [vmem:[#allocation16_spill] sm:$0xff] }
 0x2dd   : > { %v12036_v17 = vpop.f32.mrf.mxu1  ;;  %v2007_v10 = vadd.f32 %v14664_v26, %v1575_v41  ;;  %v14677_v41 = vld [vmem:[#allocation77_spill] sm:$0xff] }
 0x2de   : > { %14646 = vst [vmem:[#allocation145_spill] sm:$0xff] %v12036_v17  ;;  %v14653_v17 = vld [vmem:[#allocation50_spill] sm:$0xff] }
 0x2df   : > { %v12040_v23 = vpop.f32.mrf.mxu1  ;;  %v1615_v13 = vadd.f32 %v14653_v17, %v14652_v49  ;;  %v14666_v49 = vld [vmem:[#allocation65_spill] sm:$0xff]  ;;  %14684 = vst [vmem:[#allocation50_spill] sm:$0xff] %v12088_v1  ;;  %v14690_v1 = vld [vmem:[#allocation31_spill] sm:$0xff] }
 0x2e0   : > { %14648 = vst [vmem:[#allocation147_spill] sm:$0xff] %v12040_v23  ;;  %v1625_v23 = vadd.f32 %v14655_v27, %v14654_v11  ;;  %v1665_v17 = vadd.f32 %v14666_v49, %v14665_v16  ;;  %v14668_v27 = vld [vmem:[#allocation68_spill] sm:$0xff]  ;;  %v2013_v16 = vadd.f32 %v14678_v38, %v1605_v33  ;;  %v14687_v38 = vld [vmem:[#allocation25_spill] sm:$0xff] }
 0x2e1   : > { %v12048_v40 = vpop.f32.mrf.mxu1  ;;  %v1675_v11 = vadd.f32 %v14668_v27, %v14667_v51  ;;  %v14679_v49 = vld [vmem:[#allocation36_spill] sm:$0xff]  ;;  %v14681_v27 = vld [vmem:[#allocation38_spill] sm:$0xff] }
 0x2e2   : > { %14649 = vst [vmem:[#allocation148_spill] sm:$0xff] %v12048_v40  ;;  %v14662_v40 = vld [vmem:[#allocation24_spill] sm:$0xff]  ;;  %v1715_v51 = vadd.f32 %v14680_v12, %v14679_v49  ;;  %v1725_v59 = vadd.f32 %v11803_v21, %v14681_v27  ;;  %v2315_v12 = vadd.f32 %v11825_v45, %v2009_v24  ;;  %v14688_v49 = vld [vmem:[#allocation27_spill] sm:$0xff]  ;;  %v14689_v27 = vld [vmem:[#allocation29_spill] sm:$0xff] }
 0x2e3   : > { %v12058_v3 = vpop.f32.mrf.mxu1  ;;  %v1655_v2 = vadd.f32 %v14663_v25, %v14662_v40  ;;  %v1695_v40 = vadd.f32 %v14675_v7, %v14674_v30  ;;  %v14676_v25 = vld [vmem:[#allocation34_spill] sm:$0xff]  ;;  %v2313_v7 = vadd.f32 %v11814_v15, %v2007_v10  ;;  %v2019_v30 = vadd.f32 %v14685_v0, %v1635_v18  ;;  %v14691_v10 = vld [vmem:[#allocation33_spill] sm:$0xff]  ;;  %v14692_v0 = vld [vmem:[#allocation35_spill] sm:$0xff] }
 0x2e4   : > { %14657 = vst [vmem:[#allocation47_spill] sm:$0xff] %v12058_v3  ;;  %v14670_v3 = vld [vmem:[#allocation18_spill] sm:$0xff]  ;;  %v1705_v26 = vadd.f32 %v14677_v41, %v14676_v25  ;;  %v14686_v25 = vld [vmem:[#allocation23_spill] sm:$0xff]  ;;  %v2029_v15 = vadd.f32 %v14690_v1, %v1685_v34  ;;  %v14696_v34 = vld [vmem:[#allocation41_spill] sm:$0xff] }
 0x2e5   : > { %v2011_v43 = vadd.f32 %v14670_v3, %v1595_v4  ;;  %v12073_v5 = vpop.f32.mrf.mxu1  ;;  %v14682_v4 = vld [vmem:[#allocation21_spill] sm:$0xff]  ;;  %v14683_v3 = vld [vmem:[#allocation15_spill] sm:$0xff]  ;;  %v2021_v33 = vadd.f32 %v14686_v25, %v1645_v6  ;;  %v2023_v41 = vadd.f32 %v14687_v38, %v1655_v2  ;;  %v2031_v18 = vadd.f32 %v14691_v10, %v1695_v40 }
 0x2e6   : > { %14671 = vst [vmem:[#allocation13_spill] sm:$0xff] %v12073_v5  ;;  %v2015_v8 = vadd.f32 %v14682_v4, %v1615_v13  ;;  %v2017_v5 = vadd.f32 %v14683_v3, %v1625_v23  ;;  %v2025_v13 = vadd.f32 %v14688_v49, %v1665_v17  ;;  %v2027_v23 = vadd.f32 %v14689_v27, %v1675_v11  ;;  %v14693_v25 = vld [vmem:[#allocation37_spill] sm:$0xff]  ;;  %v14694_v24 = vld [vmem:[#allocation39_spill] sm:$0xff]  ;;  %v12111_v11 = vpop.f32.mrf.mxu0 }
 0x2e7   : > { %v12090_v37 = vpop.f32.mrf.mxu1  ;;  %v2317_v21 = vadd.f32 %v11836_v29, %v2011_v43  ;;  %v2319_v3 = vadd.f32 %v11847_v54, %v2013_v16  ;;  %v2033_v6 = vadd.f32 %v14692_v0, %v1705_v26  ;;  %v2035_v45 = vadd.f32 %v14693_v25, %v1715_v51  ;;  %v14695_v43 = vld [vmem:[#allocation40_spill] sm:$0xff]  ;;  %v14697_v26 = vld [vmem:[#allocation42_spill] sm:$0xff]  ;;  %v14698_v51 = vld [vmem:[#allocation43_spill] sm:$0xff] }
 0x2e8   : > { %v2321_v2 = vadd.f32 %v11858_v53, %v2015_v8  ;;  %v2037_v29 = vadd.f32 %v14694_v24, %v1725_v59  ;;  %v2620_v17 = vadd.f32 %v14695_v43, %v11812_v42  ;;  %v2323_v54 = vadd.f32 %v11869_v60, %v2017_v5  ;;  %v14699_v8 = vld [vmem:[#allocation44_spill] sm:$0xff]  ;;  %v14700_v49 = vld [vmem:[#allocation45_spill] sm:$0xff]  ;;  %v12138_v24 = vpop.f32.mrf.mxu0 }
 0x2e9   : > { %v12100_v4 = vpop.f32.mrf.mxu1  ;;  %v2325_v1 = vadd.f32 %v11880_v52, %v2019_v30  ;;  %v2619_v40 = vadd.f32 %v14696_v34, %v2313_v7  ;;  %v2622_v53 = vadd.f32 %v14697_v26, %v11823_v22  ;;  %v2327_v16 = vadd.f32 %v11891_v62, %v2021_v33  ;;  %v14701_v52 = vld [vmem:[#allocation46_spill] sm:$0xff]  ;;  %v14702_v7 = vld [vmem:[#allocation48_spill] sm:$0xff]  ;;  %v14703_v22 = vld [vmem:[#allocation49_spill] sm:$0xff] }
 0x2ea   : > { %v2621_v59 = vadd.f32 %v14698_v51, %v2315_v12  ;;  %v2624_v42 = vadd.f32 %v14699_v8, %v11834_v47  ;;  %v2623_v27 = vadd.f32 %v14700_v49, %v2317_v21  ;;  %v2329_v60 = vadd.f32 %v11902_v57, %v2023_v41  ;;  %v14704_v12 = vld [vmem:[#allocation51_spill] sm:$0xff]  ;;  %v14705_v21 = vld [vmem:[#allocation52_spill] sm:$0xff]  ;;  %v14706_v41 = vld [vmem:[#allocation54_spill] sm:$0xff]  ;;  %v12176_v26 = vpop.f32.mrf.mxu0 }
 0x2eb   : > { %v12113_v38 = vpop.f32.mrf.mxu1  ;;  %v2626_v5 = vadd.f32 %v14701_v52, %v11845_v39  ;;  %v2625_v30 = vadd.f32 %v14702_v7, %v2319_v3  ;;  %v2628_v0 = vadd.f32 %v14703_v22, %v11856_v32  ;;  %v2331_v62 = vadd.f32 %v11913_v35, %v2025_v13  ;;  %v14707_v32 = vld [vmem:[#allocation55_spill] sm:$0xff]  ;;  %v14708_v35 = vld [vmem:[#allocation57_spill] sm:$0xff]  ;;  %v14714_v8 = vld [vmem:[#allocation66_spill] sm:$0xff] }
 0x2ec   : > { %v2333_v33 = vadd.f32 %v11924_v44, %v2027_v23  ;;  %v2627_v47 = vadd.f32 %v14704_v12, %v2321_v2  ;;  %v2630_v25 = vadd.f32 %v14705_v21, %v11867_v46  ;;  %v2335_v39 = vadd.f32 %v11935_v56, %v2029_v15  ;;  %v14709_v46 = vld [vmem:[#allocation58_spill] sm:$0xff]  ;;  %v14710_v2 = vld [vmem:[#allocation60_spill] sm:$0xff] }
 0x2ed   : > { %v12125_v10 = vpop.f32.mrf.mxu1  ;;  %v12144_v3 = vadd.f32 %v14706_v41, %v2323_v54  ;;  %v12148_v43 = vadd.f32 %v14707_v32, %v11878_v55  ;;  %v12151_v44 = vadd.f32 %v14708_v35, %v2325_v1  ;;  %v2337_v13 = vadd.f32 %v11946_v48, %v2031_v18  ;;  %v4330_v15 = vld [vmem:[%s14410_s6 + $0x8] sm:$0xff]  ;;  %v14717_v7 = vld [vmem:[#allocation70_spill] sm:$0xff]  ;;  %v14721_v32 = vld [vmem:[#allocation111_spill] sm:$0xff] }
 0x2ee   : > { %v12156_v23 = vadd.f32 %v14709_v46, %v11889_v50  ;;  %v12159_v34 = vadd.f32 %v14710_v2, %v2327_v16  ;;  %v2339_v55 = vadd.f32 %v11957_v58, %v2033_v6  ;;  %v2926_v54 = vadd.f32 %v11980_v14, %v2620_v17  ;;  %v14711_v48 = vld [vmem:[#allocation61_spill] sm:$0xff]  ;;  %v14712_v50 = vld [vmem:[#allocation63_spill] sm:$0xff]  ;;  %7417 = vmatprep.mubr.msk.f32.mxu1 %vm4351_vm11, %v4330_v15  ;;  %v14713_v16 = vld [vmem:[#allocation64_spill] sm:$0xff] }
 0x2ef   : > { %v12140_v57 = vpop.f32.mrf.mxu1  ;;  %v12170_v18 = vadd.f32 %v14711_v48, %v11900_v28  ;;  %v12173_v1 = vadd.f32 %v14712_v50, %v2329_v60  ;;  %v12180_v51 = vadd.f32 %v14713_v16, %v11911_v61  ;;  %v12183_v49 = vadd.f32 %v14714_v8, %v2331_v62  ;;  %v14715_v58 = vld [vmem:[#allocation67_spill] sm:$0xff]  ;;  %v14716_v28 = vld [vmem:[#allocation69_spill] sm:$0xff]  ;;  %v14718_v22 = vld [vmem:[#allocation72_spill] sm:$0xff]  ;;  %v12226_v8 = vpop.f32.mrf.mxu0 }
 0x2f0   : > { %v12187_v14 = vadd.f32 %v14715_v58, %v11922_v31  ;;  %v12190_v6 = vadd.f32 %v14716_v28, %v2333_v33  ;;  %v2341_v60 = vadd.f32 %v11966_v9, %v2035_v45  ;;  %v2925_v52 = vadd.f32 %v11982_v20, %v2619_v40  ;;  %v14719_v31 = vld [vmem:[#allocation73_spill] sm:$0xff]  ;;  %v14720_v33 = vld [vmem:[#allocation75_spill] sm:$0xff]  ;;  %v14722_v9 = vld [vmem:[#allocation76_spill] sm:$0xff] }
 0x2f1   : > { %v12161_v56 = vpop.f32.mrf.mxu1  ;;  %v12198_v61 = vadd.f32 %v14717_v7, %v11933_v19  ;;  %v12201_v62 = vadd.f32 %v14718_v22, %v2335_v39  ;;  %v2343_v12 = vadd.f32 %v11976_v63, %v2037_v29  ;;  %v12206_v21 = vadd.f32 %v14719_v31, %v11944_v36  ;;  %v14723_v19 = vld [vmem:[#allocation120_spill] sm:$0xff]  ;;  %v14724_v35 = vld [vmem:[#allocation121_spill] sm:$0xff]  ;;  %v14725_v46 = vld [vmem:[#allocation78_spill] sm:$0xff] }
 0x2f2   : > { %v12209_v41 = vadd.f32 %v14720_v33, %v2337_v13  ;;  %v12213_v45 = vadd.f32 %v14722_v9, %v14721_v32  ;;  %v2928_v40 = vadd.f32 %v14723_v19, %v2622_v53  ;;  %v2927_v39 = vadd.f32 %v14724_v35, %v2621_v59  ;;  %v14726_v63 = vld [vmem:[#allocation84_spill] sm:$0xff]  ;;  %v14727_v36 = vld [vmem:[#allocation123_spill] sm:$0xff]  ;;  %v14729_v50 = vld [vmem:[#allocation126_spill] sm:$0xff] }
 0x2f3   : > { %v12192_v17 = vpop.f32.mrf.mxu1  ;;  %v12220_v2 = vadd.f32 %v14725_v46, %v2339_v55  ;;  %v3232_v29 = vadd.f32 %v14726_v63, %v2926_v54  ;;  %v2930_v15 = vadd.f32 %v14727_v36, %v2624_v42  ;;  %v14728_v48 = vld [vmem:[#allocation124_spill] sm:$0xff]  ;;  %v2932_v16 = vadd.f32 %v14729_v50, %v2626_v5  ;;  %v14730_v58 = vld [vmem:[#allocation114_spill] sm:$0xff]  ;;  %v14731_v28 = vld [vmem:[#allocation79_spill] sm:$0xff] }
 0x2f4   : > { %v2929_v13 = vadd.f32 %v14728_v48, %v2623_v27  ;;  %v12230_v7 = vadd.f32 %v14731_v28, %v14730_v58  ;;  %v14732_v22 = vld [vmem:[#allocation127_spill] sm:$0xff]  ;;  %v14733_v31 = vld [vmem:[#allocation81_spill] sm:$0xff]  ;;  %v14736_v27 = vld [vmem:[#allocation130_spill] sm:$0xff] }
 0x2f5   : > { %v12215_v20 = vpop.f32.mrf.mxu1  ;;  %v2931_v59 = vadd.f32 %v14732_v22, %v2625_v30  ;;  %v12234_v55 = vadd.f32 %v14733_v31, %v2341_v60  ;;  %v14734_v54 = vld [vmem:[#allocation85_spill] sm:$0xff]  ;;  %v2933_v19 = vadd.f32 %v14736_v27, %v2627_v47  ;;  %v14738_v35 = vld [vmem:[#allocation82_spill] sm:$0xff]  ;;  %v14739_v63 = vld [vmem:[#allocation83_spill] sm:$0xff]  ;;  %v12255_v22 = vpop.f32.mrf.mxu0 }
 0x2f6   : > { %v3231_v32 = vadd.f32 %v14734_v54, %v2925_v52  ;;  %v14735_v42 = vld [vmem:[#allocation129_spill] sm:$0xff]  ;;  %v12244_v36 = vadd.f32 %v14739_v63, %v2343_v12  ;;  %v12249_v30 = vld [vmem:[%s14409_s5] ss:$0 sm:$0xff]  ;;  %v14741_v50 = vld [vmem:[#allocation86_spill] sm:$0xff] }
 0x2f7   : > { %v9310_v53 = vpop.f32.mrf.mxu1  ;;  %v2934_v9 = vadd.f32 %v14735_v42, %v2628_v0  ;;  %v14737_v5 = vld [vmem:[#allocation117_spill] sm:$0xff]  ;;  %v3234_v0 = vadd.f32 %v14741_v50, %v2928_v40  ;;  %v14742_v58 = vld [vmem:[#allocation87_spill] sm:$0xff]  ;;  %v14743_v28 = vld [vmem:[#allocation132_spill] sm:$0xff] }
 0x2f8   : > { %v3538_v33 = vadd.f32 %v9310_v53, %v3232_v29  ;;  %v12241_v46 = vadd.f32 %v14738_v35, %v14737_v5  ;;  %v14740_v29 = vld [vmem:[#allocation119_spill] sm:$0xff]  ;;  %v3233_v47 = vadd.f32 %v14742_v58, %v2927_v39  ;;  %v2936_v53 = vadd.f32 %v14743_v28, %v2630_v25  ;;  %v14744_v12 = vld [vmem:[#allocation88_spill] sm:$0xff]  ;;  %v14745_v42 = vld [vmem:[#allocation89_spill] sm:$0xff] }
 0x2f9   : > { %v3378_v60 = vpop.f32.mrf.mxu1  ;;  %v3236_v54 = vadd.f32 %v14744_v12, %v2930_v15  ;;  %v3235_v27 = vadd.f32 %v14745_v42, %v2929_v13  ;;  %v14746_v5 = vld [vmem:[#allocation90_spill] sm:$0xff]  ;;  %v14748_v40 = vld [vmem:[#allocation91_spill] sm:$0xff]  ;;  %v14749_v39 = vld [vmem:[#allocation133_spill] sm:$0xff] }
 0x2fa   : > { %v3844_v48 = vadd.f32 %v14740_v29, %v3538_v33  ;;  %v3537_v52 = vadd.f32 %v3378_v60, %v3231_v32  ;;  %v3238_v35 = vadd.f32 %v14746_v5, %v2932_v16  ;;  %v14747_v33 = vld [vmem:[#allocation122_spill] sm:$0xff]  ;;  %v3237_v29 = vadd.f32 %v14748_v40, %v2931_v59  ;;  %v14750_v50 = vld [vmem:[#allocation135_spill] sm:$0xff]  ;;  %v14751_v15 = vld [vmem:[#allocation92_spill] sm:$0xff]  ;;  %v12284_v40 = vpop.f32.mrf.mxu0 }
 0x2fb   : > { %v9313_v31 = vpop.f32.mrf.mxu1  ;;  %v2935_v25 = vadd.f32 %v14749_v39, %v12144_v3  ;;  %v2938_v58 = vadd.f32 %v14750_v50, %v12148_v43  ;;  %v3240_v12 = vadd.f32 %v14751_v15, %v2934_v9  ;;  %v14752_v13 = vld [vmem:[#allocation93_spill] sm:$0xff]  ;;  %v14755_v5 = vld [vmem:[#allocation138_spill] sm:$0xff] }
 0x2fc   : > { %v12261_v63 = vadd.f32 %v12249_v30, %v3844_v48  ;;  %v3843_v32 = vadd.f32 %v14747_v33, %v3537_v52  ;;  %v3540_v60 = vadd.f32 %v9313_v31, %v3234_v0  ;;  %v12271_v42 = vadd.f32 %v14752_v13, %v2933_v19  ;;  %v14753_v52 = vld [vmem:[#allocation125_spill] sm:$0xff]  ;;  %v14754_v31 = vld [vmem:[#allocation136_spill] sm:$0xff]  ;;  %v14756_v33 = vld [vmem:[#allocation139_spill] sm:$0xff] }
 0x2fd   : > { %v3388_v28 = vpop.f32.mrf.mxu1  ;;  %v2937_v3 = vadd.f32 %v14754_v31, %v12151_v44  ;;  %v2940_v43 = vadd.f32 %v14755_v5, %v12156_v23  ;;  %v2939_v9 = vadd.f32 %v14756_v33, %v12159_v34  ;;  %v14757_v39 = vld [vmem:[#allocation94_spill] sm:$0xff]  ;;  %v14758_v44 = vld [vmem:[#allocation128_spill] sm:$0xff]  ;;  %v14759_v23 = vld [vmem:[#allocation141_spill] sm:$0xff] }
 0x2fe   : > { %v3915_v16 = vmax.f32 %v12261_v63, 0.0  ;;  %v12275_v48 = vadd.f32 %v12249_v30, %v3843_v32  ;;  %v3846_v0 = vadd.f32 %v14753_v52, %v3540_v60  ;;  %v3539_v59 = vadd.f32 %v3388_v28, %v3233_v47  ;;  %v14760_v34 = vld [vmem:[#allocation142_spill] sm:$0xff]  ;;  %v14761_v31 = vld [vmem:[#allocation95_spill] sm:$0xff]  ;;  %v14762_v5 = vld [vmem:[#allocation96_spill] sm:$0xff] }
 0x2ff   : > { %v9316_v19 = vpop.f32.mrf.mxu1  ;;  %v12287_v50 = vadd.f32 %v14757_v39, %v2936_v53  ;;  %v2942_v15 = vadd.f32 %v14759_v23, %v12170_v18  ;;  %v2941_v13 = vadd.f32 %v14760_v34, %v12173_v1  ;;  %v12299_v53 = vadd.f32 %v14761_v31, %v2935_v25  ;;  %v14764_v18 = vld [vmem:[#allocation144_spill] sm:$0xff]  ;;  %v14765_v23 = vld [vmem:[#allocation97_spill] sm:$0xff]  ;;  %v14766_v34 = vld [vmem:[#allocation98_spill] sm:$0xff] }
 0x300   : > { %3947 = vst [vmem:[#allocation3 + $0x8] sm:$0xff] %v3915_v16  ;;  %v3914_v47 = vmax.f32 %v12275_v48, 0.0  ;;  %v3885_v32 = vadd.f32 %v12249_v30, %v3846_v0  ;;  %v3845_v60 = vadd.f32 %v14758_v44, %v3539_v59  ;;  %v3542_v28 = vadd.f32 %v9316_v19, %v3236_v54  ;;  %v14763_v59 = vld [vmem:[#allocation131_spill] sm:$0xff]  ;;  %v12310_v44 = vpop.f32.mrf.mxu0 }
 0x301   : > { %v3398_v52 = vpop.f32.mrf.mxu1  ;;  %v12302_v33 = vadd.f32 %v14762_v5, %v2938_v58  ;;  %v2944_v39 = vadd.f32 %v14764_v18, %v12180_v51  ;;  %v12313_v25 = vadd.f32 %v14765_v23, %v2937_v3  ;;  %v12316_v58 = vadd.f32 %v14766_v34, %v2940_v43  ;;  %v14767_v31 = vld [vmem:[#allocation99_spill] sm:$0xff]  ;;  %v14769_v5 = vld [vmem:[#allocation145_spill] sm:$0xff]  ;;  %v14771_v23 = vld [vmem:[#allocation100_spill] sm:$0xff] }
 0x302   : > { %3946 = vst [vmem:[#allocation3] sm:$0xff] %v3914_v47  ;;  %v12304_v48 = vmax.f32 %v3885_v32, 0.0  ;;  %v3884_v0 = vadd.f32 %v12249_v30, %v3845_v60  ;;  %v3848_v54 = vadd.f32 %v14763_v59, %v3542_v28  ;;  %v3541_v19 = vadd.f32 %v3398_v52, %v3235_v27  ;;  %v14768_v28 = vld [vmem:[#allocation134_spill] sm:$0xff]  ;;  %v14770_v3 = vld [vmem:[#allocation147_spill] sm:$0xff] }
 0x303   : > { %v9319_v1 = vpop.f32.mrf.mxu1  ;;  %v12319_v32 = vadd.f32 %v14767_v31, %v2939_v9  ;;  %v2943_v59 = vadd.f32 %v14769_v5, %v12183_v49  ;;  %v2946_v18 = vadd.f32 %v14770_v3, %v12187_v14  ;;  %v12331_v34 = vadd.f32 %v14771_v23, %v2942_v15  ;;  %v14772_v9 = vld [vmem:[#allocation101_spill] sm:$0xff]  ;;  %v12341_v49 = vpop.f32.mrf.mxu0  ;;  %v14775_v14 = vld [vmem:[#allocation148_spill] sm:$0xff]  ;;  %v14776_v15 = vld [vmem:[#allocation47_spill] sm:$0xff] }
 0x304   : > { %3949 = vst [vmem:[#allocation3 + $0x18] sm:$0xff] %v12304_v48  ;;  %v12322_v60 = vmax.f32 %v3884_v0, 0.0  ;;  %v3887_v27 = vadd.f32 %v12249_v30, %v3848_v54  ;;  %v3847_v51 = vadd.f32 %v14768_v28, %v3541_v19  ;;  %v3544_v52 = vadd.f32 %v9319_v1, %v3238_v35  ;;  %v14774_v35 = vld [vmem:[#allocation137_spill] sm:$0xff] }
 0x305   : > { %v3408_v43 = vpop.f32.mrf.mxu1  ;;  %v12334_v31 = vadd.f32 %v14772_v9, %v2941_v13  ;;  %v2945_v28 = vadd.f32 %v14775_v14, %v12190_v6  ;;  %v2948_v5 = vadd.f32 %v14776_v15, %v12198_v61  ;;  %v14777_v13 = vld [vmem:[#allocation13_spill] sm:$0xff]  ;;  %v14778_v9 = vld [vmem:[#allocation102_spill] sm:$0xff]  ;;  %v2950_v6 = vadd.f32 %v12090_v37, %v12206_v21  ;;  %v14781_v14 = vld [vmem:[#allocation103_spill] sm:$0xff]  ;;  %v12373_v21 = vpop.f32.mrf.mxu0 }
 0x306   : > { %3948 = vst [vmem:[#allocation3 + $0x10] sm:$0xff] %v12322_v60  ;;  %v12337_v0 = vmax.f32 %v3887_v27, 0.0  ;;  %v3886_v54 = vadd.f32 %v12249_v30, %v3847_v51  ;;  %v3850_v19 = vadd.f32 %v14774_v35, %v3544_v52  ;;  %v3543_v1 = vadd.f32 %v3408_v43, %v3237_v29  ;;  %v14780_v52 = vld [vmem:[#allocation140_spill] sm:$0xff] }
 0x307   : > { %v2947_v3 = vadd.f32 %v14777_v13, %v12201_v62  ;;  %v9322_v23 = vpop.f32.mrf.mxu1  ;;  %v12350_v27 = vadd.f32 %v14778_v9, %v2944_v39  ;;  %v2949_v61 = vadd.f32 %v12100_v4, %v12209_v41  ;;  %v12362_v15 = vadd.f32 %v14781_v14, %v2943_v59  ;;  %v14782_v39 = vld [vmem:[#allocation104_spill] sm:$0xff]  ;;  %v14784_v41 = vld [vmem:[#allocation105_spill] sm:$0xff]  ;;  %v14785_v9 = vld [vmem:[#allocation106_spill] sm:$0xff] }
 0x308   : > { %14773 = vst [vmem:[#allocation14_spill] sm:$0xff] %v12337_v0  ;;  %3951 = vst [vmem:[#allocation3 + $0x28] sm:$0xff] %v12337_v0  ;;  %v12353_v51 = vmax.f32 %v3886_v54, 0.0  ;;  %v3889_v29 = vadd.f32 %v12249_v30, %v3850_v19  ;;  %v3849_v43 = vadd.f32 %v14780_v52, %v3543_v1  ;;  %v3546_v35 = vadd.f32 %v9322_v23, %v3240_v12  ;;  %v14783_v1 = vld [vmem:[#allocation143_spill] sm:$0xff] }
 0x309   : > { %v3418_v62 = vpop.f32.mrf.mxu1  ;;  %v12365_v13 = vadd.f32 %v14782_v39, %v2946_v18  ;;  %v4006_v54 = vld [vmem:[#allocation3 + $0x1] sm:$0xff]  ;;  %v12376_v59 = vadd.f32 %v14784_v41, %v2945_v28  ;;  %v12379_v18 = vadd.f32 %v14785_v9, %v2948_v5  ;;  %v14786_v52 = vld [vmem:[#allocation107_spill] sm:$0xff]  ;;  %v2952_v28 = vadd.f32 %v12113_v38, %v12213_v45  ;;  %v12406_v45 = vpop.f32.mrf.mxu0 }
 0x30a   : > { %14779 = vst [vmem:[#allocation53_spill] sm:$0xff] %v12353_v51  ;;  %3950 = vst [vmem:[#allocation3 + $0x20] sm:$0xff] %v12353_v51  ;;  %v12368_v19 = vmax.f32 %v3889_v29, 0.0  ;;  %v3888_v12 = vadd.f32 %v12249_v30, %v3849_v43  ;;  %v3852_v23 = vadd.f32 %v14783_v1, %v3546_v35  ;;  %v3545_v37 = vadd.f32 %v3418_v62, %v12271_v42  ;;  %v14788_v42 = vld [vmem:[#allocation146_spill] sm:$0xff]  ;;  %v4062_v1 = vld [vmem:[#allocation3 + $0x2] sm:$0xff] }
 0x30b   : > { %v9325_v4 = vpop.f32.mrf.mxu1  ;;  %v12382_v14 = vadd.f32 %v14786_v52, %v2947_v3  ;;  %v4034_v29 = vmax.f32 %v3914_v47, %v4006_v54  ;;  %v14789_v41 = vld [vmem:[#allocation108_spill] sm:$0xff]  ;;  %v14790_v3 = vld [vmem:[#allocation109_spill] sm:$0xff]  ;;  %v2954_v63 = vadd.f32 %v12140_v57, %v12230_v7 }
 0x30c   : > { %3953 = vst [vmem:[#allocation3 + $0x38] sm:$0xff] %v12368_v19  ;;  %v12385_v43 = vmax.f32 %v3888_v12, 0.0  ;;  %v3891_v35 = vadd.f32 %v12249_v30, %v3852_v23  ;;  %v3851_v62 = vadd.f32 %v14788_v42, %v3545_v37  ;;  %v3548_v39 = vadd.f32 %v9325_v4, %v12287_v50  ;;  %v14792_v37 = vld [vmem:[#allocation12_spill] sm:$0xff] }
 0x30d   : > { %v3428_v5 = vpop.f32.mrf.mxu1  ;;  %v12393_v9 = vadd.f32 %v14789_v41, %v2950_v6  ;;  %v12396_v47 = vadd.f32 %v14790_v3, %v2949_v61  ;;  %v12398_v54 = vld [vmem:[#allocation3 + $0x11] sm:$0xff]  ;;  %v4007_v12 = vld [vmem:[#allocation3 + $0x9] sm:$0xff]  ;;  %v4090_v52 = vmax.f32 %v4034_v29, %v4062_v1  ;;  %v2951_v6 = vadd.f32 %v12125_v10, %v12220_v2 }
 0x30e   : > { %14787 = vst [vmem:[#allocation17_spill] sm:$0xff] %v12385_v43  ;;  %14791 = vst [vmem:[#allocation56_spill] sm:$0xff] %v12398_v54  ;;  %v12401_v23 = vmax.f32 %v3891_v35, 0.0  ;;  %v3890_v50 = vadd.f32 %v12249_v30, %v3851_v62  ;;  %v3854_v4 = vadd.f32 %v14792_v37, %v3548_v39  ;;  %v3547_v38 = vadd.f32 %v3428_v5, %v12299_v53  ;;  %v14794_v39 = vld [vmem:[#allocation50_spill] sm:$0xff]  ;;  %v12423_v2 = vld [vmem:[#allocation3 + $0x12] sm:$0xff] }
 0x30f   : > { %3952 = vst [vmem:[#allocation3 + $0x30] sm:$0xff] %v12385_v43  ;;  %v9328_v61 = vpop.f32.mrf.mxu1  ;;  %v4036_v42 = vmax.f32 %v12322_v60, %v12398_v54  ;;  %v4035_v29 = vmax.f32 %v3915_v16, %v4007_v12  ;;  %v12415_v35 = vmax.f32 %v4090_v52, %v12322_v60  ;;  %14795 = vst [vmem:[#allocation59_spill] sm:$0xff] %v12423_v2  ;;  %v4063_v5 = vld [vmem:[#allocation3 + $0xa] sm:$0xff] }
 0x310   : > { %3955 = vst [vmem:[#allocation3 + $0x48] sm:$0xff] %v12401_v23  ;;  %v12418_v62 = vmax.f32 %v3890_v50, 0.0  ;;  %v3893_v53 = vadd.f32 %v12249_v30, %v3854_v4  ;;  %v3853_v1 = vadd.f32 %v14794_v39, %v3547_v38  ;;  %v3550_v10 = vadd.f32 %v9328_v61, %v12302_v33  ;;  %v14796_v41 = vld [vmem:[#allocation110_spill] sm:$0xff] }
 0x311   : > { %14793 = vst [vmem:[#allocation22_spill] sm:$0xff] %v12415_v35  ;;  %v3438_v16 = vpop.f32.mrf.mxu1  ;;  %v12428_v60 = vadd.f32 %v14796_v41, %v2952_v28  ;;  %v12430_v3 = vld [vmem:[#allocation3 + $0x21] sm:$0xff]  ;;  %v12432_v12 = vld [vmem:[#allocation3 + $0x19] sm:$0xff]  ;;  %v12435_v52 = vmax.f32 %v4036_v42, %v12423_v2  ;;  %v4091_v50 = vmax.f32 %v4035_v29, %v4063_v5  ;;  %v12443_v28 = vpop.f32.mrf.mxu0  ;;  %v2953_v5 = vadd.f32 %v12161_v56, %v12234_v55 }
 0x312   : > { %14797 = vst [vmem:[#allocation24_spill] sm:$0xff] %v12430_v3  ;;  %14798 = vst [vmem:[#allocation62_spill] sm:$0xff] %v12432_v12  ;;  %v12438_v33 = vmax.f32 %v3893_v53, 0.0  ;;  %v3892_v37 = vadd.f32 %v12249_v30, %v3853_v1  ;;  %v3856_v57 = vadd.f32 %v12111_v11, %v3550_v10  ;;  %v3549_v7 = vadd.f32 %v3438_v16, %v12313_v25  ;;  %v12460_v1 = vld [vmem:[#allocation3 + $0x22] sm:$0xff]  ;;  %v12462_v10 = vld [vmem:[#allocation3 + $0x1a] sm:$0xff] }
 0x313   : > { %14799 = vst [vmem:[#allocation16_spill] sm:$0xff] %v12435_v52  ;;  %3954 = vst [vmem:[#allocation3 + $0x40] sm:$0xff] %v12418_v62  ;;  %v9331_v4 = vpop.f32.mrf.mxu1  ;;  %v4038_v38 = vmax.f32 %v12353_v51, %v12430_v3  ;;  %v4037_v61 = vmax.f32 %v12304_v48, %v12432_v12  ;;  %v12452_v29 = vmax.f32 %v4091_v50, %v12304_v48  ;;  %v14803_v48 = vld [vmem:[#allocation112_spill] sm:$0xff]  ;;  %v14814_v12 = vld [vmem:[#allocation115_spill] sm:$0xff] }
 0x314   : > { %3957 = vst [vmem:[#allocation3 + $0x58] sm:$0xff] %v12438_v33  ;;  %v12455_v11 = vmax.f32 %v3892_v37, 0.0  ;;  %v3895_v25 = vadd.f32 %v12249_v30, %v3856_v57  ;;  %v3855_v53 = vadd.f32 %v12138_v24, %v3549_v7  ;;  %v3552_v39 = vadd.f32 %v9331_v4, %v12316_v58  ;;  %14801 = vst [vmem:[#allocation65_spill] sm:$0xff] %v12460_v1  ;;  %v12485_v7 = vpop.f32.mrf.mxu0  ;;  %v14817_v3 = vld [vmem:[#allocation116_spill] sm:$0xff] }
 0x315   : > { %14800 = vst [vmem:[#allocation26_spill] sm:$0xff] %v12452_v29  ;;  %14802 = vst [vmem:[#allocation28_spill] sm:$0xff] %v12462_v10  ;;  %v3448_v16 = vpop.f32.mrf.mxu1  ;;  %v12467_v41 = vadd.f32 %v14803_v48, %v2951_v6  ;;  %v12474_v57 = vmax.f32 %v4038_v38, %v12460_v1  ;;  %v12477_v24 = vmax.f32 %v4037_v61, %v12462_v10  ;;  %v14809_v10 = vld [vmem:[#allocation113_spill] sm:$0xff] }
 0x316   : > { %v12469_v50 = vld [vmem:[#allocation3 + $0x31] sm:$0xff]  ;;  %v12471_v37 = vld [vmem:[#allocation3 + $0x29] sm:$0xff]  ;;  %3956 = vst [vmem:[#allocation3 + $0x50] sm:$0xff] %v12455_v11  ;;  %v12480_v58 = vmax.f32 %v3895_v25, 0.0  ;;  %v3894_v56 = vadd.f32 %v12249_v30, %v3855_v53  ;;  %v3858_v55 = vadd.f32 %v12176_v26, %v3552_v39  ;;  %v3551_v6 = vadd.f32 %v3448_v16, %v12319_v32 }
 0x317   : > { %14804 = vst [vmem:[#allocation68_spill] sm:$0xff] %v12469_v50  ;;  %14805 = vst [vmem:[#allocation11_spill] sm:$0xff] %v12471_v37  ;;  %v9334_v4 = vpop.f32.mrf.mxu1  ;;  %v4040_v38 = vmax.f32 %v12385_v43, %v12469_v50  ;;  %v4039_v61 = vmax.f32 %v12337_v0, %v12471_v37  ;;  %v12501_v16 = vld [vmem:[#allocation3 + $0x32] sm:$0xff]  ;;  %v12503_v42 = vld [vmem:[#allocation3 + $0x2a] sm:$0xff]  ;;  %v2956_v48 = vadd.f32 %v12192_v17, %v12241_v46 }
 0x318   : > { %14806 = vst [vmem:[#allocation18_spill] sm:$0xff] %v12477_v24  ;;  %3959 = vst [vmem:[#allocation3 + $0x68] sm:$0xff] %v12480_v58  ;;  %v12496_v26 = vmax.f32 %v3894_v56, 0.0  ;;  %v3897_v32 = vadd.f32 %v12249_v30, %v3858_v55  ;;  %v3857_v53 = vadd.f32 %v12226_v8, %v3551_v6  ;;  %v3554_v39 = vadd.f32 %v9334_v4, %v12331_v34  ;;  %v12529_v6 = vpop.f32.mrf.mxu0 }
 0x319   : > { %14807 = vst [vmem:[#allocation30_spill] sm:$0xff] %v12501_v16  ;;  %14808 = vst [vmem:[#allocation71_spill] sm:$0xff] %v12503_v42  ;;  %v3458_v2 = vpop.f32.mrf.mxu1  ;;  %v12508_v25 = vadd.f32 %v14809_v10, %v2954_v63  ;;  %v12515_v55 = vmax.f32 %v4040_v38, %v12501_v16  ;;  %v12518_v8 = vmax.f32 %v4039_v61, %v12503_v42  ;;  %v4543_v10 = vld [vmem:[%s14411_s7 + $0x78] sm:$0xff] }
 0x31a   : > { %v12510_v1 = vld [vmem:[#allocation3 + $0x41] sm:$0xff]  ;;  %v12512_v56 = vld [vmem:[#allocation3 + $0x39] sm:$0xff]  ;;  %3958 = vst [vmem:[#allocation3 + $0x60] sm:$0xff] %v12496_v26  ;;  %v12521_v34 = vmax.f32 %v3897_v32, 0.0  ;;  %v3896_v17 = vadd.f32 %v12249_v30, %v3857_v53  ;;  %v3860_v46 = vadd.f32 %v12255_v22, %v3554_v39  ;;  %v3553_v63 = vadd.f32 %v3458_v2, %v12334_v31  ;;  %9480 = vmatprep.subr.mxu0 %v4543_v10 }
 0x31b   : > { %14810 = vst [vmem:[#allocation32_spill] sm:$0xff] %v12510_v1  ;;  %14811 = vst [vmem:[#allocation74_spill] sm:$0xff] %v12512_v56  ;;  %v9337_v4 = vpop.f32.mrf.mxu1  ;;  %v4042_v38 = vmax.f32 %v12418_v62, %v12510_v1  ;;  %v4041_v61 = vmax.f32 %v12368_v19, %v12512_v56  ;;  %v4542_v31 = vld [vmem:[%s14411_s7 + $0x70] sm:$0xff]  ;;  %v12550_v32 = vld [vmem:[#allocation3 + $0x3a] sm:$0xff]  ;;  %9481 = vmatpush3.msra.mxu0 %v4543_v10  ;;  %v2955_v29 = vadd.f32 %v12215_v20, %v12244_v36 }
 0x31c   : > { %3961 = vst [vmem:[#allocation3 + $0x78] sm:$0xff] %v12521_v34  ;;  %v12543_v2 = vmax.f32 %v3896_v17, 0.0  ;;  %v3899_v53 = vadd.f32 %v12249_v30, %v3860_v46  ;;  %v3859_v39 = vadd.f32 %v12284_v40, %v3553_v63  ;;  %v3556_v42 = vadd.f32 %v9337_v4, %v12350_v27  ;;  %v12548_v16 = vld [vmem:[#allocation3 + $0x42] sm:$0xff]  ;;  %14813 = vst [vmem:[#allocation77_spill] sm:$0xff] %v12550_v32  ;;  %v12579_v4 = vpop.f32.mrf.mxu0 }
 0x31d   : > { %14812 = vst [vmem:[#allocation34_spill] sm:$0xff] %v12548_v16  ;;  %v4541_v22 = vld [vmem:[%s14411_s7 + $0x68] sm:$0xff]  ;;  %v3468_v17 = vpop.f32.mrf.mxu1  ;;  %v12558_v51 = vadd.f32 %v14814_v12, %v2953_v5  ;;  %v12560_v46 = vld [vmem:[#allocation3 + $0x51] sm:$0xff]  ;;  %v12562_v40 = vld [vmem:[#allocation3 + $0x49] sm:$0xff]  ;;  %v12565_v27 = vmax.f32 %v4042_v38, %v12548_v16  ;;  %v12568_v63 = vmax.f32 %v4041_v61, %v12550_v32  ;;  %9482 = vmatprep.subr.mxu0 %v4542_v31 }
 0x31e   : > { %3960 = vst [vmem:[#allocation3 + $0x70] sm:$0xff] %v12543_v2  ;;  %v12571_v10 = vmax.f32 %v3899_v53, 0.0  ;;  %v3898_v20 = vadd.f32 %v12249_v30, %v3859_v39  ;;  %v3862_v36 = vadd.f32 %v12310_v44, %v3556_v42  ;;  %v3555_v12 = vadd.f32 %v3468_v17, %v12362_v15  ;;  %9483 = vmatpush3.msra.mxu0 %v4542_v31  ;;  %v4540_v5 = vld [vmem:[%s14411_s7 + $0x60] sm:$0xff]  ;;  %v12597_v52 = vld [vmem:[#allocation3 + $0x4a] sm:$0xff] }
 0x31f   : > { %v9340_v38 = vpop.f32.mrf.mxu1  ;;  %v4044_v61 = vmax.f32 %v12455_v11, %v12560_v46  ;;  %v4043_v53 = vmax.f32 %v12401_v23, %v12562_v40  ;;  %9484 = vmatprep.subr.mxu0 %v4541_v22  ;;  %v12595_v32 = vld [vmem:[#allocation3 + $0x52] sm:$0xff]  ;;  %14816 = vst [vmem:[#allocation36_spill] sm:$0xff] %v12597_v52  ;;  %v12603_v16 = vadd.f32 %v14817_v3, %v2956_v48 }
 0x320   : > { %3963 = vst [vmem:[#allocation3 + $0x88] sm:$0xff] %v12571_v10  ;;  %v12590_v15 = vmax.f32 %v3898_v20, 0.0  ;;  %v3901_v42 = vadd.f32 %v12249_v30, %v3862_v36  ;;  %v3861_v31 = vadd.f32 %v12341_v49, %v3555_v12  ;;  %v3558_v17 = vadd.f32 %v9340_v38, %v12365_v13  ;;  %14815 = vst [vmem:[#allocation20_spill] sm:$0xff] %v12595_v32  ;;  %v4539_v44 = vld [vmem:[%s14411_s7 + $0x58] sm:$0xff]  ;;  %v4538_v38 = vld [vmem:[%s14411_s7 + $0x50] sm:$0xff] }
 0x321   : > { %9485 = vmatpush3.msra.mxu0 %v4541_v22  ;;  %v3478_v39 = vpop.f32.mrf.mxu1  ;;  %v14818_v20 = vld [vmem:[#allocation118_spill] sm:$0xff]  ;;  %v12608_v36 = vld [vmem:[#allocation3 + $0x61] sm:$0xff]  ;;  %v12610_v49 = vld [vmem:[#allocation3 + $0x59] sm:$0xff]  ;;  %v12613_v13 = vmax.f32 %v4044_v61, %v12595_v32  ;;  %v12616_v22 = vmax.f32 %v4043_v53, %v12597_v52  ;;  %v12627_v61 = vpop.f32.mrf.mxu0 }
 0x322   : > { %v12606_v0 = vadd.f32 %v14818_v20, %v2955_v29  ;;  %9486 = vmatprep.subr.mxu0 %v4540_v5  ;;  %3962 = vst [vmem:[#allocation3 + $0x80] sm:$0xff] %v12590_v15  ;;  %v12619_v12 = vmax.f32 %v3901_v42, 0.0  ;;  %v3900_v3 = vadd.f32 %v12249_v30, %v3861_v31  ;;  %v3864_v29 = vadd.f32 %v12373_v21, %v3558_v17  ;;  %v12643_v24 = vld [vmem:[#allocation3 + $0x62] sm:$0xff]  ;;  %v12645_v37 = vld [vmem:[#allocation3 + $0x5a] sm:$0xff] }
 0x323   : > { %v3557_v48 = vadd.f32 %v3478_v39, %v12376_v59  ;;  %9487 = vmatpush3.msra.mxu0 %v4540_v5  ;;  %v9343_v53 = vpop.f32.mrf.mxu1  ;;  %v4046_v20 = vmax.f32 %v12496_v26, %v12608_v36  ;;  %v4045_v42 = vmax.f32 %v12438_v33, %v12610_v49  ;;  %v4537_v21 = vld [vmem:[%s14411_s7 + $0x48] sm:$0xff] }
 0x324   : > { %9488 = vmatprep.subr.mxu0 %v4539_v44  ;;  %3965 = vst [vmem:[#allocation3 + $0x98] sm:$0xff] %v12619_v12  ;;  %v12638_v59 = vmax.f32 %v3900_v3, 0.0  ;;  %v3903_v5 = vadd.f32 %v12249_v30, %v3864_v29  ;;  %v3560_v17 = vadd.f32 %v9343_v53, %v12379_v18  ;;  %v14819_v18 = vmax.f32 %v12474_v57, %v12385_v43  ;;  %v4536_v57 = vld [vmem:[%s14411_s7 + $0x40] sm:$0xff] }
 0x325   : > { %v3863_v39 = vadd.f32 %v12406_v45, %v3557_v48  ;;  %9489 = vmatpush3.msra.mxu0 %v4539_v44  ;;  %v3488_v31 = vpop.f32.mrf.mxu1  ;;  %v12650_v52 = vld [vmem:[#allocation3 + $0x71] sm:$0xff]  ;;  %v12652_v3 = vld [vmem:[#allocation3 + $0x69] sm:$0xff]  ;;  %v12655_v29 = vmax.f32 %v4046_v20, %v12643_v24  ;;  %v12658_v45 = vmax.f32 %v4045_v42, %v12645_v37 }
 0x326   : > { %v12664_v44 = vmax.f32 %v14819_v18, %v12469_v50  ;;  %9490 = vmatprep.subr.mxu0 %v4538_v38  ;;  %3964 = vst [vmem:[#allocation3 + $0x90] sm:$0xff] %v12638_v59  ;;  %v12669_v53 = vmax.f32 %v3903_v5, 0.0  ;;  %v3866_v32 = vadd.f32 %v12443_v28, %v3560_v17  ;;  %v3559_v42 = vadd.f32 %v3488_v31, %v12382_v14  ;;  %v12677_v18 = vpop.f32.mrf.mxu0  ;;  %v12693_v43 = vld [vmem:[#allocation3 + $0x72] sm:$0xff]  ;;  %v12695_v54 = vld [vmem:[#allocation3 + $0x6a] sm:$0xff] }
 0x327   : > { %v3902_v20 = vadd.f32 %v12249_v30, %v3863_v39  ;;  %9491 = vmatpush3.msra.mxu0 %v4538_v38  ;;  %v9346_v50 = vpop.f32.mrf.mxu1  ;;  %v4048_v48 = vmax.f32 %v12543_v2, %v12650_v52  ;;  %v4047_v5 = vmax.f32 %v12480_v58, %v12652_v3  ;;  %v4535_v14 = vld [vmem:[%s14411_s7 + $0x38] sm:$0xff] }
 0x328   : > { %14820 = vst [vmem:[#allocation80_spill] sm:$0xff] %v12664_v44  ;;  %14821 = vst [vmem:[#allocation38_spill] sm:$0xff] %v12669_v53  ;;  %9492 = vmatprep.subr.mxu0 %v4537_v21  ;;  %v3905_v38 = vadd.f32 %v12249_v30, %v3866_v32  ;;  %v3865_v31 = vadd.f32 %v12485_v7, %v3559_v42  ;;  %v3562_v17 = vadd.f32 %v9346_v50, %v12393_v9 }
 0x329   : > { %3967 = vst [vmem:[#allocation3 + $0xa8] sm:$0xff] %v12669_v53  ;;  %v12688_v28 = vmax.f32 %v3902_v20, 0.0  ;;  %9493 = vmatpush3.msra.mxu0 %v4537_v21  ;;  %v3498_v39 = vpop.f32.mrf.mxu1  ;;  %v12700_v35 = vld [vmem:[#allocation3 + $0x79] sm:$0xff]  ;;  %v12702_v20 = vld [vmem:[#allocation3 + $0x81] sm:$0xff]  ;;  %v4104_v32 = vmax.f32 %v4048_v48, %v12693_v43  ;;  %v12706_v7 = vmax.f32 %v4047_v5, %v12695_v54  ;;  %v14823_v9 = vmax.f32 %v12515_v55, %v12418_v62 }
 0x32a   : > { %v14824_v21 = vmax.f32 %v12518_v8, %v12368_v19  ;;  %9494 = vmatprep.subr.mxu0 %v4536_v57  ;;  %v12721_v53 = vmax.f32 %v3905_v38, 0.0  ;;  %v3904_v48 = vadd.f32 %v12249_v30, %v3865_v31  ;;  %v3868_v5 = vadd.f32 %v12529_v6, %v3562_v17  ;;  %v4534_v55 = vld [vmem:[%s14411_s7 + $0x30] sm:$0xff]  ;;  %v12742_v17 = vld [vmem:[#allocation3 + $0x7a] sm:$0xff] }
 0x32b   : > { %14822 = vst [vmem:[#allocation21_spill] sm:$0xff] %v12688_v28  ;;  %v12712_v50 = vmax.f32 %v14823_v9, %v12510_v1  ;;  %3966 = vst [vmem:[#allocation3 + $0xa0] sm:$0xff] %v12688_v28  ;;  %v3561_v44 = vadd.f32 %v3498_v39, %v12396_v47  ;;  %9495 = vmatpush3.msra.mxu0 %v4536_v57  ;;  %v9432_v9 = vpop.f32.mrf.mxu0  ;;  %v9349_v8 = vpop.f32.mrf.mxu1  ;;  %v4050_v38 = vmax.f32 %v12590_v15, %v12702_v20 }
 0x32c   : > { %v12718_v42 = vmax.f32 %v14824_v21, %v12512_v56  ;;  %14825 = vst [vmem:[#allocation15_spill] sm:$0xff] %v12721_v53  ;;  %v4049_v21 = vmax.f32 %v12521_v34, %v12700_v35  ;;  %v4135_v28 = vmax.f32 %v4104_v32, %v12590_v15  ;;  %v4134_v6 = vmax.f32 %v12706_v7, %v12521_v34  ;;  %v12744_v56 = vld [vmem:[#allocation3 + $0x82] sm:$0xff] }
 0x32d   : > { %9496 = vmatprep.subr.mxu0 %v4535_v14  ;;  %3969 = vst [vmem:[#allocation3 + $0xb8] sm:$0xff] %v12721_v53  ;;  %v12737_v47 = vmax.f32 %v3904_v48, 0.0  ;;  %v3907_v57 = vadd.f32 %v12249_v30, %v3868_v5  ;;  %v3867_v39 = vadd.f32 %v12579_v4, %v3561_v44  ;;  %v3564_v31 = vadd.f32 %v9349_v8, %v12428_v60  ;;  %v3508_v32 = vpop.f32.mrf.mxu1  ;;  %v12746_v1 = vld [vmem:[#allocation3 + $0x89] sm:$0xff] }
 0x32e   : > { %9497 = vmatpush3.msra.mxu0 %v4535_v14  ;;  %v4105_v7 = vmax.f32 %v4049_v21, %v12742_v17  ;;  %v12750_v53 = vmax.f32 %v4050_v38, %v12744_v56  ;;  %v14828_v48 = vmax.f32 %v12565_v27, %v12455_v11  ;;  %v14829_v60 = vmax.f32 %v12568_v63, %v12401_v23  ;;  %v3824_v27 = vpop.f32.mrf.mxu0 }
 0x32f   : > { %14826 = vst [vmem:[#allocation19_spill] sm:$0xff] %v12737_v47  ;;  %9498 = vmatprep.subr.mxu0 %v4534_v55  ;;  %3968 = vst [vmem:[#allocation3 + $0xb0] sm:$0xff] %v12737_v47  ;;  %v12765_v14 = vmax.f32 %v3907_v57, 0.0  ;;  %v3906_v5 = vadd.f32 %v12249_v30, %v3867_v39  ;;  %v3870_v8 = vadd.f32 %v12627_v61, %v3564_v31  ;;  %v9352_v38 = vpop.f32.mrf.mxu1  ;;  %v12782_v31 = vld [vmem:[#allocation3 + $0x8a] sm:$0xff] }
 0x330   : > { %14827 = vst [vmem:[#allocation23_spill] sm:$0xff] %v12750_v53  ;;  %v12756_v4 = vmax.f32 %v14828_v48, %v12560_v46  ;;  %v12762_v44 = vmax.f32 %v14829_v60, %v12562_v40  ;;  %v3563_v21 = vadd.f32 %v3508_v32, %v12467_v41  ;;  %9499 = vmatpush3.msra.mxu0 %v4534_v55 }
 0x331   : > { %v4051_v48 = vmax.f32 %v12571_v10, %v12746_v1  ;;  %v4136_v63 = vmax.f32 %v4105_v7, %v12571_v10  ;;  %v4166_v57 = vmax.f32 %v4135_v28, %v12702_v20  ;;  %3971 = vst [vmem:[#allocation3 + $0xc8] sm:$0xff] %v12765_v14  ;;  %v12777_v39 = vmax.f32 %v3906_v5, 0.0  ;;  %v3518_v32 = vpop.f32.mrf.mxu1 }
 0x332   : > { %v3909_v61 = vadd.f32 %v12249_v30, %v3870_v8  ;;  %v3869_v41 = vadd.f32 %v12677_v18, %v3563_v21  ;;  %v3566_v55 = vadd.f32 %v9352_v38, %v12508_v25  ;;  %v14830_v28 = vmax.f32 %v12655_v29, %v12543_v2 }
 0x333   : > { %v12785_v7 = vmax.f32 %v4051_v48, %v12782_v31  ;;  %v4167_v60 = vmax.f32 %v4136_v63, %v12746_v1  ;;  %v14831_v8 = vmax.f32 %v12658_v45, %v12480_v58  ;;  %3970 = vst [vmem:[#allocation3 + $0xc0] sm:$0xff] %v12777_v39  ;;  %v3565_v48 = vadd.f32 %v3518_v32, %v12558_v51  ;;  %v9435_v63 = vpop.f32.mrf.mxu0  ;;  %v9355_v53 = vpop.f32.mrf.mxu1 }
 0x334   : > { %v4164_v5 = vmax.f32 %v14830_v28, %v12650_v52  ;;  %v12797_v25 = vmax.f32 %v3909_v61, 0.0  ;;  %v3908_v21 = vadd.f32 %v12249_v30, %v3869_v41  ;;  %v3872_v38 = vadd.f32 %v9432_v9, %v3566_v55 }
 0x335   : > { %v4163_v18 = vmax.f32 %v14831_v8, %v12652_v3  ;;  %v4198_v28 = vmax.f32 %v4167_v60, %v12782_v31  ;;  %v4197_v47 = vmax.f32 %v4166_v57, %v12744_v56  ;;  %v4165_v45 = vmax.f32 %v4134_v6, %v12700_v35  ;;  %v3528_v55 = vpop.f32.mrf.mxu1 }
 0x336   : > { %3973 = vst [vmem:[#allocation3 + $0xd8] sm:$0xff] %v12797_v25  ;;  %v12807_v61 = vmax.f32 %v3908_v21, 0.0  ;;  %v12810_v41 = vadd.f32 %v12249_v30, %v3872_v38  ;;  %v3871_v9 = vadd.f32 %v3824_v27, %v3565_v48  ;;  %v3568_v51 = vadd.f32 %v9355_v53, %v12603_v16  ;;  %v12829_v48 = vld [vmem:[#allocation3 + $0x91] sm:$0xff] }
 0x337   : > { %v4229_v32 = vmax.f32 %v4198_v28, %v12619_v12  ;;  %v4228_v8 = vmax.f32 %v4197_v47, %v12638_v59  ;;  %v14833_v60 = vmax.f32 %v12613_v13, %v12496_v26  ;;  %v14834_v57 = vmax.f32 %v12616_v22, %v12438_v33  ;;  %v12827_v47 = vld [vmem:[#allocation3 + $0x99] sm:$0xff]  ;;  %v3834_v13 = vpop.f32.mrf.mxu0 }
 0x338   : > { %14832 = vst [vmem:[#allocation25_spill] sm:$0xff] %v12807_v61  ;;  %3972 = vst [vmem:[#allocation3 + $0xd0] sm:$0xff] %v12807_v61  ;;  %v14472_v27 = vmax.f32 %v12810_v41, 0.0  ;;  %v3910_v16 = vadd.f32 %v12249_v30, %v3871_v9  ;;  %v3874_v53 = vadd.f32 %v9435_v63, %v3568_v51  ;;  %v3567_v38 = vadd.f32 %v3528_v55, %v12606_v0  ;;  %v12840_v51 = vld [vmem:[#allocation3 + $0x9a] sm:$0xff]  ;;  %v12842_v55 = vld [vmem:[#allocation3 + $0x92] sm:$0xff] }
 0x339   : > { %v4162_v6 = vmax.f32 %v14833_v60, %v12608_v36  ;;  %v4161_v21 = vmax.f32 %v14834_v57, %v12610_v49  ;;  %v4260_v28 = vmax.f32 %v4229_v32, %v12827_v47  ;;  %v4259_v60 = vmax.f32 %v4228_v8, %v12829_v48  ;;  %14835 = vst [vmem:[#allocation27_spill] sm:$0xff] %v12840_v51 }
 0x33a   : > { %v4196_v22 = vmax.f32 %v4165_v45, %v12742_v17  ;;  %v4195_v57 = vmax.f32 %v4164_v5, %v12693_v43  ;;  %3975 = vst [vmem:[#allocation3 + $0xe8] sm:$0xff] %v14472_v27  ;;  %v12837_v9 = vmax.f32 %v3910_v16, 0.0  ;;  %v3913_v0 = vadd.f32 %v12249_v30, %v3874_v53  ;;  %14836 = vst [vmem:[#allocation29_spill] sm:$0xff] %v12842_v55 }
 0x33b   : > { %v3873_v63 = vadd.f32 %v3834_v13, %v3567_v38  ;;  %v4194_v32 = vmax.f32 %v4163_v18, %v12695_v54  ;;  %v4316_v8 = vmax.f32 %v4260_v28, %v12840_v51  ;;  %v4315_v45 = vmax.f32 %v4259_v60, %v12842_v55 }
 0x33c   : > { %v4227_v5 = vmax.f32 %v4196_v22, %v12571_v10  ;;  %v4226_v29 = vmax.f32 %v4195_v57, %v12590_v15  ;;  %3974 = vst [vmem:[#allocation3 + $0xe0] sm:$0xff] %v12837_v9  ;;  %v3945_v16 = vmax.f32 %v3913_v0, 0.0  ;;  %v4193_v13 = vmax.f32 %v4162_v6, %v12643_v24  ;;  %v14837_v10 = vld [vmem:[#allocation20_spill] sm:$0xff]  ;;  %v14840_v0 = vld [vmem:[#allocation18_spill] sm:$0xff] }
 0x33d   : > { %v12851_v53 = vadd.f32 %v12249_v30, %v3873_v63  ;;  %v4225_v38 = vmax.f32 %v4194_v32, %v12521_v34  ;;  %4390 = vmatpush1.msra.mxu1 %v4316_v8  ;;  %v4192_v60 = vmax.f32 %v4161_v21, %v12645_v37  ;;  %v4191_v15 = vmax.f32 %v12756_v4, %v14837_v10  ;;  %v12861_v57 = vld [vmem:[#allocation5] sm:$0xff] }
 0x33e   : > { %v4258_v18 = vmax.f32 %v4227_v5, %v12746_v1  ;;  %v4257_v28 = vmax.f32 %v4226_v29, %v12702_v20  ;;  %3977 = vst [vmem:[#allocation3 + $0xf8] sm:$0xff] %v3945_v16  ;;  %4391 = vmatprep.subr.mxu1 %v12861_v57  ;;  %v4224_v30 = vmax.f32 %v4193_v13, %v12543_v2  ;;  %v14838_v34 = vld [vmem:[#allocation36_spill] sm:$0xff]  ;;  %v14839_v1 = vld [vmem:[#allocation11_spill] sm:$0xff]  ;;  %v14841_v20 = vld [vmem:[#allocation14_spill] sm:$0xff] }
 0x33f   : > { %v14473_v22 = vmax.f32 %v12851_v53, 0.0  ;;  %v4190_v6 = vmax.f32 %v12762_v44, %v14838_v34  ;;  %v14842_v29 = vmax.f32 %v14840_v0, %v14841_v20  ;;  %4392 = vmatpush1.msra.mxu1 %v4315_v45  ;;  %v4256_v63 = vmax.f32 %v4225_v38, %v12700_v35  ;;  %v14843_v44 = vld [vmem:[#allocation34_spill] sm:$0xff]  ;;  %v14844_v16 = vld [vmem:[#allocation24_spill] sm:$0xff]  ;;  %v14846_v13 = vld [vmem:[#allocation53_spill] sm:$0xff] }
 0x340   : > { %v4314_v4 = vmax.f32 %v4258_v18, %v12782_v31  ;;  %v4223_v32 = vmax.f32 %v4192_v60, %v12480_v58  ;;  %v4222_v8 = vmax.f32 %v4191_v15, %v12496_v26  ;;  %4393 = vmatprep.subr.mxu1 %v12861_v57  ;;  %v4189_v5 = vmax.f32 %v12712_v50, %v14843_v44  ;;  %v14845_v45 = vld [vmem:[#allocation16_spill] sm:$0xff]  ;;  %v14848_v35 = vld [vmem:[#allocation62_spill] sm:$0xff]  ;;  %v14850_v15 = vld [vmem:[#allocation77_spill] sm:$0xff] }
 0x341   : > { %v4155_v21 = vmax.f32 %v14842_v29, %v14839_v1  ;;  %3976 = vst [vmem:[#allocation3 + $0xf0] sm:$0xff] %v14473_v22  ;;  %v4221_v2 = vmax.f32 %v4190_v6, %v12438_v33  ;;  %v14847_v31 = vmax.f32 %v14845_v45, %v14846_v13  ;;  %v14849_v38 = vld [vmem:[#allocation26_spill] sm:$0xff]  ;;  %v4313_v26 = vmax.f32 %v4257_v28, %v12744_v56  ;;  %v14852_v6 = vld [vmem:[#allocation80_spill] sm:$0xff] }
 0x342   : > { %v4153_v58 = vmax.f32 %v14849_v38, %v14848_v35  ;;  %4394 = vmatpush1.msra.mxu1 %v4314_v4  ;;  %v4255_v60 = vmax.f32 %v4224_v30, %v12650_v52  ;;  %v4188_v0 = vmax.f32 %v12718_v42, %v14850_v15  ;;  %v14851_v33 = vld [vmem:[#allocation30_spill] sm:$0xff]  ;;  %v4052_v50 = vmax.f32 %v12638_v59, %v12829_v48  ;;  %v4005_v30 = vld [vmem:[#allocation3 + $0xd8] sm:$0x3f] }
 0x343   : > { %v4154_v18 = vmax.f32 %v14847_v31, %v14844_v16  ;;  %v4187_v29 = vmax.f32 %v14852_v6, %v14851_v33  ;;  %4395 = vmatprep.subr.mxu1 %v12861_v57  ;;  %v4220_v45 = vmax.f32 %v4189_v5, %v12455_v11  ;;  %v14853_v31 = vld [vmem:[#allocation71_spill] sm:$0xff]  ;;  %v4312_v56 = vmax.f32 %v4256_v63, %v12742_v17  ;;  %v14854_v17 = vld [vmem:[#allocation65_spill] sm:$0xff]  ;;  %v14855_v63 = vld [vmem:[#allocation28_spill] sm:$0xff] }
 0x344   : > { %v4186_v35 = vmax.f32 %v4155_v21, %v14853_v31  ;;  %4396 = vmatpush1.msra.mxu1 %v4313_v26  ;;  %v4254_v52 = vmax.f32 %v4223_v32, %v12652_v3  ;;  %v12901_v28 = vmax.f32 %v4188_v0, %v12401_v23  ;;  %v4033_v4 = vld [vmem:[#allocation3 + $0xd9] sm:$0x3f]  ;;  %v4053_v38 = vmax.f32 %v12619_v12, %v12827_v47  ;;  %v14857_v26 = vld [vmem:[#allocation22_spill] sm:$0xff] }
 0x345   : > { %v12904_v42 = vmax.f32 %v4187_v29, %v12418_v62  ;;  %4397 = vmatprep.subr.mxu1 %v12861_v57  ;;  %v4253_v11 = vmax.f32 %v4222_v8, %v12608_v36  ;;  %v4185_v3 = vmax.f32 %v4154_v18, %v14854_v17  ;;  %v4311_v23 = vmax.f32 %v4255_v60, %v12693_v43  ;;  %v14856_v5 = vld [vmem:[#allocation59_spill] sm:$0xff]  ;;  %v14858_v0 = vld [vmem:[#allocation56_spill] sm:$0xff]  ;;  %v14861_v8 = vld [vmem:[#allocation17_spill] sm:$0xff] }
 0x346   : > { %v12911_v21 = vmax.f32 %v4186_v35, %v12368_v19  ;;  %4398 = vmatpush1.msra.mxu1 %v4312_v56  ;;  %v4252_v62 = vmax.f32 %v4221_v2, %v12610_v49  ;;  %v12917_v32 = vmax.f32 %v4153_v58, %v14855_v63  ;;  %v14859_v6 = vmax.f32 %v14857_v26, %v14858_v0  ;;  %v12925_v36 = vld [vmem:[#allocation3 + $0xd1] sm:$0xff]  ;;  %v12934_v2 = vld [vmem:[#allocation3 + $0xc9] sm:$0xff]  ;;  %v12936_v18 = vld [vmem:[#allocation3 + $0xc1] sm:$0xff] }
 0x347   : > { %v12928_v19 = vmax.f32 %v4052_v50, %v12842_v55  ;;  %4399 = vmatprep.subr.mxu1 %v12861_v57  ;;  %v12932_v43 = vmax.f32 %v4185_v3, %v14861_v8  ;;  %v4061_v49 = vmax.f32 %v4005_v30, %v4033_v4  ;;  %14862 = vst [vmem:[#allocation33_spill] sm:$0xff] %v12934_v2  ;;  %v4089_v56 = vld [vmem:[#allocation3 + $0xda] sm:$0x3f]  ;;  %v4120_v63 = vld [vmem:[#allocation3 + $0xe8] sm:$0x3f]  ;;  %v12962_v26 = vld [vmem:[#allocation3 + $0xb1] sm:$0xff] }
 0x348   : > { %v12923_v29 = vmax.f32 %v14859_v6, %v14856_v5  ;;  %4400 = vmatpush1.msra.mxu1 %v4311_v23  ;;  %v4310_v58 = vmax.f32 %v4254_v52, %v12695_v54  ;;  %v4251_v60 = vmax.f32 %v4220_v45, %v12560_v46  ;;  %v12944_v3 = vld [vmem:[#allocation3 + $0xb9] sm:$0xff]  ;;  %v12947_v30 = vmax.f32 %v4053_v38, %v12840_v51  ;;  %v12972_v0 = vld [vmem:[#allocation3 + $0xc2] sm:$0xff] }
 0x349   : > { %14860 = vst [vmem:[#allocation31_spill] sm:$0xff] %v12928_v19  ;;  %4401 = vmatprep.subr.mxu1 %v12861_v57  ;;  %v4309_v4 = vmax.f32 %v4253_v11, %v12643_v24  ;;  %v4117_v54 = vmax.f32 %v4061_v49, %v4089_v56  ;;  %v4060_v46 = vmax.f32 %v12807_v61, %v12925_v36  ;;  %v12956_v23 = vld [vmem:[#allocation3 + $0xd2] sm:$0xff]  ;;  %v12964_v24 = vld [vmem:[#allocation3 + $0xa1] sm:$0xff]  ;;  %v12976_v49 = vld [vmem:[#allocation3 + $0xa9] sm:$0xff] }
 0x34a   : > { %4402 = vmatpush1.msra.mxu1 %v4310_v58  ;;  %v4308_v45 = vmax.f32 %v4252_v62, %v12645_v37  ;;  %v4250_v52 = vmax.f32 %v12901_v28, %v12562_v40  ;;  %v4059_v38 = vmax.f32 %v12765_v14, %v12934_v2  ;;  %v4058_v5 = vmax.f32 %v12777_v39, %v12936_v18  ;;  %v14864_v11 = vld [vmem:[#allocation32_spill] sm:$0xff]  ;;  %v12970_v28 = vld [vmem:[#allocation3 + $0xca] sm:$0xff]  ;;  %v14865_v6 = vld [vmem:[#allocation15_spill] sm:$0xff] }
 0x34b   : > { %14863 = vst [vmem:[#allocation35_spill] sm:$0xff] %v12964_v24  ;;  %4403 = vmatprep.subr.mxu1 %v12861_v57  ;;  %v4249_v37 = vmax.f32 %v12904_v42, %v14864_v11  ;;  %v4148_v62 = vmax.f32 %v4117_v54, %v4120_v63  ;;  %v4116_v40 = vmax.f32 %v4060_v46, %v12956_v23  ;;  %v14866_v56 = vld [vmem:[#allocation74_spill] sm:$0xff]  ;;  %v12983_v54 = vld [vmem:[#allocation3 + $0xba] sm:$0xff] }
 0x34c   : > { %v4057_v8 = vmax.f32 %v14865_v6, %v12944_v3  ;;  %4404 = vmatpush1.msra.mxu1 %v4309_v4  ;;  %v4307_v58 = vmax.f32 %v4251_v60, %v14837_v10  ;;  %v4248_v27 = vmax.f32 %v12911_v21, %v14866_v56  ;;  %v4151_v50 = vld [vmem:[#allocation3 + $0xe9] sm:$0x3f]  ;;  %v4115_v42 = vmax.f32 %v4059_v38, %v12970_v28  ;;  %v14867_v4 = vld [vmem:[#allocation19_spill] sm:$0xff]  ;;  %v12990_v60 = vld [vmem:[#allocation3 + $0xe1] sm:$0xff] }
 0x34d   : > { %v4114_v63 = vmax.f32 %v4058_v5, %v12972_v0  ;;  %4405 = vmatprep.subr.mxu1 %v12861_v57  ;;  %v4179_v46 = vmax.f32 %v4148_v62, %v4151_v50  ;;  %v4147_v11 = vmax.f32 %v4116_v40, %v12837_v9  ;;  %v4056_v10 = vmax.f32 %v14867_v4, %v12962_v26  ;;  %v12994_v5 = vld [vmem:[#allocation3 + $0xb2] sm:$0xff]  ;;  %v14868_v56 = vld [vmem:[#allocation38_spill] sm:$0xff]  ;;  %v14869_v50 = vld [vmem:[#allocation21_spill] sm:$0xff] }
 0x34e   : > { %v4113_v22 = vmax.f32 %v4057_v8, %v12983_v54  ;;  %4406 = vmatpush1.msra.mxu1 %v4308_v45  ;;  %v4146_v21 = vmax.f32 %v4115_v42, %v12797_v25  ;;  %v4055_v35 = vmax.f32 %v14868_v56, %v12976_v49  ;;  %v4054_v62 = vmax.f32 %v14869_v50, %v12964_v24  ;;  %v4182_v8 = vld [vmem:[#allocation3 + $0xea] sm:$0x3f]  ;;  %v13003_v55 = vld [vmem:[#allocation3 + $0xd9] sm:$0xff]  ;;  %v13010_v24 = vld [vmem:[#allocation3 + $0xe2] sm:$0xff] }
 0x34f   : > { %v4145_v38 = vmax.f32 %v4114_v63, %v12807_v61  ;;  %4407 = vmatprep.subr.mxu1 %v12861_v57  ;;  %v4306_v40 = vmax.f32 %v4250_v52, %v14838_v34  ;;  %v4178_v45 = vmax.f32 %v4147_v11, %v12990_v60  ;;  %v4112_v63 = vmax.f32 %v4056_v10, %v12994_v5  ;;  %v13007_v61 = vld [vmem:[#allocation3 + $0xaa] sm:$0xff]  ;;  %v13014_v52 = vld [vmem:[#allocation3 + $0xa2] sm:$0xff]  ;;  %v13018_v11 = vld [vmem:[#allocation3 + $0xda] sm:$0xff] }
 0x350   : > { %v4144_v42 = vmax.f32 %v4113_v22, %v12765_v14  ;;  %4408 = vmatpush1.msra.mxu1 %v4307_v58  ;;  %v4305_v51 = vmax.f32 %v4249_v37, %v14843_v44  ;;  %v4210_v19 = vmax.f32 %v4179_v46, %v4182_v8  ;;  %v4177_v50 = vmax.f32 %v4146_v21, %v13003_v55  ;;  %v14870_v37 = vld [vmem:[#allocation68_spill] sm:$0xff] }
 0x351   : > { %v4111_v34 = vmax.f32 %v4055_v35, %v13007_v61  ;;  %4409 = vmatprep.subr.mxu1 %v12861_v57  ;;  %v4209_v22 = vmax.f32 %v4178_v45, %v13010_v24  ;;  %v4176_v10 = vmax.f32 %v4145_v38, %v12925_v36  ;;  %v4110_v44 = vmax.f32 %v4054_v62, %v13014_v52  ;;  %v4213_v62 = vld [vmem:[#allocation3 + $0xf8] sm:$0x3f] }
 0x352   : > { %v4175_v58 = vmax.f32 %v4144_v42, %v12934_v2  ;;  %4410 = vmatpush1.msra.mxu1 %v4306_v40  ;;  %v4247_v46 = vmax.f32 %v12932_v43, %v14870_v37  ;;  %v4208_v35 = vmax.f32 %v4177_v50, %v13018_v11  ;;  %v4143_v21 = vmax.f32 %v4112_v63, %v12777_v39 }
 0x353   : > { %v4142_v8 = vmax.f32 %v4111_v34, %v14865_v6  ;;  %4411 = vmatprep.subr.mxu1 %v12861_v57  ;;  %v4304_v45 = vmax.f32 %v4248_v27, %v14850_v15  ;;  %v14871_v38 = vmax.f32 %v12917_v32, %v14841_v20  ;;  %v14872_v40 = vmax.f32 %v12851_v53, 0.0 }
 0x354   : > { %v4206_v43 = vmax.f32 %v4175_v58, %v12970_v28  ;;  %4412 = vmatpush1.msra.mxu1 %v4305_v51  ;;  %v14873_v50 = vmax.f32 %v12923_v29, %v14846_v13  ;;  %v4241_v34 = vmax.f32 %v4210_v19, %v4213_v62  ;;  %v14874_v27 = vmax.f32 %v12810_v41, 0.0 }
 0x355   : > { %v4246_v42 = vmax.f32 %v14871_v38, %v14839_v1  ;;  %v4240_v2 = vmax.f32 %v4209_v22, %v14872_v40  ;;  %v4173_v37 = vmax.f32 %v4142_v8, %v12944_v3  ;;  %v14875_v1 = vld [vmem:[#allocation23_spill] sm:$0xff]  ;;  %4413 = vmatprep.subr.mxu1 %v12861_v57  ;;  %v4207_v51 = vmax.f32 %v4176_v10, %v12956_v23 }
 0x356   : > { %v4245_v63 = vmax.f32 %v14873_v50, %v14844_v16  ;;  %v4239_v15 = vmax.f32 %v4208_v35, %v14874_v27  ;;  %v14876_v20 = vmax.f32 %v14875_v1, %v12638_v59  ;;  %v4237_v32 = vmax.f32 %v4206_v43, %v12797_v25  ;;  %4414 = vmatpush1.msra.mxu1 %v4304_v45  ;;  %v14878_v35 = vld [vmem:[#allocation21_spill] sm:$0xff]  ;;  %v4299_v50 = vld [vmem:[#allocation3 + $0xf2] sm:$0xff] }
 0x357   : > { %v4141_v13 = vmax.f32 %v4110_v44, %v14867_v4  ;;  %v14877_v41 = vmax.f32 %v12785_v7, %v12619_v12  ;;  %v4303_v29 = vmax.f32 %v4247_v46, %v14851_v33  ;;  %v4174_v19 = vmax.f32 %v4143_v21, %v12936_v18  ;;  %4415 = vmatprep.subr.mxu1 %v12861_v57  ;;  %v4243_v7 = vld [vmem:[#allocation3 + $0xf1] sm:$0xff]  ;;  %v14881_v45 = vld [vmem:[#allocation29_spill] sm:$0xff] }
 0x358   : > { %v4168_v53 = vmax.f32 %v14876_v20, %v12829_v48  ;;  %v4204_v59 = vmax.f32 %v4173_v37, %v12983_v54  ;;  %v4244_v48 = vld [vmem:[#allocation3 + $0xf9] sm:$0x3f]  ;;  %v4140_v25 = vmax.f32 %v12947_v30, %v14868_v56  ;;  %v4302_v22 = vmax.f32 %v4246_v42, %v14853_v31  ;;  %v14882_v37 = vld [vmem:[#allocation25_spill] sm:$0xff] }
 0x359   : > { %v4169_v16 = vmax.f32 %v14877_v41, %v12827_v47  ;;  %4416 = vmatpush1.msra.mxu1 %v4303_v29  ;;  %v4301_v10 = vmax.f32 %v4245_v63, %v14854_v17  ;;  %v4272_v12 = vmax.f32 %v4241_v34, %v4244_v48  ;;  %v4271_v33 = vmax.f32 %v4240_v2, %v4243_v7  ;;  %v14879_v31 = vld [vmem:[#allocation31_spill] sm:$0xff]  ;;  %v4242_v2 = vld [vmem:[#allocation3 + $0xe9] sm:$0xff] }
 0x35a   : > { %v4235_v47 = vmax.f32 %v4204_v59, %v12765_v14  ;;  %4417 = vmatprep.subr.mxu1 %v12861_v57  ;;  %v4238_v58 = vmax.f32 %v4207_v51, %v12837_v9  ;;  %v4172_v44 = vmax.f32 %v4141_v13, %v12962_v26  ;;  %v4171_v46 = vmax.f32 %v4140_v25, %v12976_v49  ;;  %v14880_v17 = vld [vmem:[#allocation27_spill] sm:$0xff]  ;;  %v4300_v14 = vld [vmem:[#allocation3 + $0xfa] sm:$0x3f]  ;;  %v7438_v7 = vld [vmem:[%s14411_s7 + $0xd0] sm:$0xff] }
 0x35b   : > { %4418 = vmatpush1.msra.mxu1 %v4302_v22  ;;  %v4205_v30 = vmax.f32 %v4174_v19, %v12972_v0  ;;  %v4139_v21 = vmax.f32 %v14879_v31, %v14878_v35  ;;  %v4200_v8 = vmax.f32 %v4169_v16, %v14880_v17  ;;  %v4199_v38 = vmax.f32 %v4168_v53, %v14881_v45  ;;  %v14883_v53 = vld [vmem:[#allocation35_spill] sm:$0xff]  ;;  %v14884_v19 = vld [vmem:[#allocation33_spill] sm:$0xff] }
 0x35c   : > { %4419 = vmatprep.subr.mxu1 %v12861_v57  ;;  %v4202_v9 = vmax.f32 %v4171_v46, %v13007_v61  ;;  %v4328_v42 = vmax.f32 %v4272_v12, %v4300_v14  ;;  %v4270_v62 = vmax.f32 %v4239_v15, %v4242_v2  ;;  %v4269_v63 = vmax.f32 %v4238_v58, %v12990_v60  ;;  %v7440_v25 = vld [vmem:[%s14411_s7 + $0xe0] sm:$0xff]  ;;  %v4336_v12 = vld [vmem:[%s14410_s6 + $0x38] sm:$0xff]  ;;  %v4338_v58 = vld [vmem:[%s14410_s6 + $0x48] sm:$0xff] }
 0x35d   : > { %4420 = vmatpush1.msra.mxu1 %v4301_v10  ;;  %v4231_v40 = vmax.f32 %v4200_v8, %v14868_v56  ;;  %v4230_v43 = vmax.f32 %v4199_v38, %v14878_v35  ;;  %v4327_v27 = vmax.f32 %v4271_v33, %v4299_v50  ;;  %v4236_v1 = vmax.f32 %v4205_v30, %v14882_v37  ;;  %v4298_v56 = vld [vmem:[#allocation3 + $0xea] sm:$0xff]  ;;  %v4333_v22 = vld [vmem:[%s14410_s6 + $0x20] sm:$0xff]  ;;  %v7437_v33 = vld [vmem:[%s14411_s7 + $0xc8] sm:$0xff] }
 0x35e   : > { %4429 = vmatprep.subr.mxu1 %v12861_v57  ;;  %v4233_v34 = vmax.f32 %v4202_v9, %v14865_v6  ;;  %v4203_v20 = vmax.f32 %v4172_v44, %v12994_v5  ;;  %v4170_v51 = vmax.f32 %v4139_v21, %v14883_v53  ;;  %v4326_v15 = vmax.f32 %v4270_v62, %v4298_v56  ;;  %v7439_v10 = vld [vmem:[%s14411_s7 + $0xd8] sm:$0xff]  ;;  %v7436_v44 = vld [vmem:[%s14411_s7 + $0xc0] sm:$0xff]  ;;  %v4339_v35 = vld [vmem:[%s14410_s6 + $0x50] sm:$0xff] }
 0x35f   : > { %7416 = vmatpush2.msk.msra.mxu1 %vm4385_vm12, %v4328_v42  ;;  %v4268_v13 = vmax.f32 %v4237_v32, %v13003_v55  ;;  %v4325_v6 = vmax.f32 %v4269_v63, %v13010_v24  ;;  %v4267_v60 = vmax.f32 %v4236_v1, %v12925_v36  ;;  %v4266_v59 = vmax.f32 %v4235_v47, %v14884_v19  ;;  %v4335_v47 = vld [vmem:[%s14410_s6 + $0x30] sm:$0xff]  ;;  %v4337_v46 = vld [vmem:[%s14410_s6 + $0x40] sm:$0xff]  ;;  %v4340_v30 = vld [vmem:[%s14410_s6 + $0x58] sm:$0xff] }
 0x360   : > { %4431 = vmatprep.subr.mxu1 %v12861_v57  ;;  %v4234_v41 = vmax.f32 %v4203_v20, %v12777_v39  ;;  %v4201_v16 = vmax.f32 %v4170_v51, %v13014_v52  ;;  %v4264_v32 = vmax.f32 %v4233_v34, %v12944_v3  ;;  %v4261_v3 = vmax.f32 %v4230_v43, %v14883_v53  ;;  %v4342_v31 = vld [vmem:[%s14410_s6 + $0x68] sm:$0xff]  ;;  %v4341_v21 = vld [vmem:[%s14410_s6 + $0x60] sm:$0xff]  ;;  %v4344_v17 = vld [vmem:[%s14410_s6 + $0x78] sm:$0xff] }
 0x361   : > { %4432 = vmatpush2.msra.mxu1 %v4327_v27  ;;  %v4324_v29 = vmax.f32 %v4268_v13, %v13018_v11  ;;  %v4323_v55 = vmax.f32 %v4267_v60, %v12956_v23  ;;  %v4322_v39 = vmax.f32 %v4266_v59, %v12970_v28  ;;  %v4262_v23 = vmax.f32 %v4231_v40, %v12976_v49  ;;  %v4329_v49 = vld [vmem:[%s14410_s6] sm:$0xff]  ;;  %v4343_v8 = vld [vmem:[%s14410_s6 + $0x70] sm:$0xff]  ;;  %v4346_v45 = vld [vmem:[%s14410_s6 + $0x88] sm:$0xff] }
 0x362   : > { %4433 = vmatprep.subr.mxu1 %v12861_v57  ;;  %v4265_v24 = vmax.f32 %v4234_v41, %v12936_v18  ;;  %v4232_v36 = vmax.f32 %v4201_v16, %v14867_v4  ;;  %v4320_v18 = vmax.f32 %v4264_v32, %v12983_v54  ;;  %v7443_v54 = vld [vmem:[%s14411_s7 + $0xf8] sm:$0xff]  ;;  %v4345_v38 = vld [vmem:[%s14410_s6 + $0x80] sm:$0xff]  ;;  %v4347_v2 = vld [vmem:[%s14410_s6 + $0x90] sm:$0xff] }
 0x363   : > { %4434 = vmatpush2.msra.mxu1 %v4326_v15  ;;  %v4332_v4 = vld [vmem:[%s14410_s6 + $0x18] sm:$0xff]  ;;  %v4350_v9 = vld [vmem:[%s14410_s6 + $0xa8] sm:$0xff]  ;;  %v4349_v42 = vld [vmem:[%s14410_s6 + $0xa0] sm:$0xff] }
 0x364   : > { %4435 = vmatprep.subr.mxu1 %v12861_v57  ;;  %v4321_v11 = vmax.f32 %v4265_v24, %v12972_v0  ;;  %v4263_v48 = vmax.f32 %v4232_v36, %v12962_v26  ;;  %v4318_v0 = vmax.f32 %v4262_v23, %v13007_v61  ;;  %v4317_v26 = vmax.f32 %v4261_v3, %v13014_v52  ;;  %v7442_v61 = vld [vmem:[%s14411_s7 + $0xf0] sm:$0xff]  ;;  %v4334_v52 = vld [vmem:[%s14410_s6 + $0x28] sm:$0xff]  ;;  %v4348_v14 = vld [vmem:[%s14410_s6 + $0x98] sm:$0xff] }
 0x365   : > { %4436 = vmatpush2.msra.mxu1 %v4325_v6  ;;  %v7435_v62 = vld [vmem:[%s14411_s7 + $0xb8] sm:$0xff]  ;;  %v4533_v40 = vld [vmem:[%s14411_s7 + $0x28] sm:$0xff]  ;;  %v7434_v43 = vld [vmem:[%s14411_s7 + $0xb0] sm:$0xff] }
 0x366   : > { %4437 = vmatprep.subr.mxu1 %v12861_v57  ;;  %v4319_v28 = vmax.f32 %v4263_v48, %v12994_v5  ;;  %v4331_v5 = vld [vmem:[%s14410_s6 + $0x10] sm:$0xff]  ;;  %9500 = vmatprep.subr.mxu0 %v4533_v40  ;;  %v4532_v50 = vld [vmem:[%s14411_s7 + $0x20] sm:$0xff]  ;;  %v7433_v63 = vld [vmem:[%s14411_s7 + $0xa8] sm:$0xff] }
 0x367   : > { %4438 = vmatpush2.msra.mxu1 %v4324_v29  ;;  %9501 = vmatpush3.msra.mxu0 %v4533_v40  ;;  %v4531_v34 = vld [vmem:[%s14411_s7 + $0x18] sm:$0xff]  ;;  %v7432_v27 = vld [vmem:[%s14411_s7 + $0xa0] sm:$0xff]  ;;  %v4530_v37 = vld [vmem:[%s14411_s7 + $0x10] sm:$0xff] }
 0x368   : > { %4439 = vmatprep.subr.mxu1 %v12861_v57  ;;  %9502 = vmatprep.subr.mxu0 %v4532_v50  ;;  %v7431_v1 = vld [vmem:[%s14411_s7 + $0x98] sm:$0xff]  ;;  %v4529_v20 = vld [vmem:[%s14411_s7 + $0x8] sm:$0xff]  ;;  %v7430_v53 = vld [vmem:[%s14411_s7 + $0x90] sm:$0xff] }
 0x369   : > { %4440 = vmatpush2.msra.mxu1 %v4323_v55  ;;  %9503 = vmatpush3.msra.mxu0 %v4532_v50  ;;  %v4528_v51 = vld [vmem:[%s14411_s7] sm:$0xff]  ;;  %v7429_v56 = vld [vmem:[%s14411_s7 + $0x88] sm:$0xff]  ;;  %v7475_v15 = vld [vmem:[%s14411_s7 + $0x1f8] sm:$0xff] }
 0x36a   : > { %4441 = vmatprep.subr.mxu1 %v12861_v57  ;;  %9504 = vmatprep.subr.mxu0 %v4531_v34  ;;  %v7428_v13 = vld [vmem:[%s14411_s7 + $0x80] sm:$0xff]  ;;  %v7459_v6 = vld [vmem:[%s14411_s7 + $0x178] sm:$0xff]  ;;  %v7474_v29 = vld [vmem:[%s14411_s7 + $0x1f0] sm:$0xff] }
 0x36b   : > { %4442 = vmatpush2.msra.mxu1 %v4322_v39  ;;  %9505 = vmatpush3.msra.mxu0 %v4531_v34  ;;  %v7473_v59 = vld [vmem:[%s14411_s7 + $0x1e8] sm:$0xff]  ;;  %v7472_v24 = vld [vmem:[%s14411_s7 + $0x1e0] sm:$0xff]  ;;  %v7471_v39 = vld [vmem:[%s14411_s7 + $0x1d8] sm:$0xff] }
 0x36c   : > { %4443 = vmatprep.subr.mxu1 %v12861_v57  ;;  %9506 = vmatprep.subr.mxu0 %v4530_v37  ;;  %v7470_v48 = vld [vmem:[%s14411_s7 + $0x1d0] sm:$0xff]  ;;  %v7469_v23 = vld [vmem:[%s14411_s7 + $0x1c8] sm:$0xff]  ;;  %v7447_v50 = vld [vmem:[%s14411_s7 + $0x118] sm:$0xff] }
 0x36d   : > { %4444 = vmatpush2.msra.mxu1 %v4321_v11  ;;  %9507 = vmatpush3.msra.mxu0 %v4530_v37  ;;  %v7446_v37 = vld [vmem:[%s14411_s7 + $0x110] sm:$0xff] }
 0x36e   : > { %4445 = vmatprep.subr.mxu1 %v12861_v57  ;;  %9508 = vmatprep.subr.mxu0 %v4529_v20 }
 0x36f   : > { %4446 = vmatpush2.msra.mxu1 %v4320_v18  ;;  %9509 = vmatpush3.msra.mxu0 %v4529_v20 }
 0x370   : > { %4447 = vmatprep.subr.mxu1 %v12861_v57  ;;  %9510 = vmatprep.subr.mxu0 %v4528_v51 }
 0x371   : > { %4448 = vmatpush2.msra.mxu1 %v4319_v28  ;;  %9511 = vmatpush3.msra.mxu0 %v4528_v51  ;;  %v7445_v51 = vld [vmem:[%s14411_s7 + $0x108] sm:$0xff] }
 0x372   : > { %4449 = vmatprep.subr.mxu1 %v12861_v57  ;;  %9568 = vmatprep.subr.mxu0 %v7475_v15 }
 0x373   : > { %4450 = vmatpush2.msra.mxu1 %v4318_v0  ;;  %v7458_v0 = vld [vmem:[%s14411_s7 + $0x170] sm:$0xff] }
 0x374   : > { %4451 = vmatprep.subr.mxu1 %v12861_v57  ;;  %v7441_v57 = vld [vmem:[%s14411_s7 + $0xe8] sm:$0xff] }
 0x375   : > { %4452 = vmatpush2.msra.mxu1 %v4317_v26  ;;  %v7468_v26 = vld [vmem:[%s14411_s7 + $0x1c0] sm:$0xff] }
 0x376   : > { %4454 = vmatmul.mubr.f32.vlgmr.msra.gmra.mxu1 %v4329_v49  ;;  %9436 = vmatprep.subr.mxu1 %v7443_v54 }
 0x377   : > { %7418 = vmatprep.mubr.msk.f32.mxu1 %vm4351_vm11, %v4332_v4  ;;  %9437 = vmatpush3.msra.mxu1 %v7443_v54  ;;  %v7457_v54 = vld [vmem:[%s14411_s7 + $0x168] sm:$0xff]  ;;  %v7467_v4 = vld [vmem:[%s14411_s7 + $0x1b8] sm:$0xff] }
 0x378   : > { %9438 = vmatprep.subr.mxu1 %v7442_v61 }
 0x379   : > { %9439 = vmatpush3.msra.mxu1 %v7442_v61 }
 0x37a   : > { %4459 = vmatmul.mubr.f32.gmra.mxu1 %v4331_v5  ;;  %9440 = vmatprep.subr.mxu1 %v7441_v57  ;;  %v7456_v5 = vld [vmem:[%s14411_s7 + $0x160] sm:$0xff] }
 0x37b   : > { %7419 = vmatprep.mubr.msk.f32.mxu1 %vm4351_vm11, %v4334_v52  ;;  %9441 = vmatpush3.msra.mxu1 %v7441_v57  ;;  %v7466_v52 = vld [vmem:[%s14411_s7 + $0x1b0] sm:$0xff] }
 0x37c   : > { %9442 = vmatprep.subr.mxu1 %v7440_v25 }
 0x37d   : > { %9443 = vmatpush3.msra.mxu1 %v7440_v25 }
 0x37e   : > { %4464 = vmatmul.mubr.f32.gmra.mxu1 %v4333_v22  ;;  %9444 = vmatprep.subr.mxu1 %v7439_v10  ;;  %v7455_v22 = vld [vmem:[%s14411_s7 + $0x158] sm:$0xff] }
 0x37f   : > { %7420 = vmatprep.mubr.msk.f32.mxu1 %vm4351_vm11, %v4336_v12  ;;  %9445 = vmatpush3.msra.mxu1 %v7439_v10  ;;  %v7454_v12 = vld [vmem:[%s14411_s7 + $0x150] sm:$0xff] }
 0x380   : > { %9446 = vmatprep.subr.mxu1 %v7438_v7 }
 0x381   : > { %9447 = vmatpush3.msra.mxu1 %v7438_v7 }
 0x382   : > { %4469 = vmatmul.mubr.f32.gmra.mxu1 %v4335_v47  ;;  %9448 = vmatprep.subr.mxu1 %v7437_v33  ;;  %v7465_v47 = vld [vmem:[%s14411_s7 + $0x1a8] sm:$0xff] }
 0x383   : > { %7421 = vmatprep.mubr.msk.f32.mxu1 %vm4351_vm11, %v4338_v58  ;;  %9449 = vmatpush3.msra.mxu1 %v7437_v33  ;;  %v7453_v58 = vld [vmem:[%s14411_s7 + $0x148] sm:$0xff] }
 0x384   : > { %9450 = vmatprep.subr.mxu1 %v7436_v44 }
 0x385   : > { %9451 = vmatpush3.msra.mxu1 %v7436_v44 }
 0x386   : > { %4474 = vmatmul.mubr.f32.gmra.mxu1 %v4337_v46  ;;  %9452 = vmatprep.subr.mxu1 %v7435_v62  ;;  %v7452_v46 = vld [vmem:[%s14411_s7 + $0x140] sm:$0xff] }
 0x387   : > { %7422 = vmatprep.mubr.msk.f32.mxu1 %vm4351_vm11, %v4340_v30  ;;  %9453 = vmatpush3.msra.mxu1 %v7435_v62  ;;  %v7464_v30 = vld [vmem:[%s14411_s7 + $0x1a0] sm:$0xff] }
 0x388   : > { %9454 = vmatprep.subr.mxu1 %v7434_v43 }
 0x389   : > { %9455 = vmatpush3.msra.mxu1 %v7434_v43 }
 0x38a   : > { %4479 = vmatmul.mubr.f32.gmra.mxu1 %v4339_v35  ;;  %9456 = vmatprep.subr.mxu1 %v7433_v63 }
 0x38b   : > { %7423 = vmatprep.mubr.msk.f32.mxu1 %vm4351_vm11, %v4342_v31  ;;  %9457 = vmatpush3.msra.mxu1 %v7433_v63  ;;  %v7451_v31 = vld [vmem:[%s14411_s7 + $0x138] sm:$0xff]  ;;  %v7461_v63 = vld [vmem:[%s14411_s7 + $0x188] sm:$0xff] }
 0x38c   : > { %9458 = vmatprep.subr.mxu1 %v7432_v27 }
 0x38d   : > { %9459 = vmatpush3.msra.mxu1 %v7432_v27 }
 0x38e   : > { %4484 = vmatmul.mubr.f32.gmra.mxu1 %v4341_v21  ;;  %9460 = vmatprep.subr.mxu1 %v7431_v1 }
 0x38f   : > { %7424 = vmatprep.mubr.msk.f32.mxu1 %vm4351_vm11, %v4344_v17  ;;  %9461 = vmatpush3.msra.mxu1 %v7431_v1  ;;  %v7460_v1 = vld [vmem:[%s14411_s7 + $0x180] sm:$0xff] }
 0x390   : > { %9462 = vmatprep.subr.mxu1 %v7430_v53 }
 0x391   : > { %9463 = vmatpush3.msra.mxu1 %v7430_v53 }
 0x392   : > { %4489 = vmatmul.mubr.f32.gmra.mxu1 %v4343_v8  ;;  %9464 = vmatprep.subr.mxu1 %v7429_v56  ;;  %v7450_v8 = vld [vmem:[%s14411_s7 + $0x130] sm:$0xff] }
 0x393   : > { %7425 = vmatprep.mubr.msk.f32.mxu1 %vm4351_vm11, %v4346_v45  ;;  %9465 = vmatpush3.msra.mxu1 %v7429_v56  ;;  %v7463_v45 = vld [vmem:[%s14411_s7 + $0x198] sm:$0xff] }
 0x394   : > { %9466 = vmatprep.subr.mxu1 %v7428_v13  ;;  %v7507_v56 = vld [vmem:[%s14411_s7 + $0x2f8] sm:$0xff] }
 0x395   : > { %9467 = vmatpush3.msra.mxu1 %v7428_v13  ;;  %v7506_v13 = vld [vmem:[%s14411_s7 + $0x2f0] sm:$0xff] }
 0x396   : > { %4494 = vmatmul.mubr.f32.gmra.mxu1 %v4345_v38  ;;  %9524 = vmatprep.subr.mxu1 %v7459_v6  ;;  %v7449_v38 = vld [vmem:[%s14411_s7 + $0x128] sm:$0xff] }
 0x397   : > { %7426 = vmatprep.mubr.msk.f32.mxu1 %vm4351_vm11, %v4348_v14 }
 0x39a   : > { %4499 = vmatmul.mubr.f32.gmra.mxu1 %v4347_v2 }
 0x39b   : > { %7427 = vmatprep.mubr.msk.f32.mxu1 %vm4351_vm11, %v4350_v9  ;;  %v7448_v9 = vld [vmem:[%s14411_s7 + $0x120] sm:$0xff] }
 0x39e   : > { %4504 = vmatmul.mubr.f32.gmra.mxu1 %v4349_v42  ;;  %v7462_v42 = vld [vmem:[%s14411_s7 + $0x190] sm:$0xff] }
 0x436   : > { %v4455_v60 = vpop.f32.mrf.mxu1 }
 0x437   : > { %4509 = vst [vmem:[#allocation4] sm:$0xff] %v4455_v60  ;;  %9512 = vmatprep.mubr.f32.mxu0 %v4455_v60  ;;  %v7505_v60 = vld [vmem:[%s14411_s7 + $0x2e8] sm:$0xff] }
 0x438   : > { %v4457_v41 = vpop.f32.mrf.mxu1 }
 0x43a   : > { %v13260_v16 = vpop.f32.mrf.mxu1 }
 0x43b   : > { %4510 = vst [vmem:[#allocation4 + $0x8] sm:$0xff] %v13260_v16  ;;  %9513 = vmatmul.mubr.f32.vlgmr.msra.gmra.mxu0 %v13260_v16 }
 0x43c   : > { %v4462_v19 = vpop.f32.mrf.mxu1  ;;  %9569 = vmatpush3.msra.mxu0 %v7475_v15  ;;  %v7444_v15 = vld [vmem:[%s14411_s7 + $0x100] sm:$0xff] }
 0x43d   : > { %9570 = vmatprep.subr.mxu0 %v7474_v29  ;;  %v7504_v19 = vld [vmem:[%s14411_s7 + $0x2e0] sm:$0xff] }
 0x43e   : > { %v13270_v55 = vpop.f32.mrf.mxu1  ;;  %9571 = vmatpush3.msra.mxu0 %v7474_v29  ;;  %v7490_v29 = vld [vmem:[%s14411_s7 + $0x270] sm:$0xff] }
 0x43f   : > { %4511 = vst [vmem:[#allocation4 + $0x10] sm:$0xff] %v13270_v55  ;;  %9572 = vmatprep.subr.mxu0 %v7473_v59  ;;  %9515 = vmatprep.mubr.f32.mxu0 %v13270_v55 }
 0x440   : > { %v4467_v36 = vpop.f32.mrf.mxu1  ;;  %9573 = vmatpush3.msra.mxu0 %v7473_v59  ;;  %v7489_v59 = vld [vmem:[%s14411_s7 + $0x268] sm:$0xff] }
 0x441   : > { %9574 = vmatprep.subr.mxu0 %v7472_v24 }
 0x442   : > { %v13280_v32 = vpop.f32.mrf.mxu1  ;;  %v4544_v11 = vld [vmem:[#allocation4 + $0x1] sm:$0xff]  ;;  %9575 = vmatpush3.msra.mxu0 %v7472_v24  ;;  %v7503_v24 = vld [vmem:[%s14411_s7 + $0x2d8] sm:$0xff] }
 0x443   : > { %4512 = vst [vmem:[#allocation4 + $0x18] sm:$0xff] %v13280_v32  ;;  %9468 = vmatprep.mubr.f32.mxu1 %v4544_v11  ;;  %9576 = vmatprep.subr.mxu0 %v7471_v39  ;;  %v4779_v53 = vld [vmem:[#allocation4 + $0x2] sm:$0xff]  ;;  %v7488_v11 = vld [vmem:[%s14411_s7 + $0x260] sm:$0xff] }
 0x444   : > { %v4472_v18 = vpop.f32.mrf.mxu1  ;;  %9577 = vmatpush3.msra.mxu0 %v7471_v39 }
 0x445   : > { %9578 = vmatprep.subr.mxu0 %v7470_v48  ;;  %9516 = vmatmul.mubr.f32.gmra.mxu0 %v13280_v32  ;;  %v7487_v18 = vld [vmem:[%s14411_s7 + $0x258] sm:$0xff] }
 0x446   : > { %v13290_v28 = vpop.f32.mrf.mxu1  ;;  %v13292_v3 = vld [vmem:[#allocation4 + $0x9] sm:$0xff]  ;;  %9579 = vmatpush3.msra.mxu0 %v7470_v48 }
 0x447   : > { %4513 = vst [vmem:[#allocation4 + $0x20] sm:$0xff] %v13290_v28  ;;  %9469 = vmatmul.mubr.f32.vlgmr.msra.gmra.mxu1 %v13292_v3  ;;  %9580 = vmatprep.subr.mxu0 %v7469_v23  ;;  %v4780_v41 = vld [vmem:[#allocation4 + $0xa] sm:$0xff] }
 0x448   : > { %9525 = vmatpush3.msra.mxu1 %v7459_v6  ;;  %v4477_v49 = vpop.f32.mrf.mxu1  ;;  %9581 = vmatpush3.msra.mxu0 %v7469_v23  ;;  %v7491_v6 = vld [vmem:[%s14411_s7 + $0x278] sm:$0xff]  ;;  %v7502_v48 = vld [vmem:[%s14411_s7 + $0x2d0] sm:$0xff]  ;;  %v7501_v23 = vld [vmem:[%s14411_s7 + $0x2c8] sm:$0xff] }
 0x449   : > { %9526 = vmatprep.subr.mxu1 %v7458_v0  ;;  %9582 = vmatprep.subr.mxu0 %v7468_v26  ;;  %v7486_v49 = vld [vmem:[%s14411_s7 + $0x250] sm:$0xff] }
 0x44a   : > { %9527 = vmatpush3.msra.mxu1 %v7458_v0  ;;  %v13308_v61 = vpop.f32.mrf.mxu1  ;;  %v13313_v57 = vld [vmem:[#allocation4 + $0x11] sm:$0xff]  ;;  %9583 = vmatpush3.msra.mxu0 %v7468_v26 }
 0x44b   : > { %4514 = vst [vmem:[#allocation4 + $0x28] sm:$0xff] %v13308_v61  ;;  %9528 = vmatprep.subr.mxu1 %v7457_v54  ;;  %9471 = vmatprep.mubr.f32.mxu1 %v13313_v57 }
 0x44c   : > { %9529 = vmatpush3.msra.mxu1 %v7457_v54  ;;  %v4482_v25 = vpop.f32.mrf.mxu1  ;;  %9584 = vmatprep.subr.mxu0 %v7467_v4  ;;  %v7500_v54 = vld [vmem:[%s14411_s7 + $0x2c0] sm:$0xff] }
 0x44d   : > { %9530 = vmatprep.subr.mxu1 %v7456_v5  ;;  %9585 = vmatpush3.msra.mxu0 %v7467_v4  ;;  %v7485_v4 = vld [vmem:[%s14411_s7 + $0x248] sm:$0xff]  ;;  %v7484_v25 = vld [vmem:[%s14411_s7 + $0x240] sm:$0xff] }
 0x44e   : > { %9531 = vmatpush3.msra.mxu1 %v7456_v5  ;;  %v13323_v10 = vpop.f32.mrf.mxu1  ;;  %9586 = vmatprep.subr.mxu0 %v7466_v52  ;;  %v13328_v7 = vld [vmem:[#allocation4 + $0x19] sm:$0xff]  ;;  %v7499_v5 = vld [vmem:[%s14411_s7 + $0x2b8] sm:$0xff] }
 0x44f   : > { %4515 = vst [vmem:[#allocation4 + $0x30] sm:$0xff] %v13323_v10  ;;  %9532 = vmatprep.subr.mxu1 %v7455_v22  ;;  %9587 = vmatpush3.msra.mxu0 %v7466_v52  ;;  %v13437_v36 = vld [vmem:[#allocation4 + $0x1a] sm:$0xff] }
 0x450   : > { %9533 = vmatpush3.msra.mxu1 %v7455_v22  ;;  %v4487_v33 = vpop.f32.mrf.mxu1  ;;  %9518 = vmatprep.mubr.f32.mxu0 %v13290_v28  ;;  %v7498_v22 = vld [vmem:[%s14411_s7 + $0x2b0] sm:$0xff] }
 0x451   : > { %9534 = vmatprep.subr.mxu1 %v7454_v12  ;;  %9472 = vmatmul.mubr.f32.gmra.mxu1 %v13328_v7  ;;  %v7482_v33 = vld [vmem:[%s14411_s7 + $0x230] sm:$0xff] }
 0x452   : > { %9535 = vmatpush3.msra.mxu1 %v7454_v12  ;;  %v13339_v44 = vpop.f32.mrf.mxu1  ;;  %9588 = vmatprep.subr.mxu0 %v7465_v47  ;;  %v13352_v21 = vld [vmem:[#allocation4 + $0x21] sm:$0xff]  ;;  %v7483_v12 = vld [vmem:[%s14411_s7 + $0x238] sm:$0xff] }
 0x453   : > { %4516 = vst [vmem:[#allocation4 + $0x38] sm:$0xff] %v13339_v44  ;;  %9536 = vmatprep.subr.mxu1 %v7453_v58  ;;  %9519 = vmatmul.mubr.f32.gmra.mxu0 %v13308_v61  ;;  %v13441_v39 = vld [vmem:[#allocation4 + $0x22] sm:$0xff] }
 0x454   : > { %9537 = vmatpush3.msra.mxu1 %v7453_v58  ;;  %v4492_v35 = vpop.f32.mrf.mxu1  ;;  %9589 = vmatpush3.msra.mxu0 %v7465_v47  ;;  %v7497_v47 = vld [vmem:[%s14411_s7 + $0x2a8] sm:$0xff] }
 0x455   : > { %9538 = vmatprep.subr.mxu1 %v7452_v46  ;;  %9590 = vmatprep.subr.mxu0 %v7464_v30  ;;  %v7481_v58 = vld [vmem:[%s14411_s7 + $0x228] sm:$0xff]  ;;  %v7494_v35 = vld [vmem:[%s14411_s7 + $0x290] sm:$0xff] }
 0x456   : > { %9539 = vmatpush3.msra.mxu1 %v7452_v46  ;;  %v13354_v17 = vpop.f32.mrf.mxu1  ;;  %9591 = vmatpush3.msra.mxu0 %v7464_v30  ;;  %v13368_v14 = vld [vmem:[#allocation4 + $0x29] sm:$0xff]  ;;  %v7480_v30 = vld [vmem:[%s14411_s7 + $0x220] sm:$0xff] }
 0x457   : > { %4517 = vst [vmem:[#allocation4 + $0x40] sm:$0xff] %v13354_v17  ;;  %9540 = vmatprep.subr.mxu1 %v7451_v31  ;;  %9474 = vmatprep.mubr.f32.mxu1 %v13352_v21  ;;  %v13457_v0 = vld [vmem:[#allocation4 + $0x2a] sm:$0xff] }
 0x458   : > { %9541 = vmatpush3.msra.mxu1 %v7451_v31  ;;  %9521 = vmatprep.mubr.f32.mxu0 %v13323_v10  ;;  %v4497_v2 = vpop.f32.mrf.mxu1  ;;  %v7495_v46 = vld [vmem:[%s14411_s7 + $0x298] sm:$0xff] }
 0x459   : > { %9542 = vmatprep.subr.mxu1 %v7450_v8  ;;  %9592 = vmatprep.subr.mxu0 %v7463_v45  ;;  %v7479_v31 = vld [vmem:[%s14411_s7 + $0x218] sm:$0xff]  ;;  %v7477_v2 = vld [vmem:[%s14411_s7 + $0x208] sm:$0xff] }
 0x45a   : > { %9543 = vmatpush3.msra.mxu1 %v7450_v8  ;;  %9522 = vmatmul.mubr.f32.gmra.mxu0 %v13339_v44  ;;  %v13377_v62 = vpop.f32.mrf.mxu1  ;;  %v13381_v40 = vld [vmem:[#allocation4 + $0x31] sm:$0xff]  ;;  %v7493_v8 = vld [vmem:[%s14411_s7 + $0x288] sm:$0xff] }
 0x45b   : > { %9544 = vmatprep.subr.mxu1 %v7449_v38  ;;  %9475 = vmatmul.mubr.f32.gmra.mxu1 %v13368_v14  ;;  %4518 = vst [vmem:[#allocation4 + $0x48] sm:$0xff] %v13377_v62  ;;  %v13461_v26 = vld [vmem:[#allocation4 + $0x32] sm:$0xff] }
 0x45c   : > { %9545 = vmatpush3.msra.mxu1 %v7449_v38  ;;  %9593 = vmatpush3.msra.mxu0 %v7463_v45  ;;  %v4502_v43 = vpop.f32.mrf.mxu1  ;;  %v7478_v45 = vld [vmem:[%s14411_s7 + $0x210] sm:$0xff]  ;;  %v7492_v38 = vld [vmem:[%s14411_s7 + $0x280] sm:$0xff] }
 0x45d   : > { %9546 = vmatprep.subr.mxu1 %v7448_v9  ;;  %9594 = vmatprep.subr.mxu0 %v7462_v42  ;;  %v7538_v43 = vld [vmem:[%s14411_s7 + $0x3f0] sm:$0xff] }
 0x45e   : > { %9600 = vmatprep.mubr.f32.mxu0 %v13260_v16  ;;  %9547 = vmatpush3.msra.mxu1 %v7448_v9  ;;  %v13390_v34 = vld [vmem:[#allocation4 + $0x39] sm:$0xff]  ;;  %v4505_v27 = vpop.f32.mrf.mxu1  ;;  %v7539_v9 = vld [vmem:[%s14411_s7 + $0x3f8] sm:$0xff] }
 0x45f   : > { %9595 = vmatpush3.msra.mxu0 %v7462_v42  ;;  %9477 = vmatprep.mubr.f32.mxu1 %v13381_v40  ;;  %4519 = vst [vmem:[#allocation4 + $0x50] sm:$0xff] %v4505_v27  ;;  %v13421_v16 = vld [vmem:[#allocation4 + $0x12] sm:$0xff]  ;;  %v13476_v52 = vld [vmem:[#allocation4 + $0x3a] sm:$0xff]  ;;  %v7522_v27 = vld [vmem:[%s14411_s7 + $0x370] sm:$0xff] }
 0x460   : > { %9548 = vmatprep.subr.mxu1 %v7447_v50  ;;  %9596 = vmatprep.subr.mxu0 %v7461_v63  ;;  %v4507_v20 = vpop.f32.mrf.mxu1  ;;  %v7476_v42 = vld [vmem:[%s14411_s7 + $0x200] sm:$0xff] }
 0x461   : > { %9478 = vmatmul.mubr.f32.gmra.mxu1 %v13390_v34  ;;  %9597 = vmatpush3.msra.mxu0 %v7461_v63  ;;  %v7537_v63 = vld [vmem:[%s14411_s7 + $0x3e8] sm:$0xff]  ;;  %v7535_v20 = vld [vmem:[%s14411_s7 + $0x3d8] sm:$0xff] }
 0x462   : > { %9549 = vmatpush3.msra.mxu1 %v7447_v50  ;;  %9556 = vmatprep.mubr.f32.mxu1 %v4779_v53  ;;  %v7523_v50 = vld [vmem:[%s14411_s7 + $0x378] sm:$0xff]  ;;  %v7520_v53 = vld [vmem:[%s14411_s7 + $0x360] sm:$0xff] }
 0x463   : > { %9550 = vmatprep.subr.mxu1 %v7446_v37  ;;  %9598 = vmatprep.subr.mxu0 %v7460_v1 }
 0x464   : > { %9551 = vmatpush3.msra.mxu1 %v7446_v37  ;;  %9599 = vmatpush3.msra.mxu0 %v7460_v1  ;;  %v7536_v37 = vld [vmem:[%s14411_s7 + $0x3e0] sm:$0xff]  ;;  %v7521_v1 = vld [vmem:[%s14411_s7 + $0x368] sm:$0xff] }
 0x465   : > { %9552 = vmatprep.subr.mxu1 %v7445_v51  ;;  %9601 = vmatmul.mubr.f32.vlgmr.msra.gmra.mxu0 %v13270_v55 }
 0x466   : > { %9656 = vmatprep.subr.mxu0 %v7507_v56  ;;  %9553 = vmatpush3.msra.mxu1 %v7445_v51  ;;  %v7534_v51 = vld [vmem:[%s14411_s7 + $0x3d0] sm:$0xff] }
 0x467   : > { %9603 = vmatprep.mubr.f32.mxu0 %v13280_v32  ;;  %9657 = vmatpush3.msra.mxu0 %v7507_v56  ;;  %v7519_v56 = vld [vmem:[%s14411_s7 + $0x358] sm:$0xff] }
 0x468   : > { %9554 = vmatprep.subr.mxu1 %v7444_v15  ;;  %9658 = vmatprep.subr.mxu0 %v7506_v13 }
 0x469   : > { %9555 = vmatpush3.msra.mxu1 %v7444_v15  ;;  %9659 = vmatpush3.msra.mxu0 %v7506_v13  ;;  %v7533_v15 = vld [vmem:[%s14411_s7 + $0x3c8] sm:$0xff] }
 0x46a   : > { %9557 = vmatmul.mubr.f32.vlgmr.msra.gmra.mxu1 %v4780_v41  ;;  %9604 = vmatmul.mubr.f32.gmra.mxu0 %v13290_v28  ;;  %v13574_v13 = vld [vmem:[#allocation4 + $0x42] sm:$0xff] }
 0x46b   : > { %9612 = vmatprep.subr.mxu1 %v7491_v6  ;;  %9660 = vmatprep.subr.mxu0 %v7505_v60 }
 0x46c   : > { %9559 = vmatprep.mubr.f32.mxu1 %v13421_v16  ;;  %9606 = vmatprep.mubr.f32.mxu0 %v13308_v61 }
 0x46d   : > { %9613 = vmatpush3.msra.mxu1 %v7491_v6  ;;  %9661 = vmatpush3.msra.mxu0 %v7505_v60  ;;  %v7518_v6 = vld [vmem:[%s14411_s7 + $0x350] sm:$0xff]  ;;  %v7532_v60 = vld [vmem:[%s14411_s7 + $0x3c0] sm:$0xff] }
 0x46e   : > { %9614 = vmatprep.subr.mxu1 %v7490_v29  ;;  %9662 = vmatprep.subr.mxu0 %v7504_v19 }
 0x46f   : > { %9615 = vmatpush3.msra.mxu1 %v7490_v29  ;;  %9663 = vmatpush3.msra.mxu0 %v7504_v19  ;;  %v7531_v29 = vld [vmem:[%s14411_s7 + $0x3b8] sm:$0xff]  ;;  %v13592_v19 = vld [vmem:[#allocation4 + $0x41] sm:$0xff] }
 0x470   : > { %9560 = vmatmul.mubr.f32.gmra.mxu1 %v13437_v36  ;;  %9607 = vmatmul.mubr.f32.gmra.mxu0 %v13323_v10 }
 0x471   : > { %9616 = vmatprep.subr.mxu1 %v7489_v59  ;;  %9664 = vmatprep.subr.mxu0 %v7503_v24 }
 0x472   : > { %9562 = vmatprep.mubr.f32.mxu1 %v13441_v39  ;;  %9609 = vmatprep.mubr.f32.mxu0 %v13339_v44 }
 0x473   : > { %9617 = vmatpush3.msra.mxu1 %v7489_v59  ;;  %9665 = vmatpush3.msra.mxu0 %v7503_v24  ;;  %v7530_v59 = vld [vmem:[%s14411_s7 + $0x3b0] sm:$0xff]  ;;  %v7515_v24 = vld [vmem:[%s14411_s7 + $0x338] sm:$0xff] }
 0x474   : > { %9618 = vmatprep.subr.mxu1 %v7488_v11  ;;  %9666 = vmatprep.subr.mxu0 %v7502_v48 }
 0x475   : > { %9619 = vmatpush3.msra.mxu1 %v7488_v11  ;;  %9667 = vmatpush3.msra.mxu0 %v7502_v48  ;;  %v7529_v11 = vld [vmem:[%s14411_s7 + $0x3a8] sm:$0xff]  ;;  %v7514_v48 = vld [vmem:[%s14411_s7 + $0x330] sm:$0xff] }
 0x476   : > { %9563 = vmatmul.mubr.f32.gmra.mxu1 %v13457_v0  ;;  %9610 = vmatmul.mubr.f32.gmra.mxu0 %v13354_v17 }
 0x477   : > { %9620 = vmatprep.subr.mxu1 %v7487_v18  ;;  %9668 = vmatprep.subr.mxu0 %v7501_v23 }
 0x478   : > { %9565 = vmatprep.mubr.f32.mxu1 %v13461_v26  ;;  %9621 = vmatpush3.msra.mxu1 %v7487_v18  ;;  %v7513_v18 = vld [vmem:[%s14411_s7 + $0x328] sm:$0xff] }
 0x479   : > { %9669 = vmatpush3.msra.mxu0 %v7501_v23  ;;  %9688 = vmatprep.mubr.f32.mxu0 %v4780_v41  ;;  %v7517_v41 = vld [vmem:[%s14411_s7 + $0x348] sm:$0xff]  ;;  %v7527_v23 = vld [vmem:[%s14411_s7 + $0x398] sm:$0xff] }
 0x47a   : > { %9622 = vmatprep.subr.mxu1 %v7486_v49  ;;  %9670 = vmatprep.subr.mxu0 %v7500_v54 }
 0x47b   : > { %9623 = vmatpush3.msra.mxu1 %v7486_v49  ;;  %9671 = vmatpush3.msra.mxu0 %v7500_v54  ;;  %v7512_v49 = vld [vmem:[%s14411_s7 + $0x320] sm:$0xff]  ;;  %v7526_v54 = vld [vmem:[%s14411_s7 + $0x390] sm:$0xff] }
 0x47c   : > { %9566 = vmatmul.mubr.f32.gmra.mxu1 %v13476_v52  ;;  %9624 = vmatprep.subr.mxu1 %v7485_v4 }
 0x47d   : > { %9672 = vmatprep.subr.mxu0 %v7499_v5  ;;  %9625 = vmatpush3.msra.mxu1 %v7485_v4  ;;  %v7511_v4 = vld [vmem:[%s14411_s7 + $0x318] sm:$0xff] }
 0x47e   : > { %9644 = vmatprep.mubr.f32.mxu1 %v13292_v3  ;;  %9673 = vmatpush3.msra.mxu0 %v7499_v5  ;;  %v7496_v3 = vld [vmem:[%s14411_s7 + $0x2a0] sm:$0xff]  ;;  %v7525_v5 = vld [vmem:[%s14411_s7 + $0x388] sm:$0xff] }
 0x47f   : > { %9626 = vmatprep.subr.mxu1 %v7484_v25  ;;  %9674 = vmatprep.subr.mxu0 %v7498_v22 }
 0x480   : > { %9627 = vmatpush3.msra.mxu1 %v7484_v25  ;;  %9675 = vmatpush3.msra.mxu0 %v7498_v22  ;;  %v7510_v25 = vld [vmem:[%s14411_s7 + $0x310] sm:$0xff]  ;;  %v7524_v22 = vld [vmem:[%s14411_s7 + $0x380] sm:$0xff] }
 0x481   : > { %9628 = vmatprep.subr.mxu1 %v7483_v12  ;;  %9676 = vmatprep.subr.mxu0 %v7497_v47 }
 0x482   : > { %9629 = vmatpush3.msra.mxu1 %v7483_v12  ;;  %9677 = vmatpush3.msra.mxu0 %v7497_v47  ;;  %v7509_v12 = vld [vmem:[%s14411_s7 + $0x308] sm:$0xff]  ;;  %v7508_v47 = vld [vmem:[%s14411_s7 + $0x300] sm:$0xff] }
 0x483   : > { %9630 = vmatprep.subr.mxu1 %v7482_v33  ;;  %9678 = vmatprep.subr.mxu0 %v7496_v3 }
 0x484   : > { %9631 = vmatpush3.msra.mxu1 %v7482_v33  ;;  %9679 = vmatpush3.msra.mxu0 %v7496_v3  ;;  %v7555_v33 = vld [vmem:[%s14411_s7 + $0x478] sm:$0xff]  ;;  %v7554_v3 = vld [vmem:[%s14411_s7 + $0x470] sm:$0xff] }
 0x485   : > { %9632 = vmatprep.subr.mxu1 %v7481_v58  ;;  %9680 = vmatprep.subr.mxu0 %v7495_v46 }
 0x486   : > { %9633 = vmatpush3.msra.mxu1 %v7481_v58  ;;  %9681 = vmatpush3.msra.mxu0 %v7495_v46  ;;  %v7541_v58 = vld [vmem:[%s14411_s7 + $0x408] sm:$0xff]  ;;  %v7540_v46 = vld [vmem:[%s14411_s7 + $0x400] sm:$0xff] }
 0x487   : > { %9634 = vmatprep.subr.mxu1 %v7480_v30  ;;  %9682 = vmatprep.subr.mxu0 %v7494_v35 }
 0x488   : > { %9635 = vmatpush3.msra.mxu1 %v7480_v30  ;;  %9683 = vmatpush3.msra.mxu0 %v7494_v35  ;;  %v5614_v30 = vld [vmem:[#allocation4 + $0x4a] sm:$0xff]  ;;  %v10277_v35 = vld [vmem:[#allocation5] sm:$0xff] }
 0x489   : > { %9636 = vmatprep.subr.mxu1 %v7479_v31  ;;  %9684 = vmatprep.subr.mxu0 %v7493_v8 }
 0x48a   : > { %9637 = vmatpush3.msra.mxu1 %v7479_v31  ;;  %9685 = vmatpush3.msra.mxu0 %v7493_v8  ;;  %v7572_v31 = vld [vmem:[%s14414_s10 + $0xf8] sm:$0xff]  ;;  %v7569_v8 = vld [vmem:[%s14414_s10 + $0xe0] sm:$0xff] }
 0x48b   : > { %9638 = vmatprep.subr.mxu1 %v7478_v45  ;;  %9686 = vmatprep.subr.mxu0 %v7492_v38 }
 0x48c   : > { %9639 = vmatpush3.msra.mxu1 %v7478_v45  ;;  %9687 = vmatpush3.msra.mxu0 %v7492_v38  ;;  %v5863_v45 = vld [vmem:[%s14414_s10 + $0x60] sm:$0xff]  ;;  %v7568_v38 = vld [vmem:[%s14414_s10 + $0xd8] sm:$0xff] }
 0x48d   : > { %9640 = vmatprep.subr.mxu1 %v7477_v2  ;;  %9689 = vmatmul.mubr.f32.vlgmr.msra.gmra.mxu0 %v13421_v16 }
 0x48e   : > { %9744 = vmatprep.subr.mxu0 %v7539_v9  ;;  %9641 = vmatpush3.msra.mxu1 %v7477_v2  ;;  %v5862_v2 = vld [vmem:[%s14414_s10 + $0x58] sm:$0xff] }
 0x48f   : > { %9691 = vmatprep.mubr.f32.mxu0 %v13437_v36  ;;  %9745 = vmatpush3.msra.mxu0 %v7539_v9  ;;  %v7567_v9 = vld [vmem:[%s14414_s10 + $0xd0] sm:$0xff] }
 0x490   : > { %9642 = vmatprep.subr.mxu1 %v7476_v42  ;;  %9746 = vmatprep.subr.mxu0 %v7538_v43 }
 0x491   : > { %9643 = vmatpush3.msra.mxu1 %v7476_v42  ;;  %9747 = vmatpush3.msra.mxu0 %v7538_v43  ;;  %v5861_v42 = vld [vmem:[%s14414_s10 + $0x50] sm:$0xff]  ;;  %v7566_v43 = vld [vmem:[%s14414_s10 + $0xc8] sm:$0xff] }
 0x492   : > { %9645 = vmatmul.mubr.f32.vlgmr.msra.gmra.mxu1 %v13313_v57  ;;  %9692 = vmatmul.mubr.f32.gmra.mxu0 %v13441_v39 }
 0x493   : > { %9700 = vmatprep.subr.mxu1 %v7523_v50  ;;  %9748 = vmatprep.subr.mxu0 %v7537_v63 }
 0x494   : > { %9647 = vmatprep.mubr.f32.mxu1 %v13328_v7  ;;  %9694 = vmatprep.mubr.f32.mxu0 %v13457_v0 }
 0x495   : > { %9701 = vmatpush3.msra.mxu1 %v7523_v50  ;;  %9749 = vmatpush3.msra.mxu0 %v7537_v63  ;;  %v5860_v50 = vld [vmem:[%s14414_s10 + $0x48] sm:$0xff]  ;;  %v7565_v63 = vld [vmem:[%s14414_s10 + $0xc0] sm:$0xff] }
 0x496   : > { %9702 = vmatprep.subr.mxu1 %v7522_v27  ;;  %9750 = vmatprep.subr.mxu0 %v7536_v37 }
 0x497   : > { %9703 = vmatpush3.msra.mxu1 %v7522_v27  ;;  %9751 = vmatpush3.msra.mxu0 %v7536_v37  ;;  %v5859_v27 = vld [vmem:[%s14414_s10 + $0x40] sm:$0xff]  ;;  %v7564_v37 = vld [vmem:[%s14414_s10 + $0xb8] sm:$0xff] }
 0x498   : > { %9648 = vmatmul.mubr.f32.gmra.mxu1 %v13352_v21  ;;  %9695 = vmatmul.mubr.f32.gmra.mxu0 %v13461_v26 }
 0x499   : > { %9704 = vmatprep.subr.mxu1 %v7521_v1  ;;  %9752 = vmatprep.subr.mxu0 %v7535_v20 }
 0x49a   : > { %9650 = vmatprep.mubr.f32.mxu1 %v13368_v14  ;;  %9697 = vmatprep.mubr.f32.mxu0 %v13476_v52 }
 0x49b   : > { %9705 = vmatpush3.msra.mxu1 %v7521_v1  ;;  %9753 = vmatpush3.msra.mxu0 %v7535_v20  ;;  %v5858_v1 = vld [vmem:[%s14414_s10 + $0x38] sm:$0xff]  ;;  %v7563_v20 = vld [vmem:[%s14414_s10 + $0xb0] sm:$0xff] }
 0x49c   : > { %9706 = vmatprep.subr.mxu1 %v7520_v53  ;;  %9754 = vmatprep.subr.mxu0 %v7534_v51 }
 0x49d   : > { %9707 = vmatpush3.msra.mxu1 %v7520_v53  ;;  %9755 = vmatpush3.msra.mxu0 %v7534_v51  ;;  %v5857_v53 = vld [vmem:[%s14414_s10 + $0x30] sm:$0xff] }
 0x49e   : > { %9651 = vmatmul.mubr.f32.gmra.mxu1 %v13381_v40  ;;  %9698 = vmatmul.mubr.f32.gmra.mxu0 %v13574_v13 }
 0x49f   : > { %9708 = vmatprep.subr.mxu1 %v7519_v56  ;;  %9756 = vmatprep.subr.mxu0 %v7533_v15 }
 0x4a0   : > { %9653 = vmatprep.mubr.f32.mxu1 %v13390_v34  ;;  %9709 = vmatpush3.msra.mxu1 %v7519_v56  ;;  %v7562_v56 = vld [vmem:[%s14414_s10 + $0xa8] sm:$0xff] }
 0x4a1   : > { %9757 = vmatpush3.msra.mxu0 %v7533_v15  ;;  %9776 = vmatprep.mubr.f32.mxu0 %v13313_v57  ;;  %v7516_v57 = vld [vmem:[%s14411_s7 + $0x340] sm:$0xff]  ;;  %v5856_v15 = vld [vmem:[%s14414_s10 + $0x28] sm:$0xff] }
 0x4a2   : > { %9710 = vmatprep.subr.mxu1 %v7518_v6  ;;  %9758 = vmatprep.subr.mxu0 %v7532_v60 }
 0x4a3   : > { %9711 = vmatpush3.msra.mxu1 %v7518_v6  ;;  %9759 = vmatpush3.msra.mxu0 %v7532_v60  ;;  %v5855_v6 = vld [vmem:[%s14414_s10 + $0x20] sm:$0xff] }
 0x4a4   : > { %9654 = vmatmul.mubr.f32.gmra.mxu1 %v13592_v19  ;;  %9712 = vmatprep.subr.mxu1 %v7517_v41 }
 0x4a5   : > { %9760 = vmatprep.subr.mxu0 %v7531_v29  ;;  %9713 = vmatpush3.msra.mxu1 %v7517_v41  ;;  %v7560_v41 = vld [vmem:[%s14414_s10 + $0x98] sm:$0xff] }
 0x4a6   : > { %9732 = vmatprep.mubr.f32.mxu1 %v13270_v55  ;;  %9761 = vmatpush3.msra.mxu0 %v7531_v29  ;;  %v7528_v55 = vld [vmem:[%s14411_s7 + $0x3a0] sm:$0xff]  ;;  %v5854_v29 = vld [vmem:[%s14414_s10 + $0x18] sm:$0xff] }
 0x4a7   : > { %9714 = vmatprep.subr.mxu1 %v7516_v57  ;;  %9762 = vmatprep.subr.mxu0 %v7530_v59 }
 0x4a8   : > { %9715 = vmatpush3.msra.mxu1 %v7516_v57  ;;  %9763 = vmatpush3.msra.mxu0 %v7530_v59  ;;  %v7559_v57 = vld [vmem:[%s14414_s10 + $0x90] sm:$0xff] }
 0x4a9   : > { %9716 = vmatprep.subr.mxu1 %v7515_v24  ;;  %9764 = vmatprep.subr.mxu0 %v7529_v11  ;;  %v5853_v59 = vld [vmem:[%s14414_s10 + $0x10] sm:$0xff] }
 0x4aa   : > { %9717 = vmatpush3.msra.mxu1 %v7515_v24  ;;  %9765 = vmatpush3.msra.mxu0 %v7529_v11  ;;  %v7558_v24 = vld [vmem:[%s14414_s10 + $0x88] sm:$0xff] }
 0x4ab   : > { %9718 = vmatprep.subr.mxu1 %v7514_v48  ;;  %9766 = vmatprep.subr.mxu0 %v7528_v55  ;;  %v5852_v11 = vld [vmem:[%s14414_s10 + $0x8] sm:$0xff] }
 0x4ac   : > { %9719 = vmatpush3.msra.mxu1 %v7514_v48  ;;  %9767 = vmatpush3.msra.mxu0 %v7528_v55  ;;  %v7557_v48 = vld [vmem:[%s14414_s10 + $0x80] sm:$0xff] }
 0x4ad   : > { %9720 = vmatprep.subr.mxu1 %v7513_v18  ;;  %9768 = vmatprep.subr.mxu0 %v7527_v23 }
 0x4ae   : > { %9721 = vmatpush3.msra.mxu1 %v7513_v18  ;;  %9769 = vmatpush3.msra.mxu0 %v7527_v23  ;;  %v5851_v18 = vld [vmem:[%s14414_s10] sm:$0xff] }
 0x4af   : > { %9722 = vmatprep.subr.mxu1 %v7512_v49  ;;  %9770 = vmatprep.subr.mxu0 %v7526_v54 }
 0x4b0   : > { %9723 = vmatpush3.msra.mxu1 %v7512_v49  ;;  %9771 = vmatpush3.msra.mxu0 %v7526_v54  ;;  %v5867_v49 = vld [vmem:[#allocation5 + $0x1] sm:$0xff]  ;;  %v13819_v54 = vld [vmem:[%s14414_s10 + $0x178] sm:$0xff] }
 0x4b1   : > { %9724 = vmatprep.subr.mxu1 %v7511_v4  ;;  %9772 = vmatprep.subr.mxu0 %v7525_v5  ;;  %14885 = vst [vmem:[#allocation37_spill] sm:$0xff] %v13819_v54 }
 0x4b2   : > { %9725 = vmatpush3.msra.mxu1 %v7511_v4  ;;  %9773 = vmatpush3.msra.mxu0 %v7525_v5  ;;  %v13826_v5 = vld [vmem:[%s14414_s10 + $0x1f8] sm:$0xff] }
 0x4b3   : > { %9726 = vmatprep.subr.mxu1 %v7510_v25  ;;  %9774 = vmatprep.subr.mxu0 %v7524_v22  ;;  %14886 = vst [vmem:[#allocation39_spill] sm:$0xff] %v13826_v5 }
 0x4b4   : > { %9727 = vmatpush3.msra.mxu1 %v7510_v25  ;;  %9775 = vmatpush3.msra.mxu0 %v7524_v22 }
 0x4b5   : > { %9728 = vmatprep.subr.mxu1 %v7509_v12  ;;  %9777 = vmatmul.mubr.f32.vlgmr.msra.gmra.mxu0 %v13328_v7  ;;  %v7553_v7 = vld [vmem:[%s14411_s7 + $0x468] sm:$0xff] }
 0x4b6   : > { %9729 = vmatpush3.msra.mxu1 %v7509_v12  ;;  %9779 = vmatprep.mubr.f32.mxu0 %v13352_v21  ;;  %v7551_v21 = vld [vmem:[%s14411_s7 + $0x458] sm:$0xff] }
 0x4b7   : > { %9730 = vmatprep.subr.mxu1 %v7508_v47  ;;  %9832 = vmatprep.subr.mxu0 %v7572_v31 }
 0x4b8   : > { %9731 = vmatpush3.msra.mxu1 %v7508_v47  ;;  %9833 = vmatpush3.msra.mxu0 %v7572_v31 }
 0x4b9   : > { %9733 = vmatmul.mubr.f32.vlgmr.msra.gmra.mxu1 %v13280_v32  ;;  %9780 = vmatmul.mubr.f32.gmra.mxu0 %v13368_v14  ;;  %v7552_v32 = vld [vmem:[%s14411_s7 + $0x460] sm:$0xff] }
 0x4ba   : > { %9788 = vmatprep.subr.mxu1 %v7555_v33  ;;  %9735 = vmatprep.mubr.f32.mxu1 %v13290_v28  ;;  %v5476_v28 = vld [vmem:[#allocation4 + $0x49] sm:$0xff]  ;;  %v7548_v14 = vld [vmem:[%s14411_s7 + $0x440] sm:$0xff] }
 0x4bb   : > { %9782 = vmatprep.mubr.f32.mxu0 %v13381_v40  ;;  %9789 = vmatpush3.msra.mxu1 %v7555_v33  ;;  %v7544_v40 = vld [vmem:[%s14411_s7 + $0x420] sm:$0xff] }
 0x4bc   : > { %9790 = vmatprep.subr.mxu1 %v7554_v3 }
 0x4bd   : > { %9791 = vmatpush3.msra.mxu1 %v7554_v3  ;;  %9783 = vmatmul.mubr.f32.gmra.mxu0 %v13390_v34  ;;  %v7543_v34 = vld [vmem:[%s14411_s7 + $0x418] sm:$0xff] }
 0x4be   : > { %9736 = vmatmul.mubr.f32.gmra.mxu1 %v13308_v61  ;;  %9792 = vmatprep.subr.mxu1 %v7553_v7  ;;  %v7550_v61 = vld [vmem:[%s14411_s7 + $0x450] sm:$0xff] }
 0x4bf   : > { %9738 = vmatprep.mubr.f32.mxu1 %v13323_v10  ;;  %9785 = vmatprep.mubr.f32.mxu0 %v13592_v19  ;;  %v7549_v10 = vld [vmem:[%s14411_s7 + $0x448] sm:$0xff] }
 0x4c0   : > { %9793 = vmatpush3.msra.mxu1 %v7553_v7 }
 0x4c1   : > { %9794 = vmatprep.subr.mxu1 %v7552_v32  ;;  %9786 = vmatmul.mubr.f32.gmra.mxu0 %v5476_v28 }
 0x4c2   : > { %9795 = vmatpush3.msra.mxu1 %v7552_v32  ;;  %9864 = vmatprep.mubr.f32.mxu0 %v5867_v49 }
 0x4c3   : > { %9739 = vmatmul.mubr.f32.gmra.mxu1 %v13339_v44  ;;  %9796 = vmatprep.subr.mxu1 %v7551_v21  ;;  %v7547_v44 = vld [vmem:[%s14411_s7 + $0x438] sm:$0xff] }
 0x4c4   : > { %9741 = vmatprep.mubr.f32.mxu1 %v13354_v17  ;;  %9797 = vmatpush3.msra.mxu1 %v7551_v21  ;;  %v7546_v17 = vld [vmem:[%s14411_s7 + $0x430] sm:$0xff] }
 0x4c5   : > { %9798 = vmatprep.subr.mxu1 %v7550_v61 }
 0x4c6   : > { %9799 = vmatpush3.msra.mxu1 %v7550_v61 }
 0x4c7   : > { %9742 = vmatmul.mubr.f32.gmra.mxu1 %v13377_v62  ;;  %9800 = vmatprep.subr.mxu1 %v7549_v10  ;;  %v7545_v62 = vld [vmem:[%s14411_s7 + $0x428] sm:$0xff] }
 0x4c8   : > { %9801 = vmatpush3.msra.mxu1 %v7549_v10  ;;  %9820 = vmatprep.mubr.f32.mxu1 %v13421_v16  ;;  %v7542_v16 = vld [vmem:[%s14411_s7 + $0x410] sm:$0xff] }
 0x4c9   : > { %9802 = vmatprep.subr.mxu1 %v7548_v14 }
 0x4ca   : > { %9803 = vmatpush3.msra.mxu1 %v7548_v14 }
 0x4cb   : > { %9804 = vmatprep.subr.mxu1 %v7547_v44 }
 0x4cc   : > { %9805 = vmatpush3.msra.mxu1 %v7547_v44 }
 0x4cd   : > { %9806 = vmatprep.subr.mxu1 %v7546_v17 }
 0x4ce   : > { %9807 = vmatpush3.msra.mxu1 %v7546_v17 }
 0x4cf   : > { %9808 = vmatprep.subr.mxu1 %v7545_v62 }
 0x4d0   : > { %9809 = vmatpush3.msra.mxu1 %v7545_v62 }
 0x4d1   : > { %9810 = vmatprep.subr.mxu1 %v7544_v40 }
 0x4d2   : > { %9811 = vmatpush3.msra.mxu1 %v7544_v40 }
 0x4d3   : > { %9812 = vmatprep.subr.mxu1 %v7543_v34 }
 0x4d4   : > { %9813 = vmatpush3.msra.mxu1 %v7543_v34 }
 0x4d5   : > { %9814 = vmatprep.subr.mxu1 %v7542_v16 }
 0x4d6   : > { %9815 = vmatpush3.msra.mxu1 %v7542_v16 }
 0x4d7   : > { %9816 = vmatprep.subr.mxu1 %v7541_v58 }
 0x4d8   : > { %9817 = vmatpush3.msra.mxu1 %v7541_v58 }
 0x4d9   : > { %9818 = vmatprep.subr.mxu1 %v7540_v46 }
 0x4da   : > { %9819 = vmatpush3.msra.mxu1 %v7540_v46 }
 0x4db   : > { %9821 = vmatmul.mubr.f32.vlgmr.msra.gmra.mxu1 %v13437_v36  ;;  %v5866_v36 = vld [vmem:[%s14414_s10 + $0x78] sm:$0xff] }
 0x4dc   : > { %9823 = vmatprep.mubr.f32.mxu1 %v13441_v39  ;;  %v7571_v39 = vld [vmem:[%s14414_s10 + $0xf0] sm:$0xff]  ;;  %9876 = vmatprep.subr.mxu1 %v5866_v36 }
 0x4dd   : > { %9877 = vmatpush3.msra.mxu1 %v5866_v36  ;;  %9834 = vmatprep.subr.mxu0 %v7571_v39 }
 0x4de   : > { %9835 = vmatpush3.msra.mxu0 %v7571_v39 }
 0x4df   : > { %9824 = vmatmul.mubr.f32.gmra.mxu1 %v13457_v0  ;;  %v5865_v0 = vld [vmem:[%s14414_s10 + $0x70] sm:$0xff] }
 0x4e0   : > { %9826 = vmatprep.mubr.f32.mxu1 %v13461_v26  ;;  %v7570_v26 = vld [vmem:[%s14414_s10 + $0xe8] sm:$0xff]  ;;  %9878 = vmatprep.subr.mxu1 %v5865_v0 }
 0x4e1   : > { %9879 = vmatpush3.msra.mxu1 %v5865_v0  ;;  %9836 = vmatprep.subr.mxu0 %v7570_v26 }
 0x4e2   : > { %9837 = vmatpush3.msra.mxu0 %v7570_v26 }
 0x4e3   : > { %9827 = vmatmul.mubr.f32.gmra.mxu1 %v13476_v52  ;;  %v5864_v52 = vld [vmem:[%s14414_s10 + $0x68] sm:$0xff]  ;;  %9838 = vmatprep.subr.mxu0 %v7569_v8 }
 0x4e4   : > { %9829 = vmatprep.mubr.f32.mxu1 %v13574_v13  ;;  %9880 = vmatprep.subr.mxu1 %v5864_v52  ;;  %v7561_v13 = vld [vmem:[%s14414_s10 + $0xa0] sm:$0xff] }
 0x4e5   : > { %9881 = vmatpush3.msra.mxu1 %v5864_v52  ;;  %9839 = vmatpush3.msra.mxu0 %v7569_v8 }
 0x4e6   : > { %9882 = vmatprep.subr.mxu1 %v5863_v45  ;;  %9840 = vmatprep.subr.mxu0 %v7568_v38 }
 0x4e7   : > { %9830 = vmatmul.mubr.f32.gmra.mxu1 %v5614_v30  ;;  %9841 = vmatpush3.msra.mxu0 %v7568_v38 }
 0x4e8   : > { %9908 = vmatprep.mubr.f32.mxu1 %v10277_v35  ;;  %9883 = vmatpush3.msra.mxu1 %v5863_v45 }
 0x4e9   : > { %9884 = vmatprep.subr.mxu1 %v5862_v2  ;;  %9842 = vmatprep.subr.mxu0 %v7567_v9 }
 0x4ea   : > { %9885 = vmatpush3.msra.mxu1 %v5862_v2  ;;  %9843 = vmatpush3.msra.mxu0 %v7567_v9 }
 0x4eb   : > { %9886 = vmatprep.subr.mxu1 %v5861_v42  ;;  %9844 = vmatprep.subr.mxu0 %v7566_v43 }
 0x4ec   : > { %9887 = vmatpush3.msra.mxu1 %v5861_v42  ;;  %9845 = vmatpush3.msra.mxu0 %v7566_v43 }
 0x4ed   : > { %9888 = vmatprep.subr.mxu1 %v5860_v50  ;;  %9846 = vmatprep.subr.mxu0 %v7565_v63 }
 0x4ee   : > { %9889 = vmatpush3.msra.mxu1 %v5860_v50  ;;  %9847 = vmatpush3.msra.mxu0 %v7565_v63 }
 0x4ef   : > { %9890 = vmatprep.subr.mxu1 %v5859_v27  ;;  %9848 = vmatprep.subr.mxu0 %v7564_v37 }
 0x4f0   : > { %9891 = vmatpush3.msra.mxu1 %v5859_v27  ;;  %9849 = vmatpush3.msra.mxu0 %v7564_v37 }
 0x4f1   : > { %9892 = vmatprep.subr.mxu1 %v5858_v1  ;;  %9850 = vmatprep.subr.mxu0 %v7563_v20 }
 0x4f2   : > { %9893 = vmatpush3.msra.mxu1 %v5858_v1  ;;  %9851 = vmatpush3.msra.mxu0 %v7563_v20 }
 0x4f3   : > { %9894 = vmatprep.subr.mxu1 %v5857_v53  ;;  %9852 = vmatprep.subr.mxu0 %v7562_v56 }
 0x4f4   : > { %9895 = vmatpush3.msra.mxu1 %v5857_v53  ;;  %9853 = vmatpush3.msra.mxu0 %v7562_v56 }
 0x4f5   : > { %9896 = vmatprep.subr.mxu1 %v5856_v15  ;;  %9854 = vmatprep.subr.mxu0 %v7561_v13 }
 0x4f6   : > { %9897 = vmatpush3.msra.mxu1 %v5856_v15  ;;  %9855 = vmatpush3.msra.mxu0 %v7561_v13 }
 0x4f7   : > { %9898 = vmatprep.subr.mxu1 %v5855_v6  ;;  %9856 = vmatprep.subr.mxu0 %v7560_v41 }
 0x4f8   : > { %9899 = vmatpush3.msra.mxu1 %v5855_v6  ;;  %9857 = vmatpush3.msra.mxu0 %v7560_v41 }
 0x4f9   : > { %9900 = vmatprep.subr.mxu1 %v5854_v29  ;;  %9858 = vmatprep.subr.mxu0 %v7559_v57 }
 0x4fa   : > { %9901 = vmatpush3.msra.mxu1 %v5854_v29  ;;  %9859 = vmatpush3.msra.mxu0 %v7559_v57 }
 0x4fb   : > { %9902 = vmatprep.subr.mxu1 %v5853_v59  ;;  %9860 = vmatprep.subr.mxu0 %v7558_v24  ;;  %v9514_v23 = vpop.f32.mrf.mxu0 }
 0x4fc   : > { %9903 = vmatpush3.msra.mxu1 %v5853_v59  ;;  %9861 = vmatpush3.msra.mxu0 %v7558_v24 }
 0x4fd   : > { %9904 = vmatprep.subr.mxu1 %v5852_v11  ;;  %9862 = vmatprep.subr.mxu0 %v7557_v48  ;;  %v4740_v25 = vpop.f32.mrf.mxu0 }
 0x4fe   : > { %9905 = vmatpush3.msra.mxu1 %v5852_v11  ;;  %9863 = vmatpush3.msra.mxu0 %v7557_v48 }
 0x4ff   : > { %9906 = vmatprep.subr.mxu1 %v5851_v18  ;;  %9920 = vmatprep.subr.mxu0 %v13819_v54 }
 0x500   : > { %9907 = vmatpush3.msra.mxu1 %v5851_v18 }
 0x501   : > { %9964 = vmatprep.subr.mxu1 %v13826_v5 }
 0x505   : > { %v9517_v12 = vpop.f32.mrf.mxu0 }
 0x507   : > { %v13772_v51 = vpop.f32.mrf.mxu1  ;;  %v4750_v33 = vpop.f32.mrf.mxu0 }
 0x508   : > { %v4746_v15 = vadd.f32 %v9514_v23, %v13772_v51 }
 0x509   : > { %v13786_v60 = vpop.f32.mrf.mxu1 }
 0x50a   : > { %v4741_v41 = vadd.f32 %v4740_v25, %v13786_v60 }
 0x511   : > { %v13794_v19 = vpop.f32.mrf.mxu1 }
 0x512   : > { %v4756_v59 = vadd.f32 %v9517_v12, %v13794_v19 }
 0x513   : > { %v13811_v55 = vpop.f32.mrf.mxu1  ;;  %v9520_v7 = vpop.f32.mrf.mxu0 }
 0x514   : > { %v4751_v48 = vadd.f32 %v4750_v33, %v13811_v55 }
 0x515   : > { %v4760_v28 = vpop.f32.mrf.mxu0 }
 0x51a   : > { %v9523_v61 = vpop.f32.mrf.mxu0 }
 0x51b   : > { %v13821_v4 = vpop.f32.mrf.mxu1 }
 0x51c   : > { %v4770_v14 = vpop.f32.mrf.mxu0  ;;  %v4766_v54 = vadd.f32 %v9520_v7, %v13821_v4 }
 0x51d   : > { %v4655_v22 = vpop.f32.mrf.mxu1 }
 0x521   : > { %v13830_v47 = vpop.f32.mrf.mxu1 }
 0x522   : > { %v4776_v19 = vadd.f32 %v9523_v61, %v13830_v47 }
 0x523   : > { %v13832_v3 = vpop.f32.mrf.mxu1 }
 0x524   : > { %v4771_v33 = vadd.f32 %v4770_v14, %v13832_v3  ;;  %v5795_v3 = vpop.permute.xlu0 %5794 }
 0x525   : > { %v9602_v17 = vpop.f32.mrf.mxu0 }
 0x527   : > { %v5008_v40 = vpop.f32.mrf.mxu0 }
 0x52a   : > { %v9558_v32 = vpop.f32.mrf.mxu1  ;;  %v9605_v16 = vpop.f32.mrf.mxu0 }
 0x52b   : > { %v4910_v29 = vadd.f32 %v9558_v32, %v4746_v15 }
 0x52c   : > { %v4870_v21 = vpop.f32.mrf.mxu1  ;;  %v5018_v46 = vpop.f32.mrf.mxu0 }
 0x52d   : > { %v4909_v24 = vadd.f32 %v4870_v21, %v4741_v41  ;;  %v5048_v49 = vadd.f32 %v9602_v17, %v4910_v29 }
 0x52f   : > { %v5047_v23 = vadd.f32 %v5008_v40, %v4909_v24  ;;  %v5805_v24 = vpop.permute.xlu0 %5804 }
 0x530   : > { %v9561_v10 = vpop.f32.mrf.mxu1  ;;  %v9608_v35 = vpop.f32.mrf.mxu0 }
 0x531   : > { %v4912_v18 = vadd.f32 %v9561_v10, %v4756_v59 }
 0x532   : > { %v4880_v44 = vpop.f32.mrf.mxu1  ;;  %v5028_v36 = vpop.f32.mrf.mxu0 }
 0x533   : > { %v5050_v25 = vadd.f32 %v9605_v16, %v4912_v18 }
 0x536   : > { %v9564_v62 = vpop.f32.mrf.mxu1  ;;  %v9611_v0 = vpop.f32.mrf.mxu0 }
 0x538   : > { %v4890_v34 = vpop.f32.mrf.mxu1  ;;  %v13834_v52 = vpop.f32.mrf.mxu0 }
 0x53c   : > { %v9567_v58 = vpop.f32.mrf.mxu1 }
 0x53d   : > { %v4916_v10 = vadd.f32 %v9567_v58, %v4776_v19 }
 0x53e   : > { %v4900_v30 = vpop.f32.mrf.mxu1 }
 0x53f   : > { %v5054_v47 = vadd.f32 %v9611_v0, %v4916_v10  ;;  %v5790_v0 = vpop.permute.xlu1 %5789 }
 0x543   : > { %v5800_v19 = vpop.permute.xlu1 %5799 }
 0x54d   : > { %v9690_v45 = vpop.f32.mrf.mxu0 }
 0x54f   : > { %v5284_v2 = vpop.f32.mrf.mxu0 }
 0x552   : > { %v9646_v31 = vpop.f32.mrf.mxu1  ;;  %v9693_v42 = vpop.f32.mrf.mxu0 }
 0x553   : > { %v5186_v51 = vadd.f32 %v9646_v31, %v5048_v49 }
 0x554   : > { %v5146_v39 = vpop.f32.mrf.mxu1  ;;  %v5294_v50 = vpop.f32.mrf.mxu0 }
 0x555   : > { %v5185_v60 = vadd.f32 %v5146_v39, %v5047_v23  ;;  %v5324_v55 = vadd.f32 %v9690_v45, %v5186_v51 }
 0x557   : > { %v5323_v40 = vadd.f32 %v5284_v2, %v5185_v60 }
 0x558   : > { %v9649_v26 = vpop.f32.mrf.mxu1  ;;  %v9696_v27 = vpop.f32.mrf.mxu0 }
 0x559   : > { %v5188_v21 = vadd.f32 %v9649_v26, %v5050_v25 }
 0x55a   : > { %v5156_v8 = vpop.f32.mrf.mxu1  ;;  %v13838_v1 = vpop.f32.mrf.mxu0 }
 0x55b   : > { %14888 = vst [vmem:[#allocation41_spill] sm:$0xff] %v13838_v1  ;;  %v4914_v1 = vadd.f32 %v9564_v62, %v4766_v54  ;;  %v4915_v54 = vadd.f32 %v4900_v30, %v4771_v33  ;;  %v5326_v31 = vadd.f32 %v9693_v42, %v5188_v21  ;;  %v13855_v30 = vld [vmem:[%s14412_s8] ss:$0 sm:$0xff] }
 0x55d   : > { %v5052_v17 = vadd.f32 %v9608_v35, %v4914_v1  ;;  %v5053_v58 = vadd.f32 %v13834_v52, %v4915_v54 }
 0x55e   : > { %v9652_v38 = vpop.f32.mrf.mxu1  ;;  %v13840_v53 = vpop.f32.mrf.mxu0 }
 0x55f   : > { %14889 = vst [vmem:[#allocation42_spill] sm:$0xff] %v13840_v53  ;;  %v4911_v53 = vadd.f32 %v4880_v44, %v4751_v48 }
 0x560   : > { %v5166_v9 = vpop.f32.mrf.mxu1  ;;  %v13843_v13 = vpop.f32.mrf.mxu0 }
 0x561   : > { %14890 = vst [vmem:[#allocation43_spill] sm:$0xff] %v13843_v13  ;;  %v4761_v13 = vadd.f32 %v4760_v28, %v4655_v22  ;;  %v5049_v15 = vadd.f32 %v5018_v46, %v4911_v53  ;;  %v5190_v28 = vadd.f32 %v9652_v38, %v5052_v17 }
 0x563   : > { %v4913_v12 = vadd.f32 %v4890_v34, %v4761_v13  ;;  %v5187_v7 = vadd.f32 %v5156_v8, %v5049_v15  ;;  %v5328_v35 = vadd.f32 %v9696_v27, %v5190_v28 }
 0x564   : > { %v9655_v43 = vpop.f32.mrf.mxu1 }
 0x565   : > { %v5051_v62 = vadd.f32 %v5028_v36, %v4913_v12  ;;  %v5325_v26 = vadd.f32 %v5294_v50, %v5187_v7  ;;  %v5192_v14 = vadd.f32 %v9655_v43, %v5054_v47  ;;  %v14892_v50 = vld [vmem:[#allocation41_spill] sm:$0xff] }
 0x566   : > { %v13836_v63 = vpop.f32.mrf.mxu1  ;;  %v14893_v13 = vld [vmem:[#allocation42_spill] sm:$0xff]  ;;  %v14895_v47 = vld [vmem:[#allocation37_spill] sm:$0xff] }
 0x567   : > { %14887 = vst [vmem:[#allocation40_spill] sm:$0xff] %v13836_v63  ;;  %v5189_v39 = vadd.f32 %v5166_v9, %v5051_v62  ;;  %v5330_v41 = vadd.f32 %v14893_v13, %v5192_v14 }
 0x569   : > { %v5327_v1 = vadd.f32 %v14892_v50, %v5189_v39 }
 0x56e   : > { %v14891_v9 = vld [vmem:[#allocation40_spill] sm:$0xff] }
 0x56f   : > { %v5191_v42 = vadd.f32 %v14891_v9, %v5053_v58  ;;  %v7585_v58 = vld [vmem:[%s14414_s10 + $0x160] sm:$0xff] }
 0x575   : > { %v9778_v57 = vpop.f32.mrf.mxu0 }
 0x577   : > { %v5560_v5 = vpop.f32.mrf.mxu0 }
 0x579   : > { %v9734_v37 = vpop.f32.mrf.mxu1  ;;  %v9781_v32 = vpop.f32.mrf.mxu0 }
 0x57a   : > { %v5462_v44 = vadd.f32 %v9734_v37, %v5324_v55 }
 0x57b   : > { %v5422_v20 = vpop.f32.mrf.mxu1  ;;  %v5570_v22 = vpop.f32.mrf.mxu0 }
 0x57c   : > { %v5461_v16 = vadd.f32 %v5422_v20, %v5323_v40  ;;  %v5600_v45 = vadd.f32 %v9778_v57, %v5462_v44  ;;  %v7587_v44 = vld [vmem:[%s14414_s10 + $0x170] sm:$0xff] }
 0x57d   : > { %v9784_v46 = vpop.f32.mrf.mxu0 }
 0x57e   : > { %v9737_v56 = vpop.f32.mrf.mxu1  ;;  %v5599_v2 = vadd.f32 %v5560_v5, %v5461_v16  ;;  %v5815_v16 = vpop.permute.xlu0 %5814 }
 0x57f   : > { %v5464_v34 = vadd.f32 %v9737_v56, %v5326_v31  ;;  %v5580_v43 = vpop.f32.mrf.mxu0 }
 0x580   : > { %v5432_v6 = vpop.f32.mrf.mxu1 }
 0x581   : > { %v5463_v36 = vadd.f32 %v5432_v6, %v5325_v26  ;;  %v5602_v53 = vadd.f32 %v9781_v32, %v5464_v34  ;;  %v9787_v23 = vpop.f32.mrf.mxu0 }
 0x583   : > { %v9740_v11 = vpop.f32.mrf.mxu1  ;;  %v5601_v59 = vadd.f32 %v5570_v22, %v5463_v36  ;;  %v5590_v40 = vpop.f32.mrf.mxu0 }
 0x584   : > { %v5466_v37 = vadd.f32 %v9740_v11, %v5328_v35  ;;  %v14894_v11 = vld [vmem:[#allocation43_spill] sm:$0xff] }
 0x585   : > { %v5442_v63 = vpop.f32.mrf.mxu1  ;;  %v5329_v18 = vadd.f32 %v14894_v11, %v5191_v42  ;;  %v7598_v11 = vld [vmem:[%s14414_s10 + $0x1c8] sm:$0xff] }
 0x586   : > { %v5465_v56 = vadd.f32 %v5442_v63, %v5327_v1  ;;  %v5604_v51 = vadd.f32 %v9784_v46, %v5466_v37  ;;  %v5825_v37 = vpop.permute.xlu0 %5824 }
 0x587   : > { %v9743_v4 = vpop.f32.mrf.mxu1 }
 0x588   : > { %v5468_v48 = vadd.f32 %v9743_v4, %v5330_v41  ;;  %v5603_v15 = vadd.f32 %v5580_v43, %v5465_v56 }
 0x589   : > { %v5452_v61 = vpop.f32.mrf.mxu1 }
 0x58a   : > { %v5467_v12 = vadd.f32 %v5452_v61, %v5329_v18  ;;  %v5606_v7 = vadd.f32 %v9787_v23, %v5468_v48  ;;  %v7586_v61 = vld [vmem:[%s14414_s10 + $0x168] sm:$0xff] }
 0x58b   : > { %v7582_v48 = vld [vmem:[%s14414_s10 + $0x148] sm:$0xff] }
 0x58c   : > { %v5605_v39 = vadd.f32 %v5590_v40, %v5467_v12  ;;  %v7578_v12 = vld [vmem:[%s14414_s10 + $0x128] sm:$0xff] }
 0x58d   : > { %v7590_v40 = vld [vmem:[%s14414_s10 + $0x188] sm:$0xff] }
 0x59b   : > { %v9822_v8 = vpop.f32.mrf.mxu1 }
 0x59c   : > { %v5738_v38 = vadd.f32 %v9822_v8, %v5600_v45 }
 0x59d   : > { %v5698_v20 = vpop.f32.mrf.mxu1 }
 0x59e   : > { %v5753_v52 = vadd.f32 %v13855_v30, %v5738_v38  ;;  %v5737_v27 = vadd.f32 %v5698_v20, %v5599_v2  ;;  %v7584_v2 = vld [vmem:[%s14414_s10 + $0x158] sm:$0xff]  ;;  %v7603_v20 = vld [vmem:[%s14414_s10 + $0x1f0] sm:$0xff] }
 0x59f   : > { %v9825_v29 = vpop.f32.mrf.mxu1 }
 0x5a0   : > { %v5761_v57 = vmax.f32 %v5753_v52, 0.0  ;;  %v5752_v6 = vadd.f32 %v13855_v30, %v5737_v27  ;;  %v5740_v5 = vadd.f32 %v9825_v29, %v5602_v53  ;;  %v14896_v53 = vld [vmem:[#allocation39_spill] sm:$0xff] }
 0x5a1   : > { %v5708_v49 = vpop.f32.mrf.mxu1  ;;  %v7601_v29 = vld [vmem:[%s14414_s10 + $0x1e0] sm:$0xff] }
 0x5a2   : > { %v13863_v60 = vmul.f32 %v5795_v3, %v5761_v57  ;;  %v5760_v25 = vmax.f32 %v5752_v6, 0.0  ;;  %v5755_v63 = vadd.f32 %v13855_v30, %v5740_v5  ;;  %v5739_v32 = vadd.f32 %v5708_v49, %v5601_v59  ;;  %v5810_v3 = vpop.permute.xlu1 %5809  ;;  %v7583_v57 = vld [vmem:[%s14414_s10 + $0x150] sm:$0xff]  ;;  %v7600_v6 = vld [vmem:[%s14414_s10 + $0x1d8] sm:$0xff]  ;;  %v7581_v49 = vld [vmem:[%s14414_s10 + $0x140] sm:$0xff] }
 0x5a3   : > { %v9828_v21 = vpop.f32.mrf.mxu1 }
 0x5a4   : > { %5836 = vst [vmem:[#allocation5 + $0x11] sm:$0xff] %v13863_v60  ;;  %v13867_v55 = vmul.f32 %v5790_v0, %v5760_v25  ;;  %v5763_v33 = vmax.f32 %v5755_v63, 0.0  ;;  %v5754_v10 = vadd.f32 %v13855_v30, %v5739_v32  ;;  %v5742_v17 = vadd.f32 %v9828_v21, %v5604_v51  ;;  %v7597_v51 = vld [vmem:[%s14414_s10 + $0x1c0] sm:$0xff]  ;;  %v7580_v25 = vld [vmem:[%s14414_s10 + $0x138] sm:$0xff]  ;;  %v7579_v32 = vld [vmem:[%s14414_s10 + $0x130] sm:$0xff] }
 0x5a5   : > { %v5718_v4 = vpop.f32.mrf.mxu1  ;;  %v7596_v63 = vld [vmem:[%s14414_s10 + $0x1b8] sm:$0xff]  ;;  %v7594_v21 = vld [vmem:[%s14414_s10 + $0x1a8] sm:$0xff] }
 0x5a6   : > { %5835 = vst [vmem:[#allocation5 + $0x9] sm:$0xff] %v13867_v55  ;;  %v13874_v22 = vmul.f32 %v5805_v24, %v5763_v33  ;;  %v5762_v54 = vmax.f32 %v5754_v10, 0.0  ;;  %v5757_v28 = vadd.f32 %v13855_v30, %v5742_v17  ;;  %v5741_v62 = vadd.f32 %v5718_v4, %v5603_v15  ;;  %9865 = vmatmul.mubr.f32.vlgmr.msra.gmra.mxu0 %v13867_v55  ;;  %v5820_v27 = vpop.permute.xlu1 %5819  ;;  %v7599_v24 = vld [vmem:[%s14414_s10 + $0x1d0] sm:$0xff]  ;;  %v7577_v15 = vld [vmem:[%s14414_s10 + $0x120] sm:$0xff]  ;;  %v7576_v10 = vld [vmem:[%s14414_s10 + $0x118] sm:$0xff] }
 0x5a7   : > { %v9831_v31 = vpop.f32.mrf.mxu1  ;;  %9921 = vmatpush3.msra.mxu0 %v14895_v47  ;;  %9867 = vmatprep.mubr.f32.mxu0 %v13863_v60  ;;  %v7593_v33 = vld [vmem:[%s14414_s10 + $0x1a0] sm:$0xff]  ;;  %v7592_v17 = vld [vmem:[%s14414_s10 + $0x198] sm:$0xff]  ;;  %v7575_v4 = vld [vmem:[%s14414_s10 + $0x110] sm:$0xff] }
 0x5a8   : > { %5838 = vst [vmem:[#allocation5 + $0x21] sm:$0xff] %v13874_v22  ;;  %v13884_v34 = vmul.f32 %v5800_v19, %v5762_v54  ;;  %v5765_v46 = vmax.f32 %v5757_v28, 0.0  ;;  %v5756_v26 = vadd.f32 %v13855_v30, %v5741_v62  ;;  %v5744_v45 = vadd.f32 %v9831_v31, %v5606_v7  ;;  %9922 = vmatprep.subr.mxu0 %v7587_v44  ;;  %v7595_v19 = vld [vmem:[%s14414_s10 + $0x1b0] sm:$0xff]  ;;  %v7573_v54 = vld [vmem:[%s14414_s10 + $0x100] sm:$0xff]  ;;  %v7620_v62 = vld [vmem:[%s14414_s10 + $0x278] sm:$0xff] }
 0x5a9   : > { %v5728_v14 = vpop.f32.mrf.mxu1  ;;  %9923 = vmatpush3.msra.mxu0 %v7587_v44  ;;  %v7591_v7 = vld [vmem:[%s14414_s10 + $0x190] sm:$0xff]  ;;  %v7574_v44 = vld [vmem:[%s14414_s10 + $0x108] sm:$0xff]  ;;  %v7589_v28 = vld [vmem:[%s14414_s10 + $0x180] sm:$0xff] }
 0x5aa   : > { %5837 = vst [vmem:[#allocation5 + $0x19] sm:$0xff] %v13884_v34  ;;  %v13891_v35 = vmul.f32 %v5815_v16, %v5765_v46  ;;  %v5764_v8 = vmax.f32 %v5756_v26, 0.0  ;;  %v5759_v36 = vadd.f32 %v13855_v30, %v5744_v45  ;;  %v5743_v38 = vadd.f32 %v5728_v14, %v5605_v39  ;;  %9924 = vmatprep.subr.mxu0 %v7586_v61  ;;  %v7636_v31 = vld [vmem:[%s14414_s10 + $0x2f8] sm:$0xff]  ;;  %v7619_v47 = vld [vmem:[%s14414_s10 + $0x270] sm:$0xff]  ;;  %v7618_v46 = vld [vmem:[%s14414_s10 + $0x268] sm:$0xff] }
 0x5ab   : > { %9868 = vmatmul.mubr.f32.gmra.mxu0 %v13884_v34  ;;  %v7634_v45 = vld [vmem:[%s14414_s10 + $0x2e8] sm:$0xff]  ;;  %v7617_v14 = vld [vmem:[%s14414_s10 + $0x260] sm:$0xff] }
 0x5ac   : > { %9925 = vmatpush3.msra.mxu0 %v7586_v61  ;;  %9870 = vmatprep.mubr.f32.mxu0 %v13874_v22  ;;  %5840 = vst [vmem:[#allocation5 + $0x31] sm:$0xff] %v13891_v35  ;;  %v13900_v0 = vmul.f32 %v5810_v3, %v5764_v8  ;;  %v5767_v9 = vmax.f32 %v5759_v36, 0.0  ;;  %v5758_v42 = vadd.f32 %v13855_v30, %v5743_v38  ;;  %v7602_v30 = vld [vmem:[%s14414_s10 + $0x1e8] sm:$0xff]  ;;  %v7635_v61 = vld [vmem:[%s14414_s10 + $0x2f0] sm:$0xff]  ;;  %v7616_v8 = vld [vmem:[%s14414_s10 + $0x258] sm:$0xff] }
 0x5ad   : > { %9926 = vmatprep.subr.mxu0 %v7585_v58  ;;  %v5844_v50 = vld [vmem:[#allocation5 + $0x8] sm:$0xff]  ;;  %v13903_v1 = vld [vmem:[#allocation5 + $0x10] sm:$0xff]  ;;  %v7632_v38 = vld [vmem:[%s14414_s10 + $0x2d8] sm:$0xff] }
 0x5ae   : > { %9927 = vmatpush3.msra.mxu0 %v7585_v58  ;;  %5839 = vst [vmem:[#allocation5 + $0x29] sm:$0xff] %v13900_v0  ;;  %v13909_v43 = vmul.f32 %v5825_v37, %v5767_v9  ;;  %v5766_v52 = vmax.f32 %v5758_v42, 0.0  ;;  %9909 = vmatmul.mubr.f32.vlgmr.msra.gmra.mxu1 %v5844_v50  ;;  %v6102_v23 = vld [vmem:[#allocation5 + $0x2] sm:$0xff]  ;;  %v14013_v16 = vld [vmem:[#allocation5 + $0xa] sm:$0xff] }
 0x5af   : > { %9928 = vmatprep.subr.mxu0 %v7584_v2  ;;  %9965 = vmatpush3.msra.mxu1 %v14896_v53  ;;  %v7633_v58 = vld [vmem:[%s14414_s10 + $0x2e0] sm:$0xff]  ;;  %v7615_v9 = vld [vmem:[%s14414_s10 + $0x250] sm:$0xff]  ;;  %v7614_v37 = vld [vmem:[%s14414_s10 + $0x248] sm:$0xff] }
 0x5b0   : > { %9911 = vmatprep.mubr.f32.mxu1 %v13903_v1  ;;  %5842 = vst [vmem:[#allocation5 + $0x41] sm:$0xff] %v13909_v43  ;;  %v13917_v56 = vmul.f32 %v5820_v27, %v5766_v52  ;;  %9966 = vmatprep.subr.mxu1 %v7603_v20  ;;  %v7631_v42 = vld [vmem:[%s14414_s10 + $0x2d0] sm:$0xff]  ;;  %v7613_v27 = vld [vmem:[%s14414_s10 + $0x240] sm:$0xff] }
 0x5b1   : > { %9871 = vmatmul.mubr.f32.gmra.mxu0 %v13900_v0  ;;  %9967 = vmatpush3.msra.mxu1 %v7603_v20  ;;  %v13920_v13 = vld [vmem:[#allocation5 + $0x18] sm:$0xff]  ;;  %v13922_v41 = vld [vmem:[#allocation5 + $0x20] sm:$0xff]  ;;  %v7630_v20 = vld [vmem:[%s14414_s10 + $0x2c8] sm:$0xff] }
 0x5b2   : > { %9929 = vmatpush3.msra.mxu0 %v7584_v2  ;;  %5841 = vst [vmem:[#allocation5 + $0x39] sm:$0xff] %v13917_v56  ;;  %9968 = vmatprep.subr.mxu1 %v7602_v30  ;;  %v14020_v39 = vld [vmem:[#allocation5 + $0x12] sm:$0xff]  ;;  %v14033_v26 = vld [vmem:[#allocation5 + $0x1a] sm:$0xff] }
 0x5b3   : > { %9912 = vmatmul.mubr.f32.gmra.mxu1 %v13920_v13  ;;  %9873 = vmatprep.mubr.f32.mxu0 %v13891_v35  ;;  %v7629_v53 = vld [vmem:[%s14414_s10 + $0x2c0] sm:$0xff] }
 0x5b4   : > { %9969 = vmatpush3.msra.mxu1 %v7602_v30  ;;  %9914 = vmatprep.mubr.f32.mxu1 %v13922_v41  ;;  %v7612_v30 = vld [vmem:[%s14414_s10 + $0x238] sm:$0xff] }
 0x5b5   : > { %9970 = vmatprep.subr.mxu1 %v7601_v29  ;;  %v13937_v5 = vld [vmem:[#allocation5 + $0x28] sm:$0xff]  ;;  %v13939_v59 = vld [vmem:[#allocation5 + $0x30] sm:$0xff]  ;;  %9930 = vmatprep.subr.mxu0 %v7583_v57 }
 0x5b6   : > { %9971 = vmatpush3.msra.mxu1 %v7601_v29  ;;  %9931 = vmatpush3.msra.mxu0 %v7583_v57  ;;  %v14040_v3 = vld [vmem:[#allocation5 + $0x22] sm:$0xff]  ;;  %v14053_v36 = vld [vmem:[#allocation5 + $0x2a] sm:$0xff]  ;;  %v7628_v29 = vld [vmem:[%s14414_s10 + $0x2b8] sm:$0xff] }
 0x5b7   : > { %9972 = vmatprep.subr.mxu1 %v7600_v6  ;;  %9915 = vmatmul.mubr.f32.gmra.mxu1 %v13937_v5  ;;  %v7611_v57 = vld [vmem:[%s14414_s10 + $0x230] sm:$0xff] }
 0x5b8   : > { %9973 = vmatpush3.msra.mxu1 %v7600_v6  ;;  %9917 = vmatprep.mubr.f32.mxu1 %v13939_v59  ;;  %v7610_v6 = vld [vmem:[%s14414_s10 + $0x228] sm:$0xff] }
 0x5b9   : > { %9974 = vmatprep.subr.mxu1 %v7599_v24  ;;  %9932 = vmatprep.subr.mxu0 %v7582_v48  ;;  %v13952_v18 = vld [vmem:[#allocation5 + $0x38] sm:$0xff]  ;;  %v14079_v52 = vld [vmem:[#allocation5 + $0x40] sm:$0xff] }
 0x5ba   : > { %9975 = vmatpush3.msra.mxu1 %v7599_v24  ;;  %9874 = vmatmul.mubr.f32.gmra.mxu0 %v13917_v56  ;;  %v14060_v2 = vld [vmem:[#allocation5 + $0x32] sm:$0xff]  ;;  %v7626_v24 = vld [vmem:[%s14414_s10 + $0x2a8] sm:$0xff] }
 0x5bb   : > { %9976 = vmatprep.subr.mxu1 %v7598_v11  ;;  %9918 = vmatmul.mubr.f32.gmra.mxu1 %v13952_v18 }
 0x5bc   : > { %9933 = vmatpush3.msra.mxu0 %v7582_v48  ;;  %9977 = vmatpush3.msra.mxu1 %v7598_v11  ;;  %v7609_v48 = vld [vmem:[%s14414_s10 + $0x220] sm:$0xff] }
 0x5bd   : > { %9934 = vmatprep.subr.mxu0 %v7581_v49  ;;  %9952 = vmatprep.mubr.f32.mxu0 %v6102_v23  ;;  %v7625_v11 = vld [vmem:[%s14414_s10 + $0x2a0] sm:$0xff]  ;;  %v7607_v23 = vld [vmem:[%s14414_s10 + $0x210] sm:$0xff] }
 0x5be   : > { %9978 = vmatprep.subr.mxu1 %v7597_v51  ;;  %9996 = vmatprep.mubr.f32.mxu1 %v5844_v50  ;;  %v14073_v50 = vld [vmem:[#allocation5 + $0x3a] sm:$0xff] }
 0x5bf   : > { %9935 = vmatpush3.msra.mxu0 %v7581_v49  ;;  %9979 = vmatpush3.msra.mxu1 %v7597_v51  ;;  %v7608_v49 = vld [vmem:[%s14414_s10 + $0x218] sm:$0xff] }
 0x5c0   : > { %9936 = vmatprep.subr.mxu0 %v7580_v25  ;;  %9980 = vmatprep.subr.mxu1 %v7596_v63  ;;  %v7624_v51 = vld [vmem:[%s14414_s10 + $0x298] sm:$0xff] }
 0x5c1   : > { %9937 = vmatpush3.msra.mxu0 %v7580_v25  ;;  %9981 = vmatpush3.msra.mxu1 %v7596_v63  ;;  %v7623_v25 = vld [vmem:[%s14414_s10 + $0x290] sm:$0xff]  ;;  %v7606_v63 = vld [vmem:[%s14414_s10 + $0x208] sm:$0xff] }
 0x5c2   : > { %9938 = vmatprep.subr.mxu0 %v7579_v32  ;;  %9982 = vmatprep.subr.mxu1 %v7595_v19 }
 0x5c3   : > { %9939 = vmatpush3.msra.mxu0 %v7579_v32  ;;  %9983 = vmatpush3.msra.mxu1 %v7595_v19  ;;  %v7622_v32 = vld [vmem:[%s14414_s10 + $0x288] sm:$0xff]  ;;  %v7605_v19 = vld [vmem:[%s14414_s10 + $0x200] sm:$0xff] }
 0x5c4   : > { %9940 = vmatprep.subr.mxu0 %v7578_v12  ;;  %9984 = vmatprep.subr.mxu1 %v7594_v21 }
 0x5c5   : > { %9941 = vmatpush3.msra.mxu0 %v7578_v12  ;;  %9985 = vmatpush3.msra.mxu1 %v7594_v21  ;;  %v7621_v12 = vld [vmem:[%s14414_s10 + $0x280] sm:$0xff]  ;;  %v7652_v21 = vld [vmem:[%s14414_s10 + $0x378] sm:$0xff] }
 0x5c6   : > { %9942 = vmatprep.subr.mxu0 %v7577_v15  ;;  %9986 = vmatprep.subr.mxu1 %v7593_v33 }
 0x5c7   : > { %9943 = vmatpush3.msra.mxu0 %v7577_v15  ;;  %9987 = vmatpush3.msra.mxu1 %v7593_v33  ;;  %v7668_v15 = vld [vmem:[%s14414_s10 + $0x3f8] sm:$0xff]  ;;  %v7651_v33 = vld [vmem:[%s14414_s10 + $0x370] sm:$0xff] }
 0x5c8   : > { %9944 = vmatprep.subr.mxu0 %v7576_v10  ;;  %9988 = vmatprep.subr.mxu1 %v7592_v17 }
 0x5c9   : > { %9945 = vmatpush3.msra.mxu0 %v7576_v10  ;;  %9989 = vmatpush3.msra.mxu1 %v7592_v17  ;;  %v7667_v10 = vld [vmem:[%s14414_s10 + $0x3f0] sm:$0xff]  ;;  %v7650_v17 = vld [vmem:[%s14414_s10 + $0x368] sm:$0xff] }
 0x5ca   : > { %9946 = vmatprep.subr.mxu0 %v7575_v4  ;;  %9990 = vmatprep.subr.mxu1 %v7591_v7 }
 0x5cb   : > { %9947 = vmatpush3.msra.mxu0 %v7575_v4  ;;  %9991 = vmatpush3.msra.mxu1 %v7591_v7  ;;  %v7666_v4 = vld [vmem:[%s14414_s10 + $0x3e8] sm:$0xff]  ;;  %v7649_v7 = vld [vmem:[%s14414_s10 + $0x360] sm:$0xff] }
 0x5cc   : > { %9948 = vmatprep.subr.mxu0 %v7574_v44  ;;  %9992 = vmatprep.subr.mxu1 %v7590_v40 }
 0x5cd   : > { %9949 = vmatpush3.msra.mxu0 %v7574_v44  ;;  %9993 = vmatpush3.msra.mxu1 %v7590_v40  ;;  %v7665_v44 = vld [vmem:[%s14414_s10 + $0x3e0] sm:$0xff]  ;;  %v7648_v40 = vld [vmem:[%s14414_s10 + $0x358] sm:$0xff] }
 0x5ce   : > { %9950 = vmatprep.subr.mxu0 %v7573_v54  ;;  %9994 = vmatprep.subr.mxu1 %v7589_v28 }
 0x5cf   : > { %9951 = vmatpush3.msra.mxu0 %v7573_v54  ;;  %9995 = vmatpush3.msra.mxu1 %v7589_v28  ;;  %v7664_v54 = vld [vmem:[%s14414_s10 + $0x3d8] sm:$0xff]  ;;  %v7647_v28 = vld [vmem:[%s14414_s10 + $0x350] sm:$0xff] }
 0x5d0   : > { %9953 = vmatmul.mubr.f32.vlgmr.msra.gmra.mxu0 %v14013_v16  ;;  %9997 = vmatmul.mubr.f32.vlgmr.msra.gmra.mxu1 %v13903_v1 }
 0x5d1   : > { %10008 = vmatprep.subr.mxu0 %v7620_v62  ;;  %10052 = vmatprep.subr.mxu1 %v7636_v31 }
 0x5d2   : > { %9955 = vmatprep.mubr.f32.mxu0 %v14020_v39  ;;  %9999 = vmatprep.mubr.f32.mxu1 %v13920_v13 }
 0x5d3   : > { %10009 = vmatpush3.msra.mxu0 %v7620_v62  ;;  %10053 = vmatpush3.msra.mxu1 %v7636_v31  ;;  %v7663_v62 = vld [vmem:[%s14414_s10 + $0x3d0] sm:$0xff]  ;;  %v7662_v31 = vld [vmem:[%s14414_s10 + $0x3c8] sm:$0xff] }
 0x5d4   : > { %10010 = vmatprep.subr.mxu0 %v7619_v47  ;;  %10054 = vmatprep.subr.mxu1 %v7635_v61 }
 0x5d5   : > { %10011 = vmatpush3.msra.mxu0 %v7619_v47  ;;  %10055 = vmatpush3.msra.mxu1 %v7635_v61  ;;  %v14193_v47 = vld [vmem:[#allocation5 + $0x42] sm:$0xff] }
 0x5d6   : > { %9956 = vmatmul.mubr.f32.gmra.mxu0 %v14033_v26  ;;  %10000 = vmatmul.mubr.f32.gmra.mxu1 %v13922_v41  ;;  %v7645_v61 = vld [vmem:[%s14414_s10 + $0x340] sm:$0xff] }
 0x5d7   : > { %10012 = vmatprep.subr.mxu0 %v7618_v46  ;;  %10056 = vmatprep.subr.mxu1 %v7634_v45 }
 0x5d8   : > { %9958 = vmatprep.mubr.f32.mxu0 %v14040_v3  ;;  %10002 = vmatprep.mubr.f32.mxu1 %v13937_v5 }
 0x5d9   : > { %10013 = vmatpush3.msra.mxu0 %v7618_v46  ;;  %10057 = vmatpush3.msra.mxu1 %v7634_v45  ;;  %v7661_v46 = vld [vmem:[%s14414_s10 + $0x3c0] sm:$0xff]  ;;  %v7644_v45 = vld [vmem:[%s14414_s10 + $0x338] sm:$0xff] }
 0x5da   : > { %10014 = vmatprep.subr.mxu0 %v7617_v14  ;;  %10058 = vmatprep.subr.mxu1 %v7633_v58 }
 0x5db   : > { %10015 = vmatpush3.msra.mxu0 %v7617_v14  ;;  %10059 = vmatpush3.msra.mxu1 %v7633_v58  ;;  %v7660_v14 = vld [vmem:[%s14414_s10 + $0x3b8] sm:$0xff]  ;;  %v7643_v58 = vld [vmem:[%s14414_s10 + $0x330] sm:$0xff] }
 0x5dc   : > { %9959 = vmatmul.mubr.f32.gmra.mxu0 %v14053_v36  ;;  %10003 = vmatmul.mubr.f32.gmra.mxu1 %v13939_v59 }
 0x5dd   : > { %10016 = vmatprep.subr.mxu0 %v7616_v8  ;;  %10060 = vmatprep.subr.mxu1 %v7632_v38 }
 0x5de   : > { %9961 = vmatprep.mubr.f32.mxu0 %v14060_v2  ;;  %10005 = vmatprep.mubr.f32.mxu1 %v13952_v18 }
 0x5df   : > { %10017 = vmatpush3.msra.mxu0 %v7616_v8  ;;  %10061 = vmatpush3.msra.mxu1 %v7632_v38  ;;  %v7658_v8 = vld [vmem:[%s14414_s10 + $0x3a8] sm:$0xff]  ;;  %v7641_v38 = vld [vmem:[%s14414_s10 + $0x320] sm:$0xff] }
 0x5e0   : > { %10018 = vmatprep.subr.mxu0 %v7615_v9  ;;  %10062 = vmatprep.subr.mxu1 %v7631_v42 }
 0x5e1   : > { %10019 = vmatpush3.msra.mxu0 %v7615_v9  ;;  %10063 = vmatpush3.msra.mxu1 %v7631_v42  ;;  %v7657_v9 = vld [vmem:[%s14414_s10 + $0x3a0] sm:$0xff]  ;;  %v7640_v42 = vld [vmem:[%s14414_s10 + $0x318] sm:$0xff] }
 0x5e2   : > { %9962 = vmatmul.mubr.f32.gmra.mxu0 %v14073_v50  ;;  %10006 = vmatmul.mubr.f32.gmra.mxu1 %v14079_v52 }
 0x5e3   : > { %10020 = vmatprep.subr.mxu0 %v7614_v37  ;;  %10064 = vmatprep.subr.mxu1 %v7630_v20 }
 0x5e4   : > { %10021 = vmatpush3.msra.mxu0 %v7614_v37  ;;  %10040 = vmatprep.mubr.f32.mxu0 %v13867_v55  ;;  %v7627_v55 = vld [vmem:[%s14414_s10 + $0x2b0] sm:$0xff]  ;;  %v7656_v37 = vld [vmem:[%s14414_s10 + $0x398] sm:$0xff] }
 0x5e5   : > { %10065 = vmatpush3.msra.mxu1 %v7630_v20  ;;  %10084 = vmatprep.mubr.f32.mxu1 %v14013_v16  ;;  %v7646_v16 = vld [vmem:[%s14414_s10 + $0x348] sm:$0xff]  ;;  %v7639_v20 = vld [vmem:[%s14414_s10 + $0x310] sm:$0xff] }
 0x5e6   : > { %10022 = vmatprep.subr.mxu0 %v7613_v27  ;;  %10066 = vmatprep.subr.mxu1 %v7629_v53 }
 0x5e7   : > { %10023 = vmatpush3.msra.mxu0 %v7613_v27  ;;  %10067 = vmatpush3.msra.mxu1 %v7629_v53  ;;  %v7655_v27 = vld [vmem:[%s14414_s10 + $0x390] sm:$0xff]  ;;  %v7638_v53 = vld [vmem:[%s14414_s10 + $0x308] sm:$0xff] }
 0x5e8   : > { %10024 = vmatprep.subr.mxu0 %v7612_v30  ;;  %10068 = vmatprep.subr.mxu1 %v7628_v29 }
 0x5e9   : > { %10025 = vmatpush3.msra.mxu0 %v7612_v30  ;;  %10069 = vmatpush3.msra.mxu1 %v7628_v29  ;;  %v7654_v30 = vld [vmem:[%s14414_s10 + $0x388] sm:$0xff]  ;;  %v7637_v29 = vld [vmem:[%s14414_s10 + $0x300] sm:$0xff] }
 0x5ea   : > { %10026 = vmatprep.subr.mxu0 %v7611_v57  ;;  %10070 = vmatprep.subr.mxu1 %v7627_v55 }
 0x5eb   : > { %10027 = vmatpush3.msra.mxu0 %v7611_v57  ;;  %10071 = vmatpush3.msra.mxu1 %v7627_v55  ;;  %v7653_v57 = vld [vmem:[%s14414_s10 + $0x380] sm:$0xff]  ;;  %v7684_v55 = vld [vmem:[%s14414_s10 + $0x478] sm:$0xff] }
 0x5ec   : > { %10028 = vmatprep.subr.mxu0 %v7610_v6  ;;  %10072 = vmatprep.subr.mxu1 %v7626_v24 }
 0x5ed   : > { %10029 = vmatpush3.msra.mxu0 %v7610_v6  ;;  %10073 = vmatpush3.msra.mxu1 %v7626_v24  ;;  %v7683_v6 = vld [vmem:[%s14414_s10 + $0x470] sm:$0xff]  ;;  %v7682_v24 = vld [vmem:[%s14414_s10 + $0x468] sm:$0xff] }
 0x5ee   : > { %10030 = vmatprep.subr.mxu0 %v7609_v48  ;;  %10074 = vmatprep.subr.mxu1 %v7625_v11 }
 0x5ef   : > { %10031 = vmatpush3.msra.mxu0 %v7609_v48  ;;  %10075 = vmatpush3.msra.mxu1 %v7625_v11  ;;  %v7670_v48 = vld [vmem:[%s14414_s10 + $0x408] sm:$0xff]  ;;  %v7669_v11 = vld [vmem:[%s14414_s10 + $0x400] sm:$0xff] }
 0x5f0   : > { %10032 = vmatprep.subr.mxu0 %v7608_v49  ;;  %10076 = vmatprep.subr.mxu1 %v7624_v51 }
 0x5f1   : > { %10033 = vmatpush3.msra.mxu0 %v7608_v49  ;;  %10077 = vmatpush3.msra.mxu1 %v7624_v51  ;;  %v6937_v49 = vld [vmem:[#allocation5 + $0x4a] sm:$0xff] }
 0x5f2   : > { %10034 = vmatprep.subr.mxu0 %v7607_v23  ;;  %10078 = vmatprep.subr.mxu1 %v7623_v25 }
 0x5f3   : > { %10035 = vmatpush3.msra.mxu0 %v7607_v23  ;;  %10079 = vmatpush3.msra.mxu1 %v7623_v25 }
 0x5f4   : > { %10036 = vmatprep.subr.mxu0 %v7606_v63  ;;  %10080 = vmatprep.subr.mxu1 %v7622_v32 }
 0x5f5   : > { %10037 = vmatpush3.msra.mxu0 %v7606_v63  ;;  %10081 = vmatpush3.msra.mxu1 %v7622_v32 }
 0x5f6   : > { %10038 = vmatprep.subr.mxu0 %v7605_v19  ;;  %10082 = vmatprep.subr.mxu1 %v7621_v12 }
 0x5f7   : > { %10039 = vmatpush3.msra.mxu0 %v7605_v19  ;;  %10083 = vmatpush3.msra.mxu1 %v7621_v12 }
 0x5f8   : > { %10041 = vmatmul.mubr.f32.vlgmr.msra.gmra.mxu0 %v13863_v60  ;;  %10085 = vmatmul.mubr.f32.vlgmr.msra.gmra.mxu1 %v14020_v39 }
 0x5f9   : > { %10096 = vmatprep.subr.mxu0 %v7652_v21  ;;  %10140 = vmatprep.subr.mxu1 %v7668_v15 }
 0x5fa   : > { %10043 = vmatprep.mubr.f32.mxu0 %v13884_v34  ;;  %10087 = vmatprep.mubr.f32.mxu1 %v14033_v26 }
 0x5fb   : > { %10097 = vmatpush3.msra.mxu0 %v7652_v21  ;;  %10141 = vmatpush3.msra.mxu1 %v7668_v15 }
 0x5fc   : > { %10098 = vmatprep.subr.mxu0 %v7651_v33  ;;  %10142 = vmatprep.subr.mxu1 %v7667_v10 }
 0x5fd   : > { %10099 = vmatpush3.msra.mxu0 %v7651_v33  ;;  %10143 = vmatpush3.msra.mxu1 %v7667_v10 }
 0x5fe   : > { %10044 = vmatmul.mubr.f32.gmra.mxu0 %v13874_v22  ;;  %10088 = vmatmul.mubr.f32.gmra.mxu1 %v14040_v3 }
 0x5ff   : > { %10100 = vmatprep.subr.mxu0 %v7650_v17  ;;  %10144 = vmatprep.subr.mxu1 %v7666_v4 }
 0x600   : > { %10046 = vmatprep.mubr.f32.mxu0 %v13900_v0  ;;  %10090 = vmatprep.mubr.f32.mxu1 %v14053_v36 }
 0x601   : > { %10101 = vmatpush3.msra.mxu0 %v7650_v17  ;;  %10145 = vmatpush3.msra.mxu1 %v7666_v4 }
 0x602   : > { %10102 = vmatprep.subr.mxu0 %v7649_v7  ;;  %10146 = vmatprep.subr.mxu1 %v7665_v44 }
 0x603   : > { %10103 = vmatpush3.msra.mxu0 %v7649_v7  ;;  %10147 = vmatpush3.msra.mxu1 %v7665_v44 }
 0x604   : > { %10047 = vmatmul.mubr.f32.gmra.mxu0 %v13891_v35  ;;  %10091 = vmatmul.mubr.f32.gmra.mxu1 %v14060_v2 }
 0x605   : > { %10104 = vmatprep.subr.mxu0 %v7648_v40  ;;  %10148 = vmatprep.subr.mxu1 %v7664_v54 }
 0x606   : > { %10049 = vmatprep.mubr.f32.mxu0 %v13917_v56  ;;  %10093 = vmatprep.mubr.f32.mxu1 %v14073_v50 }
 0x607   : > { %10105 = vmatpush3.msra.mxu0 %v7648_v40  ;;  %10149 = vmatpush3.msra.mxu1 %v7664_v54 }
 0x608   : > { %10106 = vmatprep.subr.mxu0 %v7647_v28  ;;  %10150 = vmatprep.subr.mxu1 %v7663_v62 }
 0x609   : > { %10107 = vmatpush3.msra.mxu0 %v7647_v28  ;;  %10151 = vmatpush3.msra.mxu1 %v7663_v62 }
 0x60a   : > { %10050 = vmatmul.mubr.f32.gmra.mxu0 %v13909_v43  ;;  %10094 = vmatmul.mubr.f32.gmra.mxu1 %v14193_v47 }
 0x60b   : > { %10108 = vmatprep.subr.mxu0 %v7646_v16  ;;  %10152 = vmatprep.subr.mxu1 %v7662_v31 }
 0x60c   : > { %10109 = vmatpush3.msra.mxu0 %v7646_v16  ;;  %10128 = vmatprep.mubr.f32.mxu0 %v13903_v1  ;;  %v7659_v1 = vld [vmem:[%s14414_s10 + $0x3b0] sm:$0xff] }
 0x60d   : > { %10153 = vmatpush3.msra.mxu1 %v7662_v31  ;;  %10172 = vmatprep.mubr.f32.mxu1 %v13863_v60  ;;  %v7642_v60 = vld [vmem:[%s14414_s10 + $0x328] sm:$0xff] }
 0x60e   : > { %10110 = vmatprep.subr.mxu0 %v7645_v61  ;;  %10154 = vmatprep.subr.mxu1 %v7661_v46 }
 0x60f   : > { %10111 = vmatpush3.msra.mxu0 %v7645_v61  ;;  %10155 = vmatpush3.msra.mxu1 %v7661_v46 }
 0x610   : > { %10112 = vmatprep.subr.mxu0 %v7644_v45  ;;  %10156 = vmatprep.subr.mxu1 %v7660_v14 }
 0x611   : > { %10113 = vmatpush3.msra.mxu0 %v7644_v45  ;;  %10157 = vmatpush3.msra.mxu1 %v7660_v14 }
 0x612   : > { %10114 = vmatprep.subr.mxu0 %v7643_v58  ;;  %10158 = vmatprep.subr.mxu1 %v7659_v1 }
 0x613   : > { %10115 = vmatpush3.msra.mxu0 %v7643_v58  ;;  %10159 = vmatpush3.msra.mxu1 %v7659_v1 }
 0x614   : > { %10116 = vmatprep.subr.mxu0 %v7642_v60  ;;  %10160 = vmatprep.subr.mxu1 %v7658_v8 }
 0x615   : > { %10117 = vmatpush3.msra.mxu0 %v7642_v60  ;;  %10161 = vmatpush3.msra.mxu1 %v7658_v8 }
 0x616   : > { %10118 = vmatprep.subr.mxu0 %v7641_v38  ;;  %10162 = vmatprep.subr.mxu1 %v7657_v9 }
 0x617   : > { %10119 = vmatpush3.msra.mxu0 %v7641_v38  ;;  %10163 = vmatpush3.msra.mxu1 %v7657_v9 }
 0x618   : > { %10120 = vmatprep.subr.mxu0 %v7640_v42  ;;  %10164 = vmatprep.subr.mxu1 %v7656_v37 }
 0x619   : > { %10121 = vmatpush3.msra.mxu0 %v7640_v42  ;;  %10165 = vmatpush3.msra.mxu1 %v7656_v37 }
 0x61a   : > { %10122 = vmatprep.subr.mxu0 %v7639_v20  ;;  %10166 = vmatprep.subr.mxu1 %v7655_v27 }
 0x61b   : > { %10123 = vmatpush3.msra.mxu0 %v7639_v20  ;;  %10167 = vmatpush3.msra.mxu1 %v7655_v27 }
 0x61c   : > { %10124 = vmatprep.subr.mxu0 %v7638_v53  ;;  %10168 = vmatprep.subr.mxu1 %v7654_v30 }
 0x61d   : > { %10125 = vmatpush3.msra.mxu0 %v7638_v53  ;;  %10169 = vmatpush3.msra.mxu1 %v7654_v30 }
 0x61e   : > { %10126 = vmatprep.subr.mxu0 %v7637_v29  ;;  %10170 = vmatprep.subr.mxu1 %v7653_v57 }
 0x61f   : > { %10127 = vmatpush3.msra.mxu0 %v7637_v29  ;;  %10171 = vmatpush3.msra.mxu1 %v7653_v57 }
 0x620   : > { %10129 = vmatmul.mubr.f32.vlgmr.msra.gmra.mxu0 %v13920_v13  ;;  %10173 = vmatmul.mubr.f32.vlgmr.msra.gmra.mxu1 %v13884_v34  ;;  %v7681_v34 = vld [vmem:[%s14414_s10 + $0x460] sm:$0xff]  ;;  %v7678_v13 = vld [vmem:[%s14414_s10 + $0x448] sm:$0xff] }
 0x621   : > { %10184 = vmatprep.subr.mxu0 %v7684_v55  ;;  %10131 = vmatprep.mubr.f32.mxu0 %v13922_v41  ;;  %v6799_v41 = vld [vmem:[#allocation5 + $0x49] sm:$0xff] }
 0x622   : > { %10175 = vmatprep.mubr.f32.mxu1 %v13874_v22  ;;  %10185 = vmatpush3.msra.mxu0 %v7684_v55  ;;  %v7680_v22 = vld [vmem:[%s14414_s10 + $0x458] sm:$0xff] }
 0x623   : > { %10186 = vmatprep.subr.mxu0 %v7683_v6 }
 0x624   : > { %10132 = vmatmul.mubr.f32.gmra.mxu0 %v13937_v5  ;;  %10176 = vmatmul.mubr.f32.gmra.mxu1 %v13900_v0  ;;  %v7679_v0 = vld [vmem:[%s14414_s10 + $0x450] sm:$0xff] }
 0x625   : > { %10187 = vmatpush3.msra.mxu0 %v7683_v6  ;;  %10134 = vmatprep.mubr.f32.mxu0 %v13939_v59  ;;  %v7675_v5 = vld [vmem:[%s14414_s10 + $0x430] sm:$0xff]  ;;  %v7674_v59 = vld [vmem:[%s14414_s10 + $0x428] sm:$0xff] }
 0x626   : > { %10188 = vmatprep.subr.mxu0 %v7682_v24  ;;  %10178 = vmatprep.mubr.f32.mxu1 %v13891_v35  ;;  %v6661_v35 = vld [vmem:[#allocation5 + $0x48] sm:$0xff] }
 0x627   : > { %10189 = vmatpush3.msra.mxu0 %v7682_v24 }
 0x628   : > { %10190 = vmatprep.subr.mxu0 %v7681_v34  ;;  %10135 = vmatmul.mubr.f32.gmra.mxu0 %v13952_v18  ;;  %v7673_v18 = vld [vmem:[%s14414_s10 + $0x420] sm:$0xff] }
 0x629   : > { %10191 = vmatpush3.msra.mxu0 %v7681_v34  ;;  %10179 = vmatmul.mubr.f32.gmra.mxu1 %v13917_v56  ;;  %v7677_v56 = vld [vmem:[%s14414_s10 + $0x440] sm:$0xff] }
 0x62a   : > { %10192 = vmatprep.subr.mxu0 %v7680_v22  ;;  %10137 = vmatprep.mubr.f32.mxu0 %v14079_v52  ;;  %v7671_v52 = vld [vmem:[%s14414_s10 + $0x410] sm:$0xff] }
 0x62b   : > { %10181 = vmatprep.mubr.f32.mxu1 %v13909_v43  ;;  %10193 = vmatpush3.msra.mxu0 %v7680_v22  ;;  %v7676_v43 = vld [vmem:[%s14414_s10 + $0x438] sm:$0xff] }
 0x62c   : > { %10194 = vmatprep.subr.mxu0 %v7679_v0  ;;  %10138 = vmatmul.mubr.f32.gmra.mxu0 %v6661_v35 }
 0x62d   : > { %10195 = vmatpush3.msra.mxu0 %v7679_v0  ;;  %10216 = vmatprep.mubr.f32.mxu0 %v14020_v39  ;;  %v7672_v39 = vld [vmem:[%s14414_s10 + $0x418] sm:$0xff] }
 0x62e   : > { %10196 = vmatprep.subr.mxu0 %v7678_v13  ;;  %10182 = vmatmul.mubr.f32.gmra.mxu1 %v6799_v41 }
 0x62f   : > { %10197 = vmatpush3.msra.mxu0 %v7678_v13 }
 0x630   : > { %10198 = vmatprep.subr.mxu0 %v7677_v56 }
 0x631   : > { %10199 = vmatpush3.msra.mxu0 %v7677_v56 }
 0x632   : > { %10200 = vmatprep.subr.mxu0 %v7676_v43 }
 0x633   : > { %10201 = vmatpush3.msra.mxu0 %v7676_v43 }
 0x634   : > { %10202 = vmatprep.subr.mxu0 %v7675_v5 }
 0x635   : > { %10203 = vmatpush3.msra.mxu0 %v7675_v5 }
 0x636   : > { %10204 = vmatprep.subr.mxu0 %v7674_v59 }
 0x637   : > { %10205 = vmatpush3.msra.mxu0 %v7674_v59 }
 0x638   : > { %10206 = vmatprep.subr.mxu0 %v7673_v18 }
 0x639   : > { %10207 = vmatpush3.msra.mxu0 %v7673_v18 }
 0x63a   : > { %10208 = vmatprep.subr.mxu0 %v7672_v39 }
 0x63b   : > { %10209 = vmatpush3.msra.mxu0 %v7672_v39 }
 0x63c   : > { %10210 = vmatprep.subr.mxu0 %v7671_v52 }
 0x63d   : > { %10211 = vmatpush3.msra.mxu0 %v7671_v52 }
 0x63e   : > { %10212 = vmatprep.subr.mxu0 %v7670_v48 }
 0x63f   : > { %10213 = vmatpush3.msra.mxu0 %v7670_v48 }
 0x640   : > { %10214 = vmatprep.subr.mxu0 %v7669_v11 }
 0x641   : > { %10215 = vmatpush3.msra.mxu0 %v7669_v11 }
 0x642   : > { %10217 = vmatmul.mubr.f32.vlgmr.msra.gmra.mxu0 %v14033_v26 }
 0x643   : > { %10219 = vmatprep.mubr.f32.mxu0 %v14040_v3 }
 0x646   : > { %10220 = vmatmul.mubr.f32.gmra.mxu0 %v14053_v36 }
 0x647   : > { %10222 = vmatprep.mubr.f32.mxu0 %v14060_v2 }
 0x64a   : > { %10223 = vmatmul.mubr.f32.gmra.mxu0 %v14073_v50 }
 0x64b   : > { %10225 = vmatprep.mubr.f32.mxu0 %v14193_v47 }
 0x64e   : > { %10226 = vmatmul.mubr.f32.gmra.mxu0 %v6937_v49 }
 0x666   : > { %v9866_v51 = vpop.f32.mrf.mxu0 }
 0x668   : > { %v5958_v23 = vpop.f32.mrf.mxu0 }
 0x66b   : > { %v9869_v25 = vpop.f32.mrf.mxu0 }
 0x66d   : > { %v5968_v32 = vpop.f32.mrf.mxu0 }
 0x66e   : > { %v9910_v63 = vpop.f32.mrf.mxu1 }
 0x66f   : > { %v6069_v18 = vadd.f32 %v9910_v63, %v9866_v51 }
 0x670   : > { %v6063_v19 = vpop.f32.mrf.mxu1 }
 0x671   : > { %v9872_v12 = vpop.f32.mrf.mxu0  ;;  %v6064_v59 = vadd.f32 %v6063_v19, %v5958_v23 }
 0x673   : > { %v9913_v26 = vpop.f32.mrf.mxu1  ;;  %v5978_v21 = vpop.f32.mrf.mxu0 }
 0x674   : > { %v6079_v39 = vadd.f32 %v9913_v26, %v9869_v25  ;;  %v14345_v25 = vpop.permute.xlu1 %7116 }
 0x675   : > { %v6073_v3 = vpop.f32.mrf.mxu1  ;;  %vm7139_vm13 = vcmp.eq.s32.totalorder %v14345_v25, 1 }
 0x676   : > { %v6074_v49 = vadd.f32 %v6073_v3, %v5968_v32 }
 0x677   : > { %v9916_v36 = vpop.f32.mrf.mxu1 }
 0x679   : > { %v6083_v33 = vpop.f32.mrf.mxu1 }
 0x67a   : > { %v14319_v15 = vpop.f32.mrf.mxu0 }
 0x67b   : > { %14897 = vst [vmem:[#allocation44_spill] sm:$0xff] %v14319_v15  ;;  %v9919_v17 = vpop.f32.mrf.mxu1 }
 0x67c   : > { %v14321_v2 = vpop.f32.mrf.mxu0 }
 0x67d   : > { %14898 = vst [vmem:[#allocation45_spill] sm:$0xff] %v14321_v2  ;;  %v14323_v7 = vpop.f32.mrf.mxu1 }
 0x67e   : > { %14899 = vst [vmem:[#allocation46_spill] sm:$0xff] %v14323_v7 }
 0x682   : > { %v14908_v63 = vld [vmem:[#allocation44_spill] sm:$0xff] }
 0x683   : > { %v6099_v19 = vadd.f32 %v9919_v17, %v14908_v63 }
 0x684   : > { %v14909_v3 = vld [vmem:[#allocation45_spill] sm:$0xff] }
 0x690   : > { %v9954_v50 = vpop.f32.mrf.mxu0  ;;  %v9998_v44 = vpop.f32.mrf.mxu1 }
 0x692   : > { %v6193_v10 = vpop.f32.mrf.mxu0  ;;  %v6331_v54 = vpop.f32.mrf.mxu1 }
 0x693   : > { %v6232_v52 = vadd.f32 %v6193_v10, %v6064_v59 }
 0x696   : > { %v9957_v4 = vpop.f32.mrf.mxu0  ;;  %v10001_v62 = vpop.f32.mrf.mxu1 }
 0x698   : > { %v6203_v40 = vpop.f32.mrf.mxu0  ;;  %v6341_v31 = vpop.f32.mrf.mxu1 }
 0x69c   : > { %v9960_v28 = vpop.f32.mrf.mxu0  ;;  %v10004_v61 = vpop.f32.mrf.mxu1 }
 0x69e   : > { %v6213_v16 = vpop.f32.mrf.mxu0  ;;  %v6351_v14 = vpop.f32.mrf.mxu1 }
 0x6a2   : > { %v9963_v47 = vpop.f32.mrf.mxu0  ;;  %v14327_v1 = vpop.f32.mrf.mxu1 }
 0x6a3   : > { %14901 = vst [vmem:[#allocation49_spill] sm:$0xff] %v14327_v1  ;;  %v6084_v1 = vadd.f32 %v6083_v33, %v5978_v21 }
 0x6a4   : > { %v14325_v46 = vpop.f32.mrf.mxu0  ;;  %v14329_v8 = vpop.f32.mrf.mxu1 }
 0x6a5   : > { %14900 = vst [vmem:[#allocation48_spill] sm:$0xff] %v14325_v46  ;;  %14902 = vst [vmem:[#allocation51_spill] sm:$0xff] %v14329_v8  ;;  %v6235_v8 = vadd.f32 %v9957_v4, %v6079_v39  ;;  %v6234_v46 = vadd.f32 %v6203_v40, %v6074_v49 }
 0x6a7   : > { %v6373_v15 = vadd.f32 %v10001_v62, %v6235_v8  ;;  %v6372_v26 = vadd.f32 %v6341_v31, %v6234_v46 }
 0x6ac   : > { %v14911_v62 = vld [vmem:[#allocation48_spill] sm:$0xff] }
 0x6b8   : > { %v10042_v45 = vpop.f32.mrf.mxu0  ;;  %v10086_v38 = vpop.f32.mrf.mxu1 }
 0x6ba   : > { %v6469_v58 = vpop.f32.mrf.mxu0  ;;  %v6607_v42 = vpop.f32.mrf.mxu1 }
 0x6be   : > { %v10045_v60 = vpop.f32.mrf.mxu0  ;;  %v10089_v20 = vpop.f32.mrf.mxu1 }
 0x6bf   : > { %v6511_v21 = vadd.f32 %v10045_v60, %v6373_v15  ;;  %v14913_v15 = vld [vmem:[#allocation51_spill] sm:$0xff] }
 0x6c0   : > { %v6479_v9 = vpop.f32.mrf.mxu0  ;;  %v6617_v53 = vpop.f32.mrf.mxu1 }
 0x6c4   : > { %v10048_v37 = vpop.f32.mrf.mxu0  ;;  %v10092_v29 = vpop.f32.mrf.mxu1 }
 0x6c6   : > { %v6489_v27 = vpop.f32.mrf.mxu0  ;;  %v6627_v6 = vpop.f32.mrf.mxu1 }
 0x6ca   : > { %v14331_v30 = vpop.f32.mrf.mxu0  ;;  %v14335_v34 = vpop.f32.mrf.mxu1 }
 0x6cb   : > { %14903 = vst [vmem:[#allocation52_spill] sm:$0xff] %v14331_v30  ;;  %14905 = vst [vmem:[#allocation55_spill] sm:$0xff] %v14335_v34  ;;  %v6233_v34 = vadd.f32 %v9954_v50, %v6069_v18  ;;  %v6370_v30 = vadd.f32 %v6331_v54, %v6232_v52  ;;  %v6510_v54 = vadd.f32 %v6479_v9, %v6372_v26 }
 0x6cc   : > { %v14333_v57 = vpop.f32.mrf.mxu0  ;;  %v14337_v0 = vpop.f32.mrf.mxu1 }
 0x6cd   : > { %14904 = vst [vmem:[#allocation54_spill] sm:$0xff] %v14333_v57  ;;  %14906 = vst [vmem:[#allocation57_spill] sm:$0xff] %v14337_v0  ;;  %v6089_v57 = vadd.f32 %v9916_v36, %v9872_v12  ;;  %v14343_v0 = vpop.permute.xlu0 %7119  ;;  %v6371_v2 = vadd.f32 %v9998_v44, %v6233_v34  ;;  %v6236_v12 = vadd.f32 %v6213_v16, %v6084_v1  ;;  %v14910_v36 = vld [vmem:[#allocation46_spill] sm:$0xff]  ;;  %v14912_v16 = vld [vmem:[#allocation49_spill] sm:$0xff] }
 0x6ce   : > { %v6094_v50 = vadd.f32 %v14910_v36, %v14909_v3  ;;  %v6239_v44 = vadd.f32 %v9963_v47, %v6099_v19  ;;  %v6648_v46 = vadd.f32 %v6617_v53, %v6510_v54  ;;  %vm7140_vm15 = vcmp.eq.s32.totalorder %v14343_v0, 1 }
 0x6cf   : > { %v6237_v7 = vadd.f32 %v9960_v28, %v6089_v57  ;;  %v6509_v10 = vadd.f32 %v10042_v45, %v6371_v2  ;;  %v6374_v40 = vadd.f32 %v6351_v14, %v6236_v12 }
 0x6d1   : > { %v6375_v32 = vadd.f32 %v10004_v61, %v6237_v7  ;;  %v6647_v8 = vadd.f32 %v10086_v38, %v6509_v10  ;;  %v14351_v7 = vpop.permute.xlu0 %7125  ;;  %v6377_v61 = vadd.f32 %v14912_v16, %v6239_v44  ;;  %v6512_v45 = vadd.f32 %v6489_v27, %v6374_v40 }
 0x6d2   : > { %v14916_v52 = vld [vmem:[#allocation55_spill] sm:$0xff]  ;;  %vm7142_vm3 = vcmp.eq.s32.totalorder %v14351_v7, 1 }
 0x6d3   : > { %v6513_v28 = vadd.f32 %v10048_v37, %v6375_v32  ;;  %v6650_v38 = vadd.f32 %v6627_v6, %v6512_v45  ;;  %v14914_v37 = vld [vmem:[#allocation52_spill] sm:$0xff] }
 0x6d4   : > { %v14918_v19 = vld [vmem:[#allocation57_spill] sm:$0xff] }
 0x6d5   : > { %v6651_v2 = vadd.f32 %v10092_v29, %v6513_v28 }
 0x6e0   : > { %v10130_v55 = vpop.f32.mrf.mxu0  ;;  %v10174_v35 = vpop.f32.mrf.mxu1 }
 0x6e1   : > { %v6785_v14 = vadd.f32 %v10130_v55, %v6647_v8 }
 0x6e2   : > { %v6745_v24 = vpop.f32.mrf.mxu0  ;;  %v6883_v41 = vpop.f32.mrf.mxu1 }
 0x6e3   : > { %v6923_v18 = vadd.f32 %v10174_v35, %v6785_v14  ;;  %v7685_v35 = vld [vmem:[%s14415_s11] ss:$0 sm:$0xff] }
 0x6e4   : > { %v10133_v22 = vpop.f32.mrf.mxu0  ;;  %v10177_v43 = vpop.f32.mrf.mxu1 }
 0x6e6   : > { %v6755_v13 = vpop.f32.mrf.mxu0  ;;  %v6893_v48 = vpop.f32.mrf.mxu1 }
 0x6e8   : > { %v10136_v56 = vpop.f32.mrf.mxu0 }
 0x6e9   : > { %v10180_v23 = vpop.f32.mrf.mxu1  ;;  %v6789_v34 = vadd.f32 %v10136_v56, %v6651_v2 }
 0x6ea   : > { %v14339_v5 = vpop.f32.mrf.mxu0 }
 0x6eb   : > { %14907 = vst [vmem:[#allocation58_spill] sm:$0xff] %v14339_v5  ;;  %v6508_v5 = vadd.f32 %v6469_v58, %v6370_v30  ;;  %v6238_v58 = vadd.f32 %v14911_v62, %v6094_v50  ;;  %v6649_v30 = vadd.f32 %v10089_v20, %v6511_v21  ;;  %v6903_v17 = vpop.f32.mrf.mxu1  ;;  %v6515_v20 = vadd.f32 %v14914_v37, %v6377_v61 }
 0x6ec   : > { %v14341_v11 = vpop.f32.mrf.mxu0 }
 0x6ed   : > { %v6646_v4 = vadd.f32 %v6607_v42, %v6508_v5  ;;  %v6376_v1 = vadd.f32 %v14913_v15, %v6238_v58  ;;  %v6787_v60 = vadd.f32 %v10133_v22, %v6649_v30  ;;  %v14355_v42 = vpop.permute.xlu1 %7122  ;;  %v14915_v5 = vld [vmem:[#allocation54_spill] sm:$0xff]  ;;  %v6653_v49 = vadd.f32 %v14916_v52, %v6515_v20 }
 0x6ee   : > { %v6775_v51 = vpop.f32.mrf.mxu0  ;;  %v10183_v53 = vpop.f32.mrf.mxu1  ;;  %vm7141_vm2 = vcmp.eq.s32.totalorder %v14355_v42, 1 }
 0x6ef   : > { %v6784_v57 = vadd.f32 %v6745_v24, %v6646_v4  ;;  %v6786_v24 = vadd.f32 %v6755_v13, %v6648_v46  ;;  %v6514_v59 = vadd.f32 %v14915_v5, %v6376_v1  ;;  %v6925_v39 = vadd.f32 %v10177_v43, %v6787_v60  ;;  %v7132_v13 = vpop.permute.xlu0 %7131 }
 0x6f0   : > { %v6791_v3 = vadd.f32 %v14341_v11, %v6653_v49  ;;  %v6913_v50 = vpop.f32.mrf.mxu1  ;;  %vm7144_vm0 = vcmp.eq.s32.totalorder %v7132_v13, 1 }
 0x6f1   : > { %v6922_v47 = vadd.f32 %v6883_v41, %v6784_v57  ;;  %v6924_v55 = vadd.f32 %v6893_v48, %v6786_v24  ;;  %v6927_v41 = vadd.f32 %v10180_v23, %v6789_v34  ;;  %v6652_v26 = vadd.f32 %v14918_v19, %v6514_v59  ;;  %v7129_v10 = vpop.permute.xlu1 %7128 }
 0x6f2   : > { %v14917_v22 = vld [vmem:[#allocation58_spill] sm:$0xff]  ;;  %v6929_v21 = vadd.f32 %v10183_v53, %v6791_v3  ;;  %vm7143_vm14 = vcmp.eq.s32.totalorder %v7129_v10, 1 }
 0x6f3   : > { %v6788_v63 = vadd.f32 %v14917_v22, %v6650_v38  ;;  %v6790_v4 = vadd.f32 %v6775_v51, %v6652_v26 }
 0x6f5   : > { %v6926_v56 = vadd.f32 %v6903_v17, %v6788_v63  ;;  %v6928_v62 = vadd.f32 %v6913_v50, %v6790_v4  ;;  %v7138_v17 = vpop.permute.xlu0 %7137  ;;  %v7135_v45 = vpop.permute.xlu1 %7134 }
 0x6f6   : > { %vm7146_vm1 = vcmp.eq.s32.totalorder %v7138_v17, 1  ;;  %vm7145_vm4 = vcmp.eq.s32.totalorder %v7135_v45, 1 }
 0x702   : > { %v10218_v33 = vpop.f32.mrf.mxu0 }
 0x703   : > { %v7061_v6 = vadd.f32 %v10218_v33, %v6923_v18 }
 0x704   : > { %v7021_v31 = vpop.f32.mrf.mxu0 }
 0x705   : > { %v7060_v29 = vadd.f32 %v7021_v31, %v6922_v47  ;;  %v7076_v44 = vadd.f32 %v7685_v35, %v7061_v6 }
 0x706   : > { %v10221_v9 = vpop.f32.mrf.mxu0 }
 0x707   : > { %v7063_v32 = vadd.f32 %v10221_v9, %v6925_v39  ;;  %v7075_v48 = vadd.f32 %v7685_v35, %v7060_v29  ;;  %v7084_v51 = vmax.f32 %v7076_v44, 0.0 }
 0x708   : > { %v7031_v27 = vpop.f32.mrf.mxu0 }
 0x709   : > { %v7062_v43 = vadd.f32 %v7031_v27, %v6924_v55  ;;  %v7078_v54 = vadd.f32 %v7685_v35, %v7063_v32  ;;  %v7083_v30 = vmax.f32 %v7075_v48, 0.0  ;;  %v7148_v25 = vsel %vm7140_vm15, %v7084_v51, -3e+38 }
 0x70a   : > { %v10224_v12 = vpop.f32.mrf.mxu0 }
 0x70b   : > { %v7065_v36 = vadd.f32 %v10224_v12, %v6927_v41  ;;  %v7077_v58 = vadd.f32 %v7685_v35, %v7062_v43  ;;  %v7086_v2 = vmax.f32 %v7078_v54, 0.0  ;;  %v7147_v60 = vsel %vm7139_vm13, %v7083_v30, -3e+38 }
 0x70c   : > { %v7041_v23 = vpop.f32.mrf.mxu0 }
 0x70d   : > { %v7080_v40 = vadd.f32 %v7685_v35, %v7065_v36  ;;  %v7064_v33 = vadd.f32 %v7041_v23, %v6926_v56  ;;  %v7085_v15 = vmax.f32 %v7077_v58, 0.0  ;;  %v7150_v24 = vsel %vm7142_vm3, %v7086_v2, -3e+38 }
 0x70e   : > { %v10227_v28 = vpop.f32.mrf.mxu0 }
 0x70f   : > { %v7079_v11 = vadd.f32 %v7685_v35, %v7064_v33  ;;  %v7067_v8 = vadd.f32 %v10227_v28, %v6929_v21  ;;  %v7088_v31 = vmax.f32 %v7080_v40, 0.0  ;;  %v7149_v34 = vsel %vm7141_vm2, %v7085_v15, -3e+38 }
 0x710   : > { %v7051_v57 = vpop.f32.mrf.mxu0 }
 0x711   : > { %v7087_v16 = vmax.f32 %v7079_v11, 0.0  ;;  %v7082_v61 = vadd.f32 %v7685_v35, %v7067_v8  ;;  %v7066_v46 = vadd.f32 %v7051_v57, %v6928_v62  ;;  %v7152_v9 = vsel %vm7144_vm0, %v7088_v31, -3e+38 }
 0x712   : > { %v7156_v59 = vmax.f32 %v7148_v25, %v7152_v9 }
 0x713   : > { %v7151_v1 = vsel %vm7143_vm14, %v7087_v16, -3e+38  ;;  %v7090_v14 = vmax.f32 %v7082_v61, 0.0  ;;  %v7081_v47 = vadd.f32 %v7685_v35, %v7066_v46 }
 0x714   : > { %v7155_v20 = vmax.f32 %v7147_v60, %v7151_v1 }
 0x715   : > { %v7154_v38 = vsel %vm7146_vm1, %v7090_v14, -3e+38  ;;  %v7089_v37 = vmax.f32 %v7081_v47, 0.0 }
 0x716   : > { %v7158_v18 = vmax.f32 %v7150_v24, %v7154_v38  ;;  %v7159_v39 = vmax.f32 %v7155_v20, %v7156_v59 }
 0x717   : > { %v7153_v5 = vsel %vm7145_vm4, %v7089_v37, -3e+38 }
 0x718   : > { %v7157_v0 = vmax.f32 %v7149_v34, %v7153_v5 }
 0x71a   : > { %v7160_v53 = vmax.f32 %v7157_v0, %v7158_v18 }
 0x71c   : > { %v7161_v29 = vmax.f32 %v7159_v39, %v7160_v53 }
 0x71e   : > { %v7162_v42 = vrot.slane %v7161_v29, 4 }
 0x720   : > { %v7163_v27 = vmax.f32 %v7161_v29, %v7162_v42 }
 0x722   : > { %v7164_v52 = vrot.slane %v7163_v27, 2 }
 0x724   : > { %v7165_v49 = vmax.f32 %v7163_v27, %v7164_v52 }
 0x726   : > { %v7166_v55 = vrot.slane %v7165_v49, 1 }
 0x728   : > { %v7167_v7 = vmax.f32 %v7165_v49, %v7166_v55 }
 0x72a   : > { %v7168_v41 = vmul.f32 %v7167_v7, %v7167_v7 }
 0x72c   : > { %7169 = vadd.xlane.f32.xlu1 %v7168_v41 }
 0x7b5   : > { %v7170_v22 = vpop.xlane.xlu1 %7169 }
 0x7b6   : > { %v7171_v63 = vmax.f32 %v7170_v22, 1e-24 }
 0x7b8   : > { %10273 = vrsqrt.f32 %v7171_v63 }
 0x7c5   : > { %v10274_v19 = vpop.eup %10273 }
 0x7c6   : > { %v7173_v26 = vmul.f32 %v10274_v19, %v7167_v7 }
 0x7c8   : > { %7174 = vst [vmem:[%s432_s16] sm:$0x1] %v7173_v26 }
 0x7c9   : > { %10291 = shalt.err (!%p10288_p3)
}
 0x7ca   : > { %s10292_s1 = scalar_lea.hbm %s7186_s20, 16  ;;  %s10296_s16 = scalar_lea.hbm %s14417_s13, 32 }
 0x7cb   : > { %p10293_p4 = scmp.ne.s32.totalorder %s7186_s20, %s10292_s1  ;;  %p10297_p9 = scmp.lt.s32.totalorder %s7186_s20, %s14417_s13 }
 0x7cc   : > { %p10298_p10 = scmp.lt.s32.totalorder %s10296_s16, %s10292_s1 }
 0x7cd   : > { %p10294_p7 = pnand %p10293_p4, %p10452_p5 }
 0x7ce   : > { %p10299_p11 = por %p10298_p10, %p10297_p9 }
 0x7cf   : > { %p10295_p8 = pneg %p10294_p7 }
 0x7d1   : > { %p10300_p12 = pnand %p10299_p11, %p10295_p8 }
 0x7d3   : > { %10303 = shalt.err (!%p10300_p12)
}
 0x7d4   : > { %10229 = dma.vmem_to_hbm [thread:$0]  (%p10452_p5), %s7189_s21, 16, %s7186_s20, %s7176_s24  }
 0x7d5 PF: > { %p10235_p13 = scmp.ge.s32.totalorder %s10338_s28, 2  ;;  %s7200_s0 = sand.u32 1, %s10326_s25  }
 0x7d6   : > { %s7201_s17 = scalar_lea.sflag [#allocation7], %s7200_s0 }
 0x7d7   : > { %p10232_p0 = pnand %p10235_p13, %p10456_p6 }
 0x7d9   : > { %p10233_p1 = pneg %p10232_p0 }
 0x7db   : > { %10321 = dma.done.wait (%p10233_p1), %s7201_s17, 16  }
 0x7dc   : > { %10323 = vsyncadd (%p10233_p1), %s7201_s17, 4294967280  ;;  %s14919_s1 = sld [smem:[#allocation9_spill]]  ;;  %p23_p2 = scmp.ge.s32.totalorder %s10439_s14, 4  }
 0x7dd   : > { %s14920_s27 = sld [smem:[#allocation10_spill]]  ;;  %s14921_s25 = smov %s10330_s26 }
 0x7de   : > { %s14923_s28 = smov %s10439_s14  ;;  %25 = sbr.rel (!%p23_p2) target bundleno = 6 (0x6), region = 131 }
 0x7e2   : > { %s14922_s26 = smov %s14919_s1 }
 0x7e3   :  { %7205 = vsyncpa [#allocation7], 1 }
 0x7e4   :  { %7207 = vsyncpa [#allocation7 + $0x1], 1 }

</bundles_post_ra>
